<compile_context>
chip_gen: v7x
topology: tpu7x:2x2x1
jax: 0.10.0
libtpu: 0.0.40
codegen_flags: <defaults>
</compile_context>

<pallas_src>
import functools

import numpy as np
import jax
import jax.numpy as jnp
from jax import lax
from jax.experimental import pallas as pl
from jax.experimental.pallas import tpu as pltpu

# ----- small synthetic config -------------------------------------------------
BATCH = 2
SEQ = 128
HIDDEN = 128
NUM_HEADS = 4
HEAD_DIM = HIDDEN // NUM_HEADS
N_INNER = 256
NUM_LAYERS = 2
MAX_POS = 512
LN_EPS = 1e-5
INIT_STD = 0.02
NEG_INF = -1e30


# ----- shared math helpers (used inside kernels and reference) -----------------
def _layernorm(x, w, b, eps):
    mu = jnp.mean(x, axis=-1, keepdims=True)
    xc = x - mu
    var = jnp.mean(xc * xc, axis=-1, keepdims=True)
    inv = lax.rsqrt(var + eps)
    return xc * inv * w + b


def _gelu_tanh(x):
    c = 0.7978845608028654  # sqrt(2/pi)
    return 0.5 * x * (1.0 + jnp.tanh(c * (x + 0.044715 * x * x * x)))


# ----- fused Pallas kernel ------------------------------------------------------
def gpt_fused_kernel(x_ref, pos_ref, bias_ref,
                     ln1_w, ln1_b, wqkv, bqkv, wout, bout,
                     ln2_w, ln2_b, fc1_w, fc1_b, fc2_w, fc2_b,
                     lnf_w, lnf_b,
                     out_ref,
                     h_s, res_s,
                     *, num_heads, head_dim, eps, scale):
    """Whole GPTModel forward for one batch element; grid = (batch, layer)."""
    l = pl.program_id(1)
    n_layers = pl.num_programs(1)
    S, D = h_s.shape

    # Layer 0: fold in the positional-embedding add; residual=None -> zeros.
    # (Gated on l == 0, NOT program_id(0) == 0: the batch axis is megacore-
    #  sharded on v7x and each core has its own scratch.)
    @pl.when(l == 0)
    def _():
        h_s[...] = x_ref[0] + pos_ref[...]
        res_s[...] = jnp.zeros_like(res_s)

    # residual add + LN1 (f32 residual stream lives in VMEM scratch)
    resid1 = h_s[...] + res_s[...]
    x = _layernorm(resid1, ln1_w[0], ln1_b[0], eps)

    # fused QKV projection: bf16 operands, f32 accumulation on the MXU
    qkv = jnp.dot(x.astype(jnp.bfloat16), wqkv[0],
                  preferred_element_type=jnp.float32) + bqkv[0]
    # fold the softmax scale into q once ((S,D) mul) instead of per-head (S,S)
    q = (qkv[:, :D] * scale).astype(jnp.bfloat16)
    k = qkv[:, D:2 * D].astype(jnp.bfloat16)
    v = qkv[:, 2 * D:].astype(jnp.bfloat16)

    # one transpose per layer; per-head K slices become sublane row-blocks
    kT = k.T                                  # (D, S) bf16

    bias = bias_ref[...]                      # (S, S) f32 additive causal bias

    # per-head attention with deferred softmax normalization; per-head outputs
    # are collected and concatenated so the output projection is ONE K=D matmul
    ohs = []
    for hh in range(num_heads):
        lo = hh * head_dim
        hi = lo + head_dim
        s = jnp.dot(q[:, lo:hi], kT[lo:hi, :],
                    preferred_element_type=jnp.float32) + bias
        m = jnp.max(s, axis=-1, keepdims=True)        # f32 softmax stats
        p = jnp.exp(s - m)                            # unnormalized probs
        inv_l = pl.reciprocal(jnp.sum(p, axis=-1, keepdims=True), approx=True)
        oh = jnp.dot(p.astype(jnp.bfloat16), v[:, lo:hi],
                     preferred_element_type=jnp.float32) * inv_l
        ohs.append(oh)

    o = jnp.concatenate(ohs, axis=-1).astype(jnp.bfloat16)   # (S, D)
    attn = jnp.dot(o, wout[0], preferred_element_type=jnp.float32) + bout[0]

    # residual add + LN2
    resid2 = attn + resid1
    x2 = _layernorm(resid2, ln2_w[0], ln2_b[0], eps)

    # MLP: fc1 -> gelu(tanh) -> fc2 (bf16 operands, f32 accumulation)
    hmid = jnp.dot(x2.astype(jnp.bfloat16), fc1_w[0],
                   preferred_element_type=jnp.float32) + fc1_b[0]
    hmid = _gelu_tanh(hmid)
    h_new = jnp.dot(hmid.astype(jnp.bfloat16), fc2_w[0],
                    preferred_element_type=jnp.float32) + fc2_b[0]

    # carry h / residual to the next layer entirely in VMEM
    h_s[...] = h_new
    res_s[...] = resid2

    # final LayerNorm fused into the last layer iteration
    @pl.when(l == n_layers - 1)
    def _():
        out_ref[0] = _layernorm(h_new + resid2, lnf_w[...], lnf_b[...], eps)


# ----- wrapper ------------------------------------------------------------------
def _layer_spec(arr):
    rest = arr.shape[1:]
    return pl.BlockSpec((1,) + rest,
                        lambda b, l, _n=len(rest): (l,) + (0,) * _n)


def _full_spec(arr):
    return pl.BlockSpec(arr.shape, lambda b, l, _n=arr.ndim: (0,) * _n)


def gpt_forward(inputs_embeds, params):
    """GPTModel.forward(inputs_embeds=...) with default position_ids."""
    B, S, D = inputs_embeds.shape
    sp = params['stacked']
    pos = params['pos_emb'][:S]                         # (S, D) position slice

    # additive causal bias, VMEM-resident for the whole kernel (constant index)
    causal = jnp.tril(jnp.ones((S, S), dtype=bool))
    bias = jnp.where(causal, 0.0, NEG_INF).astype(jnp.float32)

    per_layer = [sp['ln1_w'], sp['ln1_b'], sp['wqkv'], sp['bqkv'],
                 sp['wout'], sp['bout'], sp['ln2_w'], sp['ln2_b'],
                 sp['fc1_w'], sp['fc1_b'], sp['fc2_w'], sp['fc2_b']]
    final_ln = [params['lnf_w'], params['lnf_b']]

    kernel = functools.partial(gpt_fused_kernel,
                               num_heads=NUM_HEADS, head_dim=HEAD_DIM,
                               eps=LN_EPS, scale=HEAD_DIM ** -0.5)

    act_spec = pl.BlockSpec((1, S, D), lambda b, l: (b, 0, 0))

    return pl.pallas_call(
        kernel,
        out_shape=jax.ShapeDtypeStruct((B, S, D), jnp.float32),
        grid_spec=pltpu.PrefetchScalarGridSpec(
            num_scalar_prefetch=0,
            grid=(B, NUM_LAYERS),                       # layer axis innermost
            in_specs=[act_spec, _full_spec(pos), _full_spec(bias)]
                     + [_layer_spec(w) for w in per_layer]
                     + [_full_spec(w) for w in final_ln],
            out_specs=act_spec,
            scratch_shapes=[pltpu.VMEM((S, D), jnp.float32),   # h carry
                            pltpu.VMEM((S, D), jnp.float32)],  # residual carry
        ),
        compiler_params=pltpu.CompilerParams(
            dimension_semantics=("parallel", "arbitrary")),
    )(inputs_embeds, pos, bias, *per_layer, *final_ln)


# ----- deterministic parameter init (mirrors _init_weights) ---------------------
def _bf16_round(x):
    # matmul weights are used in bf16 inside the kernel; round once here so the
    # f32 reference sees exactly the same weight values.
    return x.astype(jnp.bfloat16).astype(jnp.float32)


def stack_layer_params(layers):
    bf16_names = {'wqkv', 'wout', 'fc1_w', 'fc2_w'}
    names = ['ln1_w', 'ln1_b', 'wqkv', 'bqkv', 'wout', 'bout',
             'ln2_w', 'ln2_b', 'fc1_w', 'fc1_b', 'fc2_w', 'fc2_b']
    out = {}
    for n in names:
        a = jnp.stack([lp[n] for lp in layers])
        if n in bf16_names:
            a = a.astype(jnp.bfloat16)   # halves weight DMA bytes
        out[n] = a
    return out


def init_params(key):
    std = INIT_STD
    out_std = INIT_STD / np.sqrt(2 * NUM_LAYERS)  # rescale_prenorm_residual
    keys = jax.random.split(key, 1 + NUM_LAYERS)
    params = {
        'pos_emb': std * jax.random.normal(keys[0], (MAX_POS, HIDDEN), jnp.float32),
        'lnf_w': jnp.ones((1, HIDDEN), jnp.float32),
        'lnf_b': jnp.zeros((1, HIDDEN), jnp.float32),
        'layers': [],
    }
    for i in range(NUM_LAYERS):
        k = jax.random.split(keys[1 + i], 4)
        params['layers'].append(dict(
            ln1_w=jnp.ones((1, HIDDEN), jnp.float32),
            ln1_b=jnp.zeros((1, HIDDEN), jnp.float32),
            wqkv=_bf16_round(std * jax.random.normal(k[0], (HIDDEN, 3 * HIDDEN), jnp.float32)),
            bqkv=jnp.zeros((1, 3 * HIDDEN), jnp.float32),
            wout=_bf16_round(out_std * jax.random.normal(k[1], (HIDDEN, HIDDEN), jnp.float32)),
            bout=jnp.zeros((1, HIDDEN), jnp.float32),
            ln2_w=jnp.ones((1, HIDDEN), jnp.float32),
            ln2_b=jnp.zeros((1, HIDDEN), jnp.float32),
            fc1_w=_bf16_round(std * jax.random.normal(k[2], (HIDDEN, N_INNER), jnp.float32)),
            fc1_b=jnp.zeros((1, N_INNER), jnp.float32),
            fc2_w=_bf16_round(out_std * jax.random.normal(k[3], (N_INNER, HIDDEN), jnp.float32)),
            fc2_b=jnp.zeros((1, HIDDEN), jnp.float32),
        ))
    params['stacked'] = stack_layer_params(params['layers'])
    return params


# ----- pure-JAX f32 reference for correctness check ------------------------------
def ref_forward(inputs_embeds, params):
    B, S, D = inputs_embeds.shape
    dotp = functools.partial(jnp.matmul, precision=lax.Precision.HIGHEST)
    scale = HEAD_DIM ** -0.5
    mask = np.tril(np.ones((S, S), dtype=bool))
    h = inputs_embeds + params['pos_emb'][:S][None]
    res = jnp.zeros_like(h)
    for lp in params['layers']:
        resid1 = h + res
        x = _layernorm(resid1, lp['ln1_w'], lp['ln1_b'], LN_EPS)
        qkv = dotp(x, lp['wqkv']) + lp['bqkv']
        q, k, v = jnp.split(qkv, 3, axis=-1)
        qh = q.reshape(B, S, NUM_HEADS, HEAD_DIM).transpose(0, 2, 1, 3)
        kh = k.reshape(B, S, NUM_HEADS, HEAD_DIM).transpose(0, 2, 1, 3)
        vh = v.reshape(B, S, NUM_HEADS, HEAD_DIM).transpose(0, 2, 1, 3)
        s = jnp.einsum('bhqd,bhkd->bhqk', qh, kh,
                       precision=lax.Precision.HIGHEST) * scale
        s = jnp.where(mask[None, None], s, NEG_INF)
        p = jax.nn.softmax(s, axis=-1)
        o = jnp.einsum('bhqk,bhkd->bhqd', p, vh, precision=lax.Precision.HIGHEST)
        o = o.transpose(0, 2, 1, 3).reshape(B, S, D)
        attn = dotp(o, lp['wout']) + lp['bout']
        resid2 = attn + resid1
        x2 = _layernorm(resid2, lp['ln2_w'], lp['ln2_b'], LN_EPS)
        hmid = _gelu_tanh(dotp(x2, lp['fc1_w']) + lp['fc1_b'])
        h = dotp(hmid, lp['fc2_w']) + lp['fc2_b']
        res = resid2
    return _layernorm(h + res, params['lnf_w'], params['lnf_b'], LN_EPS)


if __name__ == "__main__":
    key = jax.random.PRNGKey(0)
    kp, kx = jax.random.split(key)
    params = init_params(kp)
    inputs_embeds = jax.random.normal(kx, (BATCH, SEQ, HIDDEN), jnp.float32)

    fwd = jax.jit(gpt_forward)
    out = jax.block_until_ready(fwd(inputs_embeds, params))
    assert out.shape == (BATCH, SEQ, HIDDEN)
    assert bool(jnp.all(jnp.isfinite(out)))

    ref = ref_forward(inputs_embeds, params)
    np.testing.assert_allclose(np.asarray(out), np.asarray(ref),
                               rtol=2e-2, atol=2e-2)
    print("KERNEL_OK")
</pallas_src>

<mosaic_0001>
module attributes {stable_mosaic.version = 11 : i64} {
  func.func @gpt_fused_kernel(%arg0: i32, %arg1: i32, %arg2: memref<1x128x128xf32, #tpu.memory_space<vmem>>, %arg3: memref<128x128xf32, #tpu.memory_space<vmem>>, %arg4: memref<128x128xf32, #tpu.memory_space<vmem>>, %arg5: memref<1x1x128xf32, #tpu.memory_space<vmem>>, %arg6: memref<1x1x128xf32, #tpu.memory_space<vmem>>, %arg7: memref<1x128x384xbf16, #tpu.memory_space<vmem>>, %arg8: memref<1x1x384xf32, #tpu.memory_space<vmem>>, %arg9: memref<1x128x128xbf16, #tpu.memory_space<vmem>>, %arg10: memref<1x1x128xf32, #tpu.memory_space<vmem>>, %arg11: memref<1x1x128xf32, #tpu.memory_space<vmem>>, %arg12: memref<1x1x128xf32, #tpu.memory_space<vmem>>, %arg13: memref<1x128x256xbf16, #tpu.memory_space<vmem>>, %arg14: memref<1x1x256xf32, #tpu.memory_space<vmem>>, %arg15: memref<1x256x128xbf16, #tpu.memory_space<vmem>>, %arg16: memref<1x1x128xf32, #tpu.memory_space<vmem>>, %arg17: memref<1x128xf32, #tpu.memory_space<vmem>>, %arg18: memref<1x128xf32, #tpu.memory_space<vmem>>, %arg19: memref<1x128x128xf32, #tpu.memory_space<vmem>>, %arg20: memref<128x128xf32, #tpu.memory_space<vmem>>, %arg21: memref<128x128xf32, #tpu.memory_space<vmem>>) attributes {dimension_semantics = [#tpu.dimension_semantics<parallel>, #tpu.dimension_semantics<arbitrary>], iteration_bounds = array<i64: 2, 2>, scalar_prefetch = 0 : i64, scratch_operands = 2 : i64, tpu.core_type = #tpu.core_type<tc>, window_params = [{transform_indices = @transform_0, window_bounds = array<i64: 1, 128, 128>}, {pipeline_mode = #tpu.pipeline_mode<synchronous>, transform_indices = @transform_1, window_bounds = array<i64: 128, 128>}, {pipeline_mode = #tpu.pipeline_mode<synchronous>, transform_indices = @transform_2, window_bounds = array<i64: 128, 128>}, {transform_indices = @transform_3, window_bounds = array<i64: 1, 1, 128>}, {transform_indices = @transform_4, window_bounds = array<i64: 1, 1, 128>}, {transform_indices = @transform_5, window_bounds = array<i64: 1, 128, 384>}, {transform_indices = @transform_6, window_bounds = array<i64: 1, 1, 384>}, {transform_indices = @transform_7, window_bounds = array<i64: 1, 128, 128>}, {transform_indices = @transform_8, window_bounds = array<i64: 1, 1, 128>}, {transform_indices = @transform_9, window_bounds = array<i64: 1, 1, 128>}, {transform_indices = @transform_10, window_bounds = array<i64: 1, 1, 128>}, {transform_indices = @transform_11, window_bounds = array<i64: 1, 128, 256>}, {transform_indices = @transform_12, window_bounds = array<i64: 1, 1, 256>}, {transform_indices = @transform_13, window_bounds = array<i64: 1, 256, 128>}, {transform_indices = @transform_14, window_bounds = array<i64: 1, 1, 128>}, {pipeline_mode = #tpu.pipeline_mode<synchronous>, transform_indices = @transform_15, window_bounds = array<i64: 1, 128>}, {pipeline_mode = #tpu.pipeline_mode<synchronous>, transform_indices = @transform_16, window_bounds = array<i64: 1, 128>}, {transform_indices = @transform_17, window_bounds = array<i64: 1, 128, 128>}]} {
    %c0_i32 = arith.constant 0 : i32
    %0 = arith.cmpi eq, %arg1, %c0_i32 : i32
    %1 = arith.extui %0 : i1 to i32
    %c0_i32_0 = arith.constant 0 : i32
    %2 = arith.cmpi ne, %1, %c0_i32_0 : i32
    scf.if %2 {
      %c0_81 = arith.constant 0 : index
      %c0_82 = arith.constant 0 : index
      %c0_83 = arith.constant 0 : index
      %184 = vector.load %arg2[%c0_81, %c0_82, %c0_83] : memref<1x128x128xf32, #tpu.memory_space<vmem>>, vector<1x128x128xf32>
      %185 = vector.shape_cast %184 : vector<1x128x128xf32> to vector<128x128xf32>
      %c0_84 = arith.constant 0 : index
      %c0_85 = arith.constant 0 : index
      %186 = vector.load %arg3[%c0_84, %c0_85] : memref<128x128xf32, #tpu.memory_space<vmem>>, vector<128x128xf32>
      %187 = arith.addf %185, %186 : vector<128x128xf32>
      %c0_86 = arith.constant 0 : index
      %c0_87 = arith.constant 0 : index
      %188 = vector.load %arg20[%c0_86, %c0_87] : memref<128x128xf32, #tpu.memory_space<vmem>>, vector<128x128xf32>
      tpu.vector_store %arg20[%c0_86, %c0_87], %187 {strides = array<i32>} : memref<128x128xf32, #tpu.memory_space<vmem>>, vector<128x128xf32>,
      %cst_88 = arith.constant 0.000000e+00 : f32
      %189 = vector.broadcast %cst_88 : f32 to vector<128x128xf32>
      %c0_89 = arith.constant 0 : index
      %c0_90 = arith.constant 0 : index
      %190 = vector.load %arg21[%c0_89, %c0_90] : memref<128x128xf32, #tpu.memory_space<vmem>>, vector<128x128xf32>
      tpu.vector_store %arg21[%c0_89, %c0_90], %189 {strides = array<i32>} : memref<128x128xf32, #tpu.memory_space<vmem>>, vector<128x128xf32>,
    } else {
    }
    %c0 = arith.constant 0 : index
    %c0_1 = arith.constant 0 : index
    %3 = vector.load %arg20[%c0, %c0_1] : memref<128x128xf32, #tpu.memory_space<vmem>>, vector<128x128xf32>
    %c0_2 = arith.constant 0 : index
    %c0_3 = arith.constant 0 : index
    %4 = vector.load %arg21[%c0_2, %c0_3] : memref<128x128xf32, #tpu.memory_space<vmem>>, vector<128x128xf32>
    %5 = arith.addf %3, %4 : vector<128x128xf32>
    %c0_4 = arith.constant 0 : index
    %c0_5 = arith.constant 0 : index
    %c0_6 = arith.constant 0 : index
    %6 = vector.load %arg5[%c0_4, %c0_5, %c0_6] : memref<1x1x128xf32, #tpu.memory_space<vmem>>, vector<1x1x128xf32>
    %7 = vector.shape_cast %6 : vector<1x1x128xf32> to vector<1x128xf32>
    %c0_7 = arith.constant 0 : index
    %c0_8 = arith.constant 0 : index
    %c0_9 = arith.constant 0 : index
    %8 = vector.load %arg6[%c0_7, %c0_8, %c0_9] : memref<1x1x128xf32, #tpu.memory_space<vmem>>, vector<1x1x128xf32>
    %9 = vector.shape_cast %8 : vector<1x1x128xf32> to vector<1x128xf32>
    %cst = arith.constant dense<0.000000e+00> : vector<128xf32>
    %10 = vector.multi_reduction <add>, %5, %cst [1] : vector<128x128xf32> to vector<128xf32>
    %11 = vector.shape_cast %10 : vector<128xf32> to vector<128x1xf32>
    %cst_10 = arith.constant 1.280000e+02 : f32
    %12 = vector.broadcast %cst_10 : f32 to vector<128x1xf32>
    %13 = arith.divf %11, %12 : vector<128x1xf32>
    %14 = vector.broadcast %13 : vector<128x1xf32> to vector<128x128xf32>
    %15 = arith.subf %5, %14 : vector<128x128xf32>
    %16 = arith.mulf %15, %15 : vector<128x128xf32>
    %cst_11 = arith.constant dense<0.000000e+00> : vector<128xf32>
    %17 = vector.multi_reduction <add>, %16, %cst_11 [1] : vector<128x128xf32> to vector<128xf32>
    %18 = vector.shape_cast %17 : vector<128xf32> to vector<128x1xf32>
    %cst_12 = arith.constant 1.280000e+02 : f32
    %19 = vector.broadcast %cst_12 : f32 to vector<128x1xf32>
    %20 = arith.divf %18, %19 : vector<128x1xf32>
    %cst_13 = arith.constant 9.99999974E-6 : f32
    %21 = vector.broadcast %cst_13 : f32 to vector<128x1xf32>
    %22 = arith.addf %20, %21 : vector<128x1xf32>
    %23 = math.rsqrt %22 : vector<128x1xf32>
    %24 = vector.broadcast %23 : vector<128x1xf32> to vector<128x128xf32>
    %25 = arith.mulf %15, %24 : vector<128x128xf32>
    %26 = vector.broadcast %7 : vector<1x128xf32> to vector<128x128xf32>
    %27 = arith.mulf %25, %26 : vector<128x128xf32>
    %28 = vector.broadcast %9 : vector<1x128xf32> to vector<128x128xf32>
    %29 = arith.addf %27, %28 : vector<128x128xf32>
    %30 = arith.truncf %29 : vector<128x128xf32> to vector<128x128xbf16>
    %c0_14 = arith.constant 0 : index
    %c0_15 = arith.constant 0 : index
    %c0_16 = arith.constant 0 : index
    %31 = vector.load %arg7[%c0_14, %c0_15, %c0_16] : memref<1x128x384xbf16, #tpu.memory_space<vmem>>, vector<1x128x384xbf16>
    %32 = vector.shape_cast %31 : vector<1x128x384xbf16> to vector<128x384xbf16>
    %cst_17 = arith.constant dense<0.000000e+00> : vector<128x384xf32>
    %33 = tpu.matmul %30, %32, %cst_17 {dimension_numbers = #tpu.dot_dimension_numbers<[1], [0], [0], [1], [0, 0, 1, 1], [], []>} : vector<128x128xbf16>, vector<128x384xbf16>, vector<128x384xf32> -> vector<128x384xf32>
    %c0_18 = arith.constant 0 : index
    %c0_19 = arith.constant 0 : index
    %c0_20 = arith.constant 0 : index
    %34 = vector.load %arg8[%c0_18, %c0_19, %c0_20] : memref<1x1x384xf32, #tpu.memory_space<vmem>>, vector<1x1x384xf32>
    %35 = vector.shape_cast %34 : vector<1x1x384xf32> to vector<1x384xf32>
    %36 = vector.broadcast %35 : vector<1x384xf32> to vector<128x384xf32>
    %37 = arith.addf %33, %36 : vector<128x384xf32>
    %38 = vector.extract_strided_slice %37 {offsets = [0, 0], sizes = [128, 128], strides = [1, 1]} : vector<128x384xf32> to vector<128x128xf32>
    %cst_21 = arith.constant 0.176776692 : f32
    %39 = vector.broadcast %cst_21 : f32 to vector<128x128xf32>
    %40 = arith.mulf %38, %39 : vector<128x128xf32>
    %41 = arith.truncf %40 : vector<128x128xf32> to vector<128x128xbf16>
    %42 = vector.extract_strided_slice %37 {offsets = [0, 128], sizes = [128, 128], strides = [1, 1]} : vector<128x384xf32> to vector<128x128xf32>
    %43 = arith.truncf %42 : vector<128x128xf32> to vector<128x128xbf16>
    %44 = vector.extract_strided_slice %37 {offsets = [0, 256], sizes = [128, 128], strides = [1, 1]} : vector<128x384xf32> to vector<128x128xf32>
    %45 = arith.truncf %44 : vector<128x128xf32> to vector<128x128xbf16>
    %46 = tpu.transpose %43, [1, 0] : vector<128x128xbf16> -> vector<128x128xbf16>
    %c0_22 = arith.constant 0 : index
    %c0_23 = arith.constant 0 : index
    %47 = vector.load %arg4[%c0_22, %c0_23] : memref<128x128xf32, #tpu.memory_space<vmem>>, vector<128x128xf32>
    %48 = vector.extract_strided_slice %41 {offsets = [0, 0], sizes = [128, 32], strides = [1, 1]} : vector<128x128xbf16> to vector<128x32xbf16>
    %49 = vector.extract_strided_slice %46 {offsets = [0, 0], sizes = [32, 128], strides = [1, 1]} : vector<128x128xbf16> to vector<32x128xbf16>
    %cst_24 = arith.constant dense<0.000000e+00> : vector<128x128xf32>
    %50 = tpu.matmul %48, %49, %cst_24 {dimension_numbers = #tpu.dot_dimension_numbers<[1], [0], [0], [1], [0, 0, 1, 1], [], []>} : vector<128x32xbf16>, vector<32x128xbf16>, vector<128x128xf32> -> vector<128x128xf32>
    %51 = arith.addf %50, %47 : vector<128x128xf32>
    %cst_25 = arith.constant dense<0xFF800000> : vector<128xf32>
    %52 = vector.multi_reduction <maximumf>, %51, %cst_25 [1] : vector<128x128xf32> to vector<128xf32>
    %53 = vector.shape_cast %52 : vector<128xf32> to vector<128x1xf32>
    %54 = vector.broadcast %53 : vector<128x1xf32> to vector<128x128xf32>
    %55 = arith.subf %51, %54 : vector<128x128xf32>
    %56 = math.exp %55 : vector<128x128xf32>
    %cst_26 = arith.constant dense<0.000000e+00> : vector<128xf32>
    %57 = vector.multi_reduction <add>, %56, %cst_26 [1] : vector<128x128xf32> to vector<128xf32>
    %58 = vector.shape_cast %57 : vector<128xf32> to vector<128x1xf32>
    %59 = tpu.reciprocal %58 {approx = true} : vector<128x1xf32> -> vector<128x1xf32>
    %60 = arith.truncf %56 : vector<128x128xf32> to vector<128x128xbf16>
    %61 = vector.extract_strided_slice %45 {offsets = [0, 0], sizes = [128, 32], strides = [1, 1]} : vector<128x128xbf16> to vector<128x32xbf16>
    %cst_27 = arith.constant dense<0.000000e+00> : vector<128x32xf32>
    %62 = tpu.matmul %60, %61, %cst_27 {dimension_numbers = #tpu.dot_dimension_numbers<[1], [0], [0], [1], [0, 0, 1, 1], [], []>} : vector<128x128xbf16>, vector<128x32xbf16>, vector<128x32xf32> -> vector<128x32xf32>
    %63 = vector.broadcast %59 : vector<128x1xf32> to vector<128x32xf32>
    %64 = arith.mulf %62, %63 : vector<128x32xf32>
    %65 = vector.extract_strided_slice %41 {offsets = [0, 32], sizes = [128, 32], strides = [1, 1]} : vector<128x128xbf16> to vector<128x32xbf16>
    %66 = vector.extract_strided_slice %46 {offsets = [32, 0], sizes = [32, 128], strides = [1, 1]} : vector<128x128xbf16> to vector<32x128xbf16>
    %cst_28 = arith.constant dense<0.000000e+00> : vector<128x128xf32>
    %67 = tpu.matmul %65, %66, %cst_28 {dimension_numbers = #tpu.dot_dimension_numbers<[1], [0], [0], [1], [0, 0, 1, 1], [], []>} : vector<128x32xbf16>, vector<32x128xbf16>, vector<128x128xf32> -> vector<128x128xf32>
    %68 = arith.addf %67, %47 : vector<128x128xf32>
    %cst_29 = arith.constant dense<0xFF800000> : vector<128xf32>
    %69 = vector.multi_reduction <maximumf>, %68, %cst_29 [1] : vector<128x128xf32> to vector<128xf32>
    %70 = vector.shape_cast %69 : vector<128xf32> to vector<128x1xf32>
    %71 = vector.broadcast %70 : vector<128x1xf32> to vector<128x128xf32>
    %72 = arith.subf %68, %71 : vector<128x128xf32>
    %73 = math.exp %72 : vector<128x128xf32>
    %cst_30 = arith.constant dense<0.000000e+00> : vector<128xf32>
    %74 = vector.multi_reduction <add>, %73, %cst_30 [1] : vector<128x128xf32> to vector<128xf32>
    %75 = vector.shape_cast %74 : vector<128xf32> to vector<128x1xf32>
    %76 = tpu.reciprocal %75 {approx = true} : vector<128x1xf32> -> vector<128x1xf32>
    %77 = arith.truncf %73 : vector<128x128xf32> to vector<128x128xbf16>
    %78 = vector.extract_strided_slice %45 {offsets = [0, 32], sizes = [128, 32], strides = [1, 1]} : vector<128x128xbf16> to vector<128x32xbf16>
    %cst_31 = arith.constant dense<0.000000e+00> : vector<128x32xf32>
    %79 = tpu.matmul %77, %78, %cst_31 {dimension_numbers = #tpu.dot_dimension_numbers<[1], [0], [0], [1], [0, 0, 1, 1], [], []>} : vector<128x128xbf16>, vector<128x32xbf16>, vector<128x32xf32> -> vector<128x32xf32>
    %80 = vector.broadcast %76 : vector<128x1xf32> to vector<128x32xf32>
    %81 = arith.mulf %79, %80 : vector<128x32xf32>
    %82 = vector.extract_strided_slice %41 {offsets = [0, 64], sizes = [128, 32], strides = [1, 1]} : vector<128x128xbf16> to vector<128x32xbf16>
    %83 = vector.extract_strided_slice %46 {offsets = [64, 0], sizes = [32, 128], strides = [1, 1]} : vector<128x128xbf16> to vector<32x128xbf16>
    %cst_32 = arith.constant dense<0.000000e+00> : vector<128x128xf32>
    %84 = tpu.matmul %82, %83, %cst_32 {dimension_numbers = #tpu.dot_dimension_numbers<[1], [0], [0], [1], [0, 0, 1, 1], [], []>} : vector<128x32xbf16>, vector<32x128xbf16>, vector<128x128xf32> -> vector<128x128xf32>
    %85 = arith.addf %84, %47 : vector<128x128xf32>
    %cst_33 = arith.constant dense<0xFF800000> : vector<128xf32>
    %86 = vector.multi_reduction <maximumf>, %85, %cst_33 [1] : vector<128x128xf32> to vector<128xf32>
    %87 = vector.shape_cast %86 : vector<128xf32> to vector<128x1xf32>
    %88 = vector.broadcast %87 : vector<128x1xf32> to vector<128x128xf32>
    %89 = arith.subf %85, %88 : vector<128x128xf32>
    %90 = math.exp %89 : vector<128x128xf32>
    %cst_34 = arith.constant dense<0.000000e+00> : vector<128xf32>
    %91 = vector.multi_reduction <add>, %90, %cst_34 [1] : vector<128x128xf32> to vector<128xf32>
    %92 = vector.shape_cast %91 : vector<128xf32> to vector<128x1xf32>
    %93 = tpu.reciprocal %92 {approx = true} : vector<128x1xf32> -> vector<128x1xf32>
    %94 = arith.truncf %90 : vector<128x128xf32> to vector<128x128xbf16>
    %95 = vector.extract_strided_slice %45 {offsets = [0, 64], sizes = [128, 32], strides = [1, 1]} : vector<128x128xbf16> to vector<128x32xbf16>
    %cst_35 = arith.constant dense<0.000000e+00> : vector<128x32xf32>
    %96 = tpu.matmul %94, %95, %cst_35 {dimension_numbers = #tpu.dot_dimension_numbers<[1], [0], [0], [1], [0, 0, 1, 1], [], []>} : vector<128x128xbf16>, vector<128x32xbf16>, vector<128x32xf32> -> vector<128x32xf32>
    %97 = vector.broadcast %93 : vector<128x1xf32> to vector<128x32xf32>
    %98 = arith.mulf %96, %97 : vector<128x32xf32>
    %99 = vector.extract_strided_slice %41 {offsets = [0, 96], sizes = [128, 32], strides = [1, 1]} : vector<128x128xbf16> to vector<128x32xbf16>
    %100 = vector.extract_strided_slice %46 {offsets = [96, 0], sizes = [32, 128], strides = [1, 1]} : vector<128x128xbf16> to vector<32x128xbf16>
    %cst_36 = arith.constant dense<0.000000e+00> : vector<128x128xf32>
    %101 = tpu.matmul %99, %100, %cst_36 {dimension_numbers = #tpu.dot_dimension_numbers<[1], [0], [0], [1], [0, 0, 1, 1], [], []>} : vector<128x32xbf16>, vector<32x128xbf16>, vector<128x128xf32> -> vector<128x128xf32>
    %102 = arith.addf %101, %47 : vector<128x128xf32>
    %cst_37 = arith.constant dense<0xFF800000> : vector<128xf32>
    %103 = vector.multi_reduction <maximumf>, %102, %cst_37 [1] : vector<128x128xf32> to vector<128xf32>
    %104 = vector.shape_cast %103 : vector<128xf32> to vector<128x1xf32>
    %105 = vector.broadcast %104 : vector<128x1xf32> to vector<128x128xf32>
    %106 = arith.subf %102, %105 : vector<128x128xf32>
    %107 = math.exp %106 : vector<128x128xf32>
    %cst_38 = arith.constant dense<0.000000e+00> : vector<128xf32>
    %108 = vector.multi_reduction <add>, %107, %cst_38 [1] : vector<128x128xf32> to vector<128xf32>
    %109 = vector.shape_cast %108 : vector<128xf32> to vector<128x1xf32>
    %110 = tpu.reciprocal %109 {approx = true} : vector<128x1xf32> -> vector<128x1xf32>
    %111 = arith.truncf %107 : vector<128x128xf32> to vector<128x128xbf16>
    %112 = vector.extract_strided_slice %45 {offsets = [0, 96], sizes = [128, 32], strides = [1, 1]} : vector<128x128xbf16> to vector<128x32xbf16>
    %cst_39 = arith.constant dense<0.000000e+00> : vector<128x32xf32>
    %113 = tpu.matmul %111, %112, %cst_39 {dimension_numbers = #tpu.dot_dimension_numbers<[1], [0], [0], [1], [0, 0, 1, 1], [], []>} : vector<128x128xbf16>, vector<128x32xbf16>, vector<128x32xf32> -> vector<128x32xf32>
    %114 = vector.broadcast %110 : vector<128x1xf32> to vector<128x32xf32>
    %115 = arith.mulf %113, %114 : vector<128x32xf32>
    %116 = tpu.concatenate %64, %81, %98, %115 in 1 : vector<128x32xf32>, vector<128x32xf32>, vector<128x32xf32>, vector<128x32xf32> -> vector<128x128xf32>
    %117 = arith.truncf %116 : vector<128x128xf32> to vector<128x128xbf16>
    %c0_40 = arith.constant 0 : index
    %c0_41 = arith.constant 0 : index
    %c0_42 = arith.constant 0 : index
    %118 = vector.load %arg9[%c0_40, %c0_41, %c0_42] : memref<1x128x128xbf16, #tpu.memory_space<vmem>>, vector<1x128x128xbf16>
    %119 = vector.shape_cast %118 : vector<1x128x128xbf16> to vector<128x128xbf16>
    %cst_43 = arith.constant dense<0.000000e+00> : vector<128x128xf32>
    %120 = tpu.matmul %117, %119, %cst_43 {dimension_numbers = #tpu.dot_dimension_numbers<[1], [0], [0], [1], [0, 0, 1, 1], [], []>} : vector<128x128xbf16>, vector<128x128xbf16>, vector<128x128xf32> -> vector<128x128xf32>
    %c0_44 = arith.constant 0 : index
    %c0_45 = arith.constant 0 : index
    %c0_46 = arith.constant 0 : index
    %121 = vector.load %arg10[%c0_44, %c0_45, %c0_46] : memref<1x1x128xf32, #tpu.memory_space<vmem>>, vector<1x1x128xf32>
    %122 = vector.shape_cast %121 : vector<1x1x128xf32> to vector<1x128xf32>
    %123 = vector.broadcast %122 : vector<1x128xf32> to vector<128x128xf32>
    %124 = arith.addf %120, %123 : vector<128x128xf32>
    %125 = arith.addf %124, %5 : vector<128x128xf32>
    %c0_47 = arith.constant 0 : index
    %c0_48 = arith.constant 0 : index
    %c0_49 = arith.constant 0 : index
    %126 = vector.load %arg11[%c0_47, %c0_48, %c0_49] : memref<1x1x128xf32, #tpu.memory_space<vmem>>, vector<1x1x128xf32>
    %127 = vector.shape_cast %126 : vector<1x1x128xf32> to vector<1x128xf32>
    %c0_50 = arith.constant 0 : index
    %c0_51 = arith.constant 0 : index
    %c0_52 = arith.constant 0 : index
    %128 = vector.load %arg12[%c0_50, %c0_51, %c0_52] : memref<1x1x128xf32, #tpu.memory_space<vmem>>, vector<1x1x128xf32>
    %129 = vector.shape_cast %128 : vector<1x1x128xf32> to vector<1x128xf32>
    %cst_53 = arith.constant dense<0.000000e+00> : vector<128xf32>
    %130 = vector.multi_reduction <add>, %125, %cst_53 [1] : vector<128x128xf32> to vector<128xf32>
    %131 = vector.shape_cast %130 : vector<128xf32> to vector<128x1xf32>
    %cst_54 = arith.constant 1.280000e+02 : f32
    %132 = vector.broadcast %cst_54 : f32 to vector<128x1xf32>
    %133 = arith.divf %131, %132 : vector<128x1xf32>
    %134 = vector.broadcast %133 : vector<128x1xf32> to vector<128x128xf32>
    %135 = arith.subf %125, %134 : vector<128x128xf32>
    %136 = arith.mulf %135, %135 : vector<128x128xf32>
    %cst_55 = arith.constant dense<0.000000e+00> : vector<128xf32>
    %137 = vector.multi_reduction <add>, %136, %cst_55 [1] : vector<128x128xf32> to vector<128xf32>
    %138 = vector.shape_cast %137 : vector<128xf32> to vector<128x1xf32>
    %cst_56 = arith.constant 1.280000e+02 : f32
    %139 = vector.broadcast %cst_56 : f32 to vector<128x1xf32>
    %140 = arith.divf %138, %139 : vector<128x1xf32>
    %cst_57 = arith.constant 9.99999974E-6 : f32
    %141 = vector.broadcast %cst_57 : f32 to vector<128x1xf32>
    %142 = arith.addf %140, %141 : vector<128x1xf32>
    %143 = math.rsqrt %142 : vector<128x1xf32>
    %144 = vector.broadcast %143 : vector<128x1xf32> to vector<128x128xf32>
    %145 = arith.mulf %135, %144 : vector<128x128xf32>
    %146 = vector.broadcast %127 : vector<1x128xf32> to vector<128x128xf32>
    %147 = arith.mulf %145, %146 : vector<128x128xf32>
    %148 = vector.broadcast %129 : vector<1x128xf32> to vector<128x128xf32>
    %149 = arith.addf %147, %148 : vector<128x128xf32>
    %150 = arith.truncf %149 : vector<128x128xf32> to vector<128x128xbf16>
    %c0_58 = arith.constant 0 : index
    %c0_59 = arith.constant 0 : index
    %c0_60 = arith.constant 0 : index
    %151 = vector.load %arg13[%c0_58, %c0_59, %c0_60] : memref<1x128x256xbf16, #tpu.memory_space<vmem>>, vector<1x128x256xbf16>
    %152 = vector.shape_cast %151 : vector<1x128x256xbf16> to vector<128x256xbf16>
    %cst_61 = arith.constant dense<0.000000e+00> : vector<128x256xf32>
    %153 = tpu.matmul %150, %152, %cst_61 {dimension_numbers = #tpu.dot_dimension_numbers<[1], [0], [0], [1], [0, 0, 1, 1], [], []>} : vector<128x128xbf16>, vector<128x256xbf16>, vector<128x256xf32> -> vector<128x256xf32>
    %c0_62 = arith.constant 0 : index
    %c0_63 = arith.constant 0 : index
    %c0_64 = arith.constant 0 : index
    %154 = vector.load %arg14[%c0_62, %c0_63, %c0_64] : memref<1x1x256xf32, #tpu.memory_space<vmem>>, vector<1x1x256xf32>
    %155 = vector.shape_cast %154 : vector<1x1x256xf32> to vector<1x256xf32>
    %156 = vector.broadcast %155 : vector<1x256xf32> to vector<128x256xf32>
    %157 = arith.addf %153, %156 : vector<128x256xf32>
    %cst_65 = arith.constant 5.000000e-01 : f32
    %158 = vector.broadcast %cst_65 : f32 to vector<128x256xf32>
    %159 = arith.mulf %158, %157 : vector<128x256xf32>
    %cst_66 = arith.constant 4.471500e-02 : f32
    %160 = vector.broadcast %cst_66 : f32 to vector<128x256xf32>
    %161 = arith.mulf %160, %157 : vector<128x256xf32>
    %162 = arith.mulf %161, %157 : vector<128x256xf32>
    %163 = arith.mulf %162, %157 : vector<128x256xf32>
    %164 = arith.addf %157, %163 : vector<128x256xf32>
    %cst_67 = arith.constant 0.797884583 : f32
    %165 = vector.broadcast %cst_67 : f32 to vector<128x256xf32>
    %166 = arith.mulf %165, %164 : vector<128x256xf32>
    %167 = math.tanh %166 : vector<128x256xf32>
    %cst_68 = arith.constant 1.000000e+00 : f32
    %168 = vector.broadcast %cst_68 : f32 to vector<128x256xf32>
    %169 = arith.addf %168, %167 : vector<128x256xf32>
    %170 = arith.mulf %159, %169 : vector<128x256xf32>
    %171 = arith.truncf %170 : vector<128x256xf32> to vector<128x256xbf16>
    %c0_69 = arith.constant 0 : index
    %c0_70 = arith.constant 0 : index
    %c0_71 = arith.constant 0 : index
    %172 = vector.load %arg15[%c0_69, %c0_70, %c0_71] : memref<1x256x128xbf16, #tpu.memory_space<vmem>>, vector<1x256x128xbf16>
    %173 = vector.shape_cast %172 : vector<1x256x128xbf16> to vector<256x128xbf16>
    %cst_72 = arith.constant dense<0.000000e+00> : vector<128x128xf32>
    %174 = tpu.matmul %171, %173, %cst_72 {dimension_numbers = #tpu.dot_dimension_numbers<[1], [0], [0], [1], [0, 0, 1, 1], [], []>} : vector<128x256xbf16>, vector<256x128xbf16>, vector<128x128xf32> -> vector<128x128xf32>
    %c0_73 = arith.constant 0 : index
    %c0_74 = arith.constant 0 : index
    %c0_75 = arith.constant 0 : index
    %175 = vector.load %arg16[%c0_73, %c0_74, %c0_75] : memref<1x1x128xf32, #tpu.memory_space<vmem>>, vector<1x1x128xf32>
    %176 = vector.shape_cast %175 : vector<1x1x128xf32> to vector<1x128xf32>
    %177 = vector.broadcast %176 : vector<1x128xf32> to vector<128x128xf32>
    %178 = arith.addf %174, %177 : vector<128x128xf32>
    %c0_76 = arith.constant 0 : index
    %c0_77 = arith.constant 0 : index
    %179 = vector.load %arg20[%c0_76, %c0_77] : memref<128x128xf32, #tpu.memory_space<vmem>>, vector<128x128xf32>
    tpu.vector_store %arg20[%c0_76, %c0_77], %178 {strides = array<i32>} : memref<128x128xf32, #tpu.memory_space<vmem>>, vector<128x128xf32>,
    %c0_78 = arith.constant 0 : index
    %c0_79 = arith.constant 0 : index
    %180 = vector.load %arg21[%c0_78, %c0_79] : memref<128x128xf32, #tpu.memory_space<vmem>>, vector<128x128xf32>
    tpu.vector_store %arg21[%c0_78, %c0_79], %125 {strides = array<i32>} : memref<128x128xf32, #tpu.memory_space<vmem>>, vector<128x128xf32>,
    %c1_i32 = arith.constant 1 : i32
    %181 = arith.cmpi eq, %arg1, %c1_i32 : i32
    %182 = arith.extui %181 : i1 to i32
    %c0_i32_80 = arith.constant 0 : i32
    %183 = arith.cmpi ne, %182, %c0_i32_80 : i32
    scf.if %183 {
      %184 = arith.addf %178, %125 : vector<128x128xf32>
      %c0_81 = arith.constant 0 : index
      %c0_82 = arith.constant 0 : index
      %185 = vector.load %arg17[%c0_81, %c0_82] : memref<1x128xf32, #tpu.memory_space<vmem>>, vector<1x128xf32>
      %c0_83 = arith.constant 0 : index
      %c0_84 = arith.constant 0 : index
      %186 = vector.load %arg18[%c0_83, %c0_84] : memref<1x128xf32, #tpu.memory_space<vmem>>, vector<1x128xf32>
      %cst_85 = arith.constant dense<0.000000e+00> : vector<128xf32>
      %187 = vector.multi_reduction <add>, %184, %cst_85 [1] : vector<128x128xf32> to vector<128xf32>
      %188 = vector.shape_cast %187 : vector<128xf32> to vector<128x1xf32>
      %cst_86 = arith.constant 1.280000e+02 : f32
      %189 = vector.broadcast %cst_86 : f32 to vector<128x1xf32>
      %190 = arith.divf %188, %189 : vector<128x1xf32>
      %191 = vector.broadcast %190 : vector<128x1xf32> to vector<128x128xf32>
      %192 = arith.subf %184, %191 : vector<128x128xf32>
      %193 = arith.mulf %192, %192 : vector<128x128xf32>
      %cst_87 = arith.constant dense<0.000000e+00> : vector<128xf32>
      %194 = vector.multi_reduction <add>, %193, %cst_87 [1] : vector<128x128xf32> to vector<128xf32>
      %195 = vector.shape_cast %194 : vector<128xf32> to vector<128x1xf32>
      %cst_88 = arith.constant 1.280000e+02 : f32
      %196 = vector.broadcast %cst_88 : f32 to vector<128x1xf32>
      %197 = arith.divf %195, %196 : vector<128x1xf32>
      %cst_89 = arith.constant 9.99999974E-6 : f32
      %198 = vector.broadcast %cst_89 : f32 to vector<128x1xf32>
      %199 = arith.addf %197, %198 : vector<128x1xf32>
      %200 = math.rsqrt %199 : vector<128x1xf32>
      %201 = vector.broadcast %200 : vector<128x1xf32> to vector<128x128xf32>
      %202 = arith.mulf %192, %201 : vector<128x128xf32>
      %203 = vector.broadcast %185 : vector<1x128xf32> to vector<128x128xf32>
      %204 = arith.mulf %202, %203 : vector<128x128xf32>
      %205 = vector.broadcast %186 : vector<1x128xf32> to vector<128x128xf32>
      %206 = arith.addf %204, %205 : vector<128x128xf32>
      %c0_90 = arith.constant 0 : index
      %c0_91 = arith.constant 0 : index
      %c0_92 = arith.constant 0 : index
      %207 = vector.load %arg19[%c0_90, %c0_91, %c0_92] : memref<1x128x128xf32, #tpu.memory_space<vmem>>, vector<1x128x128xf32>
      %208 = vector.shape_cast %207 : vector<1x128x128xf32> to vector<128x128xf32>
      %209 = vector.shape_cast %206 : vector<128x128xf32> to vector<1x128x128xf32>
      tpu.vector_store %arg19[%c0_90, %c0_91, %c0_92], %209 {strides = array<i32>} : memref<1x128x128xf32, #tpu.memory_space<vmem>>, vector<1x128x128xf32>,
    } else {
    }
    return
  }
  func.func @transform_0(%arg0: i32, %arg1: i32) -> (i32, i32, i32) {
    %c0_i32 = arith.constant 0 : i32
    %c0_i32_0 = arith.constant 0 : i32
    %c0_i32_1 = arith.constant 0 : i32
    return %arg0, %c0_i32, %c0_i32_0 : i32, i32, i32
  }
  func.func @transform_1(%arg0: i32, %arg1: i32) -> (i32, i32) {
    %c0_i32 = arith.constant 0 : i32
    %c0_i32_0 = arith.constant 0 : i32
    %c0_i32_1 = arith.constant 0 : i32
    return %c0_i32, %c0_i32_0 : i32, i32
  }
  func.func @transform_2(%arg0: i32, %arg1: i32) -> (i32, i32) {
    %c0_i32 = arith.constant 0 : i32
    %c0_i32_0 = arith.constant 0 : i32
    %c0_i32_1 = arith.constant 0 : i32
    return %c0_i32, %c0_i32_0 : i32, i32
  }
  func.func @transform_3(%arg0: i32, %arg1: i32) -> (i32, i32, i32) {
    %c0_i32 = arith.constant 0 : i32
    %c0_i32_0 = arith.constant 0 : i32
    %c0_i32_1 = arith.constant 0 : i32
    return %arg1, %c0_i32, %c0_i32_0 : i32, i32, i32
  }
  func.func @transform_4(%arg0: i32, %arg1: i32) -> (i32, i32, i32) {
    %c0_i32 = arith.constant 0 : i32
    %c0_i32_0 = arith.constant 0 : i32
    %c0_i32_1 = arith.constant 0 : i32
    return %arg1, %c0_i32, %c0_i32_0 : i32, i32, i32
  }
  func.func @transform_5(%arg0: i32, %arg1: i32) -> (i32, i32, i32) {
    %c0_i32 = arith.constant 0 : i32
    %c0_i32_0 = arith.constant 0 : i32
    %c0_i32_1 = arith.constant 0 : i32
    return %arg1, %c0_i32, %c0_i32_0 : i32, i32, i32
  }
  func.func @transform_6(%arg0: i32, %arg1: i32) -> (i32, i32, i32) {
    %c0_i32 = arith.constant 0 : i32
    %c0_i32_0 = arith.constant 0 : i32
    %c0_i32_1 = arith.constant 0 : i32
    return %arg1, %c0_i32, %c0_i32_0 : i32, i32, i32
  }
  func.func @transform_7(%arg0: i32, %arg1: i32) -> (i32, i32, i32) {
    %c0_i32 = arith.constant 0 : i32
    %c0_i32_0 = arith.constant 0 : i32
    %c0_i32_1 = arith.constant 0 : i32
    return %arg1, %c0_i32, %c0_i32_0 : i32, i32, i32
  }
  func.func @transform_8(%arg0: i32, %arg1: i32) -> (i32, i32, i32) {
    %c0_i32 = arith.constant 0 : i32
    %c0_i32_0 = arith.constant 0 : i32
    %c0_i32_1 = arith.constant 0 : i32
    return %arg1, %c0_i32, %c0_i32_0 : i32, i32, i32
  }
  func.func @transform_9(%arg0: i32, %arg1: i32) -> (i32, i32, i32) {
    %c0_i32 = arith.constant 0 : i32
    %c0_i32_0 = arith.constant 0 : i32
    %c0_i32_1 = arith.constant 0 : i32
    return %arg1, %c0_i32, %c0_i32_0 : i32, i32, i32
  }
  func.func @transform_10(%arg0: i32, %arg1: i32) -> (i32, i32, i32) {
    %c0_i32 = arith.constant 0 : i32
    %c0_i32_0 = arith.constant 0 : i32
    %c0_i32_1 = arith.constant 0 : i32
    return %arg1, %c0_i32, %c0_i32_0 : i32, i32, i32
  }
  func.func @transform_11(%arg0: i32, %arg1: i32) -> (i32, i32, i32) {
    %c0_i32 = arith.constant 0 : i32
    %c0_i32_0 = arith.constant 0 : i32
    %c0_i32_1 = arith.constant 0 : i32
    return %arg1, %c0_i32, %c0_i32_0 : i32, i32, i32
  }
  func.func @transform_12(%arg0: i32, %arg1: i32) -> (i32, i32, i32) {
    %c0_i32 = arith.constant 0 : i32
    %c0_i32_0 = arith.constant 0 : i32
    %c0_i32_1 = arith.constant 0 : i32
    return %arg1, %c0_i32, %c0_i32_0 : i32, i32, i32
  }
  func.func @transform_13(%arg0: i32, %arg1: i32) -> (i32, i32, i32) {
    %c0_i32 = arith.constant 0 : i32
    %c0_i32_0 = arith.constant 0 : i32
    %c0_i32_1 = arith.constant 0 : i32
    return %arg1, %c0_i32, %c0_i32_0 : i32, i32, i32
  }
  func.func @transform_14(%arg0: i32, %arg1: i32) -> (i32, i32, i32) {
    %c0_i32 = arith.constant 0 : i32
    %c0_i32_0 = arith.constant 0 : i32
    %c0_i32_1 = arith.constant 0 : i32
    return %arg1, %c0_i32, %c0_i32_0 : i32, i32, i32
  }
  func.func @transform_15(%arg0: i32, %arg1: i32) -> (i32, i32) {
    %c0_i32 = arith.constant 0 : i32
    %c0_i32_0 = arith.constant 0 : i32
    %c0_i32_1 = arith.constant 0 : i32
    return %c0_i32, %c0_i32_0 : i32, i32
  }
  func.func @transform_16(%arg0: i32, %arg1: i32) -> (i32, i32) {
    %c0_i32 = arith.constant 0 : i32
    %c0_i32_0 = arith.constant 0 : i32
    %c0_i32_1 = arith.constant 0 : i32
    return %c0_i32, %c0_i32_0 : i32, i32
  }
  func.func @transform_17(%arg0: i32, %arg1: i32) -> (i32, i32, i32) {
    %c0_i32 = arith.constant 0 : i32
    %c0_i32_0 = arith.constant 0 : i32
    %c0_i32_1 = arith.constant 0 : i32
    return %arg0, %c0_i32, %c0_i32_0 : i32, i32, i32
  }
}

</mosaic_0001>

<bundles_post_ra>
// kernel: gpt_forward.1
= control target key start
LH: loop header
LB: loop body
LE: loop exit
PB: predicated region body
PF: predicated region fallthrough
CT: control target
= control target key end

     0   :  { %s10399_s0 = inlined_call_operand.vmem [shape: f32[2,128,128], index: 0, kind: input, shape index: {}]   ;;  %s10400_s1 = inlined_call_operand.vmem [shape: f32[128,128], index: 1, kind: input, shape index: {}]   ;;  %s10401_s2 = inlined_call_operand.vmem [shape: f32[128,128], index: 2, kind: input, shape index: {}]   ;;  %s10402_s3 = inlined_call_operand.vmem [shape: f32[2,1,128], index: 3, kind: input, shape index: {}]   ;;  %s10403_s4 = inlined_call_operand.vmem [shape: f32[2,1,128], index: 4, kind: input, shape index: {}]   ;;  %s10404_s5 = inlined_call_operand.hbm [shape: bf16[2,128,384], index: 5, kind: input, shape index: {}]   ;;  %s10405_s6 = inlined_call_operand.vmem [shape: f32[2,1,384], index: 6, kind: input, shape index: {}]   ;;  %s10406_s7 = inlined_call_operand.hbm [shape: bf16[2,128,128], index: 7, kind: input, shape index: {}]   ;;  %s10407_s8 = inlined_call_operand.hbm [shape: f32[2,1,128], index: 8, kind: input, shape index: {}]   ;;  %s10408_s9 = inlined_call_operand.vmem [shape: f32[2,1,128], index: 9, kind: input, shape index: {}]   ;;  %s10409_s10 = inlined_call_operand.vmem [shape: f32[2,1,128], index: 10, kind: input, shape index: {}]   ;;  %s10410_s11 = inlined_call_operand.hbm [shape: bf16[2,128,256], index: 11, kind: input, shape index: {}]   ;;  %s10411_s12 = inlined_call_operand.vmem [shape: f32[2,1,256], index: 12, kind: input, shape index: {}]   ;;  %s10412_s13 = inlined_call_operand.hbm [shape: bf16[2,256,128], index: 13, kind: input, shape index: {}]   ;;  %s10413_s14 = inlined_call_operand.vmem [shape: f32[2,1,128], index: 14, kind: input, shape index: {}]   ;;  %s10414_s15 = inlined_call_operand.vmem [shape: f32[1,128], index: 15, kind: input, shape index: {}]   ;;  %s10415_s16 = inlined_call_operand.hbm [shape: f32[1,128], index: 16, kind: input, shape index: {}]   ;;  %s10416_s17 = inlined_call_operand.hbm [shape: f32[2,128,128], index: 17, kind: output, shape index: {}]  }
   0x1   :  { %10505 = sst [smem:[#allocation105_spill]] %s10399_s0 }
   0x2   :  { %10506 = sst [smem:[#allocation106_spill]] %s10400_s1 }
   0x3   :  { %10507 = sst [smem:[#allocation107_spill]] %s10401_s2 }
   0x4   :  { %10508 = sst [smem:[#allocation108_spill]] %s10402_s3 }
   0x5   :  { %10509 = sst [smem:[#allocation109_spill]] %s10403_s4 }
   0x6   :  { %10510 = sst [smem:[#allocation110_spill]] %s10404_s5 }
   0x7   :  { %10511 = sst [smem:[#allocation111_spill]] %s10405_s6 }
   0x8   :  { %10512 = sst [smem:[#allocation112_spill]] %s10406_s7 }
   0x9   :  { %10513 = sst [smem:[#allocation113_spill]] %s10407_s8 }
   0xa   :  { %10514 = sst [smem:[#allocation114_spill]] %s10408_s9 }
   0xb   :  { %10515 = sst [smem:[#allocation115_spill]] %s10409_s10 }
   0xc   :  { %10516 = sst [smem:[#allocation116_spill]] %s10410_s11 }
   0xd   :  { %10517 = sst [smem:[#allocation117_spill]] %s10411_s12 }
   0xe   :  { %10518 = sst [smem:[#allocation118_spill]] %s10412_s13 }
   0xf   :  { %10519 = sst [smem:[#allocation119_spill]] %s10413_s14 }
  0x10   :  { %10520 = sst [smem:[#allocation120_spill]] %s10414_s15 }
  0x11   :  { %10521 = sst [smem:[#allocation121_spill]] %s10415_s16 }
  0x12   :  { %10522 = sst [smem:[#allocation122_spill]] %s10416_s17 }
  0x13   :  { %22 = vsyncpa [#allocation5], 0 }
  0x14   :  { %24 = vsyncpa [#allocation5 + $0x1], 0 }
  0x15   :  { %25 = vsyncpa [#allocation8], 0 }
  0x16   :  { %27 = vsyncpa [#allocation8 + $0x1], 0 }
  0x17   :  { %28 = vsyncpa [#allocation11], 0 }
  0x18   :  { %30 = vsyncpa [#allocation11 + $0x1], 0 }
  0x19   :  { %31 = vsyncpa [#allocation14], 0 }
  0x1a   :  { %32 = vsyncpa [#allocation6], 0 }
  0x1b   :  { %34 = vsyncpa [#allocation6 + $0x1], 0  ;;  %s7362_s24 = smov 0   ;;  %s7364_s25 = smov 0  }
  0x1c   :  { %s7366_s26 = smov 0   ;;  %s7368_s27 = smov 0  }
  0x1d   :  { %s7370_s28 = smov 0   ;;  %s7372_s29 = smov 0  }
  0x1e   :  { %s7374_s0 = smov 0   ;;  %s7376_s30 = smov 0  }
  0x1f   :  { %s7378_s18 = smov 0   ;;  %s7380_s19 = smov 0  }
  0x20   :  { %s7382_s1 = smov 0  }
  0x21 LB: > { %10523 = sst [smem:[#allocation21_spill]] %s7210_s24  ;;  %s49_s20 = sadd.s32 1, %s7242_s18  ;;  %s7250_s1 = sphi %s7382_s1, %s40_s1   ;;  %s7246_s19 = sphi %s7380_s19, %s10765_s19   ;;  %s7242_s18 = sphi %s7378_s18, %s10764_s18   ;;  %s7238_s30 = sphi %s7376_s30, %s10763_s30   ;;  %s7234_s0 = sphi %s7374_s0, %s10762_s0   ;;  %s7230_s29 = sphi %s7372_s29, %s10761_s29   ;;  %s7226_s28 = sphi %s7370_s28, %s10767_s28   ;;  %s7222_s27 = sphi %s7368_s27, %s10766_s27   ;;  %s7218_s26 = sphi %s7366_s26, %s10759_s26   ;;  %s7214_s25 = sphi %s7364_s25, %s10758_s25   ;;  %s7210_s24 = sphi %s7362_s24, %s10757_s24  }
  0x22   : > { %10524 = sst [smem:[#allocation22_spill]] %s7214_s25  ;;  %s179_s21 = sadd.s32 1, %s7230_s29 }
  0x23   : > { %10525 = sst [smem:[#allocation23_spill]] %s7218_s26  ;;  %p7419_p0 = scmp.ge.s32.totalorder %s49_s20, 2 }
  0x24   : > { %10526 = sst [smem:[#allocation24_spill]] %s7230_s29  ;;  %p186_p1 = scmp.ne.s32.totalorder %s7230_s29, %s7226_s28 }
  0x25   : > { %10527 = sst [smem:[#allocation25_spill]] %s7234_s0  ;;  %p187_p2 = scmp.eq.s32.totalorder %s7250_s1, 0 }
  0x26   : > { %10528 = sst [smem:[#allocation26_spill]] %s7238_s30  ;;  %s10769_s20 = smov (%p7419_p0, %s49_s20), 0 }
  0x27   : > { %10529 = sst [smem:[#allocation27_spill]] %s7242_s18  ;;  %p188_p3 = por %p187_p2, %p186_p1 }
  0x28   : > { %10530 = sst [smem:[#allocation28_spill]] %s7246_s19  ;;  %p6201_p4 = scmp.lt.s32.totalorder %s7250_s1, 4 }
  0x29   : > { %10531 = sst [smem:[#allocation29_spill]] %s7250_s1  ;;  %s176_s23 = ssub.s32 %s7242_s18, %s10769_s20 }
  0x2a   : > { %s10532_s22 = scalar_select %p7419_p0, 1, 0 }
  0x2b   : > { %10533 = sst [smem:[#allocation30_spill]] %s10769_s20  ;;  %s7434_s17 = sand.u32 1, %s7230_s29  }
  0x2c   : > { %p177_p5 = scmp.eq.s32.totalorder %s176_s23, 0  ;;  %p7436_p6 = pnand %p6201_p4, %p188_p3 }
  0x2d   : > { %s10422_s2 = sand.u32 1, %s7250_s1   ;;  %s5429_s14 = sshll.u32 %s7434_s17, 6 }
  0x2e   : > { %s10534_s15 = scalar_select %p7436_p6, 1, 0 }
  0x2f   : > { %s7443_s12 = scalar_select %p177_p5, %s7230_s29, %s179_s21  }
  0x30   : > { %s5559_s6 = sshll.u32 %s7242_s18, 10  ;;  %s10536_s7 = sld [smem:[#allocation112_spill]] }
  0x31   : > { %10535 = sst [smem:[#allocation31_spill]] %s7443_s12  ;;  %s590_s23 = scalar_lea.vmem [#allocation7], %s5429_s14 }
  0x32   : > { %s597_s20 = sshll.u32 %s590_s23, 4  ;;  %s7455_s3 = scalar_lea.sflag [#allocation8], %s10422_s2  ;;  %s7451_s20 = int_to_ptr.vmem [resolvable:$true] %s597_s20 }
  0x33   : > { %p7461_p8 = pneg %p7436_p6 }
  0x35   : > { %s10537_s21 = scalar_select %p7461_p8, 1, 0 }
  0x36   : > { %s7449_s4 = scalar_lea.hbm %s10536_s7, %s5559_s6  ;;  %s6943_s10 = scalar_lea.hbm %s10536_s7, 2048 }
  0x37   : > { %s6938_s0 = scalar_lea.hbm %s7449_s4, 1024  ;;  %p6944_p11 = scmp.lt.u32.totalorder %s7449_s4, %s10536_s7 }
  0x38   : > { %p6939_p7 = scmp.ne.s32.totalorder %s7449_s4, %s6938_s0  ;;  %p6945_p12 = scmp.lt.u32.totalorder %s6943_s10, %s6938_s0 }
  0x39   : > { %p6947_p1 = scmp.lt.u32.totalorder %s6938_s0, %s7449_s4 }
  0x3a   : > { %p6941_p9 = pnand %p7461_p8, %p6939_p7  ;;  %p6946_p13 = por %p6945_p12, %p6944_p11 }
  0x3c   : > { %p6942_p10 = pneg %p6941_p9  ;;  %p6948_p2 = por %p6947_p1, %p6946_p13 }
  0x3e   : > { %p6949_p3 = pnand %p6948_p2, %p6942_p10 }
  0x40   : > { %6952 = shalt.err (!%p6949_p3)
}
  0x41   : > { %s6953_s2 = scalar_lea.vmem %s7451_s20, 1024  ;;  %s7252_s6 = smov [#allocation7]  }
  0x42   : > { %p6954_p4 = scmp.ne.s32.totalorder %s7451_s20, %s6953_s2  ;;  %s6958_s9 = sshll.u32 %s7252_s6, 4  ;;  %s6959_s9 = int_to_ptr.vmem [resolvable:$false] %s6958_s9 }
  0x43   : > { %s6960_s14 = scalar_lea.vmem %s6959_s9, 2048  ;;  %p6961_p9 = scmp.lt.s32.totalorder %s7451_s20, %s6959_s9 }
  0x44   : > { %p6956_p5 = pnand %p6954_p4, %p7461_p8  ;;  %p6962_p0 = scmp.lt.s32.totalorder %s6960_s14, %s6953_s2 }
  0x46   : > { %p6957_p7 = pneg %p6956_p5  ;;  %p6963_p11 = por %p6962_p0, %p6961_p9 }
  0x48   : > { %p6964_p12 = pnand %p6963_p11, %p6957_p7 }
  0x4a   : > { %6967 = shalt.err (!%p6964_p12)
}
  0x4b   : > { %s10426_s0 = smov 64   ;;  %s10427_s10 = smov 4  }
  0x4c   : > { %6186 = dma.hbm_to_vmem [thread:$0]  (!%p7436_p6), %s7449_s4, 1024, %s7451_s20, %s7455_s3, %s10426_s0, %s10426_s0, %s10427_s10  }
  0x4d   : > { %s5433_s2 = sshll.u32 %s7434_s17, 7  ;;  %s5560_s23 = sshll.u32 %s7242_s18, 11 }
  0x4e   : > { %s10538_s11 = sld [smem:[#allocation116_spill]]  ;;  %s640_s7 = scalar_lea.vmem [#allocation10], %s5433_s2 }
  0x4f   : > { %s647_s12 = sshll.u32 %s640_s7, 4  ;;  %s10539_s29 = sand.u32 1, %s7250_s1   ;;  %s7499_s12 = int_to_ptr.vmem [resolvable:$true] %s647_s12 }
  0x50   : > { %s7503_s30 = scalar_lea.sflag [#allocation11], %s10539_s29 }
  0x54   : > { %s7495_s14 = scalar_lea.hbm %s10538_s11, %s5560_s23  ;;  %s6973_s9 = scalar_lea.hbm %s10538_s11, 4096 }
  0x55   : > { %s6968_s4 = scalar_lea.hbm %s7495_s14, 2048  ;;  %p6974_p1 = scmp.lt.u32.totalorder %s7495_s14, %s10538_s11 }
  0x56   : > { %p6969_p0 = scmp.ne.s32.totalorder %s7495_s14, %s6968_s4  ;;  %p6975_p2 = scmp.lt.u32.totalorder %s6973_s9, %s6968_s4 }
  0x57   : > { %p6977_p4 = scmp.lt.u32.totalorder %s6968_s4, %s7495_s14 }
  0x58   : > { %p6971_p10 = pnand %p6969_p0, %p7461_p8  ;;  %p6976_p3 = por %p6975_p2, %p6974_p1 }
  0x5a   : > { %p6972_p13 = pneg %p6971_p10  ;;  %p6978_p5 = por %p6977_p4, %p6976_p3 }
  0x5c   : > { %p6979_p7 = pnand %p6978_p5, %p6972_p13 }
  0x5e   : > { %6982 = shalt.err (!%p6979_p7)
}
  0x5f   : > { %s6983_s7 = scalar_lea.vmem %s7499_s12, 2048  ;;  %s7255_s29 = smov [#allocation10]  }
  0x60   : > { %p6984_p9 = scmp.ne.s32.totalorder %s7499_s12, %s6983_s7  ;;  %s6988_s20 = sshll.u32 %s7255_s29, 4  ;;  %s6989_s20 = int_to_ptr.vmem [resolvable:$false] %s6988_s20 }
  0x61   : > { %s6990_s0 = scalar_lea.vmem %s6989_s20, 4096  ;;  %p6991_p0 = scmp.lt.s32.totalorder %s7499_s12, %s6989_s20 }
  0x62   : > { %p6986_p11 = pnand %p6984_p9, %p7461_p8  ;;  %p6992_p10 = scmp.lt.s32.totalorder %s6990_s0, %s6983_s7 }
  0x64   : > { %p6987_p12 = pneg %p6986_p11  ;;  %p6993_p1 = por %p6992_p10, %p6991_p0 }
  0x66   : > { %p6994_p2 = pnand %p6993_p1, %p6987_p12 }
  0x68   : > { %6997 = shalt.err (!%p6994_p2)
}
  0x69   : > { %s7256_s10 = smov 128   ;;  %s7257_s4 = smov 8  }
  0x6a   : > { %6192 = dma.hbm_to_vmem [thread:$0]  (!%p7436_p6), %s7495_s14, 2048, %s7499_s12, %s7503_s30, %s7256_s10, %s7256_s10, %s7257_s4  }
  0x6b   : > { %s10540_s13 = sld [smem:[#allocation118_spill]]  ;;  %s668_s29 = scalar_lea.vmem [#allocation12], %s5433_s2 }
  0x6c   : > { %s675_s20 = sshll.u32 %s668_s29, 4  ;;  %s7539_s0 = sadd.s32 4294967295, %s7250_s1   ;;  %s7536_s20 = int_to_ptr.vmem [resolvable:$true] %s675_s20 }
  0x6d   : > { %s5424_s12 = sadd.s32 4294967294, %s7250_s1   ;;  %s52_s14 = sadd.s32 1, %s7246_s19 }
  0x6e   : > { %p192_p13 = scmp.ne.s32.totalorder %s7226_s28, %s7222_s27  ;;  %p10541_p3 = scmp.ne.s32.totalorder %s10532_s22, 0 }
  0x6f   : > { %p10437_p4 = scmp.eq.s32.totalorder %s7539_s0, 0  ;;  %s481_s2 = sadd.s32 1, %s7218_s26 }
  0x70   : > { %s10771_s14 = smov (!%p10541_p3, %s52_s14), %s7246_s19  ;;  %p491_p7 = scmp.ne.s32.totalorder %s7218_s26, %s7214_s25 }
  0x71   : > { %s7532_s7 = scalar_lea.hbm %s10540_s13, %s5560_s23  ;;  %p54_p5 = scmp.ge.s32.totalorder %s10771_s14, 2 }
  0x72   : > { %p7554_p9 = por %p10437_p4, %p192_p13  ;;  %p492_p11 = scmp.eq.s32.totalorder %s7539_s0, 3 }
  0x73   : > { %s10773_s14 = smov (%p54_p5, %s10771_s14), 0  ;;  %p497_p0 = scmp.ne.s32.totalorder %s7214_s25, %s7210_s24 }
  0x74   : > { %s10542_s23 = scalar_select %p7554_p9, 1, 0 }
  0x75   : > { %10543 = sst [smem:[#allocation32_spill]] %s10773_s14  ;;  %p7561_p12 = por %p492_p11, %p491_p7 }
  0x76   : > { %s478_s22 = ssub.s32 %s7246_s19, %s10773_s14  ;;  %p498_p10 = scmp.eq.s32.totalorder %s5424_s12, 3 }
  0x77   : > { %s10544_s27 = scalar_select %p7561_p12, 1, 0 }
  0x78   : > { %p479_p1 = scmp.eq.s32.totalorder %s478_s22, 0  ;;  %p5425_p2 = scmp.ge.s32.totalorder %s7250_s1, 1 }
  0x79   : > { %10545 = sst [smem:[#allocation33_spill]] %s10544_s27  ;;  %p7570_p13 = por %p498_p10, %p497_p0 }
  0x7a   : > { %p505_p3 = scmp.lt.s32.totalorder %s7250_s1, 5  ;;  %s7258_s9 = smov [#allocation13]  }
  0x7b   : > { %s10546_s10 = scalar_select %p7570_p13, 1, 0 }
  0x7c   : > { %s7576_s4 = scalar_select %p479_p1, %s7218_s26, %s481_s2  }
  0x7d   : > { %10547 = sst [smem:[#allocation34_spill]] %s10546_s10  ;;  %p7578_p5 = pnand %p5425_p2, %p505_p3 }
  0x7e   : > { %10548 = sst [smem:[#allocation35_spill]] %s7576_s4  ;;  %s527_s29 = sshll.u32 %s7258_s9, 4  ;;  %s528_s29 = int_to_ptr.vmem [resolvable:$true] %s527_s29 }
  0x7f   : > { %s10549_s6 = scalar_select %p7578_p5, 1, 0 }
  0x80   : > { %p6176_p7 = pneg %p7578_p5  ;;  %s6156_s12 = smul.u32 192, %s7434_s17 }
  0x81   : > { %s6157_s11 = smul.u32 3072, %s7242_s18  ;;  %s10551_s5 = sld [smem:[#allocation110_spill]] }
  0x82   : > { %p7587_p11 = pnand %p6176_p7, %p10437_p4  ;;  %s10552_s16 = sld [smem:[#allocation121_spill]] }
  0x84   : > { %p7000_p10 = pneg %p7587_p11 }
  0x87   : > { %s7595_s19 = scalar_lea.hbm %s10551_s5, %s6157_s11 }
  0x88   : > { %s6998_s10 = scalar_lea.hbm %s10552_s16, 16 }
  0x89   : > { %p6999_p0 = scmp.ne.s32.totalorder %s10552_s16, %s6998_s10  ;;  %p7005_p3 = scmp.lt.u32.totalorder %s6998_s10, %s10552_s16 }
  0x8b   : > { %p7001_p1 = pnand %p7000_p10, %p6999_p0 }
  0x8d   : > { %p7002_p2 = pneg %p7001_p1 }
  0x8f   : > { %p7007_p7 = pnand %p7005_p3, %p7002_p2 }
  0x91   : > { %7010 = shalt.err (!%p7007_p7)
}
  0x92   : > { %s7011_s11 = scalar_lea.vmem %s528_s29, 16  ;;  %s7018_s26 = scalar_lea.vmem %s528_s29, 32 }
  0x93   : > { %p7012_p4 = scmp.ne.s32.totalorder %s528_s29, %s7011_s11  ;;  %p7019_p9 = scmp.lt.s32.totalorder %s528_s29, %s528_s29 }
  0x94   : > { %p7020_p5 = scmp.lt.s32.totalorder %s7018_s26, %s7011_s11 }
  0x95   : > { %p7014_p13 = pnand %p7012_p4, %p7000_p10 }
  0x96   : > { %p7021_p6 = por %p7020_p5, %p7019_p9 }
  0x97   : > { %p7015_p12 = pneg %p7014_p13 }
  0x99   : > { %p7022_p8 = pnand %p7021_p6, %p7015_p12 }
  0x9b   : > { %7025 = shalt.err (!%p7022_p8)
}
  0x9c   : > { %6179 = dma.hbm_to_vmem [thread:$0]  (!%p7587_p11), %s10552_s16, 16, %s528_s29, [#allocation14]  }
  0x9d   : > { %s562_s1 = scalar_lea.vmem [#allocation4], %s6156_s12  ;;  %s559_s10 = scalar_lea.sflag [#allocation5], %s7434_s17 }
  0x9e   : > { %s569_s27 = sshll.u32 %s562_s1, 4  ;;  %s7026_s4 = scalar_lea.hbm %s7595_s19, 3072  ;;  %s7613_s27 = int_to_ptr.vmem [resolvable:$true] %s569_s27 }
  0x9f   : > { %p7027_p6 = scmp.ne.s32.totalorder %s7595_s19, %s7026_s4  ;;  %p10553_p8 = scmp.ne.s32.totalorder %s10537_s21, 0 }
  0xa0   : > { %s7031_s9 = scalar_lea.hbm %s10551_s5, 6144  ;;  %p7032_p12 = scmp.lt.u32.totalorder %s7595_s19, %s10551_s5 }
  0xa1   : > { %p7029_p4 = pnand %p7027_p6, %p10553_p8  ;;  %p7033_p13 = scmp.lt.u32.totalorder %s7031_s9, %s7026_s4 }
  0xa2   : > { %p7035_p11 = scmp.lt.u32.totalorder %s7026_s4, %s7595_s19 }
  0xa3   : > { %p7030_p9 = pneg %p7029_p4  ;;  %p7034_p5 = por %p7033_p13, %p7032_p12 }
  0xa5   : > { %p7036_p0 = por %p7035_p11, %p7034_p5 }
  0xa7   : > { %p7037_p10 = pnand %p7036_p0, %p7030_p9 }
  0xa9   : > { %7040 = shalt.err (!%p7037_p10)
}
  0xaa   : > { %s7041_s29 = scalar_lea.vmem %s7613_s27, 3072  ;;  %s7259_s12 = smov [#allocation4]  }
  0xab   : > { %p7042_p1 = scmp.ne.s32.totalorder %s7613_s27, %s7041_s29  ;;  %s7046_s24 = sshll.u32 %s7259_s12, 4  ;;  %s7047_s24 = int_to_ptr.vmem [resolvable:$false] %s7046_s24 }
  0xac   : > { %s7048_s14 = scalar_lea.vmem %s7047_s24, 6144  ;;  %p7049_p7 = scmp.lt.s32.totalorder %s7613_s27, %s7047_s24 }
  0xad   : > { %p7044_p2 = pnand %p7042_p1, %p10553_p8  ;;  %p7050_p6 = scmp.lt.s32.totalorder %s7048_s14, %s7041_s29 }
  0xaf   : > { %p7045_p3 = pneg %p7044_p2  ;;  %p7051_p4 = por %p7050_p6, %p7049_p7 }
  0xb1   : > { %p7052_p12 = pnand %p7051_p4, %p7045_p3 }
  0xb3   : > { %7055 = shalt.err (!%p7052_p12)
}
  0xb4   : > { %s7260_s1 = smov 192   ;;  %s7261_s4 = smov 12  }
  0xb5   : > { %p10554_p9 = scmp.ne.s32.totalorder %s10534_s15, 0  ;;  %s5432_s22 = sshll.u32 %s7242_s18, 4 }
  0xb6   : > { %s610_s2 = scalar_lea.vmem [#allocation9], %s7434_s17  ;;  %s10555_s8 = sld [smem:[#allocation113_spill]] }
  0xb7   : > { %6183 = dma.hbm_to_vmem [thread:$0]  (!%p10554_p9), %s7595_s19, 3072, %s7613_s27, %s559_s10, %s7260_s1, %s7260_s1, %s7261_s4  }
  0xb8   : > { %s617_s9 = sshll.u32 %s610_s2, 4  ;;  %s618_s9 = int_to_ptr.vmem [resolvable:$true] %s617_s9 }
  0xbc   : > { %s615_s29 = scalar_lea.hbm %s10555_s8, %s5432_s22  ;;  %s7061_s5 = scalar_lea.hbm %s10555_s8, 32 }
  0xbd   : > { %s7056_s12 = scalar_lea.hbm %s615_s29, 16  ;;  %p7062_p0 = scmp.lt.u32.totalorder %s615_s29, %s10555_s8 }
  0xbe   : > { %p7057_p13 = scmp.ne.s32.totalorder %s615_s29, %s7056_s12  ;;  %p7063_p10 = scmp.lt.u32.totalorder %s7061_s5, %s7056_s12 }
  0xbf   : > { %p7065_p2 = scmp.lt.u32.totalorder %s7056_s12, %s615_s29 }
  0xc0   : > { %p7059_p5 = pnand %p7057_p13, %p10553_p8  ;;  %p7064_p1 = por %p7063_p10, %p7062_p0 }
  0xc2   : > { %p7060_p11 = pneg %p7059_p5  ;;  %p7066_p3 = por %p7065_p2, %p7064_p1 }
  0xc4   : > { %p7067_p7 = pnand %p7066_p3, %p7060_p11 }
  0xc6   : > { %7070 = shalt.err (!%p7067_p7)
}
  0xc7   : > { %s7071_s17 = scalar_lea.vmem %s618_s9, 16  ;;  %s7262_s19 = smov [#allocation9]  }
  0xc8   : > { %p7072_p6 = scmp.ne.s32.totalorder %s618_s9, %s7071_s17  ;;  %s7076_s27 = sshll.u32 %s7262_s19, 4  ;;  %s7077_s27 = int_to_ptr.vmem [resolvable:$false] %s7076_s27 }
  0xc9   : > { %s7078_s10 = scalar_lea.vmem %s7077_s27, 32  ;;  %p7079_p13 = scmp.lt.s32.totalorder %s618_s9, %s7077_s27 }
  0xca   : > { %p7074_p4 = pnand %p7072_p6, %p10553_p8  ;;  %p7080_p5 = scmp.lt.s32.totalorder %s7078_s10, %s7071_s17 }
  0xcc   : > { %p7075_p12 = pneg %p7074_p4  ;;  %p7081_p9 = por %p7080_p5, %p7079_p13 }
  0xce   : > { %p7082_p0 = pnand %p7081_p9, %p7075_p12 }
  0xd0   : > { %7085 = shalt.err (!%p7082_p0)
}
  0xd1   : > { %p10556_p10 = scmp.ne.s32.totalorder %s10534_s15, 0  ;;  %s7086_s5 = scalar_lea.hbm %s7532_s7, 2048 }
  0xd2   : > { %p7087_p11 = scmp.ne.s32.totalorder %s7532_s7, %s7086_s5  ;;  %s7091_s1 = scalar_lea.hbm %s10540_s13, 4096 }
  0xd3   : > { %6189 = dma.hbm_to_vmem [thread:$0]  (!%p10556_p10), %s615_s29, 16, %s618_s9, %s7455_s3  }
  0xd4   : > { %p7089_p1 = pnand %p7087_p11, %p10553_p8  ;;  %p7092_p9 = scmp.lt.u32.totalorder %s7532_s7, %s10540_s13 }
  0xd5   : > { %p7093_p3 = scmp.lt.u32.totalorder %s7091_s1, %s7086_s5  ;;  %p7095_p6 = scmp.lt.u32.totalorder %s7086_s5, %s7532_s7 }
  0xd6   : > { %p7090_p2 = pneg %p7089_p1 }
  0xd7   : > { %p7094_p7 = por %p7093_p3, %p7092_p9 }
  0xd9   : > { %p7096_p4 = por %p7095_p6, %p7094_p7 }
  0xdb   : > { %p7097_p12 = pnand %p7096_p4, %p7090_p2 }
  0xdd   : > { %7100 = shalt.err (!%p7097_p12)
}
  0xde   : > { %s7101_s3 = scalar_lea.vmem %s7536_s20, 2048  ;;  %s7263_s2 = smov [#allocation12]  }
  0xdf   : > { %p7102_p13 = scmp.ne.s32.totalorder %s7536_s20, %s7101_s3  ;;  %s7106_s9 = sshll.u32 %s7263_s2, 4  ;;  %s7107_s9 = int_to_ptr.vmem [resolvable:$false] %s7106_s9 }
  0xe0   : > { %s7108_s11 = scalar_lea.vmem %s7107_s9, 4096  ;;  %p7109_p11 = scmp.lt.s32.totalorder %s7536_s20, %s7107_s9 }
  0xe1   : > { %p7104_p5 = pnand %p7102_p13, %p10553_p8  ;;  %p7110_p1 = scmp.lt.s32.totalorder %s7108_s11, %s7101_s3 }
  0xe3   : > { %p7105_p0 = pneg %p7104_p5  ;;  %p7111_p9 = por %p7110_p1, %p7109_p11 }
  0xe5   : > { %p7112_p3 = pnand %p7111_p9, %p7105_p0 }
  0xe7   : > { %7115 = shalt.err (!%p7112_p3)
}
  0xe8   : > { %s10557_s26 = smov 4   ;;  %s10558_s29 = smov 64  }
  0xe9   : > { %6195 = dma.hbm_to_vmem [thread:$0]  (!%p10556_p10), %s7532_s7, 2048, %s7536_s20, %s7503_s30, %s10558_s29, %s10558_s29, %s10557_s26  }
  0xea   : > { %p10559_p8 = scmp.ne.s32.totalorder %s10549_s6, 0 }
  0xec   : > { %693 = sbr.rel (%p10559_p8) target bundleno = 4517 (0x11a5), region = 88 }
  0xf3   : > { %s7685_s21 = sand.u32 1, %s7226_s28   ;;  %p10560_p2 = scmp.ne.s32.totalorder %s10542_s23, 0 }
  0xf4   : > { %s6158_s12 = smul.u32 192, %s7685_s21  ;;  %s696_s24 = scalar_lea.sflag [#allocation5], %s7685_s21 }
  0xf6   : > { %s7689_s14 = scalar_lea.vmem [#allocation4], %s6158_s12 }
  0xf7   : > { %7189 = dma.done.wait (%p10560_p2), %s696_s24, 3072  }
  0xf8   : > { %7191 = vsyncadd (%p10560_p2), %s696_s24, 4294964224  ;;  %s704_s15 = sand.u32 1, %s7539_s0   ;;  %s5440_s30 = sshll.u32 %s7685_s21, 6 }
  0xf9   : > { %s705_s7 = scalar_lea.sflag [#allocation8], %s704_s15  ;;  %s7697_s20 = scalar_lea.vmem [#allocation7], %s5440_s30 }
  0xfa   : > { %7193 = dma.done.wait (%p10560_p2), %s705_s7, 1040  }
  0xfb   : > { %7195 = vsyncadd (%p10560_p2), %s705_s7, 4294966256  ;;  %s5441_s6 = sshll.u32 %s7685_s21, 7  ;;  %s722_s19 = scalar_lea.sflag [#allocation11], %s704_s15 }
  0xfc   : > { %s7705_s27 = scalar_lea.vmem [#allocation10], %s5441_s6 }
  0xfd   : > { %7197 = dma.done.wait (%p10560_p2), %s722_s19, 4096  }
  0xfe   : > { %7199 = vsyncadd (%p10560_p2), %s722_s19, 4294963200  ;;  %s7711_s10 = scalar_lea.vmem [#allocation12], %s5441_s6  ;;  %p10561_p10 = scmp.eq.s32.totalorder %s7539_s0, 0 }
 0x100   : > { %7201 = dma.done.wait (%p10561_p10), [#allocation14], 16   ;;  %p10562_p7 = pmov %p10561_p10 }
 0x101   : > { %s10563_s5 = sld [smem:[#allocation22_spill]]  ;;  %s10564_s16 = sld [smem:[#allocation26_spill]] }
 0x102   : > { %7203 = vsyncadd (%p10562_p7), [#allocation14], 4294967280  ;;  %s10565_s25 = sld [smem:[#allocation25_spill]]  ;;  %s10566_s2 = sld [smem:[#allocation105_spill]] }
 0x103   : > { %s10570_s13 = sld [smem:[#allocation115_spill]]  ;;  %s10571_s3 = sld [smem:[#allocation111_spill]] }
 0x104   : > { %s10572_s12 = sld [smem:[#allocation117_spill]]  ;;  %s10573_s7 = sld [smem:[#allocation119_spill]] }
 0x107   : > { %s10447_s1 = sand.u32 1, %s10563_s5   ;;  %p836_p6 = scmp.lt.s32.totalorder %s10564_s16, 1 }
 0x108   : > { %s5444_s4 = sshll.u32 %s10447_s1, 7  ;;  %p841_p4 = scmp.lt.s32.totalorder %s10565_s25, 1 }
 0x109   : > { %s10775_s16 = smov (!%p836_p6, %s10564_s16), 1  ;;  %s10569_s1 = sld [smem:[#allocation114_spill]] }
 0x10a   : > { %s7724_s23 = scalar_select %p841_p4, %s10565_s25, 1 }
 0x10b   : > { %s5562_s0 = sshll.u32 %s10775_s16, 7  ;;  %p5448_p12 = scmp.ne.s32.totalorder %s10565_s25, 0 }
 0x10c   : > { %s7729_s9 = scalar_lea.vmem %s10566_s2, %s5562_s0  ;;  %s6159_s6 = smul.u32 3, %s7724_s23  ;;  %v7264_v7 = vmov (!%p5448_p12), 0.0  }
 0x10d   : > { %s856_s18 = scalar_lea.vmem %s10570_s13, %s7724_s23  ;;  %s5447_s11 = sshll.u32 %s7724_s23, 1  ;;  %v869_v0 = vld [vmem:[%s7729_s9] sm:$0xff] (!%p5448_p12)  ;;  %v870_v2 = vld [vmem:[%s7729_s9 + $0x8] sm:$0xff] (!%p5448_p12)  ;;  %v871_v5 = vld [vmem:[%s7729_s9 + $0x10] sm:$0xff] (!%p5448_p12)  ;;  %933 = vst [vmem:[#allocation3] sm:$0xff] (!%p5448_p12), %v7264_v7 }
 0x10e   : > { %s7751_s2 = scalar_lea.vmem %s10571_s3, %s6159_s6  ;;  %s7757_s24 = scalar_lea.vmem %s10572_s12, %s5447_s11  ;;  %934 = vst [vmem:[#allocation3 + $0x8] sm:$0xff] (!%p5448_p12), %v7264_v7  ;;  %935 = vst [vmem:[#allocation3 + $0x10] sm:$0xff] (!%p5448_p12), %v7264_v7  ;;  %v872_v10 = vld [vmem:[%s7729_s9 + $0x18] sm:$0xff] (!%p5448_p12)  ;;  %v873_v12 = vld [vmem:[%s7729_s9 + $0x20] sm:$0xff] (!%p5448_p12) }
 0x10f   : > { %s853_s17 = scalar_lea.vmem %s10569_s1, %s7724_s23  ;;  %s863_s19 = scalar_lea.vmem %s10573_s7, %s7724_s23  ;;  %936 = vst [vmem:[#allocation3 + $0x18] sm:$0xff] (!%p5448_p12), %v7264_v7  ;;  %937 = vst [vmem:[#allocation3 + $0x20] sm:$0xff] (!%p5448_p12), %v7264_v7  ;;  %v874_v15 = vld [vmem:[%s7729_s9 + $0x28] sm:$0xff] (!%p5448_p12)  ;;  %v875_v19 = vld [vmem:[%s7729_s9 + $0x30] sm:$0xff] (!%p5448_p12) }
 0x110   : > { %s7763_s1 = scalar_lea.vmem [#allocation15], %s5444_s4  ;;  %868 = sbr.rel (%p5448_p12) target bundleno = 290 (0x122), region = 116  ;;  %938 = vst [vmem:[#allocation3 + $0x28] sm:$0xff] (!%p5448_p12), %v7264_v7  ;;  %939 = vst [vmem:[#allocation3 + $0x30] sm:$0xff] (!%p5448_p12), %v7264_v7  ;;  %v876_v21 = vld [vmem:[%s7729_s9 + $0x38] sm:$0xff] (!%p5448_p12)  ;;  %v877_v24 = vld [vmem:[%s7729_s9 + $0x40] sm:$0xff] (!%p5448_p12) }
 0x111   : > { %s10574_s6 = sld [smem:[#allocation106_spill]] (!%p5448_p12)  ;;  %940 = vst [vmem:[#allocation3 + $0x38] sm:$0xff] (!%p5448_p12), %v7264_v7  ;;  %941 = vst [vmem:[#allocation3 + $0x40] sm:$0xff] (!%p5448_p12), %v7264_v7  ;;  %v878_v28 = vld [vmem:[%s7729_s9 + $0x48] sm:$0xff] (!%p5448_p12)  ;;  %v879_v30 = vld [vmem:[%s7729_s9 + $0x50] sm:$0xff] (!%p5448_p12) }
 0x112   : > { %942 = vst [vmem:[#allocation3 + $0x48] sm:$0xff] (!%p5448_p12), %v7264_v7  ;;  %943 = vst [vmem:[#allocation3 + $0x50] sm:$0xff] (!%p5448_p12), %v7264_v7  ;;  %v880_v33 = vld [vmem:[%s7729_s9 + $0x58] sm:$0xff] (!%p5448_p12)  ;;  %v881_v37 = vld [vmem:[%s7729_s9 + $0x60] sm:$0xff] (!%p5448_p12) }
 0x113   : > { %944 = vst [vmem:[#allocation3 + $0x58] sm:$0xff] (!%p5448_p12), %v7264_v7  ;;  %945 = vst [vmem:[#allocation3 + $0x60] sm:$0xff] (!%p5448_p12), %v7264_v7  ;;  %v882_v39 = vld [vmem:[%s7729_s9 + $0x68] sm:$0xff] (!%p5448_p12)  ;;  %v883_v42 = vld [vmem:[%s7729_s9 + $0x70] sm:$0xff] (!%p5448_p12) }
 0x114   : > { %946 = vst [vmem:[#allocation3 + $0x68] sm:$0xff] (!%p5448_p12), %v7264_v7  ;;  %947 = vst [vmem:[#allocation3 + $0x70] sm:$0xff] (!%p5448_p12), %v7264_v7  ;;  %v884_v46 = vld [vmem:[%s7729_s9 + $0x78] sm:$0xff] (!%p5448_p12) }
 0x115   : > { %948 = vst [vmem:[#allocation3 + $0x78] sm:$0xff] (!%p5448_p12), %v7264_v7 }
 0x117   : > { %v885_v1 = vld [vmem:[%s10574_s6] sm:$0xff]  ;;  %v886_v4 = vld [vmem:[%s10574_s6 + $0x8] sm:$0xff]  ;;  %v887_v6 = vld [vmem:[%s10574_s6 + $0x10] sm:$0xff] }
 0x118   : > { %v901_v3 = vadd.f32 %v885_v1, %v869_v0  ;;  %v902_v8 = vadd.f32 %v886_v4, %v870_v2  ;;  %v903_v9 = vadd.f32 %v887_v6, %v871_v5  ;;  %v888_v11 = vld [vmem:[%s10574_s6 + $0x18] sm:$0xff]  ;;  %v889_v14 = vld [vmem:[%s10574_s6 + $0x20] sm:$0xff]  ;;  %v890_v16 = vld [vmem:[%s10574_s6 + $0x28] sm:$0xff] }
 0x119   : > { %v904_v13 = vadd.f32 %v888_v11, %v872_v10  ;;  %v905_v17 = vadd.f32 %v889_v14, %v873_v12  ;;  %v906_v18 = vadd.f32 %v890_v16, %v874_v15  ;;  %v891_v20 = vld [vmem:[%s10574_s6 + $0x30] sm:$0xff]  ;;  %v892_v23 = vld [vmem:[%s10574_s6 + $0x38] sm:$0xff]  ;;  %v893_v25 = vld [vmem:[%s10574_s6 + $0x40] sm:$0xff] }
 0x11a   : > { %917 = vst [vmem:[#allocation2] sm:$0xff] %v901_v3  ;;  %918 = vst [vmem:[#allocation2 + $0x8] sm:$0xff] %v902_v8  ;;  %v907_v22 = vadd.f32 %v891_v20, %v875_v19  ;;  %v908_v26 = vadd.f32 %v892_v23, %v876_v21  ;;  %v909_v27 = vadd.f32 %v893_v25, %v877_v24  ;;  %v894_v29 = vld [vmem:[%s10574_s6 + $0x48] sm:$0xff]  ;;  %v895_v32 = vld [vmem:[%s10574_s6 + $0x50] sm:$0xff] }
 0x11b   : > { %919 = vst [vmem:[#allocation2 + $0x10] sm:$0xff] %v903_v9  ;;  %920 = vst [vmem:[#allocation2 + $0x18] sm:$0xff] %v904_v13  ;;  %v910_v31 = vadd.f32 %v894_v29, %v878_v28  ;;  %v896_v34 = vld [vmem:[%s10574_s6 + $0x58] sm:$0xff]  ;;  %v911_v35 = vadd.f32 %v895_v32, %v879_v30  ;;  %v897_v38 = vld [vmem:[%s10574_s6 + $0x60] sm:$0xff] }
 0x11c   : > { %921 = vst [vmem:[#allocation2 + $0x20] sm:$0xff] %v905_v17  ;;  %922 = vst [vmem:[#allocation2 + $0x28] sm:$0xff] %v906_v18  ;;  %v912_v36 = vadd.f32 %v896_v34, %v880_v33  ;;  %v913_v40 = vadd.f32 %v897_v38, %v881_v37  ;;  %v898_v41 = vld [vmem:[%s10574_s6 + $0x68] sm:$0xff]  ;;  %v899_v43 = vld [vmem:[%s10574_s6 + $0x70] sm:$0xff] }
 0x11d   : > { %923 = vst [vmem:[#allocation2 + $0x30] sm:$0xff] %v907_v22  ;;  %924 = vst [vmem:[#allocation2 + $0x38] sm:$0xff] %v908_v26  ;;  %v914_v44 = vadd.f32 %v898_v41, %v882_v39  ;;  %v915_v45 = vadd.f32 %v899_v43, %v883_v42  ;;  %v900_v47 = vld [vmem:[%s10574_s6 + $0x78] sm:$0xff] }
 0x11e   : > { %925 = vst [vmem:[#allocation2 + $0x40] sm:$0xff] %v909_v27  ;;  %926 = vst [vmem:[#allocation2 + $0x48] sm:$0xff] %v910_v31  ;;  %v916_v48 = vadd.f32 %v900_v47, %v884_v46 }
 0x11f   : > { %927 = vst [vmem:[#allocation2 + $0x50] sm:$0xff] %v911_v35  ;;  %928 = vst [vmem:[#allocation2 + $0x58] sm:$0xff] %v912_v36 }
 0x120   : > { %929 = vst [vmem:[#allocation2 + $0x60] sm:$0xff] %v913_v40  ;;  %930 = vst [vmem:[#allocation2 + $0x68] sm:$0xff] %v914_v44 }
 0x121   : > { %931 = vst [vmem:[#allocation2 + $0x70] sm:$0xff] %v915_v45  ;;  %932 = vst [vmem:[#allocation2 + $0x78] sm:$0xff] %v916_v48 }
 0x122 PF: > { %v949_v49 = vld [vmem:[#allocation2] sm:$0xff]  ;;  %v951_v51 = vld [vmem:[#allocation2 + $0x10] sm:$0xff]  ;;  %v950_v54 = vld [vmem:[#allocation2 + $0x8] sm:$0xff]  ;;  %s10591_s8 = sld [smem:[#allocation108_spill]]  ;;  %s10593_s4 = sld [smem:[#allocation109_spill]]  ;;  %vm1671_vm0 = vcmask 261120  }
 0x123   : > { %v965_v50 = vld [vmem:[#allocation3] sm:$0xff]  ;;  %v967_v53 = vld [vmem:[#allocation3 + $0x10] sm:$0xff]  ;;  %v966_v55 = vld [vmem:[#allocation3 + $0x8] sm:$0xff]  ;;  %s10604_s22 = sld [smem:[#allocation107_spill]]  ;;  %vm3648_vm1 = vcmask 523264   ;;  %vm3665_vm2 = vcmask 785408  }
 0x124   : > { %v7830_v52 = vadd.f32 %v965_v50, %v949_v49  ;;  %v7832_v56 = vadd.f32 %v967_v53, %v951_v51  ;;  %v952_v57 = vld [vmem:[#allocation2 + $0x18] sm:$0xff]  ;;  %v7835_v59 = vadd.f32 %v966_v55, %v950_v54  ;;  %v953_v61 = vld [vmem:[#allocation2 + $0x20] sm:$0xff]  ;;  %v954_v63 = vld [vmem:[#allocation2 + $0x28] sm:$0xff] }
 0x125   : > { %v968_v58 = vld [vmem:[#allocation3 + $0x18] sm:$0xff]  ;;  %v969_v62 = vld [vmem:[#allocation3 + $0x20] sm:$0xff]  ;;  %v970_v0 = vld [vmem:[#allocation3 + $0x28] sm:$0xff] }
 0x126   : > { %10575 = vst [vmem:[#allocation36_spill] sm:$0xff] %v7830_v52  ;;  %10576 = vst [vmem:[#allocation37_spill] sm:$0xff] %v7832_v56  ;;  %999 = vadd.xlane.f32.xlu0 %v7830_v52  ;;  %1003 = vadd.xlane.f32.xlu1 %v7832_v56  ;;  %v7838_v60 = vadd.f32 %v968_v58, %v952_v57  ;;  %v7841_v1 = vadd.f32 %v969_v62, %v953_v61  ;;  %v955_v3 = vld [vmem:[#allocation2 + $0x30] sm:$0xff]  ;;  %v956_v5 = vld [vmem:[#allocation2 + $0x38] sm:$0xff] }
 0x127   : > { %10577 = vst [vmem:[#allocation38_spill] sm:$0xff] %v7835_v59  ;;  %v7844_v2 = vadd.f32 %v970_v0, %v954_v63  ;;  %v971_v4 = vld [vmem:[#allocation3 + $0x30] sm:$0xff]  ;;  %v972_v6 = vld [vmem:[#allocation3 + $0x38] sm:$0xff]  ;;  %v957_v7 = vld [vmem:[#allocation2 + $0x40] sm:$0xff] }
 0x128   : > { %10578 = vst [vmem:[#allocation39_spill] sm:$0xff] %v7838_v60  ;;  %10579 = vst [vmem:[#allocation40_spill] sm:$0xff] %v7841_v1  ;;  %v973_v8 = vld [vmem:[#allocation3 + $0x40] sm:$0xff]  ;;  %v7847_v9 = vadd.f32 %v971_v4, %v955_v3  ;;  %v958_v10 = vld [vmem:[#allocation2 + $0x48] sm:$0xff]  ;;  %v7850_v12 = vadd.f32 %v972_v6, %v956_v5  ;;  %s10592_s13 = scalar_lea.vmem %s10591_s8, %s7724_s23  ;;  %s10594_s7 = scalar_lea.vmem %s10593_s4, %s7724_s23 }
 0x129   : > { %10580 = vst [vmem:[#allocation41_spill] sm:$0xff] %v7844_v2  ;;  %v974_v11 = vld [vmem:[#allocation3 + $0x48] sm:$0xff]  ;;  %v959_v13 = vld [vmem:[#allocation2 + $0x50] sm:$0xff]  ;;  %v7853_v15 = vadd.f32 %v973_v8, %v957_v7  ;;  %v960_v16 = vld [vmem:[#allocation2 + $0x58] sm:$0xff]  ;;  %s7267_s4 = smov 64   ;;  %s10745_s23 = sld [smem:[#allocation25_spill]] }
 0x12a   : > { %1001 = vadd.xlane.f32.xlu0 %v7835_v59  ;;  %1005 = vadd.xlane.f32.xlu1 %v7838_v60  ;;  %10581 = vst [vmem:[#allocation42_spill] sm:$0xff] %v7847_v9  ;;  %10582 = vst [vmem:[#allocation43_spill] sm:$0xff] %v7850_v12  ;;  %v975_v14 = vld [vmem:[#allocation3 + $0x50] sm:$0xff]  ;;  %v976_v17 = vld [vmem:[#allocation3 + $0x58] sm:$0xff]  ;;  %v7856_v18 = vadd.f32 %v974_v11, %v958_v10 }
 0x12b   : > { %10583 = vst [vmem:[#allocation44_spill] sm:$0xff] %v7853_v15  ;;  %v961_v19 = vld [vmem:[#allocation2 + $0x60] sm:$0xff]  ;;  %v7859_v21 = vadd.f32 %v975_v14, %v959_v13  ;;  %v962_v22 = vld [vmem:[#allocation2 + $0x68] sm:$0xff]  ;;  %v7862_v24 = vadd.f32 %v976_v17, %v960_v16  ;;  %v963_v25 = vld [vmem:[#allocation2 + $0x70] sm:$0xff] }
 0x12c   : > { %10584 = vst [vmem:[#allocation45_spill] sm:$0xff] %v7856_v18  ;;  %v977_v20 = vld [vmem:[#allocation3 + $0x60] sm:$0xff]  ;;  %v978_v23 = vld [vmem:[#allocation3 + $0x68] sm:$0xff]  ;;  %v979_v26 = vld [vmem:[#allocation3 + $0x70] sm:$0xff] }
 0x12d   : > { %10585 = vst [vmem:[#allocation46_spill] sm:$0xff] %v7859_v21  ;;  %10586 = vst [vmem:[#allocation47_spill] sm:$0xff] %v7862_v24  ;;  %v7865_v27 = vadd.f32 %v977_v20, %v961_v19  ;;  %v964_v28 = vld [vmem:[#allocation2 + $0x78] sm:$0xff]  ;;  %v7868_v30 = vadd.f32 %v978_v23, %v962_v22  ;;  %v7871_v31 = vadd.f32 %v979_v26, %v963_v25  ;;  %v6426_v33 = vld [vmem:[%s7689_s14 + $0x4] ss:$12 sps:$4 sm:$0xff]  }
 0x12e   : > { %1007 = vadd.xlane.f32.xlu0 %v7841_v1  ;;  %1009 = vadd.xlane.f32.xlu1 %v7844_v2  ;;  %v980_v29 = vld [vmem:[#allocation3 + $0x78] sm:$0xff]  ;;  %v6428_v34 = vld [vmem:[%s7689_s14] ss:$12 sps:$4 sm:$0xff]   ;;  %v6431_v36 = vld [vmem:[%s7689_s14 + $0x8] ss:$12 sps:$4 sm:$0xff]  }
 0x12f   : > { %10587 = vst [vmem:[#allocation48_spill] sm:$0xff] %v7865_v27  ;;  %10588 = vst [vmem:[#allocation49_spill] sm:$0xff] %v7868_v30  ;;  %v7874_v32 = vadd.f32 %v980_v29, %v964_v28  ;;  %v6429_v35 = vld [vmem:[%s7689_s14 + $0x1c] ss:$12 sps:$4 sm:$0xff]   ;;  %1405 = vmatprep.subr.bf16.mxu0 %v6426_v33  ;;  %5788 = vmatprep.subr.bf16.mxu1 %v6431_v36  ;;  %v6432_v20 = vld [vmem:[%s7689_s14 + $0x18] ss:$12 sps:$4 sm:$0xff]  }
 0x130   : > { %10589 = vst [vmem:[#allocation50_spill] sm:$0xff] %v7871_v31  ;;  %1406 = vmatpush1.bf16.msra.mxu0 %v6428_v34  ;;  %5789 = vmatpush3.bf16.msra.mxu1 %v6431_v36  ;;  %v6433_v33 = vld [vmem:[%s7689_s14 + $0x34] ss:$12 sps:$4 sm:$0xff]   ;;  %p5551_p13 = scmp.ne.s32.totalorder %s10745_s23, 1 }
 0x131   : > { %10590 = vst [vmem:[#allocation51_spill] sm:$0xff] %v7874_v32  ;;  %1407 = vmatprep.subr.bf16.mxu0 %v6429_v35  ;;  %v6435_v34 = vld [vmem:[%s7689_s14 + $0x20] ss:$12 sps:$4 sm:$0xff]   ;;  %s10746_s3 = sld [smem:[#allocation120_spill]] (!%p5551_p13) }
 0x132   : > { %1011 = vadd.xlane.f32.xlu0 %v7847_v9  ;;  %1013 = vadd.xlane.f32.xlu1 %v7850_v12 }
 0x133   : > { %5790 = vmatprep.subr.bf16.mxu1 %v6435_v34 }
 0x134   : > { %1408 = vmatpush1.bf16.msra.mxu0 %v6432_v20  ;;  %5791 = vmatpush3.bf16.msra.mxu1 %v6435_v34  ;;  %v6448_v20 = vld [vmem:[%s7689_s14 + $0x78] ss:$12 sps:$4 sm:$0xff]   ;;  %v6457_v34 = vld [vmem:[%s7689_s14 + $0xb0] ss:$12 sps:$4 sm:$0xff]  }
 0x135   : > { %1409 = vmatprep.subr.bf16.mxu0 %v6433_v33  ;;  %v6456_v33 = vld [vmem:[%s7689_s14 + $0xa8] ss:$12 sps:$4 sm:$0xff]  }
 0x136   : > { %1015 = vadd.xlane.f32.xlu0 %v7853_v15  ;;  %1017 = vadd.xlane.f32.xlu1 %v7856_v18 }
 0x13a   : > { %1019 = vadd.xlane.f32.xlu0 %v7859_v21  ;;  %1021 = vadd.xlane.f32.xlu1 %v7862_v24 }
 0x13e   : > { %1023 = vadd.xlane.f32.xlu0 %v7865_v27  ;;  %1025 = vadd.xlane.f32.xlu1 %v7868_v30 }
 0x142   : > { %1027 = vadd.xlane.f32.xlu0 %v7871_v31  ;;  %1029 = vadd.xlane.f32.xlu1 %v7874_v32 }
 0x1b3   : > { %v1000_v37 = vpop.xlane.xlu0 %999  ;;  %v1004_v39 = vpop.xlane.xlu1 %1003 }
 0x1b4   : > { %v1032_v38 = vmul.f32 0.0078125, %v1000_v37  ;;  %v1034_v40 = vmul.f32 0.0078125, %v1004_v39  ;;  %v6436_v39 = vld [vmem:[%s7689_s14 + $0x30] ss:$12 sps:$4 sm:$0xff]  }
 0x1b5   : > { %1410 = vmatpush1.bf16.msra.mxu0 %v6436_v39 }
 0x1b6   : > { %v7883_v41 = vsub.f32 %v7830_v52, %v1032_v38  ;;  %v7886_v43 = vsub.f32 %v7832_v56, %v1034_v40 }
 0x1b7   : > { %v1002_v42 = vpop.xlane.xlu0 %1001  ;;  %v1006_v46 = vpop.xlane.xlu1 %1005 }
 0x1b8   : > { %v1033_v44 = vmul.f32 0.0078125, %v1002_v42  ;;  %v1064_v45 = vmul.f32 %v7883_v41, %v7883_v41  ;;  %v1035_v47 = vmul.f32 0.0078125, %v1006_v46  ;;  %v1066_v48 = vmul.f32 %v7886_v43, %v7886_v43 }
 0x1ba   : > { %1080 = vadd.xlane.f32.xlu0 %v1064_v45  ;;  %v7893_v49 = vsub.f32 %v7835_v59, %v1033_v44  ;;  %v7896_v51 = vsub.f32 %v7838_v60, %v1035_v47 }
 0x1bb   : > { %v1008_v50 = vpop.xlane.xlu0 %1007  ;;  %v1010_v55 = vpop.xlane.xlu1 %1009 }
 0x1bc   : > { %v1036_v53 = vmul.f32 0.0078125, %v1008_v50  ;;  %v1065_v54 = vmul.f32 %v7893_v49, %v7893_v49  ;;  %v1037_v57 = vmul.f32 0.0078125, %v1010_v55  ;;  %v1067_v58 = vmul.f32 %v7896_v51, %v7896_v51  ;;  %v6439_v50 = vld [vmem:[%s7689_s14 + $0x38] ss:$12 sps:$4 sm:$0xff]   ;;  %v6440_v55 = vld [vmem:[%s7689_s14 + $0x48] ss:$12 sps:$4 sm:$0xff]  }
 0x1bd   : > { %5792 = vmatprep.subr.bf16.mxu1 %v6439_v50 }
 0x1be   : > { %1084 = vadd.xlane.f32.xlu0 %v1066_v48  ;;  %1082 = vadd.xlane.f32.xlu1 %v1065_v54  ;;  %v7903_v61 = vsub.f32 %v7841_v1, %v1036_v53  ;;  %v7906_v63 = vsub.f32 %v7844_v2, %v1037_v57  ;;  %v6437_v48 = vld [vmem:[%s7689_s14 + $0x4c] ss:$12 sps:$4 sm:$0xff]  }
 0x1bf   : > { %v1012_v62 = vpop.xlane.xlu0 %1011  ;;  %v1014_v4 = vpop.xlane.xlu1 %1013  ;;  %1411 = vmatprep.subr.bf16.mxu0 %v6437_v48  ;;  %5793 = vmatpush3.bf16.msra.mxu1 %v6439_v50  ;;  %v8379_v1 = vld [vmem:[%s10604_s22 + $0x68] sm:$0xff] }
 0x1c0   : > { %v1038_v0 = vmul.f32 0.0078125, %v1012_v62  ;;  %v1068_v3 = vmul.f32 %v7903_v61, %v7903_v61  ;;  %v1039_v5 = vmul.f32 0.0078125, %v1014_v4  ;;  %v1069_v6 = vmul.f32 %v7906_v63, %v7906_v63  ;;  %1412 = vmatpush1.bf16.msra.mxu0 %v6440_v55 }
 0x1c2   : > { %1086 = vadd.xlane.f32.xlu1 %v1067_v58  ;;  %1088 = vadd.xlane.f32.xlu0 %v1068_v3  ;;  %v7913_v7 = vsub.f32 %v7847_v9, %v1038_v0  ;;  %v7916_v10 = vsub.f32 %v7850_v12, %v1039_v5  ;;  %v6441_v5 = vld [vmem:[%s7689_s14 + $0x64] ss:$12 sps:$4 sm:$0xff]   ;;  %v8370_v12 = vld [vmem:[%s10604_s22 + $0x78] sm:$0xff] }
 0x1c3   : > { %v1016_v8 = vpop.xlane.xlu0 %1015  ;;  %v1018_v14 = vpop.xlane.xlu1 %1017  ;;  %1413 = vmatprep.subr.bf16.mxu0 %v6441_v5 }
 0x1c4   : > { %v1040_v11 = vmul.f32 0.0078125, %v1016_v8  ;;  %v1070_v13 = vmul.f32 %v7913_v7, %v7913_v7  ;;  %v1041_v16 = vmul.f32 0.0078125, %v1018_v14  ;;  %v1071_v17 = vmul.f32 %v7916_v10, %v7916_v10 }
 0x1c6   : > { %1090 = vadd.xlane.f32.xlu1 %v1069_v6  ;;  %1092 = vadd.xlane.f32.xlu0 %v1070_v13  ;;  %v7923_v19 = vsub.f32 %v7853_v15, %v1040_v11  ;;  %v7927_v23 = vsub.f32 %v7856_v18, %v1041_v16  ;;  %v6443_v6 = vld [vmem:[%s7689_s14 + $0x50] ss:$12 sps:$4 sm:$0xff]   ;;  %v6444_v11 = vld [vmem:[%s7689_s14 + $0x60] ss:$12 sps:$4 sm:$0xff]  }
 0x1c7   : > { %v1020_v22 = vpop.xlane.xlu0 %1019  ;;  %v1022_v28 = vpop.xlane.xlu1 %1021  ;;  %5794 = vmatprep.subr.bf16.mxu1 %v6443_v6  ;;  %1414 = vmatpush1.bf16.msra.mxu0 %v6444_v11  ;;  %v6445_v16 = vld [vmem:[%s7689_s14 + $0x7c] ss:$12 sps:$4 sm:$0xff]   ;;  %v8339_v15 = vld [vmem:[%s10604_s22 + $0x50] sm:$0xff] }
 0x1c8   : > { %v1042_v25 = vmul.f32 0.0078125, %v1020_v22  ;;  %v1072_v26 = vmul.f32 %v7923_v19, %v7923_v19  ;;  %v1043_v29 = vmul.f32 0.0078125, %v1022_v28  ;;  %v1073_v35 = vmul.f32 %v7927_v23, %v7927_v23  ;;  %5795 = vmatpush3.bf16.msra.mxu1 %v6443_v6  ;;  %1415 = vmatprep.subr.bf16.mxu0 %v6445_v16  ;;  %v6449_v22 = vld [vmem:[%s7689_s14 + $0x94] ss:$12 sps:$4 sm:$0xff]   ;;  %v6453_v28 = vld [vmem:[%s7689_s14 + $0xac] ss:$12 sps:$4 sm:$0xff]  }
 0x1c9   : > { %v8321_v18 = vld [vmem:[%s10604_s22 + $0x28] sm:$0xff] }
 0x1ca   : > { %1094 = vadd.xlane.f32.xlu1 %v1071_v17  ;;  %1096 = vadd.xlane.f32.xlu0 %v1072_v26  ;;  %v7936_v36 = vsub.f32 %v7859_v21, %v1042_v25  ;;  %v7939_v38 = vsub.f32 %v7862_v24, %v1043_v29  ;;  %v6447_v17 = vld [vmem:[%s7689_s14 + $0x68] ss:$12 sps:$4 sm:$0xff]   ;;  %v6451_v25 = vld [vmem:[%s7689_s14 + $0x80] ss:$12 sps:$4 sm:$0xff]   ;;  %v6452_v26 = vld [vmem:[%s7689_s14 + $0x90] ss:$12 sps:$4 sm:$0xff]  }
 0x1cb   : > { %v1024_v37 = vpop.xlane.xlu0 %1023  ;;  %v1026_v44 = vpop.xlane.xlu1 %1025  ;;  %5796 = vmatprep.subr.bf16.mxu1 %v6447_v17  ;;  %1416 = vmatpush1.bf16.msra.mxu0 %v6448_v20  ;;  %v6455_v29 = vld [vmem:[%s7689_s14 + $0x98] ss:$12 sps:$4 sm:$0xff]   ;;  %v8330_v24 = vld [vmem:[%s10604_s22 + $0x70] sm:$0xff] }
 0x1cc   : > { %v1044_v40 = vmul.f32 0.0078125, %v1024_v37  ;;  %v1074_v42 = vmul.f32 %v7936_v36, %v7936_v36  ;;  %v1045_v45 = vmul.f32 0.0078125, %v1026_v44  ;;  %v1075_v46 = vmul.f32 %v7939_v38, %v7939_v38  ;;  %5797 = vmatpush3.bf16.msra.mxu1 %v6447_v17  ;;  %1417 = vmatprep.subr.bf16.mxu0 %v6449_v22 }
 0x1cd   : > { %5798 = vmatprep.subr.bf16.mxu1 %v6451_v25 }
 0x1ce   : > { %1098 = vadd.xlane.f32.xlu1 %v1073_v35  ;;  %1100 = vadd.xlane.f32.xlu0 %v1074_v42  ;;  %v7947_v47 = vsub.f32 %v7865_v27, %v1044_v40  ;;  %v7952_v54 = vsub.f32 %v7868_v30, %v1045_v45  ;;  %v10451_v35 = vmov 0   ;;  %v8294_v30 = vld [vmem:[%s10604_s22 + $0x40] sm:$0xff]  ;;  %v8303_v27 = vld [vmem:[%s10604_s22 + $0x38] sm:$0xff] }
 0x1cf   : > { %v1028_v53 = vpop.xlane.xlu0 %1027  ;;  %v1030_v62 = vpop.xlane.xlu1 %1029  ;;  %1418 = vmatpush1.bf16.msra.mxu0 %v6452_v26  ;;  %1437 = vmatprep.mubr.bf16.mxu0 %v10451_v35 }
 0x1d0   : > { %v1046_v57 = vmul.f32 0.0078125, %v1028_v53  ;;  %v1076_v58 = vmul.f32 %v7947_v47, %v7947_v47  ;;  %v1047_v0 = vmul.f32 0.0078125, %v1030_v62  ;;  %v1077_v3 = vmul.f32 %v7952_v54, %v7952_v54  ;;  %5799 = vmatpush3.bf16.msra.mxu1 %v6451_v25  ;;  %1419 = vmatprep.subr.bf16.mxu0 %v6453_v28  ;;  %v7989_v28 = vld [vmem:[%s10592_s13] ss:$0 sm:$0xff] }
 0x1d1   : > { %5800 = vmatprep.subr.bf16.mxu1 %v6455_v29 }
 0x1d2   : > { %1102 = vadd.xlane.f32.xlu1 %v1075_v46  ;;  %1104 = vadd.xlane.f32.xlu0 %v1076_v58  ;;  %v7960_v4 = vsub.f32 %v7871_v31, %v1046_v57  ;;  %v7965_v8 = vsub.f32 %v7874_v32, %v1047_v0 }
 0x1d3   : > { %1420 = vmatpush1.bf16.msra.mxu0 %v6456_v33 }
 0x1d4   : > { %v1078_v13 = vmul.f32 %v7960_v4, %v7960_v4  ;;  %v1079_v14 = vmul.f32 %v7965_v8, %v7965_v8  ;;  %5801 = vmatpush3.bf16.msra.mxu1 %v6455_v29 }
 0x1d5   : > { %5802 = vmatprep.subr.bf16.mxu1 %v6457_v34 }
 0x1d6   : > { %1106 = vadd.xlane.f32.xlu1 %v1077_v3  ;;  %1108 = vadd.xlane.f32.xlu0 %v1078_v13 }
 0x1d8   : > { %5803 = vmatpush3.bf16.msra.mxu1 %v6457_v34 }
 0x1da   : > { %1110 = vadd.xlane.f32.xlu1 %v1079_v14 }
 0x247   : > { %v1081_v37 = vpop.xlane.xlu0 %1080 }
 0x248   : > { %v1112_v39 = vmul.f32 0.0078125, %v1081_v37 }
 0x24a   : > { %v1128_v40 = vadd.f32 1e-05, %v1112_v39 }
 0x24b   : > { %v1083_v42 = vpop.xlane.xlu1 %1082  ;;  %v1085_v44 = vpop.xlane.xlu0 %1084 }
 0x24c   : > { %6506 = vrsqrt.f32 %v1128_v40  ;;  %v1113_v45 = vmul.f32 0.0078125, %v1083_v42  ;;  %v1114_v46 = vmul.f32 0.0078125, %v1085_v44 }
 0x24e   : > { %v1129_v48 = vadd.f32 1e-05, %v1113_v45  ;;  %v1130_v50 = vadd.f32 1e-05, %v1114_v46  ;;  %v7998_v46 = vld [vmem:[%s10594_s7] ss:$0 sm:$0xff] }
 0x24f   : > { %v1087_v53 = vpop.xlane.xlu1 %1086  ;;  %v1089_v55 = vpop.xlane.xlu0 %1088  ;;  %s7268_s7 = smov 32  }
 0x250   : > { %6508 = vrsqrt.f32 %v1129_v48  ;;  %v1115_v57 = vmul.f32 0.0078125, %v1087_v53  ;;  %v1116_v58 = vmul.f32 0.0078125, %v1089_v55 }
 0x251   : > { %6510 = vrsqrt.f32 %v1130_v50 }
 0x252   : > { %v1131_v62 = vadd.f32 1e-05, %v1115_v57  ;;  %v1132_v0 = vadd.f32 1e-05, %v1116_v58 }
 0x253   : > { %v1091_v3 = vpop.xlane.xlu1 %1090  ;;  %v1093_v5 = vpop.xlane.xlu0 %1092 }
 0x254   : > { %6512 = vrsqrt.f32 %v1131_v62  ;;  %v1117_v6 = vmul.f32 0.0078125, %v1091_v3  ;;  %v1118_v11 = vmul.f32 0.0078125, %v1093_v5 }
 0x255   : > { %6514 = vrsqrt.f32 %v1132_v0 }
 0x256   : > { %v6507_v13 = vpop.eup %6506  ;;  %v1133_v14 = vadd.f32 1e-05, %v1117_v6  ;;  %v1134_v16 = vadd.f32 1e-05, %v1118_v11 }
 0x257   : > { %v1095_v17 = vpop.xlane.xlu1 %1094  ;;  %v1097_v20 = vpop.xlane.xlu0 %1096  ;;  %v1160_v22 = vmul.f32 %v6507_v13, %v7883_v41 }
 0x258   : > { %6516 = vrsqrt.f32 %v1133_v14  ;;  %v1119_v25 = vmul.f32 0.0078125, %v1095_v17  ;;  %v1120_v26 = vmul.f32 0.0078125, %v1097_v20 }
 0x259   : > { %6518 = vrsqrt.f32 %v1134_v16  ;;  %v1182_v41 = vmul.f32 %v7989_v28, %v1160_v22 }
 0x25a   : > { %v6509_v29 = vpop.eup %6508  ;;  %v1135_v33 = vadd.f32 1e-05, %v1119_v25  ;;  %v1136_v34 = vadd.f32 1e-05, %v1120_v26 }
 0x25b   : > { %v6511_v37 = vpop.eup %6510  ;;  %v1099_v39 = vpop.xlane.xlu1 %1098  ;;  %v1161_v42 = vmul.f32 %v6509_v29, %v7893_v49  ;;  %v1204_v3 = vadd.f32 %v7998_v46, %v1182_v41 }
 0x25c   : > { %v1101_v40 = vpop.xlane.xlu0 %1100  ;;  %6520 = vrsqrt.f32 %v1135_v33  ;;  %v1121_v44 = vmul.f32 0.0078125, %v1099_v39  ;;  %v1162_v48 = vmul.f32 %v6511_v37, %v7886_v43 }
 0x25d   : > { %v1122_v45 = vmul.f32 0.0078125, %v1101_v40  ;;  %6522 = vrsqrt.f32 %v1136_v34  ;;  %v1183_v50 = vmul.f32 %v7989_v28, %v1161_v42 }
 0x25e   : > { %v6513_v53 = vpop.eup %6512  ;;  %v1137_v55 = vadd.f32 1e-05, %v1121_v44  ;;  %v1184_v49 = vmul.f32 %v7989_v28, %v1162_v48 }
 0x25f   : > { %v1138_v57 = vadd.f32 1e-05, %v1122_v45  ;;  %v6515_v58 = vpop.eup %6514  ;;  %v1103_v62 = vpop.xlane.xlu1 %1102  ;;  %v1205_v5 = vadd.f32 %v7998_v46, %v1183_v50  ;;  %v1163_v6 = vmul.f32 %v6513_v53, %v7896_v51 }
 0x260   : > { %v1105_v0 = vpop.xlane.xlu0 %1104  ;;  %6524 = vrsqrt.f32 %v1137_v55  ;;  %v1123_v11 = vmul.f32 0.0078125, %v1103_v62  ;;  %v1164_v16 = vmul.f32 %v6515_v58, %v7903_v61  ;;  %v1206_v25 = vadd.f32 %v7998_v46, %v1184_v49 }
 0x261   : > { %v1124_v43 = vmul.f32 0.0078125, %v1105_v0  ;;  %6526 = vrsqrt.f32 %v1138_v57  ;;  %v1220_v13 = vpack.c.bf16 %v1205_v5, %v1204_v3  ;;  %v1185_v14 = vmul.f32 %v7989_v28, %v1163_v6 }
 0x262   : > { %v6517_v17 = vpop.eup %6516  ;;  %v1139_v20 = vadd.f32 1e-05, %v1123_v11  ;;  %v1186_v37 = vmul.f32 %v7989_v28, %v1164_v16 }
 0x263   : > { %v1140_v22 = vadd.f32 1e-05, %v1124_v43  ;;  %v6519_v26 = vpop.eup %6518  ;;  %v1107_v29 = vpop.xlane.xlu1 %1106  ;;  %1438 = vmatmul.mubr.bf16.vlgmr.msra.gmra.mrb[0].mxu0 %v1220_v13  ;;  %5804 = vmatprep.mubr.bf16.mxu1 %v1220_v13  ;;  %v1207_v51 = vadd.f32 %v7998_v46, %v1185_v14  ;;  %v1165_v34 = vmul.f32 %v6517_v17, %v7906_v63 }
 0x264   : > { %v1109_v33 = vpop.xlane.xlu0 %1108  ;;  %6528 = vrsqrt.f32 %v1139_v20  ;;  %v1125_v39 = vmul.f32 0.0078125, %v1107_v29  ;;  %1447 = vmatprep.mubr.bf16.mxu0 %v10451_v35  ;;  %v1166_v61 = vmul.f32 %v6519_v26, %v7913_v7  ;;  %v1208_v55 = vadd.f32 %v7998_v46, %v1186_v37 }
 0x265   : > { %v1126_v40 = vmul.f32 0.0078125, %v1109_v33  ;;  %6530 = vrsqrt.f32 %v1140_v22  ;;  %v1221_v42 = vpack.c.bf16 %v1207_v51, %v1206_v25  ;;  %v1187_v41 = vmul.f32 %v7989_v28, %v1165_v34 }
 0x266   : > { %v6521_v44 = vpop.eup %6520  ;;  %v1141_v45 = vadd.f32 1e-05, %v1125_v39  ;;  %v1188_v50 = vmul.f32 %v7989_v28, %v1166_v61 }
 0x267   : > { %v1142_v48 = vadd.f32 1e-05, %v1126_v40  ;;  %v6523_v53 = vpop.eup %6522  ;;  %v1111_v63 = vpop.xlane.xlu1 %1110  ;;  %5805 = vmatmul.mubr.bf16.vlgmr.msra.gmra.mrb[0].mxu1 %v1221_v42  ;;  %v1209_v57 = vadd.f32 %v7998_v46, %v1187_v41  ;;  %v1167_v49 = vmul.f32 %v6521_v44, %v7916_v10 }
 0x268   : > { %6532 = vrsqrt.f32 %v1141_v45  ;;  %v1127_v7 = vmul.f32 0.0078125, %v1111_v63  ;;  %v1168_v58 = vmul.f32 %v6523_v53, %v7923_v19  ;;  %v1210_v6 = vadd.f32 %v7998_v46, %v1188_v50 }
 0x269   : > { %6534 = vrsqrt.f32 %v1142_v48  ;;  %v1222_v62 = vpack.c.bf16 %v1209_v57, %v1208_v55  ;;  %v1189_v0 = vmul.f32 %v7989_v28, %v1167_v49 }
 0x26a   : > { %v6525_v3 = vpop.eup %6524  ;;  %v1143_v5 = vadd.f32 1e-05, %v1127_v7  ;;  %v1190_v10 = vmul.f32 %v7989_v28, %v1168_v58 }
 0x26b   : > { %v6527_v11 = vpop.eup %6526  ;;  %1448 = vmatmul.mubr.bf16.gmra.mrb[4].mxu0 %v1221_v42  ;;  %5808 = vmatprep.mubr.bf16.mxu1 %v1222_v62  ;;  %v1211_v43 = vadd.f32 %v7998_v46, %v1189_v0  ;;  %v1169_v13 = vmul.f32 %v6525_v3, %v7927_v23 }
 0x26c   : > { %6536 = vrsqrt.f32 %v1143_v5  ;;  %1457 = vmatprep.mubr.bf16.mxu0 %v10451_v35  ;;  %v1170_v19 = vmul.f32 %v6527_v11, %v7936_v36  ;;  %v1212_v25 = vadd.f32 %v7998_v46, %v1190_v10 }
 0x26d   : > { %v1223_v14 = vpack.c.bf16 %v1211_v43, %v1210_v6  ;;  %v1191_v16 = vmul.f32 %v7989_v28, %v1169_v13 }
 0x26e   : > { %v6529_v17 = vpop.eup %6528  ;;  %v1192_v20 = vmul.f32 %v7989_v28, %v1170_v19 }
 0x26f   : > { %v6531_v22 = vpop.eup %6530  ;;  %5809 = vmatmul.mubr.bf16.gmra.mrb[4].mxu1 %v1223_v14  ;;  %v1213_v26 = vadd.f32 %v7998_v46, %v1191_v16  ;;  %v1171_v23 = vmul.f32 %v6529_v17, %v7939_v38 }
 0x270   : > { %v1172_v29 = vmul.f32 %v6531_v22, %v7947_v47  ;;  %v1214_v34 = vadd.f32 %v7998_v46, %v1192_v20 }
 0x271   : > { %v1224_v33 = vpack.c.bf16 %v1213_v26, %v1212_v25  ;;  %v1193_v51 = vmul.f32 %v7989_v28, %v1171_v23 }
 0x272   : > { %v6533_v36 = vpop.eup %6532  ;;  %v1194_v61 = vmul.f32 %v7989_v28, %v1172_v29 }
 0x273   : > { %v6535_v37 = vpop.eup %6534  ;;  %1458 = vmatmul.mubr.bf16.gmra.mrb[8].mxu0 %v1222_v62  ;;  %5812 = vmatprep.mubr.bf16.mxu1 %v1224_v33  ;;  %v1215_v39 = vadd.f32 %v7998_v46, %v1193_v51  ;;  %v1173_v40 = vmul.f32 %v6533_v36, %v7952_v54 }
 0x274   : > { %1467 = vmatprep.mubr.bf16.mxu0 %v10451_v35  ;;  %v1174_v38 = vmul.f32 %v6535_v37, %v7960_v4  ;;  %v1216_v44 = vadd.f32 %v7998_v46, %v1194_v61 }
 0x275   : > { %v1225_v47 = vpack.c.bf16 %v1215_v39, %v1214_v34  ;;  %v1195_v42 = vmul.f32 %v7989_v28, %v1173_v40 }
 0x276   : > { %v6537_v41 = vpop.eup %6536  ;;  %v1196_v50 = vmul.f32 %v7989_v28, %v1174_v38 }
 0x277   : > { %5813 = vmatmul.mubr.bf16.gmra.mrb[8].mxu1 %v1225_v47  ;;  %v1217_v45 = vadd.f32 %v7998_v46, %v1195_v42  ;;  %v1175_v48 = vmul.f32 %v6537_v41, %v7965_v8  ;;  %v1262_v8 = vlaneseq }
 0x278   : > { %v1218_v4 = vadd.f32 %v7998_v46, %v1196_v50 }
 0x279   : > { %v1226_v54 = vpack.c.bf16 %v1217_v45, %v1216_v44  ;;  %v1197_v53 = vmul.f32 %v7989_v28, %v1175_v48  ;;  %v8052_v28 = vshrl.u32 %v1262_v8, 7 }
 0x27b   : > { %1468 = vmatmul.mubr.bf16.gmra.mrb[12].mxu0 %v1223_v14  ;;  %5816 = vmatprep.mubr.bf16.mxu1 %v1226_v54  ;;  %v1219_v63 = vadd.f32 %v7998_v46, %v1197_v53  ;;  %10595 = vst [vmem:[#allocation52_spill] sm:$0xff] %v8052_v28  ;;  %v10450_v57 = vsub.s32 0, %v8052_v28  ;;  %v1260_v46 = vld [vmem:[%s7751_s2] sm:$0x7]  ;;  %v10449_v49 = vsub.s32 1, %v8052_v28  ;;  %v1272_v58 = vsub.s32 2, %v8052_v28 }
 0x27c   : > { %1477 = vmatprep.mubr.bf16.mxu0 %v10451_v35  ;;  %s7266_s2 = smov 96  }
 0x27d   : > { %v1227_v55 = vpack.c.bf16 %v1219_v63, %v1218_v4  ;;  %v8059_v7 = vrot.slane %v1260_v46, %v10450_v57  ;;  %v8064_v0 = vrot.slane %v1260_v46, %v10449_v49  ;;  %v8068_v13 = vrot.slane %v1260_v46, %v1272_v58  ;;  %v8281_v57 = vld [vmem:[%s10604_s22 + $0x30] sm:$0xff] }
 0x27f   : > { %5817 = vmatmul.mubr.bf16.gmra.mrb[12].mxu1 %v1227_v55 }
 0x283   : > { %1478 = vmatmul.mubr.bf16.gmra.mrb[16].mxu0 %v1224_v33 }
 0x284   : > { %1487 = vmatprep.mubr.bf16.mxu0 %v10451_v35 }
 0x28b   : > { %1488 = vmatmul.mubr.bf16.gmra.mrb[20].mxu0 %v1225_v47 }
 0x28c   : > { %1497 = vmatprep.mubr.bf16.mxu0 %v10451_v35 }
 0x293   : > { %1498 = vmatmul.mubr.bf16.gmra.mrb[24].mxu0 %v1226_v54 }
 0x294   : > { %1507 = vmatprep.mubr.bf16.mxu0 %v10451_v35  ;;  %v8286_v35 = vld [vmem:[%s10604_s22 + $0x20] sm:$0xff] }
 0x29b   : > { %1508 = vmatmul.mubr.bf16.gmra.mrb[28].mxu0 %v1227_v55 }
 0x336   : > { %v1439_v62 = vpop.f32.mrb[0].mxu0 }
 0x337   : > { %v1440_v3 = vadd.f32 %v1439_v62, %v8059_v7  ;;  %v1441_v5 = vpop.f32.mrb[1].mxu0 }
 0x338   : > { %v1443_v6 = vpop.f32.mrb[2].mxu0  ;;  %v1442_v10 = vadd.f32 %v1441_v5, %v8064_v0 }
 0x339   : > { %v1444_v11 = vadd.f32 %v1443_v6, %v8059_v7  ;;  %v1445_v43 = vpop.f32.mrb[3].mxu0  ;;  %v1615_v16 = vmul.f32 0.17677669, %v1440_v3 }
 0x33a   : > { %v1446_v19 = vadd.f32 %v1445_v43, %v8064_v0  ;;  %v5806_v14 = vpop.f32.mrb[0].mxu1 }
 0x33b   : > { %v1616_v17 = vmul.f32 0.17677669, %v1444_v11  ;;  %v1552_v20 = vpop.f32.mrb[1].mxu1  ;;  %v1561_v23 = vadd.f32 %v5806_v14, %v8068_v13 }
 0x33c   : > { %v8072_v22 = vpack.c.bf16 %v1446_v19, %v1442_v10  ;;  %v5807_v25 = vpop.f32.mrb[2].mxu1  ;;  %v1553_v51 = vadd.f32 %v1552_v20, %v8068_v13 }
 0x33d   : > { %v8074_v26 = vpack.c.bf16 %v1616_v17, %v1615_v16  ;;  %v1564_v29 = vadd.f32 %v5807_v25, %v8068_v13  ;;  %v1555_v33 = vpop.f32.mrb[3].mxu1 }
 0x33e   : > { %10596 = vst [vmem:[#allocation53_spill] sm:$0xff] %v8072_v22  ;;  %v1556_v36 = vadd.f32 %v1555_v33, %v8068_v13  ;;  %2098 = vrot.lane.b32.xlu0 %v8072_v22, %s7266_s2  ;;  %v1449_v34 = vpop.f32.mrb[4].mxu0  ;;  %6124 = vmatprep.subr.msk.bf16.mxu0 %vm1671_vm0, %v8072_v22  ;;  %v1697_v37 = vsel %vm1671_vm0, %v8072_v22, 0 }
 0x33f   : > { %v8086_v39 = vpack.c.bf16 %v1564_v29, %v1561_v23  ;;  %v1450_v40 = vadd.f32 %v1449_v34, %v8059_v7  ;;  %v1451_v61 = vpop.f32.mrb[5].mxu0  ;;  %5821 = vmatpush3.bf16.xpose.msra.mxu0 %v1697_v37  ;;  %5836 = vmatprep.mubr.msk.bf16.mxu0 %vm1671_vm0, %v8074_v26 }
 0x340   : > { %v8091_v38 = vpack.c.bf16 %v1556_v36, %v1553_v51  ;;  %v1453_v47 = vpop.f32.mrb[6].mxu0  ;;  %v1452_v44 = vadd.f32 %v1451_v61, %v8064_v0 }
 0x341   : > { %v1454_v42 = vadd.f32 %v1453_v47, %v8059_v7  ;;  %v1455_v41 = vpop.f32.mrb[7].mxu0  ;;  %v1617_v50 = vmul.f32 0.17677669, %v1450_v40 }
 0x342   : > { %10597 = vst [vmem:[#allocation54_spill] sm:$0xff] %v8091_v38  ;;  %v1456_v45 = vadd.f32 %v1455_v41, %v8064_v0  ;;  %v5810_v48 = vpop.f32.mrb[4].mxu1  ;;  %5852 = vmatprep.subr.bf16.mxu1 %v8091_v38 }
 0x343   : > { %v1618_v54 = vmul.f32 0.17677669, %v1454_v42  ;;  %v1568_v53 = vpop.f32.mrb[5].mxu1  ;;  %5853 = vmatpush3.bf16.msra.mxu1 %v8091_v38  ;;  %v1577_v8 = vadd.f32 %v5810_v48, %v8068_v13 }
 0x344   : > { %v8098_v4 = vpack.c.bf16 %v1456_v45, %v1452_v44  ;;  %v5811_v63 = vpop.f32.mrb[6].mxu1  ;;  %5854 = vmatprep.subr.bf16.mxu1 %v8086_v39  ;;  %v1569_v62 = vadd.f32 %v1568_v53, %v8068_v13 }
 0x345   : > { %v8101_v55 = vpack.c.bf16 %v1618_v54, %v1617_v50  ;;  %v1580_v46 = vadd.f32 %v5811_v63, %v8068_v13  ;;  %v1571_v58 = vpop.f32.mrb[7].mxu1 }
 0x346   : > { %10598 = vst [vmem:[#allocation55_spill] sm:$0xff] %v8098_v4  ;;  %v1572_v3 = vadd.f32 %v1571_v58, %v8068_v13  ;;  %2100 = vrot.lane.b32.xlu1 %v8098_v4, %s7266_s2  ;;  %v1459_v5 = vpop.f32.mrb[8].mxu0  ;;  %6125 = vmatprep.subr.msk.bf16.mxu0 %vm1671_vm0, %v8098_v4  ;;  %v1700_v6 = vsel %vm1671_vm0, %v8098_v4, 0 }
 0x347   : > { %v8113_v11 = vpack.c.bf16 %v1580_v46, %v1577_v8  ;;  %v1460_v43 = vadd.f32 %v1459_v5, %v8059_v7  ;;  %v1461_v10 = vpop.f32.mrb[9].mxu0  ;;  %5823 = vmatpush3.bf16.xpose.msra.mxu0 %v1700_v6  ;;  %5855 = vmatpush3.bf16.msra.mxu1 %v8086_v39 }
 0x348   : > { %v8117_v19 = vpack.c.bf16 %v1572_v3, %v1569_v62  ;;  %v1463_v14 = vpop.f32.mrb[10].mxu0  ;;  %v1462_v20 = vadd.f32 %v1461_v10, %v8064_v0 }
 0x349   : > { %v1464_v16 = vadd.f32 %v1463_v14, %v8059_v7  ;;  %v1465_v17 = vpop.f32.mrb[11].mxu0  ;;  %v1619_v29 = vmul.f32 0.17677669, %v1460_v43 }
 0x34a   : > { %10599 = vst [vmem:[#allocation56_spill] sm:$0xff] %v8117_v19  ;;  %v1466_v25 = vadd.f32 %v1465_v17, %v8064_v0  ;;  %v5814_v23 = vpop.f32.mrb[8].mxu1  ;;  %5856 = vmatprep.subr.bf16.mxu1 %v8117_v19 }
 0x34b   : > { %v1620_v33 = vmul.f32 0.17677669, %v1464_v16  ;;  %v1584_v51 = vpop.f32.mrb[9].mxu1  ;;  %5857 = vmatpush3.bf16.msra.mxu1 %v8117_v19  ;;  %v1593_v40 = vadd.f32 %v5814_v23, %v8068_v13 }
 0x34c   : > { %v8124_v36 = vpack.c.bf16 %v1466_v25, %v1462_v20  ;;  %v5815_v34 = vpop.f32.mrb[10].mxu1  ;;  %5858 = vmatprep.subr.bf16.mxu1 %v8113_v11  ;;  %v1585_v42 = vadd.f32 %v1584_v51, %v8068_v13 }
 0x34d   : > { %v8127_v37 = vpack.c.bf16 %v1620_v33, %v1619_v29  ;;  %v1596_v61 = vadd.f32 %v5815_v34, %v8068_v13  ;;  %v1587_v47 = vpop.f32.mrb[11].mxu1 }
 0x34e   : > { %v1588_v41 = vadd.f32 %v1587_v47, %v8068_v13  ;;  %2102 = vrot.lane.b32.xlu0 %v8124_v36, %s7266_s2  ;;  %v1469_v44 = vpop.f32.mrb[12].mxu0  ;;  %6126 = vmatprep.subr.msk.bf16.mxu0 %vm1671_vm0, %v8124_v36  ;;  %v1703_v45 = vsel %vm1671_vm0, %v8124_v36, 0 }
 0x34f   : > { %v8139_v48 = vpack.c.bf16 %v1596_v61, %v1593_v40  ;;  %v1470_v50 = vadd.f32 %v1469_v44, %v8059_v7  ;;  %v1471_v54 = vpop.f32.mrb[13].mxu0  ;;  %5825 = vmatpush3.bf16.xpose.msra.mxu0 %v1703_v45  ;;  %5859 = vmatpush3.bf16.msra.mxu1 %v8113_v11 }
 0x350   : > { %v8143_v53 = vpack.c.bf16 %v1588_v41, %v1585_v42  ;;  %v1473_v63 = vpop.f32.mrb[14].mxu0  ;;  %v1472_v58 = vadd.f32 %v1471_v54, %v8064_v0 }
 0x351   : > { %v1474_v8 = vadd.f32 %v1473_v63, %v8059_v7  ;;  %v1475_v46 = vpop.f32.mrb[15].mxu0  ;;  %v1621_v5 = vmul.f32 0.17677669, %v1470_v50 }
 0x352   : > { %v1476_v62 = vadd.f32 %v1475_v46, %v8064_v0  ;;  %v5818_v3 = vpop.f32.mrb[12].mxu1  ;;  %5860 = vmatprep.subr.bf16.mxu1 %v8143_v53 }
 0x353   : > { %v1622_v6 = vmul.f32 0.17677669, %v1474_v8  ;;  %v1600_v43 = vpop.f32.mrb[13].mxu1  ;;  %5861 = vmatpush3.bf16.msra.mxu1 %v8143_v53  ;;  %v1609_v17 = vadd.f32 %v5818_v3, %v8068_v13 }
 0x354   : > { %v8150_v10 = vpack.c.bf16 %v1476_v62, %v1472_v58  ;;  %v5819_v14 = vpop.f32.mrb[14].mxu1  ;;  %5862 = vmatprep.subr.bf16.mxu1 %v8139_v48  ;;  %v1601_v23 = vadd.f32 %v1600_v43, %v8068_v13 }
 0x355   : > { %v8153_v16 = vpack.c.bf16 %v1622_v6, %v1621_v5  ;;  %v1612_v20 = vadd.f32 %v5819_v14, %v8068_v13  ;;  %v1603_v25 = vpop.f32.mrb[15].mxu1 }
 0x356   : > { %10600 = vst [vmem:[#allocation57_spill] sm:$0xff] %v8150_v10  ;;  %v1604_v29 = vadd.f32 %v1603_v25, %v8068_v13  ;;  %v1479_v33 = vpop.f32.mrb[16].mxu0  ;;  %6127 = vmatprep.subr.msk.bf16.mxu0 %vm1671_vm0, %v8150_v10  ;;  %v1706_v51 = vsel %vm1671_vm0, %v8150_v10, 0 }
 0x357   : > { %v8163_v34 = vpack.c.bf16 %v1612_v20, %v1609_v17  ;;  %v1480_v40 = vadd.f32 %v1479_v33, %v8059_v7  ;;  %v1481_v61 = vpop.f32.mrb[17].mxu0  ;;  %5827 = vmatpush3.bf16.xpose.msra.mxu0 %v1706_v51  ;;  %5863 = vmatpush3.bf16.msra.mxu1 %v8139_v48 }
 0x358   : > { %v8167_v47 = vpack.c.bf16 %v1604_v29, %v1601_v23  ;;  %v1483_v42 = vpop.f32.mrb[18].mxu0  ;;  %v1482_v44 = vadd.f32 %v1481_v61, %v8064_v0 }
 0x359   : > { %v1484_v13 = vadd.f32 %v1483_v42, %v8059_v7  ;;  %v1485_v41 = vpop.f32.mrb[19].mxu0  ;;  %v1623_v50 = vmul.f32 0.17677669, %v1480_v40 }
 0x35a   : > { %10601 = vst [vmem:[#allocation58_spill] sm:$0xff] %v8167_v47  ;;  %v1486_v45 = vadd.f32 %v1485_v41, %v8064_v0  ;;  %5864 = vmatprep.subr.bf16.mxu1 %v8167_v47 }
 0x35b   : > { %v1624_v54 = vmul.f32 0.17677669, %v1484_v13  ;;  %5865 = vmatpush3.bf16.msra.mxu1 %v8167_v47 }
 0x35c   : > { %v8174_v63 = vpack.c.bf16 %v1486_v45, %v1482_v44  ;;  %5866 = vmatprep.subr.bf16.mxu1 %v8163_v34 }
 0x35d   : > { %v8177_v8 = vpack.c.bf16 %v1624_v54, %v1623_v50 }
 0x35e   : > { %v1489_v46 = vpop.f32.mrb[20].mxu0  ;;  %6128 = vmatprep.subr.msk.bf16.mxu0 %vm1671_vm0, %v8174_v63  ;;  %v1709_v58 = vsel %vm1671_vm0, %v8174_v63, 0 }
 0x35f   : > { %10602 = vst [vmem:[#allocation59_spill] sm:$0xff] %v8177_v8  ;;  %v1490_v62 = vadd.f32 %v1489_v46, %v8059_v7  ;;  %v1491_v3 = vpop.f32.mrb[21].mxu0  ;;  %5829 = vmatpush3.bf16.xpose.msra.mxu0 %v1709_v58  ;;  %5867 = vmatpush3.bf16.msra.mxu1 %v8163_v34 }
 0x360   : > { %v1493_v5 = vpop.f32.mrb[22].mxu0  ;;  %v1492_v14 = vadd.f32 %v1491_v3, %v8064_v0 }
 0x361   : > { %v1494_v6 = vadd.f32 %v1493_v5, %v8059_v7  ;;  %v1495_v43 = vpop.f32.mrb[23].mxu0  ;;  %v1625_v20 = vmul.f32 0.17677669, %v1490_v62 }
 0x362   : > { %v1496_v17 = vadd.f32 %v1495_v43, %v8064_v0 }
 0x363   : > { %v1626_v25 = vmul.f32 0.17677669, %v1494_v6 }
 0x364   : > { %v8188_v23 = vpack.c.bf16 %v1496_v17, %v1492_v14 }
 0x365   : > { %v8190_v29 = vpack.c.bf16 %v1626_v25, %v1625_v20 }
 0x366   : > { %v1499_v33 = vpop.f32.mrb[24].mxu0  ;;  %6129 = vmatprep.subr.msk.bf16.mxu0 %vm1671_vm0, %v8188_v23  ;;  %v1712_v51 = vsel %vm1671_vm0, %v8188_v23, 0 }
 0x367   : > { %v1500_v40 = vadd.f32 %v1499_v33, %v8059_v7  ;;  %v1501_v61 = vpop.f32.mrb[25].mxu0  ;;  %5831 = vmatpush3.bf16.xpose.msra.mxu0 %v1712_v51 }
 0x368   : > { %v1503_v42 = vpop.f32.mrb[26].mxu0  ;;  %v1502_v44 = vadd.f32 %v1501_v61, %v8064_v0 }
 0x369   : > { %v1504_v13 = vadd.f32 %v1503_v42, %v8059_v7  ;;  %v1505_v41 = vpop.f32.mrb[27].mxu0  ;;  %v1627_v50 = vmul.f32 0.17677669, %v1500_v40 }
 0x36a   : > { %v1506_v45 = vadd.f32 %v1505_v41, %v8064_v0  ;;  %v8246_v41 = vld [vmem:[%s10604_s22 + $0x18] sm:$0xff] }
 0x36b   : > { %v1628_v54 = vmul.f32 0.17677669, %v1504_v13 }
 0x36c   : > { %v8200_v46 = vpack.c.bf16 %v1506_v45, %v1502_v44 }
 0x36d   : > { %v8202_v58 = vpack.c.bf16 %v1628_v54, %v1627_v50  ;;  %v8254_v50 = vld [vmem:[%s10604_s22] sm:$0xff] }
 0x36e   : > { %v1509_v62 = vpop.f32.mrb[28].mxu0  ;;  %6130 = vmatprep.subr.msk.bf16.mxu0 %vm1671_vm0, %v8200_v46  ;;  %v1715_v3 = vsel %vm1671_vm0, %v8200_v46, 0 }
 0x36f   : > { %10603 = vst [vmem:[#allocation60_spill] sm:$0xff] %v8202_v58  ;;  %v1510_v5 = vadd.f32 %v1509_v62, %v8059_v7  ;;  %v1511_v6 = vpop.f32.mrb[29].mxu0  ;;  %5833 = vmatpush3.bf16.xpose.msra.mxu0 %v1715_v3 }
 0x370   : > { %v1513_v43 = vpop.f32.mrb[30].mxu0  ;;  %v1512_v20 = vadd.f32 %v1511_v6, %v8064_v0 }
 0x371   : > { %v1514_v14 = vadd.f32 %v1513_v43, %v8059_v7  ;;  %v1515_v17 = vpop.f32.mrb[31].mxu0  ;;  %v1629_v33 = vmul.f32 0.17677669, %v1510_v5  ;;  %v8263_v5 = vld [vmem:[%s10604_s22 + $0x8] sm:$0xff] }
 0x372   : > { %v1516_v25 = vadd.f32 %v1515_v17, %v8064_v0  ;;  %v8241_v0 = vld [vmem:[%s10604_s22 + $0x10] sm:$0xff] }
 0x373   : > { %v1630_v51 = vmul.f32 0.17677669, %v1514_v14 }
 0x374   : > { %v8212_v40 = vpack.c.bf16 %v1516_v25, %v1512_v20 }
 0x375   : > { %v8214_v61 = vpack.c.bf16 %v1630_v51, %v1629_v33 }
 0x376   : > { %6131 = vmatprep.subr.msk.bf16.mxu0 %vm1671_vm0, %v8212_v40  ;;  %v1718_v42 = vsel %vm1671_vm0, %v8212_v40, 0 }
 0x377   : > { %5835 = vmatpush3.bf16.xpose.msra.mxu0 %v1718_v42 }
 0x37e   : > { %5837 = vmatmul.mubr.msk.bf16.vlgmr.msra.gmra.mrb[32].mxu0 %vm1671_vm0, %v8101_v55 }
 0x37f   : > { %5840 = vmatprep.mubr.msk.bf16.mxu0 %vm1671_vm0, %v8127_v37 }
 0x386   : > { %5841 = vmatmul.mubr.msk.bf16.gmra.mrb[36].mxu0 %vm1671_vm0, %v8153_v16 }
 0x387   : > { %5844 = vmatprep.mubr.msk.bf16.mxu0 %vm1671_vm0, %v8177_v8 }
 0x38e   : > { %5845 = vmatmul.mubr.msk.bf16.gmra.mrb[40].mxu0 %vm1671_vm0, %v8190_v29 }
 0x38f   : > { %5848 = vmatprep.mubr.msk.bf16.mxu0 %vm1671_vm0, %v8202_v58 }
 0x396   : > { %5849 = vmatmul.mubr.msk.bf16.gmra.mrb[44].mxu0 %vm1671_vm0, %v8214_v61 }
 0x3b0   : > { %v8234_v7 = vpop.permute.xlu0 %2098 }
 0x3b1   : > { %6132 = vmatprep.subr.msk.bf16.mxu1 %vm1671_vm0, %v8234_v7 }
 0x451   : > { %v5838_v13 = vpop.f32.mrb[32].mxu0 }
 0x452   : > { %v8249_v44 = vadd.f32 %v5838_v13, %v8241_v0  ;;  %v1754_v45 = vpop.f32.mrb[33].mxu0 }
 0x453   : > { %v5839_v54 = vpop.f32.mrb[34].mxu0  ;;  %v8266_v6 = vadd.f32 %v1754_v45, %v8254_v50 }
 0x454   : > { %v8257_v62 = vadd.f32 %v5839_v54, %v8246_v41  ;;  %1821 = vmax.xlane.f32.xlu0 %v8249_v44  ;;  %v1757_v3 = vpop.f32.mrb[35].mxu0 }
 0x455   : > { %v8270_v43 = vadd.f32 %v1757_v3, %v8263_v5 }
 0x456   : > { %1823 = vmax.xlane.f32.xlu1 %v8257_v62 }
 0x458   : > { %1817 = vmax.xlane.f32.xlu0 %v8266_v6 }
 0x459   : > { %v5842_v14 = vpop.f32.mrb[36].mxu0 }
 0x45a   : > { %v1770_v17 = vpop.f32.mrb[37].mxu0  ;;  %1819 = vmax.xlane.f32.xlu1 %v8270_v43  ;;  %v8289_v28 = vadd.f32 %v5842_v14, %v8281_v57  ;;  %v8312_v14 = vld [vmem:[%s10604_s22 + $0x48] sm:$0xff] }
 0x45b   : > { %v5843_v20 = vpop.f32.mrb[38].mxu0  ;;  %v8297_v32 = vadd.f32 %v1770_v17, %v8286_v35 }
 0x45c   : > { %v1773_v25 = vpop.f32.mrb[39].mxu0  ;;  %v8315_v17 = vadd.f32 %v5843_v20, %v8303_v27 }
 0x45d   : > { %v8333_v20 = vadd.f32 %v1773_v25, %v8321_v18  ;;  %v8352_v25 = vld [vmem:[%s10604_s22 + $0x58] sm:$0xff] }
 0x461   : > { %v5846_v33 = vpop.f32.mrb[40].mxu0 }
 0x462   : > { %v1786_v51 = vpop.f32.mrb[41].mxu0  ;;  %v8346_v21 = vadd.f32 %v5846_v33, %v8339_v15 }
 0x463   : > { %v5847_v42 = vpop.f32.mrb[42].mxu0  ;;  %v8306_v31 = vadd.f32 %v1786_v51, %v8294_v30 }
 0x464   : > { %v1789_v13 = vpop.f32.mrb[43].mxu0  ;;  %v8356_v2 = vadd.f32 %v5847_v42, %v8352_v25 }
 0x465   : > { %v8324_v51 = vadd.f32 %v1789_v13, %v8312_v14 }
 0x469   : > { %v5850_v54 = vpop.f32.mrb[44].mxu0 }
 0x46a   : > { %v1802_v45 = vpop.f32.mrb[45].mxu0  ;;  %v8342_v13 = vadd.f32 %v5850_v54, %v8330_v24  ;;  %v8361_v54 = vld [vmem:[%s10604_s22 + $0x60] sm:$0xff] }
 0x46b   : > { %2104 = vrot.lane.b32.xlu1 %v8150_v10, %s7266_s2  ;;  %v5851_v49 = vpop.f32.mrb[46].mxu0  ;;  %v8365_v33 = vadd.f32 %v1802_v45, %v8361_v54 }
 0x46c   : > { %v1805_v3 = vpop.f32.mrb[47].mxu0  ;;  %v8374_v42 = vadd.f32 %v5851_v49, %v8370_v12  ;;  %v2103_v49 = vpop.permute.xlu0 %2102 }
 0x46d   : > { %v8383_v45 = vadd.f32 %v1805_v3, %v8379_v1  ;;  %v2101_v3 = vpop.permute.xlu1 %2100 }
 0x46e   : > { %2106 = vrot.lane.b32.xlu0 %v8174_v63, %s7266_s2 }
 0x48d   : > { %1829 = vmax.xlane.f32.xlu0 %v8289_v28 }
 0x48f   : > { %1825 = vmax.xlane.f32.xlu1 %v8297_v32 }
 0x491   : > { %1833 = vmax.xlane.f32.xlu0 %v8306_v31 }
 0x493   : > { %1831 = vmax.xlane.f32.xlu1 %v8315_v17 }
 0x495   : > { %1835 = vmax.xlane.f32.xlu0 %v8324_v51 }
 0x497   : > { %1827 = vmax.xlane.f32.xlu1 %v8333_v20 }
 0x499   : > { %1845 = vmax.xlane.f32.xlu0 %v8342_v13 }
 0x49b   : > { %1837 = vmax.xlane.f32.xlu1 %v8346_v21 }
 0x49f   : > { %1839 = vmax.xlane.f32.xlu1 %v8356_v2 }
 0x4a3   : > { %1841 = vmax.xlane.f32.xlu1 %v8365_v33 }
 0x4a7   : > { %1847 = vmax.xlane.f32.xlu1 %v8374_v42 }
 0x4ab   : > { %1843 = vmax.xlane.f32.xlu1 %v8383_v45 }
 0x4af   : > { %2110 = vrot.lane.b32.xlu0 %v8200_v46, %s7266_s2 }
 0x4b3   : > { %2112 = vrot.lane.b32.xlu0 %v8212_v40, %s7266_s2 }
 0x4b7   : > { %2074 = vrot.lane.b32.xlu0 %v8074_v26, %s7266_s2 }
 0x4bb   : > { %2078 = vrot.lane.b32.xlu0 %v8127_v37, %s7266_s2 }
 0x4bc   : > { %2108 = vrot.lane.b32.xlu1 %v8188_v23, %s7266_s2 }
 0x4bf   : > { %2082 = vrot.lane.b32.xlu0 %v8177_v8, %s7266_s2 }
 0x4c0   : > { %2076 = vrot.lane.b32.xlu1 %v8101_v55, %s7266_s2 }
 0x4c3   : > { %2086 = vrot.lane.b32.xlu0 %v8202_v58, %s7266_s2 }
 0x4c4   : > { %2080 = vrot.lane.b32.xlu1 %v8153_v16, %s7266_s2 }
 0x4c7   : > { %2403 = vrot.lane.b32.xlu0 %v8091_v38, %s7266_s2 }
 0x4c8   : > { %2084 = vrot.lane.b32.xlu1 %v8190_v29, %s7266_s2 }
 0x4cb   : > { %2407 = vrot.lane.b32.xlu0 %v8117_v19, %s7266_s2 }
 0x4cc   : > { %2088 = vrot.lane.b32.xlu1 %v8214_v61, %s7266_s2 }
 0x4cf   : > { %2415 = vrot.lane.b32.xlu0 %v8167_v47, %s7266_s2 }
 0x4d0   : > { %2405 = vrot.lane.b32.xlu1 %v8086_v39, %s7266_s2 }
 0x4d3   : > { %2556 = vrot.lane.b32.xlu0 %v8072_v22, %s7267_s4 }
 0x4d4   : > { %2409 = vrot.lane.b32.xlu1 %v8113_v11, %s7266_s2 }
 0x4d7   : > { %2558 = vrot.lane.b32.xlu0 %v8098_v4, %s7267_s4 }
 0x4d8   : > { %2411 = vrot.lane.b32.xlu1 %v8143_v53, %s7266_s2 }
 0x4db   : > { %2562 = vrot.lane.b32.xlu0 %v8150_v10, %s7267_s4 }
 0x4dc   : > { %2413 = vrot.lane.b32.xlu1 %v8139_v48, %s7266_s2 }
 0x4e0   : > { %2417 = vrot.lane.b32.xlu1 %v8163_v34, %s7266_s2 }
 0x4e1   : > { %v1822_v9 = vpop.xlane.xlu0 %1821 }
 0x4e2   : > { %v1851_v52 = vsub.f32 %v8249_v44, %v1822_v9 }
 0x4e3   : > { %v1824_v59 = vpop.xlane.xlu1 %1823 }
 0x4e4   : > { %v1852_v60 = vsub.f32 %v8257_v62, %v1824_v59  ;;  %2560 = vrot.lane.b32.xlu1 %v8124_v36, %s7267_s4  ;;  %v1869_v38 = vmul.f32 1.442695, %v1851_v52  ;;  %v2139_v52 = vsel %vm1671_vm0, %v8234_v7, 0 }
 0x4e5   : > { %v1818_v56 = vpop.xlane.xlu0 %1817 }
 0x4e6   : > { %v1871_v4 = vmul.f32 1.442695, %v1852_v60  ;;  %v1849_v10 = vsub.f32 %v8266_v6, %v1818_v56 }
 0x4e7   : > { %v1820_v22 = vpop.xlane.xlu1 %1819 }
 0x4e8   : > { %v1865_v47 = vmul.f32 1.442695, %v1849_v10  ;;  %v1850_v19 = vsub.f32 %v8270_v43, %v1820_v22  ;;  %6538 = vpow2.f32 %v1871_v4  ;;  %v2142_v22 = vsel %vm1671_vm0, %v2101_v3, 0 }
 0x4e9   : > { %v2107_v10 = vpop.permute.xlu0 %2106 }
 0x4ea   : > { %v1867_v58 = vmul.f32 1.442695, %v1850_v19  ;;  %6540 = vpow2.f32 %v1865_v47  ;;  %v2151_v47 = vsel %vm1671_vm0, %v2107_v10, 0 }
 0x4eb   : > { %v2105_v4 = vpop.permute.xlu1 %2104 }
 0x4ec   : > { %6542 = vpow2.f32 %v1867_v58  ;;  %v2148_v19 = vsel %vm1671_vm0, %v2105_v4, 0 }
 0x4ed   : > { %6544 = vpow2.f32 %v1869_v38  ;;  %v2145_v38 = vsel %vm1671_vm0, %v2103_v49, 0 }
 0x4f2   : > { %v8436_v59 = vpop.eup %6538 }
 0x4f3   : > { %10605 = vst [vmem:[#allocation61_spill] sm:$0xff] %v8436_v59 }
 0x4f4   : > { %v8438_v62 = vpop.eup %6540 }
 0x4f5   : > { %10606 = vst [vmem:[#allocation62_spill] sm:$0xff] %v8438_v62 }
 0x4f6   : > { %v8440_v8 = vpop.eup %6542 }
 0x4f7   : > { %10607 = vst [vmem:[#allocation63_spill] sm:$0xff] %v8440_v8  ;;  %v8442_v9 = vpop.eup %6544  ;;  %v1945_v56 = vpack.c.bf16 %v8440_v8, %v8438_v62  ;;  %v8882_v62 = vld [vmem:[%s10604_s22 + $0x40] sm:$0xff] }
 0x4f8   : > { %10608 = vst [vmem:[#allocation64_spill] sm:$0xff] %v8442_v9  ;;  %v1946_v60 = vpack.c.bf16 %v8436_v59, %v8442_v9 }
 0x4f9   : > { %5868 = vmatprep.mubr.bf16.mxu1 %v1945_v56 }
 0x4fa   : > { %5869 = vmatmul.mubr.bf16.vlgmr.msra.gmra.mrb[16].mxu1 %v1946_v60 }
 0x4fb   : > { %5885 = vmatpush3.bf16.xpose.msra.mxu1 %v2139_v52 }
 0x4fc   : > { %6133 = vmatprep.subr.msk.bf16.mxu1 %vm1671_vm0, %v2101_v3 }
 0x503   : > { %5887 = vmatpush3.bf16.xpose.msra.mxu1 %v2142_v22 }
 0x504   : > { %6134 = vmatprep.subr.msk.bf16.mxu1 %vm1671_vm0, %v2103_v49 }
 0x50b   : > { %5889 = vmatpush3.bf16.xpose.msra.mxu1 %v2145_v38 }
 0x50c   : > { %6135 = vmatprep.subr.msk.bf16.mxu1 %vm1671_vm0, %v2105_v4 }
 0x513   : > { %5891 = vmatpush3.bf16.xpose.msra.mxu1 %v2148_v19 }
 0x514   : > { %6136 = vmatprep.subr.msk.bf16.mxu1 %vm1671_vm0, %v2107_v10 }
 0x51a   : > { %v1830_v58 = vpop.xlane.xlu0 %1829 }
 0x51b   : > { %5893 = vmatpush3.bf16.xpose.msra.mxu1 %v2151_v47  ;;  %v1855_v3 = vsub.f32 %v8289_v28, %v1830_v58 }
 0x51c   : > { %v1826_v7 = vpop.xlane.xlu1 %1825 }
 0x51d   : > { %v1853_v44 = vsub.f32 %v8297_v32, %v1826_v7  ;;  %v1877_v47 = vmul.f32 1.442695, %v1855_v3 }
 0x51e   : > { %v1834_v6 = vpop.xlane.xlu0 %1833 }
 0x51f   : > { %v1873_v56 = vmul.f32 1.442695, %v1853_v44  ;;  %v1857_v52 = vsub.f32 %v8306_v31, %v1834_v6 }
 0x520   : > { %v1832_v43 = vpop.xlane.xlu1 %1831 }
 0x521   : > { %v1856_v49 = vsub.f32 %v8315_v17, %v1832_v43  ;;  %6546 = vpow2.f32 %v1873_v56  ;;  %v1881_v7 = vmul.f32 1.442695, %v1857_v52 }
 0x522   : > { %v1836_v60 = vpop.xlane.xlu0 %1835 }
 0x523   : > { %v1879_v22 = vmul.f32 1.442695, %v1856_v49  ;;  %v1858_v38 = vsub.f32 %v8324_v51, %v1836_v60 }
 0x524   : > { %v1828_v4 = vpop.xlane.xlu1 %1827 }
 0x525   : > { %v1883_v19 = vmul.f32 1.442695, %v1858_v38  ;;  %v1854_v10 = vsub.f32 %v8333_v20, %v1828_v4  ;;  %6548 = vpow2.f32 %v1879_v22 }
 0x526   : > { %v1846_v32 = vpop.xlane.xlu0 %1845 }
 0x527   : > { %v1875_v59 = vmul.f32 1.442695, %v1854_v10  ;;  %6550 = vpow2.f32 %v1883_v19  ;;  %v1863_v10 = vsub.f32 %v8342_v13, %v1846_v32 }
 0x528   : > { %v1838_v17 = vpop.xlane.xlu1 %1837 }
 0x529   : > { %6552 = vpow2.f32 %v1875_v59  ;;  %v1859_v28 = vsub.f32 %v8346_v21, %v1838_v17 }
 0x52a   : > { %6554 = vpow2.f32 %v1877_v47  ;;  %v2111_v31 = vpop.permute.xlu0 %2110 }
 0x52b   : > { %6556 = vpow2.f32 %v1881_v7  ;;  %v1885_v58 = vmul.f32 1.442695, %v1859_v28  ;;  %v8468_v43 = vpop.eup %6546 }
 0x52c   : > { %v1840_v51 = vpop.xlane.xlu1 %1839  ;;  %10609 = vst [vmem:[#allocation65_spill] sm:$0xff] %v8468_v43 }
 0x52d   : > { %v1860_v44 = vsub.f32 %v8356_v2, %v1840_v51  ;;  %6558 = vpow2.f32 %v1885_v58 }
 0x52e   : > { %v8466_v6 = vpop.permute.xlu0 %2112 }
 0x52f   : > { %v1887_v20 = vmul.f32 1.442695, %v1860_v44  ;;  %v8470_v3 = vpop.eup %6548 }
 0x530   : > { %v1842_v49 = vpop.xlane.xlu1 %1841  ;;  %10610 = vst [vmem:[#allocation66_spill] sm:$0xff] %v8470_v3 }
 0x531   : > { %6560 = vpow2.f32 %v1887_v20  ;;  %v8472_v59 = vpop.eup %6550  ;;  %v1861_v60 = vsub.f32 %v8365_v33, %v1842_v49 }
 0x532   : > { %10611 = vst [vmem:[#allocation67_spill] sm:$0xff] %v8472_v59  ;;  %v2075_v21 = vpop.permute.xlu0 %2074 }
 0x533   : > { %v8474_v56 = vpop.eup %6552  ;;  %v1889_v7 = vmul.f32 1.442695, %v1861_v60 }
 0x534   : > { %10612 = vst [vmem:[#allocation68_spill] sm:$0xff] %v8474_v56  ;;  %v8477_v52 = vpop.eup %6554  ;;  %v1848_v2 = vpop.xlane.xlu1 %1847  ;;  %v1947_v22 = vpack.c.bf16 %v8474_v56, %v8468_v43  ;;  %v8869_v43 = vld [vmem:[%s10604_s22 + $0x38] sm:$0xff] }
 0x535   : > { %10613 = vst [vmem:[#allocation69_spill] sm:$0xff] %v8477_v52  ;;  %v8481_v38 = vpop.eup %6556  ;;  %v1864_v4 = vsub.f32 %v8374_v42, %v1848_v2  ;;  %v1948_v19 = vpack.c.bf16 %v8470_v3, %v8477_v52  ;;  %v1893_v42 = vmul.f32 1.442695, %v1863_v10  ;;  %6562 = vpow2.f32 %v1889_v7 }
 0x536   : > { %10614 = vst [vmem:[#allocation70_spill] sm:$0xff] %v8481_v38  ;;  %5872 = vmatprep.mubr.bf16.mxu1 %v1947_v22  ;;  %v2079_v47 = vpop.permute.xlu0 %2078  ;;  %v1949_v33 = vpack.c.bf16 %v8472_v59, %v8481_v38  ;;  %v2157_v10 = vsel %vm1671_vm0, %v2111_v31, 0 }
 0x537   : > { %5873 = vmatmul.mubr.bf16.gmra.mrb[20].mxu1 %v1948_v19  ;;  %v1895_v17 = vmul.f32 1.442695, %v1864_v4  ;;  %v8490_v51 = vpop.eup %6558 }
 0x538   : > { %v1844_v28 = vpop.xlane.xlu1 %1843  ;;  %5876 = vmatprep.mubr.bf16.mxu1 %v1949_v33  ;;  %10615 = vst [vmem:[#allocation71_spill] sm:$0xff] %v8490_v51 }
 0x539   : > { %v1862_v58 = vsub.f32 %v8383_v45, %v1844_v28  ;;  %6564 = vpow2.f32 %v1895_v17 }
 0x53a   : > { %v2083_v44 = vpop.permute.xlu0 %2082 }
 0x53b   : > { %v8492_v20 = vpop.eup %6560  ;;  %v1891_v13 = vmul.f32 1.442695, %v1862_v58 }
 0x53c   : > { %10616 = vst [vmem:[#allocation72_spill] sm:$0xff] %v8492_v20  ;;  %v2109_v32 = vpop.permute.xlu1 %2108  ;;  %v1950_v49 = vpack.c.bf16 %v8492_v20, %v8490_v51 }
 0x53d   : > { %6566 = vpow2.f32 %v1891_v13  ;;  %6137 = vmatprep.subr.msk.bf16.mxu1 %vm1671_vm0, %v2109_v32  ;;  %v2154_v60 = vsel %vm1671_vm0, %v2109_v32, 0  ;;  %v2160_v13 = vsel %vm1671_vm0, %v8466_v6, 0 }
 0x53e   : > { %6568 = vpow2.f32 %v1893_v42  ;;  %5895 = vmatpush3.bf16.xpose.msra.mxu1 %v2154_v60  ;;  %v2087_v45 = vpop.permute.xlu0 %2086 }
 0x53f   : > { %5877 = vmatmul.mubr.bf16.gmra.mrb[24].mxu1 %v1950_v49  ;;  %6138 = vmatprep.subr.msk.bf16.mxu1 %vm1671_vm0, %v2111_v31  ;;  %v8499_v19 = vpop.eup %6562 }
 0x540   : > { %v2077_v2 = vpop.permute.xlu1 %2076  ;;  %10617 = vst [vmem:[#allocation73_spill] sm:$0xff] %v8499_v19 }
 0x542   : > { %v2404_v22 = vpop.permute.xlu0 %2403 }
 0x543   : > { %5916 = vmatprep.subr.bf16.mxu0 %v2404_v22  ;;  %v8502_v33 = vpop.eup %6564 }
 0x544   : > { %v2081_v4 = vpop.permute.xlu1 %2080  ;;  %5917 = vmatpush3.bf16.msra.mxu0 %v2404_v22  ;;  %10618 = vst [vmem:[#allocation74_spill] sm:$0xff] %v8502_v33 }
 0x546   : > { %5897 = vmatpush3.bf16.xpose.msra.mxu1 %v2157_v10  ;;  %v2408_v49 = vpop.permute.xlu0 %2407 }
 0x547   : > { %v8504_v7 = vpop.eup %6566  ;;  %6139 = vmatprep.subr.msk.bf16.mxu1 %vm1671_vm0, %v8466_v6 }
 0x548   : > { %10619 = vst [vmem:[#allocation75_spill] sm:$0xff] %v8504_v7  ;;  %v8508_v17 = vpop.eup %6568  ;;  %v2085_v28 = vpop.permute.xlu1 %2084  ;;  %v1951_v58 = vpack.c.bf16 %v8504_v7, %v8499_v19 }
 0x549   : > { %10620 = vst [vmem:[#allocation76_spill] sm:$0xff] %v8508_v17  ;;  %v1952_v42 = vpack.c.bf16 %v8502_v33, %v8508_v17 }
 0x54a   : > { %5880 = vmatprep.mubr.bf16.mxu1 %v1951_v58  ;;  %v2416_v6 = vpop.permute.xlu0 %2415 }
 0x54b   : > { %5881 = vmatmul.mubr.bf16.gmra.mrb[28].mxu1 %v1952_v42 }
 0x54c   : > { %v2089_v31 = vpop.permute.xlu1 %2088  ;;  %5900 = vmatprep.mubr.msk.bf16.mxu1 %vm1671_vm0, %v2075_v21 }
 0x54e   : > { %5899 = vmatpush3.bf16.xpose.msra.mxu1 %v2160_v13 }
 0x550   : > { %v2406_v32 = vpop.permute.xlu1 %2405 }
 0x551   : > { %5918 = vmatprep.subr.bf16.mxu0 %v2406_v32 }
 0x552   : > { %5919 = vmatpush3.bf16.msra.mxu0 %v2406_v32 }
 0x553   : > { %5920 = vmatprep.subr.bf16.mxu0 %v2408_v49 }
 0x554   : > { %v2410_v60 = vpop.permute.xlu1 %2409 }
 0x555   : > { %5901 = vmatmul.mubr.msk.bf16.vlgmr.msra.gmra.mrb[32].mxu1 %vm1671_vm0, %v2077_v2 }
 0x556   : > { %5904 = vmatprep.mubr.msk.bf16.mxu1 %vm1671_vm0, %v2079_v47  ;;  %5921 = vmatpush3.bf16.msra.mxu0 %v2408_v49  ;;  %v8523_v47 = vpop.permute.xlu0 %2556 }
 0x557   : > { %5922 = vmatprep.subr.bf16.mxu0 %v2410_v60 }
 0x558   : > { %v2412_v22 = vpop.permute.xlu1 %2411 }
 0x55a   : > { %5923 = vmatpush3.bf16.msra.mxu0 %v2410_v60 }
 0x55b   : > { %5924 = vmatprep.subr.bf16.mxu0 %v2412_v22 }
 0x55c   : > { %v2414_v21 = vpop.permute.xlu1 %2413 }
 0x55d   : > { %5905 = vmatmul.mubr.msk.bf16.gmra.mrb[36].mxu1 %vm1671_vm0, %v2081_v4 }
 0x55e   : > { %5908 = vmatprep.mubr.msk.bf16.mxu1 %vm1671_vm0, %v2083_v44  ;;  %5925 = vmatpush3.bf16.msra.mxu0 %v2412_v22 }
 0x55f   : > { %5926 = vmatprep.subr.bf16.mxu0 %v2414_v21 }
 0x560   : > { %v2418_v2 = vpop.permute.xlu1 %2417 }
 0x562   : > { %5927 = vmatpush3.bf16.msra.mxu0 %v2414_v21 }
 0x563   : > { %5928 = vmatprep.subr.bf16.mxu0 %v2416_v6 }
 0x565   : > { %5909 = vmatmul.mubr.msk.bf16.gmra.mrb[40].mxu1 %vm1671_vm0, %v2085_v28 }
 0x566   : > { %5912 = vmatprep.mubr.msk.bf16.mxu1 %vm1671_vm0, %v2087_v45  ;;  %5929 = vmatpush3.bf16.msra.mxu0 %v2416_v6 }
 0x567   : > { %5930 = vmatprep.subr.bf16.mxu0 %v2418_v2 }
 0x56a   : > { %5931 = vmatpush3.bf16.msra.mxu0 %v2418_v2 }
 0x56b   : > { %6140 = vmatprep.subr.msk.bf16.mxu0 %vm1671_vm0, %v8523_v47 }
 0x56d   : > { %5913 = vmatmul.mubr.msk.bf16.gmra.mrb[44].mxu1 %vm1671_vm0, %v2089_v31 }
 0x5cd   : > { %v8528_v44 = vpop.f32.mrb[16].mxu1 }
 0x5ce   : > { %10621 = vst [vmem:[#allocation77_spill] sm:$0xff] %v8528_v44  ;;  %v8530_v4 = vpop.f32.mrb[17].mxu1 }
 0x5cf   : > { %10622 = vst [vmem:[#allocation78_spill] sm:$0xff] %v8530_v4  ;;  %v8532_v10 = vpop.f32.mrb[18].mxu1 }
 0x5d0   : > { %10623 = vst [vmem:[#allocation79_spill] sm:$0xff] %v8532_v10  ;;  %v8534_v28 = vpop.f32.mrb[19].mxu1 }
 0x5d1   : > { %10624 = vst [vmem:[#allocation80_spill] sm:$0xff] %v8534_v28 }
 0x60a   : > { %v8536_v58 = vpop.f32.mrb[20].mxu1 }
 0x60b   : > { %10625 = vst [vmem:[#allocation81_spill] sm:$0xff] %v8536_v58  ;;  %v8538_v45 = vpop.f32.mrb[21].mxu1 }
 0x60c   : > { %10626 = vst [vmem:[#allocation82_spill] sm:$0xff] %v8538_v45  ;;  %v8540_v42 = vpop.f32.mrb[22].mxu1  ;;  %v10644_v45 = vld [vmem:[#allocation57_spill] sm:$0xff] }
 0x60d   : > { %10627 = vst [vmem:[#allocation83_spill] sm:$0xff] %v8540_v42  ;;  %v8542_v13 = vpop.f32.mrb[23].mxu1 }
 0x60e   : > { %10628 = vst [vmem:[#allocation84_spill] sm:$0xff] %v8542_v13 }
 0x612   : > { %v8544_v32 = vpop.f32.mrb[24].mxu1 }
 0x613   : > { %10629 = vst [vmem:[#allocation85_spill] sm:$0xff] %v8544_v32  ;;  %v8546_v49 = vpop.f32.mrb[25].mxu1 }
 0x614   : > { %10630 = vst [vmem:[#allocation86_spill] sm:$0xff] %v8546_v49  ;;  %v8548_v31 = vpop.f32.mrb[26].mxu1 }
 0x615   : > { %10631 = vst [vmem:[#allocation87_spill] sm:$0xff] %v8548_v31  ;;  %v8550_v60 = vpop.f32.mrb[27].mxu1 }
 0x616   : > { %10632 = vst [vmem:[#allocation88_spill] sm:$0xff] %v8550_v60 }
 0x61e   : > { %v8552_v22 = vpop.f32.mrb[28].mxu1 }
 0x61f   : > { %10633 = vst [vmem:[#allocation89_spill] sm:$0xff] %v8552_v22  ;;  %v8554_v21 = vpop.f32.mrb[29].mxu1 }
 0x620   : > { %10634 = vst [vmem:[#allocation90_spill] sm:$0xff] %v8554_v21  ;;  %v8556_v6 = vpop.f32.mrb[30].mxu1 }
 0x621   : > { %10635 = vst [vmem:[#allocation91_spill] sm:$0xff] %v8556_v6  ;;  %v8558_v2 = vpop.f32.mrb[31].mxu1 }
 0x622   : > { %10636 = vst [vmem:[#allocation92_spill] sm:$0xff] %v8558_v2 }
 0x628   : > { %v5902_v33 = vpop.f32.mrb[32].mxu1 }
 0x629   : > { %v8561_v7 = vadd.f32 %v5902_v33, %v8241_v0  ;;  %v2196_v42 = vpop.f32.mrb[33].mxu1 }
 0x62a   : > { %v5903_v32 = vpop.f32.mrb[34].mxu1  ;;  %v8568_v22 = vadd.f32 %v2196_v42, %v8254_v50 }
 0x62b   : > { %2263 = vmax.xlane.f32.xlu0 %v8561_v7  ;;  %v2199_v49 = vpop.f32.mrb[35].mxu1  ;;  %v8573_v2 = vadd.f32 %v5903_v32, %v8246_v41 }
 0x62c   : > { %v8565_v31 = vadd.f32 %v2199_v49, %v8263_v5 }
 0x62e   : > { %2261 = vmax.xlane.f32.xlu1 %v8565_v31 }
 0x62f   : > { %2259 = vmax.xlane.f32.xlu0 %v8568_v22 }
 0x630   : > { %v5906_v6 = vpop.f32.mrb[36].mxu1 }
 0x631   : > { %v8576_v0 = vadd.f32 %v5906_v6, %v8281_v57  ;;  %v2212_v33 = vpop.f32.mrb[37].mxu1 }
 0x632   : > { %v5907_v21 = vpop.f32.mrb[38].mxu1  ;;  %v8584_v42 = vadd.f32 %v2212_v33, %v8286_v35 }
 0x633   : > { %2265 = vmax.xlane.f32.xlu0 %v8573_v2  ;;  %2271 = vmax.xlane.f32.xlu1 %v8576_v0  ;;  %v2215_v5 = vpop.f32.mrb[39].mxu1  ;;  %v8589_v57 = vadd.f32 %v5907_v21, %v8303_v27 }
 0x634   : > { %v8581_v50 = vadd.f32 %v2215_v5, %v8321_v18 }
 0x637   : > { %2269 = vmax.xlane.f32.xlu0 %v8581_v50  ;;  %2267 = vmax.xlane.f32.xlu1 %v8584_v42 }
 0x638   : > { %v5910_v41 = vpop.f32.mrb[40].mxu1 }
 0x639   : > { %v8592_v32 = vadd.f32 %v5910_v41, %v8339_v15  ;;  %v2228_v49 = vpop.f32.mrb[41].mxu1 }
 0x63a   : > { %v5911_v6 = vpop.f32.mrb[42].mxu1  ;;  %v8597_v35 = vadd.f32 %v2228_v49, %v8294_v30 }
 0x63b   : > { %2273 = vmax.xlane.f32.xlu1 %v8589_v57  ;;  %2279 = vmax.xlane.f32.xlu0 %v8592_v32  ;;  %v2231_v5 = vpop.f32.mrb[43].mxu1  ;;  %v8601_v60 = vadd.f32 %v5911_v6, %v8352_v25  ;;  %v10641_v6 = vld [vmem:[#allocation58_spill] sm:$0xff] }
 0x63c   : > { %v8609_v58 = vadd.f32 %v2231_v5, %v8312_v14  ;;  %v10640_v14 = vld [vmem:[#allocation56_spill] sm:$0xff]  ;;  %v10642_v5 = vld [vmem:[#allocation53_spill] sm:$0xff] }
 0x63f   : > { %2275 = vmax.xlane.f32.xlu1 %v8597_v35 }
 0x640   : > { %v5914_v33 = vpop.f32.mrb[44].mxu1 }
 0x641   : > { %v2244_v27 = vpop.f32.mrb[45].mxu1  ;;  %v8613_v30 = vadd.f32 %v5914_v33, %v8330_v24  ;;  %v10638_v24 = vld [vmem:[#allocation60_spill] sm:$0xff] }
 0x642   : > { %v8604_v21 = vadd.f32 %v2244_v27, %v8361_v54  ;;  %v5915_v41 = vpop.f32.mrb[46].mxu1  ;;  %v8672_v27 = vpop.permute.xlu1 %2560 }
 0x643   : > { %2281 = vmax.xlane.f32.xlu1 %v8601_v60  ;;  %v2247_v13 = vpop.f32.mrb[47].mxu1  ;;  %v8617_v49 = vadd.f32 %v5915_v41, %v8370_v12  ;;  %v10643_v41 = vld [vmem:[#allocation55_spill] sm:$0xff] }
 0x644   : > { %2283 = vmax.xlane.f32.xlu0 %v8604_v21  ;;  %v8635_v12 = vadd.f32 %v2247_v13, %v8379_v1  ;;  %v10637_v1 = vld [vmem:[#allocation59_spill] sm:$0xff]  ;;  %v8664_v13 = vpop.permute.xlu0 %2558 }
 0x647   : > { %2277 = vmax.xlane.f32.xlu1 %v8609_v58 }
 0x648   : > { %v8670_v33 = vpop.permute.xlu0 %2562 }
 0x64b   : > { %2287 = vmax.xlane.f32.xlu1 %v8613_v30 }
 0x64f   : > { %2289 = vmax.xlane.f32.xlu1 %v8617_v49 }
 0x65a   : > { %2566 = vrot.lane.b32.xlu0 %v8188_v23, %s7267_s4 }
 0x660   : > { %2564 = vrot.lane.b32.xlu1 %v8174_v63, %s7267_s4 }
 0x664   : > { %2542 = vrot.lane.b32.xlu1 %v8101_v55, %s7267_s4 }
 0x668   : > { %2546 = vrot.lane.b32.xlu1 %v8153_v16, %s7267_s4 }
 0x66c   : > { %2550 = vrot.lane.b32.xlu1 %v8190_v29, %s7267_s4 }
 0x670   : > { %2554 = vrot.lane.b32.xlu1 %v8214_v61, %s7267_s4 }
 0x674   : > { %2855 = vrot.lane.b32.xlu1 %v8086_v39, %s7267_s4 }
 0x678   : > { %2859 = vrot.lane.b32.xlu1 %v8113_v11, %s7267_s4 }
 0x679   : > { %2285 = vmax.xlane.f32.xlu0 %v8635_v12 }
 0x67c   : > { %2861 = vrot.lane.b32.xlu1 %v8143_v53, %s7267_s4 }
 0x680   : > { %2863 = vrot.lane.b32.xlu1 %v8139_v48, %s7267_s4 }
 0x684   : > { %2867 = vrot.lane.b32.xlu1 %v8163_v34, %s7267_s4 }
 0x688   : > { %3010 = vrot.lane.b32.xlu1 %v8124_v36, %s7268_s7  ;;  %v10639_v36 = vld [vmem:[#allocation54_spill] sm:$0xff] }
 0x68f   : > { %2568 = vrot.lane.b32.xlu0 %v8200_v46, %s7267_s4 }
 0x693   : > { %2570 = vrot.lane.b32.xlu0 %v8212_v40, %s7267_s4 }
 0x697   : > { %2540 = vrot.lane.b32.xlu0 %v8074_v26, %s7267_s4 }
 0x69b   : > { %2544 = vrot.lane.b32.xlu0 %v8127_v37, %s7267_s4 }
 0x69f   : > { %2548 = vrot.lane.b32.xlu0 %v10637_v1, %s7267_s4 }
 0x6a3   : > { %2552 = vrot.lane.b32.xlu0 %v10638_v24, %s7267_s4 }
 0x6a7   : > { %2853 = vrot.lane.b32.xlu0 %v10639_v36, %s7267_s4 }
 0x6ab   : > { %2857 = vrot.lane.b32.xlu0 %v10640_v14, %s7267_s4 }
 0x6af   : > { %2865 = vrot.lane.b32.xlu0 %v10641_v6, %s7267_s4 }
 0x6b3   : > { %3006 = vrot.lane.b32.xlu0 %v10642_v5, %s7268_s7 }
 0x6b7   : > { %3008 = vrot.lane.b32.xlu0 %v10643_v41, %s7268_s7 }
 0x6b8   : > { %v2264_v10 = vpop.xlane.xlu0 %2263 }
 0x6b9   : > { %v2293_v4 = vsub.f32 %v8561_v7, %v2264_v10 }
 0x6bb   : > { %v2262_v17 = vpop.xlane.xlu1 %2261  ;;  %3012 = vrot.lane.b32.xlu0 %v10644_v45, %s7268_s7  ;;  %v2311_v38 = vmul.f32 1.442695, %v2293_v4 }
 0x6bc   : > { %v2292_v28 = vsub.f32 %v8565_v31, %v2262_v17  ;;  %v2260_v44 = vpop.xlane.xlu0 %2259 }
 0x6bd   : > { %v2291_v19 = vsub.f32 %v8568_v22, %v2260_v44 }
 0x6be   : > { %v2309_v5 = vmul.f32 1.442695, %v2292_v28 }
 0x6bf   : > { %v2307_v59 = vmul.f32 1.442695, %v2291_v19 }
 0x6c0   : > { %6570 = vpow2.f32 %v2309_v5  ;;  %v2272_v20 = vpop.xlane.xlu1 %2271  ;;  %v2266_v51 = vpop.xlane.xlu0 %2265 }
 0x6c1   : > { %6572 = vpow2.f32 %v2307_v59  ;;  %v2294_v41 = vsub.f32 %v8573_v2, %v2266_v51  ;;  %v2297_v56 = vsub.f32 %v8576_v0, %v2272_v20 }
 0x6c2   : > { %6574 = vpow2.f32 %v2311_v38 }
 0x6c3   : > { %v2313_v3 = vmul.f32 1.442695, %v2294_v41  ;;  %v2319_v10 = vmul.f32 1.442695, %v2297_v56  ;;  %v2597_v41 = vsel %vm1671_vm0, %v8523_v47, 0 }
 0x6c4   : > { %v2268_v45 = vpop.xlane.xlu1 %2267  ;;  %v2270_v52 = vpop.xlane.xlu0 %2269 }
 0x6c5   : > { %v2295_v17 = vsub.f32 %v8584_v42, %v2268_v45  ;;  %v2296_v7 = vsub.f32 %v8581_v50, %v2270_v52  ;;  %6576 = vpow2.f32 %v2313_v3 }
 0x6c7   : > { %v2315_v44 = vmul.f32 1.442695, %v2295_v17  ;;  %v2317_v19 = vmul.f32 1.442695, %v2296_v7 }
 0x6c8   : > { %v2274_v28 = vpop.xlane.xlu1 %2273  ;;  %v2280_v56 = vpop.xlane.xlu0 %2279 }
 0x6c9   : > { %6578 = vpow2.f32 %v2315_v44  ;;  %v2298_v59 = vsub.f32 %v8589_v57, %v2274_v28  ;;  %v2301_v42 = vsub.f32 %v8592_v32, %v2280_v56 }
 0x6ca   : > { %v8686_v4 = vpop.eup %6570  ;;  %6580 = vpow2.f32 %v2317_v19 }
 0x6cb   : > { %v8688_v51 = vpop.eup %6572  ;;  %v2321_v20 = vmul.f32 1.442695, %v2298_v59  ;;  %6582 = vpow2.f32 %v2319_v10  ;;  %v2327_v44 = vmul.f32 1.442695, %v2301_v42 }
 0x6cc   : > { %v2276_v38 = vpop.xlane.xlu1 %2275  ;;  %v2387_v31 = vpack.c.bf16 %v8686_v4, %v8688_v51  ;;  %v8692_v3 = vpop.eup %6574 }
 0x6cd   : > { %6584 = vpow2.f32 %v2321_v20  ;;  %v2299_v52 = vsub.f32 %v8597_v35, %v2276_v38 }
 0x6ce   : > { %5932 = vmatprep.mubr.bf16.mxu0 %v2387_v31  ;;  %v2603_v31 = vsel %vm1671_vm0, %v8672_v27, 0 }
 0x6cf   : > { %v8695_v22 = vpop.eup %6576  ;;  %v2323_v5 = vmul.f32 1.442695, %v2299_v52 }
 0x6d0   : > { %v2282_v2 = vpop.xlane.xlu1 %2281  ;;  %v2388_v50 = vpack.c.bf16 %v8695_v22, %v8692_v3 }
 0x6d1   : > { %v2302_v0 = vsub.f32 %v8601_v60, %v2282_v2  ;;  %6586 = vpow2.f32 %v2323_v5 }
 0x6d2   : > { %5933 = vmatmul.mubr.bf16.vlgmr.msra.gmra.mrb[48].mxu0 %v2388_v50 }
 0x6d3   : > { %v8701_v57 = vpop.eup %6578  ;;  %v2329_v35 = vmul.f32 1.442695, %v2302_v0  ;;  %5949 = vmatpush3.bf16.xpose.msra.mxu0 %v2597_v41  ;;  %v2606_v0 = vsel %vm1671_vm0, %v8670_v33, 0 }
 0x6d4   : > { %v8705_v45 = vpop.eup %6580  ;;  %v2278_v17 = vpop.xlane.xlu1 %2277  ;;  %6141 = vmatprep.subr.msk.bf16.mxu0 %vm1671_vm0, %v8664_v13 }
 0x6d5   : > { %v2300_v60 = vsub.f32 %v8609_v58, %v2278_v17  ;;  %v2389_v32 = vpack.c.bf16 %v8705_v45, %v8701_v57  ;;  %v8712_v7 = vpop.eup %6582  ;;  %6588 = vpow2.f32 %v2329_v35  ;;  %v2600_v58 = vsel %vm1671_vm0, %v8664_v13, 0 }
 0x6d7   : > { %v8714_v19 = vpop.eup %6584  ;;  %v2325_v47 = vmul.f32 1.442695, %v2300_v60  ;;  %5936 = vmatprep.mubr.bf16.mxu0 %v2389_v32 }
 0x6d8   : > { %v2390_v10 = vpack.c.bf16 %v8714_v19, %v8712_v7  ;;  %v2288_v28 = vpop.xlane.xlu1 %2287 }
 0x6d9   : > { %6590 = vpow2.f32 %v2325_v47 }
 0x6da   : > { %6592 = vpow2.f32 %v2327_v44  ;;  %5937 = vmatmul.mubr.bf16.gmra.mrb[52].mxu0 %v2390_v10 }
 0x6db   : > { %5951 = vmatpush3.bf16.xpose.msra.mxu0 %v2600_v58  ;;  %v8722_v59 = vpop.eup %6586 }
 0x6dc   : > { %6142 = vmatprep.subr.msk.bf16.mxu0 %vm1671_vm0, %v8672_v27  ;;  %v2290_v2 = vpop.xlane.xlu1 %2289  ;;  %v2284_v27 = vpop.xlane.xlu0 %2283 }
 0x6dd   : > { %v2303_v35 = vsub.f32 %v8604_v21, %v2284_v27  ;;  %v2306_v17 = vsub.f32 %v8617_v49, %v2290_v2 }
 0x6df   : > { %v8724_v20 = vpop.eup %6588  ;;  %v2331_v60 = vmul.f32 1.442695, %v2303_v35  ;;  %v2337_v32 = vmul.f32 1.442695, %v2306_v17 }
 0x6e0   : > { %v2565_v50 = vpop.permute.xlu1 %2564  ;;  %v2567_v5 = vpop.permute.xlu0 %2566 }
 0x6e1   : > { %v2609_v42 = vsel %vm1671_vm0, %v2565_v50, 0  ;;  %v2612_v41 = vsel %vm1671_vm0, %v2567_v5, 0  ;;  %6594 = vpow2.f32 %v2331_v60 }
 0x6e2   : > { %6596 = vpow2.f32 %v2337_v32 }
 0x6e3   : > { %v8726_v38 = vpop.eup %6590  ;;  %5953 = vmatpush3.bf16.xpose.msra.mxu0 %v2603_v31 }
 0x6e4   : > { %v8730_v56 = vpop.eup %6592  ;;  %v2391_v13 = vpack.c.bf16 %v8726_v38, %v8722_v59  ;;  %6143 = vmatprep.subr.msk.bf16.mxu0 %vm1671_vm0, %v8670_v33  ;;  %v2305_v33 = vsub.f32 %v8613_v30, %v2288_v28  ;;  %v2543_v31 = vpop.permute.xlu1 %2542 }
 0x6e5   : > { %10645 = vst [vmem:[#allocation59_spill] sm:$0xff] %v8730_v56  ;;  %v2392_v52 = vpack.c.bf16 %v8724_v20, %v8730_v56 }
 0x6e6   : > { %5940 = vmatprep.mubr.bf16.mxu0 %v2391_v13  ;;  %v2335_v10 = vmul.f32 1.442695, %v2305_v33 }
 0x6e7   : > { %5941 = vmatmul.mubr.bf16.gmra.mrb[56].mxu0 %v2392_v52 }
 0x6e8   : > { %v2547_v30 = vpop.permute.xlu1 %2546 }
 0x6eb   : > { %5955 = vmatpush3.bf16.xpose.msra.mxu0 %v2606_v0  ;;  %v8751_v52 = vpop.eup %6594 }
 0x6ec   : > { %6144 = vmatprep.subr.msk.bf16.mxu0 %vm1671_vm0, %v2565_v50  ;;  %10646 = vst [vmem:[#allocation60_spill] sm:$0xff] %v8751_v52  ;;  %v8754_v2 = vpop.eup %6596  ;;  %v2551_v27 = vpop.permute.xlu1 %2550 }
 0x6ed   : > { %10647 = vst [vmem:[#allocation54_spill] sm:$0xff] %v8754_v2 }
 0x6f0   : > { %v2555_v17 = vpop.permute.xlu1 %2554 }
 0x6f3   : > { %5957 = vmatpush3.bf16.xpose.msra.mxu0 %v2609_v42 }
 0x6f4   : > { %6145 = vmatprep.subr.msk.bf16.mxu0 %vm1671_vm0, %v2567_v5  ;;  %v2856_v60 = vpop.permute.xlu1 %2855 }
 0x6fb   : > { %5959 = vmatpush3.bf16.xpose.msra.mxu0 %v2612_v41 }
 0x706   : > { %v2286_v44 = vpop.xlane.xlu0 %2285 }
 0x707   : > { %v2304_v47 = vsub.f32 %v8635_v12, %v2286_v44  ;;  %v2860_v44 = vpop.permute.xlu1 %2859 }
 0x709   : > { %v2333_v58 = vmul.f32 1.442695, %v2304_v47 }
 0x70a   : > { %v2569_v13 = vpop.permute.xlu0 %2568 }
 0x70b   : > { %6598 = vpow2.f32 %v2333_v58  ;;  %6146 = vmatprep.subr.msk.bf16.mxu0 %vm1671_vm0, %v2569_v13  ;;  %v2615_v21 = vsel %vm1671_vm0, %v2569_v13, 0 }
 0x70c   : > { %6600 = vpow2.f32 %v2335_v10  ;;  %5961 = vmatpush3.bf16.xpose.msra.mxu0 %v2615_v21  ;;  %v2862_v10 = vpop.permute.xlu1 %2861 }
 0x70e   : > { %v2571_v49 = vpop.permute.xlu0 %2570 }
 0x70f   : > { %6147 = vmatprep.subr.msk.bf16.mxu0 %vm1671_vm0, %v2571_v49  ;;  %v2618_v12 = vsel %vm1671_vm0, %v2571_v49, 0 }
 0x710   : > { %v2864_v58 = vpop.permute.xlu1 %2863 }
 0x712   : > { %v2541_v28 = vpop.permute.xlu0 %2540 }
 0x714   : > { %5963 = vmatpush3.bf16.xpose.msra.mxu0 %v2618_v12  ;;  %v2868_v13 = vpop.permute.xlu1 %2867 }
 0x715   : > { %v8756_v0 = vpop.eup %6598 }
 0x716   : > { %10648 = vst [vmem:[#allocation56_spill] sm:$0xff] %v8756_v0  ;;  %v8758_v50 = vpop.eup %6600  ;;  %v2545_v42 = vpop.permute.xlu0 %2544  ;;  %v2393_v5 = vpack.c.bf16 %v8756_v0, %v8751_v52 }
 0x717   : > { %10649 = vst [vmem:[#allocation58_spill] sm:$0xff] %v8758_v50  ;;  %v2394_v41 = vpack.c.bf16 %v8754_v2, %v8758_v50 }
 0x718   : > { %5944 = vmatprep.mubr.bf16.mxu0 %v2393_v5 }
 0x719   : > { %5945 = vmatmul.mubr.bf16.gmra.mrb[60].mxu0 %v2394_v41 }
 0x71a   : > { %5964 = vmatprep.mubr.msk.bf16.mxu0 %vm1671_vm0, %v2541_v28  ;;  %v2549_v35 = vpop.permute.xlu0 %2548 }
 0x71e   : > { %v2553_v33 = vpop.permute.xlu0 %2552 }
 0x721   : > { %5965 = vmatmul.mubr.msk.bf16.vlgmr.msra.gmra.mrb[64].mxu0 %vm1671_vm0, %v2543_v31 }
 0x722   : > { %5968 = vmatprep.mubr.msk.bf16.mxu0 %vm1671_vm0, %v2545_v42  ;;  %v2854_v32 = vpop.permute.xlu0 %2853 }
 0x723   : > { %5980 = vmatprep.subr.bf16.mxu1 %v2854_v32 }
 0x724   : > { %5981 = vmatpush3.bf16.msra.mxu1 %v2854_v32 }
 0x725   : > { %5982 = vmatprep.subr.bf16.mxu1 %v2856_v60 }
 0x726   : > { %v2858_v47 = vpop.permute.xlu0 %2857 }
 0x728   : > { %5983 = vmatpush3.bf16.msra.mxu1 %v2856_v60 }
 0x729   : > { %5969 = vmatmul.mubr.msk.bf16.gmra.mrb[68].mxu0 %vm1671_vm0, %v2547_v30  ;;  %5984 = vmatprep.subr.bf16.mxu1 %v2858_v47 }
 0x72a   : > { %5972 = vmatprep.mubr.msk.bf16.mxu0 %vm1671_vm0, %v2549_v35  ;;  %v2866_v31 = vpop.permute.xlu0 %2865 }
 0x72c   : > { %5985 = vmatpush3.bf16.msra.mxu1 %v2858_v47 }
 0x72d   : > { %5986 = vmatprep.subr.bf16.mxu1 %v2860_v44 }
 0x72e   : > { %v8772_v21 = vpop.permute.xlu0 %3006 }
 0x730   : > { %5987 = vmatpush3.bf16.msra.mxu1 %v2860_v44 }
 0x731   : > { %5973 = vmatmul.mubr.msk.bf16.gmra.mrb[72].mxu0 %vm1671_vm0, %v2551_v27  ;;  %5988 = vmatprep.subr.bf16.mxu1 %v2862_v10 }
 0x732   : > { %5976 = vmatprep.mubr.msk.bf16.mxu0 %vm1671_vm0, %v2553_v33 }
 0x734   : > { %5989 = vmatpush3.bf16.msra.mxu1 %v2862_v10 }
 0x735   : > { %5990 = vmatprep.subr.bf16.mxu1 %v2864_v58 }
 0x738   : > { %5991 = vmatpush3.bf16.msra.mxu1 %v2864_v58 }
 0x739   : > { %5977 = vmatmul.mubr.msk.bf16.gmra.mrb[76].mxu0 %vm1671_vm0, %v2555_v17  ;;  %5992 = vmatprep.subr.bf16.mxu1 %v2866_v31 }
 0x73c   : > { %5993 = vmatpush3.bf16.msra.mxu1 %v2866_v31  ;;  %v8811_v31 = vld [vmem:[%s10604_s22 + $0x10] sm:$0xff] }
 0x73d   : > { %5994 = vmatprep.subr.bf16.mxu1 %v2868_v13 }
 0x740   : > { %5995 = vmatpush3.bf16.msra.mxu1 %v2868_v13 }
 0x741   : > { %6148 = vmatprep.subr.msk.bf16.mxu1 %vm1671_vm0, %v8772_v21 }
 0x7a5   : > { %v8776_v49 = vpop.f32.mrb[48].mxu0 }
 0x7a6   : > { %10650 = vst [vmem:[#allocation53_spill] sm:$0xff] %v8776_v49  ;;  %v8778_v30 = vpop.f32.mrb[49].mxu0 }
 0x7a7   : > { %v8780_v28 = vpop.f32.mrb[50].mxu0 }
 0x7a8   : > { %10651 = vst [vmem:[#allocation55_spill] sm:$0xff] %v8780_v28  ;;  %v8782_v12 = vpop.f32.mrb[51].mxu0 }
 0x7ad   : > { %v8784_v27 = vpop.f32.mrb[52].mxu0 }
 0x7ae   : > { %10652 = vst [vmem:[#allocation57_spill] sm:$0xff] %v8784_v27  ;;  %v8786_v42 = vpop.f32.mrb[53].mxu0 }
 0x7af   : > { %10653 = vst [vmem:[#allocation93_spill] sm:$0xff] %v8786_v42  ;;  %v8788_v5 = vpop.f32.mrb[54].mxu0 }
 0x7b0   : > { %10654 = vst [vmem:[#allocation94_spill] sm:$0xff] %v8788_v5  ;;  %v8790_v41 = vpop.f32.mrb[55].mxu0  ;;  %v8846_v5 = vld [vmem:[%s10604_s22 + $0x30] sm:$0xff] }
 0x7b1   : > { %10655 = vst [vmem:[#allocation95_spill] sm:$0xff] %v8790_v41 }
 0x7ba   : > { %v8792_v35 = vpop.f32.mrb[56].mxu0 }
 0x7bb   : > { %10656 = vst [vmem:[#allocation96_spill] sm:$0xff] %v8792_v35  ;;  %v8794_v17 = vpop.f32.mrb[57].mxu0 }
 0x7bc   : > { %10657 = vst [vmem:[#allocation97_spill] sm:$0xff] %v8794_v17  ;;  %v8796_v33 = vpop.f32.mrb[58].mxu0 }
 0x7bd   : > { %10658 = vst [vmem:[#allocation98_spill] sm:$0xff] %v8796_v33  ;;  %v8798_v60 = vpop.f32.mrb[59].mxu0 }
 0x7be   : > { %10659 = vst [vmem:[#allocation99_spill] sm:$0xff] %v8798_v60  ;;  %v8838_v60 = vld [vmem:[%s10604_s22 + $0x18] sm:$0xff] }
 0x7ec   : > { %v8800_v32 = vpop.f32.mrb[60].mxu0 }
 0x7ed   : > { %10660 = vst [vmem:[#allocation100_spill] sm:$0xff] %v8800_v32  ;;  %v8802_v44 = vpop.f32.mrb[61].mxu0 }
 0x7ee   : > { %10661 = vst [vmem:[#allocation101_spill] sm:$0xff] %v8802_v44  ;;  %v8804_v47 = vpop.f32.mrb[62].mxu0  ;;  %v8828_v44 = vld [vmem:[%s10604_s22] sm:$0xff] }
 0x7ef   : > { %10662 = vst [vmem:[#allocation102_spill] sm:$0xff] %v8804_v47  ;;  %v8806_v10 = vpop.f32.mrb[63].mxu0  ;;  %v8820_v47 = vld [vmem:[%s10604_s22 + $0x8] sm:$0xff] }
 0x7f0   : > { %10663 = vst [vmem:[#allocation103_spill] sm:$0xff] %v8806_v10 }
 0x7f4   : > { %v5966_v58 = vpop.f32.mrb[64].mxu0 }
 0x7f5   : > { %v8814_v13 = vadd.f32 %v8811_v31, %v5966_v58  ;;  %v2654_v35 = vpop.f32.mrb[65].mxu0 }
 0x7f6   : > { %v5967_v33 = vpop.f32.mrb[66].mxu0  ;;  %v8831_v58 = vadd.f32 %v8828_v44, %v2654_v35 }
 0x7f7   : > { %2721 = vmax.xlane.f32.xlu0 %v8814_v13  ;;  %v2657_v32 = vpop.f32.mrb[67].mxu0 }
 0x7f8   : > { %v8823_v10 = vadd.f32 %v8820_v47, %v2657_v32  ;;  %v8841_v32 = vadd.f32 %v8838_v60, %v5967_v33  ;;  %v8859_v33 = vld [vmem:[%s10604_s22 + $0x20] sm:$0xff] }
 0x7fa   : > { %2719 = vmax.xlane.f32.xlu1 %v8823_v10 }
 0x7fb   : > { %2717 = vmax.xlane.f32.xlu0 %v8831_v58 }
 0x7fc   : > { %v5970_v17 = vpop.f32.mrb[68].mxu0 }
 0x7fd   : > { %v8849_v35 = vadd.f32 %v8846_v5, %v5970_v17  ;;  %v2670_v27 = vpop.f32.mrb[69].mxu0 }
 0x7fe   : > { %v5971_v41 = vpop.f32.mrb[70].mxu0  ;;  %v8862_v28 = vadd.f32 %v8859_v33, %v2670_v27 }
 0x7ff   : > { %2723 = vmax.xlane.f32.xlu0 %v8841_v32  ;;  %2729 = vmax.xlane.f32.xlu1 %v8849_v35  ;;  %v2673_v42 = vpop.f32.mrb[71].mxu0 }
 0x800   : > { %v8854_v49 = vadd.f32 %v2673_v42, %v8321_v18  ;;  %v8872_v18 = vadd.f32 %v8869_v43, %v5971_v41 }
 0x803   : > { %2727 = vmax.xlane.f32.xlu0 %v8854_v49  ;;  %2725 = vmax.xlane.f32.xlu1 %v8862_v28 }
 0x804   : > { %v5974_v17 = vpop.f32.mrb[72].mxu0 }
 0x805   : > { %v8875_v42 = vadd.f32 %v5974_v17, %v8339_v15  ;;  %v2686_v8 = vpop.f32.mrb[73].mxu0 }
 0x806   : > { %v5975_v9 = vpop.f32.mrb[74].mxu0  ;;  %v8885_v2 = vadd.f32 %v8882_v62, %v2686_v8  ;;  %v8899_v8 = vld [vmem:[%s10604_s22 + $0x48] sm:$0xff] }
 0x807   : > { %2731 = vmax.xlane.f32.xlu1 %v8872_v18  ;;  %2737 = vmax.xlane.f32.xlu0 %v8875_v42  ;;  %v2689_v27 = vpop.f32.mrb[75].mxu0  ;;  %v8889_v15 = vadd.f32 %v5975_v9, %v8352_v25  ;;  %v8908_v25 = vld [vmem:[%s10604_s22 + $0x70] sm:$0xff]  ;;  %v8917_v9 = vld [vmem:[%s10604_s22 + $0x78] sm:$0xff] }
 0x808   : > { %v8902_v56 = vadd.f32 %v8899_v8, %v2689_v27 }
 0x80b   : > { %2733 = vmax.xlane.f32.xlu1 %v8885_v2 }
 0x80c   : > { %v5978_v41 = vpop.f32.mrb[76].mxu0 }
 0x80d   : > { %v2702_v17 = vpop.f32.mrb[77].mxu0 }
 0x80e   : > { %v8892_v0 = vadd.f32 %v2702_v17, %v8361_v54  ;;  %v5979_v50 = vpop.f32.mrb[78].mxu0  ;;  %v8911_v54 = vadd.f32 %v8908_v25, %v5978_v41 }
 0x80f   : > { %2739 = vmax.xlane.f32.xlu1 %v8889_v15  ;;  %v2705_v52 = vpop.f32.mrb[79].mxu0  ;;  %v8920_v27 = vadd.f32 %v8917_v9, %v5979_v50 }
 0x810   : > { %2741 = vmax.xlane.f32.xlu0 %v8892_v0 }
 0x813   : > { %2735 = vmax.xlane.f32.xlu1 %v8902_v56 }
 0x817   : > { %2745 = vmax.xlane.f32.xlu1 %v8911_v54 }
 0x81b   : > { %2747 = vmax.xlane.f32.xlu1 %v8920_v27 }
 0x826   : > { %3016 = vrot.lane.b32.xlu0 %v8188_v23, %s7268_s7  ;;  %v8940_v23 = vld [vmem:[%s10604_s22 + $0x68] sm:$0xff] }
 0x82c   : > { %3014 = vrot.lane.b32.xlu1 %v8174_v63, %s7268_s7  ;;  %v8943_v63 = vadd.f32 %v8940_v23, %v2705_v52 }
 0x830   : > { %2992 = vrot.lane.b32.xlu1 %v8101_v55, %s7268_s7  ;;  %v8973_v55 = vpop.permute.xlu1 %3010 }
 0x834   : > { %2996 = vrot.lane.b32.xlu1 %v8153_v16, %s7268_s7 }
 0x838   : > { %3000 = vrot.lane.b32.xlu1 %v8190_v29, %s7268_s7 }
 0x83c   : > { %3004 = vrot.lane.b32.xlu1 %v8214_v61, %s7268_s7 }
 0x840   : > { %3305 = vrot.lane.b32.xlu1 %v8086_v39, %s7268_s7  ;;  %v8965_v39 = vpop.permute.xlu0 %3008 }
 0x844   : > { %3313 = vrot.lane.b32.xlu1 %v8139_v48, %s7268_s7 }
 0x845   : > { %2743 = vmax.xlane.f32.xlu0 %v8943_v63 }
 0x85b   : > { %3018 = vrot.lane.b32.xlu0 %v8200_v46, %s7268_s7 }
 0x85f   : > { %3020 = vrot.lane.b32.xlu0 %v8212_v40, %s7268_s7 }
 0x863   : > { %2990 = vrot.lane.b32.xlu0 %v8074_v26, %s7268_s7  ;;  %v8971_v26 = vpop.permute.xlu0 %3012 }
 0x867   : > { %2994 = vrot.lane.b32.xlu0 %v8127_v37, %s7268_s7 }
 0x868   : > { %2341 = vadd.xlane.f32.xlu1 %v8686_v4 }
 0x86b   : > { %2998 = vrot.lane.b32.xlu0 %v10637_v1, %s7268_s7 }
 0x86f   : > { %3002 = vrot.lane.b32.xlu0 %v10638_v24, %s7268_s7 }
 0x873   : > { %3303 = vrot.lane.b32.xlu0 %v10639_v36, %s7268_s7 }
 0x877   : > { %3307 = vrot.lane.b32.xlu0 %v10640_v14, %s7268_s7 }
 0x87b   : > { %3309 = vrot.lane.b32.xlu0 %v8113_v11, %s7268_s7 }
 0x87f   : > { %3311 = vrot.lane.b32.xlu0 %v8143_v53, %s7268_s7 }
 0x883   : > { %3315 = vrot.lane.b32.xlu0 %v10641_v6, %s7268_s7 }
 0x884   : > { %v2722_v37 = vpop.xlane.xlu0 %2721 }
 0x885   : > { %v2751_v11 = vsub.f32 %v8814_v13, %v2722_v37 }
 0x887   : > { %v2720_v48 = vpop.xlane.xlu1 %2719  ;;  %3317 = vrot.lane.b32.xlu0 %v8163_v34, %s7268_s7  ;;  %v2769_v24 = vmul.f32 1.442695, %v2751_v11 }
 0x888   : > { %v2750_v16 = vsub.f32 %v8823_v10, %v2720_v48  ;;  %v2718_v29 = vpop.xlane.xlu0 %2717 }
 0x889   : > { %v2749_v46 = vsub.f32 %v8831_v58, %v2718_v29 }
 0x88a   : > { %v2767_v53 = vmul.f32 1.442695, %v2750_v16 }
 0x88b   : > { %v2765_v40 = vmul.f32 1.442695, %v2749_v46 }
 0x88c   : > { %6602 = vpow2.f32 %v2767_v53  ;;  %v2730_v61 = vpop.xlane.xlu1 %2729  ;;  %v2724_v1 = vpop.xlane.xlu0 %2723 }
 0x88d   : > { %6604 = vpow2.f32 %v2765_v40  ;;  %v2752_v36 = vsub.f32 %v8841_v32, %v2724_v1  ;;  %v2755_v6 = vsub.f32 %v8849_v35, %v2730_v61 }
 0x88e   : > { %6606 = vpow2.f32 %v2769_v24  ;;  %v3047_v24 = vsel %vm1671_vm0, %v8772_v21, 0 }
 0x88f   : > { %v2771_v14 = vmul.f32 1.442695, %v2752_v36  ;;  %v2777_v58 = vmul.f32 1.442695, %v2755_v6 }
 0x890   : > { %v2726_v34 = vpop.xlane.xlu1 %2725  ;;  %v2728_v4 = vpop.xlane.xlu0 %2727 }
 0x891   : > { %v2753_v52 = vsub.f32 %v8862_v28, %v2726_v34  ;;  %v2754_v50 = vsub.f32 %v8854_v49, %v2728_v4  ;;  %6608 = vpow2.f32 %v2771_v14 }
 0x893   : > { %v2773_v10 = vmul.f32 1.442695, %v2753_v52  ;;  %v2775_v13 = vmul.f32 1.442695, %v2754_v50 }
 0x894   : > { %v2732_v41 = vpop.xlane.xlu1 %2731  ;;  %v2738_v16 = vpop.xlane.xlu0 %2737 }
 0x895   : > { %6610 = vpow2.f32 %v2773_v10  ;;  %v2756_v17 = vsub.f32 %v8872_v18, %v2732_v41  ;;  %v2759_v40 = vsub.f32 %v8875_v42, %v2738_v16  ;;  %v3053_v41 = vsel %vm1671_vm0, %v8973_v55, 0 }
 0x896   : > { %v8987_v37 = vpop.eup %6602  ;;  %6612 = vpow2.f32 %v2775_v13 }
 0x897   : > { %v8989_v32 = vpop.eup %6604  ;;  %v2779_v35 = vmul.f32 1.442695, %v2756_v17  ;;  %6614 = vpow2.f32 %v2777_v58  ;;  %v2785_v34 = vmul.f32 1.442695, %v2759_v40 }
 0x898   : > { %v2734_v48 = vpop.xlane.xlu1 %2733  ;;  %v2845_v28 = vpack.c.bf16 %v8987_v37, %v8989_v32  ;;  %v8993_v49 = vpop.eup %6606 }
 0x899   : > { %6616 = vpow2.f32 %v2779_v35  ;;  %v2757_v29 = vsub.f32 %v8885_v2, %v2734_v48  ;;  %v3056_v48 = vsel %vm1671_vm0, %v8971_v26, 0 }
 0x89a   : > { %5996 = vmatprep.mubr.bf16.mxu1 %v2845_v28 }
 0x89b   : > { %v8996_v11 = vpop.eup %6608  ;;  %v2781_v1 = vmul.f32 1.442695, %v2757_v29 }
 0x89c   : > { %v2740_v18 = vpop.xlane.xlu1 %2739  ;;  %v2846_v53 = vpack.c.bf16 %v8996_v11, %v8993_v49 }
 0x89d   : > { %v2760_v46 = vsub.f32 %v8889_v15, %v2740_v18  ;;  %6618 = vpow2.f32 %v2781_v1 }
 0x89e   : > { %5997 = vmatmul.mubr.bf16.vlgmr.msra.gmra.mrb[48].mxu1 %v2846_v53 }
 0x89f   : > { %v9002_v61 = vpop.eup %6610  ;;  %v2787_v2 = vmul.f32 1.442695, %v2760_v46  ;;  %6013 = vmatpush3.bf16.xpose.msra.mxu1 %v3047_v24 }
 0x8a0   : > { %v9006_v36 = vpop.eup %6612  ;;  %v2736_v14 = vpop.xlane.xlu1 %2735  ;;  %6149 = vmatprep.subr.msk.bf16.mxu1 %vm1671_vm0, %v8965_v39 }
 0x8a1   : > { %v2758_v15 = vsub.f32 %v8902_v56, %v2736_v14  ;;  %v2847_v42 = vpack.c.bf16 %v9006_v36, %v9002_v61  ;;  %v9013_v6 = vpop.eup %6614  ;;  %6620 = vpow2.f32 %v2787_v2  ;;  %v3050_v56 = vsel %vm1671_vm0, %v8965_v39, 0 }
 0x8a3   : > { %v9015_v4 = vpop.eup %6616  ;;  %v2783_v21 = vmul.f32 1.442695, %v2758_v15  ;;  %6000 = vmatprep.mubr.bf16.mxu1 %v2847_v42 }
 0x8a4   : > { %v2848_v52 = vpack.c.bf16 %v9015_v4, %v9013_v6  ;;  %v2746_v50 = vpop.xlane.xlu1 %2745 }
 0x8a5   : > { %6622 = vpow2.f32 %v2783_v21 }
 0x8a6   : > { %6624 = vpow2.f32 %v2785_v34  ;;  %2339 = vadd.xlane.f32.xlu0 %v8688_v51  ;;  %6001 = vmatmul.mubr.bf16.gmra.mrb[52].mxu1 %v2848_v52 }
 0x8a7   : > { %6015 = vmatpush3.bf16.xpose.msra.mxu1 %v3050_v56  ;;  %v9024_v10 = vpop.eup %6618 }
 0x8a8   : > { %6150 = vmatprep.subr.msk.bf16.mxu1 %vm1671_vm0, %v8973_v55  ;;  %v2748_v35 = vpop.xlane.xlu1 %2747  ;;  %v2742_v55 = vpop.xlane.xlu0 %2741 }
 0x8a9   : > { %v2761_v46 = vsub.f32 %v8892_v0, %v2742_v55  ;;  %v2764_v53 = vsub.f32 %v8920_v27, %v2748_v35 }
 0x8ab   : > { %v9026_v13 = vpop.eup %6620  ;;  %v2789_v40 = vmul.f32 1.442695, %v2761_v46  ;;  %v2795_v1 = vmul.f32 1.442695, %v2764_v53 }
 0x8ac   : > { %v3015_v28 = vpop.permute.xlu1 %3014  ;;  %v3017_v29 = vpop.permute.xlu0 %3016 }
 0x8ad   : > { %v3059_v16 = vsel %vm1671_vm0, %v3015_v28, 0  ;;  %v3062_v18 = vsel %vm1671_vm0, %v3017_v29, 0  ;;  %6626 = vpow2.f32 %v2789_v40 }
 0x8ae   : > { %6628 = vpow2.f32 %v2795_v1 }
 0x8af   : > { %v9028_v58 = vpop.eup %6622  ;;  %6017 = vmatpush3.bf16.xpose.msra.mxu1 %v3053_v41 }
 0x8b0   : > { %v9032_v17 = vpop.eup %6624  ;;  %v2849_v51 = vpack.c.bf16 %v9028_v58, %v9024_v10  ;;  %6151 = vmatprep.subr.msk.bf16.mxu1 %vm1671_vm0, %v8971_v26  ;;  %v2763_v26 = vsub.f32 %v8911_v54, %v2746_v50  ;;  %v2993_v0 = vpop.permute.xlu1 %2992 }
 0x8b1   : > { %v2850_v39 = vpack.c.bf16 %v9026_v13, %v9032_v17 }
 0x8b2   : > { %6004 = vmatprep.mubr.bf16.mxu1 %v2849_v51  ;;  %v2793_v14 = vmul.f32 1.442695, %v2763_v26 }
 0x8b3   : > { %6005 = vmatmul.mubr.bf16.gmra.mrb[56].mxu1 %v2850_v39 }
 0x8b4   : > { %v2997_v54 = vpop.permute.xlu1 %2996 }
 0x8b7   : > { %6019 = vmatpush3.bf16.xpose.msra.mxu1 %v3056_v48  ;;  %v9053_v52 = vpop.eup %6626 }
 0x8b8   : > { %6152 = vmatprep.subr.msk.bf16.mxu1 %vm1671_vm0, %v3015_v28  ;;  %v9056_v56 = vpop.eup %6628  ;;  %v3001_v48 = vpop.permute.xlu1 %3000 }
 0x8bc   : > { %v3005_v55 = vpop.permute.xlu1 %3004 }
 0x8bf   : > { %6021 = vmatpush3.bf16.xpose.msra.mxu1 %v3059_v16 }
 0x8c0   : > { %6153 = vmatprep.subr.msk.bf16.mxu1 %vm1671_vm0, %v3017_v29 }
 0x8c7   : > { %6023 = vmatpush3.bf16.xpose.msra.mxu1 %v3062_v18  ;;  %v3306_v18 = vpop.permute.xlu1 %3305 }
 0x8cb   : > { %v3314_v40 = vpop.permute.xlu1 %3313 }
 0x8d2   : > { %v2744_v24 = vpop.xlane.xlu0 %2743 }
 0x8d3   : > { %v2762_v2 = vsub.f32 %v8943_v63, %v2744_v24  ;;  %v10664_v24 = vmov 0  }
 0x8d5   : > { %v2791_v15 = vmul.f32 1.442695, %v2762_v2 }
 0x8d6   : > { %v3019_v42 = vpop.permute.xlu0 %3018 }
 0x8d7   : > { %6630 = vpow2.f32 %v2791_v15  ;;  %6154 = vmatprep.subr.msk.bf16.mxu1 %vm1671_vm0, %v3019_v42  ;;  %v3065_v34 = vsel %vm1671_vm0, %v3019_v42, 0 }
 0x8d8   : > { %6632 = vpow2.f32 %v2793_v14  ;;  %6025 = vmatpush3.bf16.xpose.msra.mxu1 %v3065_v34 }
 0x8da   : > { %v3021_v27 = vpop.permute.xlu0 %3020 }
 0x8db   : > { %6155 = vmatprep.subr.msk.bf16.mxu1 %vm1671_vm0, %v3021_v27  ;;  %v3068_v63 = vsel %vm1671_vm0, %v3021_v27, 0 }
 0x8de   : > { %v2991_v21 = vpop.permute.xlu0 %2990 }
 0x8e0   : > { %6027 = vmatpush3.bf16.xpose.msra.mxu1 %v3068_v63 }
 0x8e1   : > { %v9058_v50 = vpop.eup %6630 }
 0x8e2   : > { %v9060_v41 = vpop.eup %6632  ;;  %v2995_v51 = vpop.permute.xlu0 %2994  ;;  %v2851_v39 = vpack.c.bf16 %v9058_v50, %v9053_v52 }
 0x8e3   : > { %v2852_v35 = vpack.c.bf16 %v9056_v56, %v9060_v41 }
 0x8e4   : > { %6008 = vmatprep.mubr.bf16.mxu1 %v2851_v39 }
 0x8e5   : > { %6009 = vmatmul.mubr.bf16.gmra.mrb[60].mxu1 %v2852_v35 }
 0x8e6   : > { %6028 = vmatprep.mubr.msk.bf16.mxu1 %vm1671_vm0, %v2991_v21  ;;  %v2999_v28 = vpop.permute.xlu0 %2998 }
 0x8ea   : > { %v3003_v16 = vpop.permute.xlu0 %3002 }
 0x8ed   : > { %6029 = vmatmul.mubr.msk.bf16.vlgmr.msra.gmra.mrb[64].mxu1 %vm1671_vm0, %v2993_v0 }
 0x8ee   : > { %6032 = vmatprep.mubr.msk.bf16.mxu1 %vm1671_vm0, %v2995_v51  ;;  %v3304_v29 = vpop.permute.xlu0 %3303 }
 0x8ef   : > { %6044 = vmatprep.subr.bf16.mxu0 %v3304_v29 }
 0x8f0   : > { %6045 = vmatpush3.bf16.msra.mxu0 %v3304_v29 }
 0x8f1   : > { %6046 = vmatprep.subr.bf16.mxu0 %v3306_v18 }
 0x8f2   : > { %v3308_v46 = vpop.permute.xlu0 %3307 }
 0x8f4   : > { %6047 = vmatpush3.bf16.msra.mxu0 %v3306_v18 }
 0x8f5   : > { %6033 = vmatmul.mubr.msk.bf16.gmra.mrb[68].mxu1 %vm1671_vm0, %v2997_v54  ;;  %6048 = vmatprep.subr.bf16.mxu0 %v3308_v46  ;;  %v2342_v14 = vpop.xlane.xlu1 %2341 }
 0x8f6   : > { %6036 = vmatprep.mubr.msk.bf16.mxu1 %vm1671_vm0, %v2999_v28  ;;  %v3310_v53 = vpop.permute.xlu0 %3309  ;;  %6634 = vrcp.f32 %v2342_v14 }
 0x8f8   : > { %6049 = vmatpush3.bf16.msra.mxu0 %v3308_v46 }
 0x8f9   : > { %6050 = vmatprep.subr.bf16.mxu0 %v3310_v53 }
 0x8fa   : > { %v3312_v26 = vpop.permute.xlu0 %3311 }
 0x8fc   : > { %6051 = vmatpush3.bf16.msra.mxu0 %v3310_v53 }
 0x8fd   : > { %6037 = vmatmul.mubr.msk.bf16.gmra.mrb[72].mxu1 %vm1671_vm0, %v3001_v48  ;;  %6052 = vmatprep.subr.bf16.mxu0 %v3312_v26 }
 0x8fe   : > { %6040 = vmatprep.mubr.msk.bf16.mxu1 %vm1671_vm0, %v3003_v16  ;;  %v3316_v1 = vpop.permute.xlu0 %3315 }
 0x900   : > { %6053 = vmatpush3.bf16.msra.mxu0 %v3312_v26  ;;  %v6635_v42 = vpop.eup %6634 }
 0x901   : > { %6054 = vmatprep.subr.bf16.mxu0 %v3314_v40  ;;  %v9079_v27 = vmul.f32 %v6635_v42, %v8782_v12 }
 0x902   : > { %v3318_v2 = vpop.permute.xlu0 %3317 }
 0x904   : > { %6055 = vmatpush3.bf16.msra.mxu0 %v3314_v40 }
 0x905   : > { %6041 = vmatmul.mubr.msk.bf16.gmra.mrb[76].mxu1 %vm1671_vm0, %v3005_v55  ;;  %6056 = vmatprep.subr.bf16.mxu0 %v3316_v1 }
 0x906   : > { %4244 = vmatprep.mubr.bf16.mxu1 %v10664_v24 }
 0x908   : > { %6057 = vmatpush3.bf16.msra.mxu0 %v3316_v1 }
 0x909   : > { %6058 = vmatprep.subr.bf16.mxu0 %v3318_v2 }
 0x90c   : > { %6059 = vmatpush3.bf16.msra.mxu0 %v3318_v2 }
 0x933   : > { %v2340_v15 = vpop.xlane.xlu0 %2339 }
 0x934   : > { %6636 = vrcp.f32 %v2340_v15 }
 0x93e   : > { %v6637_v34 = vpop.eup %6636 }
 0x93f   : > { %v9076_v0 = vmul.f32 %v6637_v34, %v8778_v30 }
 0x971   : > { %v9083_v21 = vpop.f32.mrb[48].mxu1 }
 0x972   : > { %v9085_v63 = vpop.f32.mrb[49].mxu1 }
 0x973   : > { %v9087_v51 = vpop.f32.mrb[50].mxu1 }
 0x974   : > { %v9089_v39 = vpop.f32.mrb[51].mxu1 }
 0x979   : > { %v9091_v35 = vpop.f32.mrb[52].mxu1 }
 0x97a   : > { %v9093_v48 = vpop.f32.mrb[53].mxu1 }
 0x97b   : > { %v9095_v30 = vpop.f32.mrb[54].mxu1 }
 0x97c   : > { %v9097_v28 = vpop.f32.mrb[55].mxu1 }
 0x986   : > { %v9099_v12 = vpop.f32.mrb[56].mxu1 }
 0x987   : > { %v9101_v55 = vpop.f32.mrb[57].mxu1 }
 0x988   : > { %v9103_v16 = vpop.f32.mrb[58].mxu1 }
 0x989   : > { %v9105_v29 = vpop.f32.mrb[59].mxu1 }
 0x9b8   : > { %v9107_v18 = vpop.f32.mrb[60].mxu1 }
 0x9b9   : > { %v9109_v46 = vpop.f32.mrb[61].mxu1 }
 0x9ba   : > { %v9111_v53 = vpop.f32.mrb[62].mxu1 }
 0x9bb   : > { %10665 = vst [vmem:[#allocation104_spill] sm:$0xff] %v9111_v53  ;;  %v9113_v26 = vpop.f32.mrb[63].mxu1 }
 0x9c0   : > { %v6030_v40 = vpop.f32.mrb[64].mxu1 }
 0x9c1   : > { %v9116_v1 = vadd.f32 %v8811_v31, %v6030_v40  ;;  %v3104_v2 = vpop.f32.mrb[65].mxu1 }
 0x9c2   : > { %v9119_v14 = vadd.f32 %v8828_v44, %v3104_v2  ;;  %v6031_v15 = vpop.f32.mrb[66].mxu1 }
 0x9c3   : > { %3171 = vmax.xlane.f32.xlu1 %v9116_v1  ;;  %v3107_v42 = vpop.f32.mrb[67].mxu1  ;;  %v9130_v40 = vadd.f32 %v8838_v60, %v6031_v15 }
 0x9c4   : > { %3167 = vmax.xlane.f32.xlu0 %v9119_v14 }
 0x9c7   : > { %2345 = vadd.xlane.f32.xlu1 %v8695_v22 }
 0x9c8   : > { %2343 = vadd.xlane.f32.xlu0 %v8692_v3  ;;  %v6034_v34 = vpop.f32.mrb[68].mxu1 }
 0x9c9   : > { %v3120_v54 = vpop.f32.mrb[69].mxu1  ;;  %v9143_v60 = vadd.f32 %v8846_v5, %v6034_v34 }
 0x9ca   : > { %v6035_v24 = vpop.f32.mrb[70].mxu1  ;;  %v9133_v22 = vadd.f32 %v8859_v33, %v3120_v54 }
 0x9cb   : > { %2799 = vadd.xlane.f32.xlu1 %v8987_v37  ;;  %v3123_v31 = vpop.f32.mrb[71].mxu1  ;;  %v9138_v37 = vadd.f32 %v8820_v47, %v3107_v42  ;;  %v6902_v47 = vld [vmem:[%s10604_s22 + $0x50] sm:$0xff] }
 0x9cc   : > { %2797 = vadd.xlane.f32.xlu0 %v8989_v32 }
 0x9cf   : > { %2803 = vadd.xlane.f32.xlu1 %v8996_v11 }
 0x9d0   : > { %2801 = vadd.xlane.f32.xlu0 %v8993_v49  ;;  %v6038_v44 = vpop.f32.mrb[72].mxu1 }
 0x9d1   : > { %v3136_v2 = vpop.f32.mrb[73].mxu1  ;;  %v9150_v54 = vadd.f32 %v6902_v47, %v6038_v44 }
 0x9d2   : > { %v6039_v3 = vpop.f32.mrb[74].mxu1  ;;  %v9158_v5 = vadd.f32 %v8882_v62, %v3136_v2  ;;  %v10680_v2 = vld [vmem:[#allocation70_spill] sm:$0xff] }
 0x9d3   : > { %3173 = vmax.xlane.f32.xlu1 %v9130_v40  ;;  %v3139_v53 = vpop.f32.mrb[75].mxu1 }
 0x9d4   : > { %3175 = vmax.xlane.f32.xlu0 %v9133_v22 }
 0x9d7   : > { %3169 = vmax.xlane.f32.xlu1 %v9138_v37 }
 0x9d8   : > { %2347 = vadd.xlane.f32.xlu0 %v8701_v57  ;;  %v6042_v32 = vpop.f32.mrb[76].mxu1  ;;  %v9155_v57 = vadd.f32 %v8869_v43, %v6035_v24  ;;  %v9182_v43 = vadd.f32 %v8899_v8, %v3139_v53  ;;  %v6905_v24 = vld [vmem:[%s10604_s22 + $0x60] sm:$0xff] }
 0x9d9   : > { %v3152_v49 = vpop.f32.mrb[77].mxu1  ;;  %v9177_v62 = vadd.f32 %v8908_v25, %v6042_v32 }
 0x9da   : > { %v6043_v33 = vpop.f32.mrb[78].mxu1  ;;  %v9187_v34 = vadd.f32 %v6905_v24, %v3152_v49 }
 0x9db   : > { %3179 = vmax.xlane.f32.xlu1 %v9143_v60  ;;  %v3155_v11 = vpop.f32.mrb[79].mxu1  ;;  %v9198_v8 = vadd.f32 %v8917_v9, %v6043_v33  ;;  %v10670_v9 = vld [vmem:[#allocation54_spill] sm:$0xff]  ;;  %v10681_v33 = vld [vmem:[#allocation71_spill] sm:$0xff] }
 0x9dc   : > { %2351 = vadd.xlane.f32.xlu0 %v8712_v7  ;;  %v6903_v7 = vld [vmem:[%s10604_s22 + $0x28] sm:$0xff]  ;;  %v9203_v25 = vadd.f32 %v8940_v23, %v3155_v11  ;;  %v10671_v23 = vld [vmem:[#allocation62_spill] sm:$0xff] }
 0x9dd   : > { %v9165_v15 = vadd.f32 %v6903_v7, %v3123_v31 }
 0x9df   : > { %2349 = vadd.xlane.f32.xlu1 %v8705_v45  ;;  %v6904_v45 = vld [vmem:[%s10604_s22 + $0x58] sm:$0xff] }
 0x9e0   : > { %3187 = vmax.xlane.f32.xlu0 %v9150_v54  ;;  %v9170_v42 = vadd.f32 %v6904_v45, %v6039_v3  ;;  %v10682_v45 = vld [vmem:[#allocation55_spill] sm:$0xff] }
 0x9e3   : > { %3181 = vmax.xlane.f32.xlu1 %v9155_v57 }
 0x9e4   : > { %3183 = vmax.xlane.f32.xlu0 %v9158_v5 }
 0x9e7   : > { %3177 = vmax.xlane.f32.xlu1 %v9165_v15 }
 0x9e8   : > { %3189 = vmax.xlane.f32.xlu0 %v9170_v42 }
 0x9eb   : > { %2353 = vadd.xlane.f32.xlu1 %v8714_v19  ;;  %v10666_v19 = vld [vmem:[#allocation59_spill] sm:$0xff] }
 0x9ec   : > { %2805 = vadd.xlane.f32.xlu0 %v9002_v61  ;;  %v10672_v61 = vld [vmem:[#allocation64_spill] sm:$0xff] }
 0x9ef   : > { %2807 = vadd.xlane.f32.xlu1 %v9006_v36  ;;  %v10673_v36 = vld [vmem:[#allocation63_spill] sm:$0xff] }
 0x9f0   : > { %3195 = vmax.xlane.f32.xlu0 %v9177_v62 }
 0x9f3   : > { %3185 = vmax.xlane.f32.xlu1 %v9182_v43 }
 0x9f4   : > { %3191 = vmax.xlane.f32.xlu0 %v9187_v34 }
 0x9f7   : > { %2811 = vadd.xlane.f32.xlu1 %v9015_v4  ;;  %v10675_v4 = vld [vmem:[#allocation61_spill] sm:$0xff] }
 0x9f8   : > { %2809 = vadd.xlane.f32.xlu0 %v9013_v6  ;;  %v10674_v6 = vld [vmem:[#allocation65_spill] sm:$0xff] }
 0x9fb   : > { %2357 = vadd.xlane.f32.xlu1 %v8726_v38  ;;  %v10669_v38 = vld [vmem:[#allocation56_spill] sm:$0xff] }
 0x9fc   : > { %2355 = vadd.xlane.f32.xlu0 %v8722_v59  ;;  %v10667_v59 = vld [vmem:[#allocation60_spill] sm:$0xff] }
 0x9ff   : > { %2361 = vadd.xlane.f32.xlu1 %v8724_v20  ;;  %v10668_v20 = vld [vmem:[#allocation58_spill] sm:$0xff] }
 0xa00   : > { %2359 = vadd.xlane.f32.xlu0 %v10666_v19 }
 0xa03   : > { %3197 = vmax.xlane.f32.xlu1 %v9198_v8 }
 0xa04   : > { %2813 = vadd.xlane.f32.xlu0 %v9024_v10  ;;  %v10676_v10 = vld [vmem:[#allocation69_spill] sm:$0xff] }
 0xa07   : > { %3193 = vmax.xlane.f32.xlu1 %v9203_v25 }
 0xa08   : > { %2817 = vadd.xlane.f32.xlu0 %v9032_v17  ;;  %v10679_v17 = vpack.i.bf16 %v9079_v27, %v9076_v0 }
 0xa0b   : > { %2815 = vadd.xlane.f32.xlu1 %v9028_v58  ;;  %v10678_v58 = vld [vmem:[#allocation66_spill] sm:$0xff] }
 0xa0c   : > { %2363 = vadd.xlane.f32.xlu0 %v10667_v59 }
 0xa0f   : > { %2819 = vadd.xlane.f32.xlu1 %v9026_v13  ;;  %v10677_v13 = vld [vmem:[#allocation68_spill] sm:$0xff] }
 0xa10   : > { %2367 = vadd.xlane.f32.xlu0 %v10668_v20  ;;  %v10683_v20 = vld [vmem:[#allocation53_spill] sm:$0xff] }
 0xa13   : > { %2365 = vadd.xlane.f32.xlu1 %v10669_v38 }
 0xa14   : > { %2821 = vadd.xlane.f32.xlu0 %v9053_v52 }
 0xa17   : > { %2369 = vadd.xlane.f32.xlu1 %v10670_v9 }
 0xa18   : > { %2825 = vadd.xlane.f32.xlu0 %v9060_v41 }
 0xa1b   : > { %2823 = vadd.xlane.f32.xlu1 %v9058_v50 }
 0xa1c   : > { %1897 = vadd.xlane.f32.xlu0 %v10671_v23 }
 0xa1f   : > { %2827 = vadd.xlane.f32.xlu1 %v9056_v56 }
 0xa20   : > { %1901 = vadd.xlane.f32.xlu0 %v10672_v61 }
 0xa23   : > { %1899 = vadd.xlane.f32.xlu1 %v10673_v36 }
 0xa24   : > { %1905 = vadd.xlane.f32.xlu0 %v10674_v6 }
 0xa27   : > { %1903 = vadd.xlane.f32.xlu1 %v10675_v4 }
 0xa28   : > { %1909 = vadd.xlane.f32.xlu0 %v10676_v10 }
 0xa2b   : > { %1907 = vadd.xlane.f32.xlu1 %v10677_v13 }
 0xa2f   : > { %1911 = vadd.xlane.f32.xlu1 %v10678_v58 }
 0xa3e   : > { %6307 = vrot.lane.b32.xlu0 %v10679_v17, %s7268_s7 }
 0xa50   : > { %v3172_v52 = vpop.xlane.xlu1 %3171 }
 0xa51   : > { %v3168_v56 = vpop.xlane.xlu0 %3167  ;;  %v3201_v7 = vsub.f32 %v9116_v1, %v3172_v52 }
 0xa52   : > { %v3199_v32 = vsub.f32 %v9119_v14, %v3168_v56 }
 0xa53   : > { %v3219_v1 = vmul.f32 1.442695, %v3201_v7 }
 0xa54   : > { %v2346_v50 = vpop.xlane.xlu1 %2345  ;;  %v3215_v59 = vmul.f32 1.442695, %v3199_v32 }
 0xa55   : > { %v2344_v41 = vpop.xlane.xlu0 %2343  ;;  %6638 = vrcp.f32 %v2346_v50 }
 0xa56   : > { %6640 = vrcp.f32 %v2344_v41 }
 0xa58   : > { %v2800_v53 = vpop.xlane.xlu1 %2799 }
 0xa59   : > { %6642 = vrcp.f32 %v2800_v53  ;;  %v2798_v31 = vpop.xlane.xlu0 %2797 }
 0xa5a   : > { %6644 = vrcp.f32 %v2798_v31 }
 0xa5c   : > { %v2804_v44 = vpop.xlane.xlu1 %2803 }
 0xa5d   : > { %6646 = vrcp.f32 %v2804_v44  ;;  %1913 = vadd.xlane.f32.xlu0 %v10680_v2  ;;  %v2802_v3 = vpop.xlane.xlu0 %2801 }
 0xa5e   : > { %6648 = vrcp.f32 %v2802_v3 }
 0xa5f   : > { %v6639_v27 = vpop.eup %6638  ;;  %6650 = vpow2.f32 %v3215_v59 }
 0xa60   : > { %v3174_v0 = vpop.xlane.xlu1 %3173  ;;  %v6641_v47 = vpop.eup %6640  ;;  %v2527_v24 = vmul.f32 %v6639_v27, %v10682_v45 }
 0xa61   : > { %v3202_v49 = vsub.f32 %v9130_v40, %v3174_v0  ;;  %1917 = vadd.xlane.f32.xlu0 %v10681_v33  ;;  %v3176_v11 = vpop.xlane.xlu0 %3175  ;;  %v2526_v38 = vmul.f32 %v6641_v47, %v10683_v20  ;;  %v10684_v40 = vld [vmem:[#allocation72_spill] sm:$0xff] }
 0xa62   : > { %v3203_v31 = vsub.f32 %v9133_v22, %v3176_v11 }
 0xa63   : > { %v6643_v19 = vpop.eup %6642  ;;  %v3221_v23 = vmul.f32 1.442695, %v3202_v49  ;;  %v6311_v6 = vpack.i.bf16 %v2527_v24, %v2526_v38  ;;  %v10685_v38 = vld [vmem:[#allocation93_spill] sm:$0xff] }
 0xa64   : > { %v6645_v9 = vpop.eup %6644  ;;  %v3170_v61 = vpop.xlane.xlu1 %3169  ;;  %v2975_v14 = vmul.f32 %v6643_v19, %v9089_v39 }
 0xa65   : > { %v3200_v36 = vsub.f32 %v9138_v37, %v3170_v61  ;;  %1919 = vadd.xlane.f32.xlu0 %v10684_v40  ;;  %v2348_v4 = vpop.xlane.xlu0 %2347  ;;  %v2974_v10 = vmul.f32 %v6645_v9, %v9085_v63  ;;  %6312 = vrot.lane.b32.xlu1 %v6311_v6, %s7268_s7  ;;  %6652 = vpow2.f32 %v3221_v23  ;;  %v10686_v23 = vld [vmem:[#allocation95_spill] sm:$0xff] }
 0xa67   : > { %v6647_v13 = vpop.eup %6646  ;;  %v3217_v58 = vmul.f32 1.442695, %v3200_v36  ;;  %v6316_v17 = vpack.i.bf16 %v2975_v14, %v2974_v10 }
 0xa68   : > { %v6649_v52 = vpop.eup %6648  ;;  %v3180_v56 = vpop.xlane.xlu1 %3179  ;;  %v2977_v39 = vmul.f32 %v6647_v13, %v9087_v51 }
 0xa69   : > { %6654 = vpow2.f32 %v3217_v58  ;;  %v2352_v37 = vpop.xlane.xlu0 %2351  ;;  %v2976_v50 = vmul.f32 %v6649_v52, %v9083_v21  ;;  %6317 = vrot.lane.b32.xlu1 %v6316_v17, %s7267_s4  ;;  %v9246_v2 = vpop.eup %6650  ;;  %v3223_v21 = vmul.f32 1.442695, %v3203_v31  ;;  %v3205_v0 = vsub.f32 %v9143_v60, %v3180_v56 }
 0xa6a   : > { %6656 = vpow2.f32 %v3219_v1 }
 0xa6b   : > { %v6321_v63 = vpack.i.bf16 %v2977_v39, %v2976_v50  ;;  %6658 = vrcp.f32 %v2348_v4  ;;  %v3227_v24 = vmul.f32 1.442695, %v3205_v0 }
 0xa6c   : > { %v2350_v41 = vpop.xlane.xlu1 %2349 }
 0xa6d   : > { %v3188_v53 = vpop.xlane.xlu0 %3187  ;;  %6660 = vrcp.f32 %v2350_v41  ;;  %6322 = vrot.lane.b32.xlu1 %v6321_v63, %s7267_s4 }
 0xa6e   : > { %6662 = vpow2.f32 %v3223_v21  ;;  %v3209_v4 = vsub.f32 %v9150_v54, %v3188_v53 }
 0xa6f   : > { %v9249_v32 = vpop.eup %6652  ;;  %6664 = vrcp.f32 %v2352_v37 }
 0xa70   : > { %v3182_v44 = vpop.xlane.xlu1 %3181 }
 0xa71   : > { %v3206_v51 = vsub.f32 %v9155_v57, %v3182_v44  ;;  %v3184_v3 = vpop.xlane.xlu0 %3183  ;;  %v10687_v44 = vld [vmem:[#allocation57_spill] sm:$0xff] }
 0xa72   : > { %v3207_v61 = vsub.f32 %v9158_v5, %v3184_v3  ;;  %v10688_v3 = vld [vmem:[#allocation94_spill] sm:$0xff] }
 0xa73   : > { %v9252_v27 = vpop.eup %6654  ;;  %v3229_v33 = vmul.f32 1.442695, %v3206_v51 }
 0xa74   : > { %v9254_v49 = vpop.eup %6656  ;;  %v3178_v22 = vpop.xlane.xlu1 %3177  ;;  %v3295_v11 = vpack.c.bf16 %v9252_v27, %v9246_v2  ;;  %v3231_v10 = vmul.f32 1.442695, %v3207_v61 }
 0xa75   : > { %v3204_v47 = vsub.f32 %v9165_v15, %v3178_v22  ;;  %v3190_v7 = vpop.xlane.xlu0 %3189  ;;  %v3296_v57 = vpack.c.bf16 %v9249_v32, %v9254_v49  ;;  %v6659_v45 = vpop.eup %6658  ;;  %6666 = vpow2.f32 %v3229_v33 }
 0xa76   : > { %6060 = vmatprep.mubr.bf16.mxu0 %v3295_v11  ;;  %v2528_v9 = vmul.f32 %v6659_v45, %v10685_v38  ;;  %v3210_v36 = vsub.f32 %v9170_v42, %v3190_v7  ;;  %v3235_v42 = vmul.f32 1.442695, %v3209_v4  ;;  %v10689_v4 = vld [vmem:[#allocation67_spill] sm:$0xff] }
 0xa77   : > { %v3225_v60 = vmul.f32 1.442695, %v3204_v47  ;;  %6061 = vmatmul.mubr.bf16.vlgmr.msra.gmra.mrb[80].mxu0 %v3296_v57  ;;  %v6661_v19 = vpop.eup %6660 }
 0xa78   : > { %v2354_v59 = vpop.xlane.xlu1 %2353  ;;  %v2529_v15 = vmul.f32 %v6661_v19, %v10686_v23  ;;  %v9267_v1 = vpop.eup %6662  ;;  %v3237_v13 = vmul.f32 1.442695, %v3210_v36 }
 0xa79   : > { %6668 = vpow2.f32 %v3225_v60  ;;  %v2806_v20 = vpop.xlane.xlu0 %2805  ;;  %v6665_v17 = vpop.eup %6664 }
 0xa7a   : > { %6670 = vpow2.f32 %v3227_v24  ;;  %v6326_v14 = vpack.i.bf16 %v2529_v15, %v2528_v9  ;;  %v9281_v51 = vmul.f32 %v6665_v17, %v10687_v44  ;;  %v10690_v17 = vld [vmem:[#allocation99_spill] sm:$0xff] }
 0xa7b   : > { %6672 = vrcp.f32 %v2354_v59 }
 0xa7c   : > { %6674 = vrcp.f32 %v2806_v20  ;;  %v2808_v40 = vpop.xlane.xlu1 %2807  ;;  %6327 = vrot.lane.b32.xlu0 %v6326_v14, %s7268_s7 }
 0xa7d   : > { %6676 = vrcp.f32 %v2808_v40  ;;  %v3196_v6 = vpop.xlane.xlu0 %3195 }
 0xa7e   : > { %6678 = vpow2.f32 %v3231_v10  ;;  %v3213_v45 = vsub.f32 %v9177_v62, %v3196_v6 }
 0xa7f   : > { %v9270_v56 = vpop.eup %6666  ;;  %6680 = vpow2.f32 %v3237_v13 }
 0xa80   : > { %v3186_v58 = vpop.xlane.xlu1 %3185  ;;  %v3243_v38 = vmul.f32 1.442695, %v3213_v45 }
 0xa81   : > { %v3208_v5 = vsub.f32 %v9182_v43, %v3186_v58  ;;  %v3192_v52 = vpop.xlane.xlu0 %3191 }
 0xa82   : > { %v3211_v19 = vsub.f32 %v9187_v34, %v3192_v52 }
 0xa83   : > { %v9272_v39 = vpop.eup %6668  ;;  %v3233_v37 = vmul.f32 1.442695, %v3208_v5 }
 0xa84   : > { %v9274_v50 = vpop.eup %6670  ;;  %v2812_v54 = vpop.xlane.xlu1 %2811  ;;  %v3297_v63 = vpack.c.bf16 %v9272_v39, %v9267_v1  ;;  %v3239_v15 = vmul.f32 1.442695, %v3211_v19 }
 0xa85   : > { %v6673_v41 = vpop.eup %6672  ;;  %6682 = vpow2.f32 %v3233_v37  ;;  %v2810_v53 = vpop.xlane.xlu0 %2809  ;;  %v3298_v43 = vpack.c.bf16 %v9270_v56, %v9274_v50  ;;  %v10691_v37 = vld [vmem:[#allocation97_spill] sm:$0xff] }
 0xa86   : > { %v6675_v31 = vpop.eup %6674  ;;  %6684 = vpow2.f32 %v3235_v42  ;;  %6064 = vmatprep.mubr.bf16.mxu0 %v3297_v63  ;;  %v9284_v21 = vmul.f32 %v6673_v41, %v10688_v3  ;;  %v10693_v3 = vld [vmem:[#allocation96_spill] sm:$0xff] }
 0xa87   : > { %v6677_v0 = vpop.eup %6676  ;;  %6686 = vrcp.f32 %v2812_v54  ;;  %6065 = vmatmul.mubr.bf16.gmra.mrb[84].mxu0 %v3298_v43  ;;  %v9289_v11 = vmul.f32 %v6675_v31, %v9093_v48  ;;  %v10692_v31 = vld [vmem:[#allocation98_spill] sm:$0xff] }
 0xa88   : > { %6688 = vrcp.f32 %v2810_v53  ;;  %v2358_v33 = vpop.xlane.xlu1 %2357  ;;  %v6331_v22 = vpack.i.bf16 %v9284_v21, %v9281_v51  ;;  %v9292_v47 = vmul.f32 %v6677_v0, %v9097_v28  ;;  %v9297_v60 = vpop.eup %6678  ;;  %v10695_v51 = vld [vmem:[#allocation101_spill] sm:$0xff] }
 0xa89   : > { %6690 = vrcp.f32 %v2358_v33  ;;  %v2356_v7 = vpop.xlane.xlu0 %2355  ;;  %v9300_v48 = vpop.eup %6680 }
 0xa8a   : > { %6692 = vrcp.f32 %v2356_v7  ;;  %v6336_v57 = vpack.i.bf16 %v9292_v47, %v9289_v11  ;;  %v10694_v7 = vld [vmem:[#allocation73_spill] sm:$0xff]  ;;  %v10697_v11 = vld [vmem:[#allocation103_spill] sm:$0xff] }
 0xa8c   : > { %v2362_v24 = vpop.xlane.xlu1 %2361 }
 0xa8d   : > { %6694 = vrcp.f32 %v2362_v24  ;;  %v2360_v59 = vpop.xlane.xlu0 %2359 }
 0xa8e   : > { %6696 = vrcp.f32 %v2360_v59 }
 0xa8f   : > { %v9302_v28 = vpop.eup %6682  ;;  %6698 = vpow2.f32 %v3243_v38 }
 0xa90   : > { %v9304_v20 = vpop.eup %6684  ;;  %v3198_v9 = vpop.xlane.xlu1 %3197  ;;  %v3299_v23 = vpack.c.bf16 %v9302_v28, %v9297_v60  ;;  %6700 = vpow2.f32 %v3239_v15 }
 0xa91   : > { %v6687_v62 = vpop.eup %6686  ;;  %v3214_v61 = vsub.f32 %v9198_v8, %v3198_v9  ;;  %v2814_v14 = vpop.xlane.xlu0 %2813  ;;  %v3300_v34 = vpack.c.bf16 %v9300_v48, %v9304_v20  ;;  %1915 = vadd.xlane.f32.xlu1 %v10689_v4 }
 0xa92   : > { %v6689_v36 = vpop.eup %6688  ;;  %6068 = vmatprep.mubr.bf16.mxu0 %v3299_v23  ;;  %v9312_v40 = vmul.f32 %v6687_v62, %v9095_v30 }
 0xa93   : > { %v6691_v6 = vpop.eup %6690  ;;  %6069 = vmatmul.mubr.bf16.gmra.mrb[88].mxu0 %v3300_v34  ;;  %v9316_v10 = vmul.f32 %v6689_v36, %v9091_v35  ;;  %v3245_v58 = vmul.f32 1.442695, %v3214_v61 }
 0xa94   : > { %v6693_v13 = vpop.eup %6692  ;;  %v3194_v8 = vpop.xlane.xlu1 %3193  ;;  %v9319_v5 = vmul.f32 %v6691_v6, %v10690_v17 }
 0xa95   : > { %v3212_v52 = vsub.f32 %v9203_v25, %v3194_v8  ;;  %v2818_v42 = vpop.xlane.xlu0 %2817  ;;  %v6341_v30 = vpack.i.bf16 %v9312_v40, %v9316_v10  ;;  %v9325_v54 = vmul.f32 %v6693_v13, %v10691_v37  ;;  %v10696_v8 = vld [vmem:[#allocation100_spill] sm:$0xff] }
 0xa96   : > { %6702 = vrcp.f32 %v2818_v42 }
 0xa97   : > { %v6695_v35 = vpop.eup %6694  ;;  %6704 = vrcp.f32 %v2814_v14  ;;  %v3241_v63 = vmul.f32 1.442695, %v3212_v52  ;;  %v6366_v41 = vpack.i.bf16 %v9319_v5, %v9325_v54 }
 0xa98   : > { %v6697_v53 = vpop.eup %6696  ;;  %6706 = vpow2.f32 %v3245_v58  ;;  %v2816_v43 = vpop.xlane.xlu1 %2815  ;;  %v9330_v44 = vmul.f32 %v6695_v35, %v10692_v31 }
 0xa99   : > { %6708 = vpow2.f32 %v3241_v63  ;;  %v2364_v25 = vpop.xlane.xlu0 %2363  ;;  %v9333_v0 = vmul.f32 %v6697_v53, %v10693_v3  ;;  %v9338_v19 = vpop.eup %6698 }
 0xa9a   : > { %6710 = vrcp.f32 %v2816_v43  ;;  %v9340_v59 = vpop.eup %6700  ;;  %v10698_v43 = vld [vmem:[#allocation102_spill] sm:$0xff] }
 0xa9b   : > { %6712 = vrcp.f32 %v2364_v25  ;;  %v6371_v33 = vpack.i.bf16 %v9330_v44, %v9333_v0  ;;  %1921 = vadd.xlane.f32.xlu0 %v10694_v7 }
 0xa9c   : > { %v2820_v45 = vpop.xlane.xlu1 %2819 }
 0xa9d   : > { %6714 = vrcp.f32 %v2820_v45  ;;  %v2368_v24 = vpop.xlane.xlu0 %2367 }
 0xa9e   : > { %6716 = vrcp.f32 %v2368_v24 }
 0xa9f   : > { %3251 = vadd.xlane.f32.xlu0 %v9254_v49 }
 0xaa0   : > { %v6703_v38 = vpop.eup %6702  ;;  %v2366_v9 = vpop.xlane.xlu1 %2365 }
 0xaa1   : > { %v6705_v23 = vpop.eup %6704  ;;  %6718 = vrcp.f32 %v2366_v9  ;;  %v2822_v62 = vpop.xlane.xlu0 %2821  ;;  %v9344_v15 = vmul.f32 %v6703_v38, %v9099_v12  ;;  %v10699_v38 = vld [vmem:[#allocation78_spill] sm:$0xff] }
 0xaa2   : > { %v9346_v61 = vpop.eup %6706  ;;  %6720 = vrcp.f32 %v2822_v62  ;;  %6332 = vrot.lane.b32.xlu1 %v6331_v22, %s7268_s7  ;;  %v9360_v4 = vmul.f32 %v6705_v23, %v9101_v55 }
 0xaa3   : > { %v9348_v14 = vpop.eup %6708  ;;  %3247 = vadd.xlane.f32.xlu0 %v9246_v2  ;;  %v3302_v6 = vpack.c.bf16 %v9346_v61, %v9338_v19 }
 0xaa4   : > { %v6711_v34 = vpop.eup %6710  ;;  %v2370_v49 = vpop.xlane.xlu1 %2369  ;;  %v3301_v36 = vpack.c.bf16 %v9348_v14, %v9340_v59 }
 0xaa5   : > { %v6713_v40 = vpop.eup %6712  ;;  %6722 = vrcp.f32 %v2370_v49  ;;  %v2826_v12 = vpop.xlane.xlu0 %2825  ;;  %v9363_v10 = vmul.f32 %v6711_v34, %v9105_v29  ;;  %v10700_v49 = vld [vmem:[#allocation104_spill] sm:$0xff] }
 0xaa6   : > { %6724 = vrcp.f32 %v2826_v12  ;;  %6072 = vmatprep.mubr.bf16.mxu0 %v3301_v36  ;;  %v9366_v2 = vmul.f32 %v6713_v40, %v10695_v51  ;;  %6337 = vrot.lane.b32.xlu1 %v6336_v57, %s7267_s4 }
 0xaa7   : > { %v6715_v21 = vpop.eup %6714  ;;  %6073 = vmatmul.mubr.bf16.gmra.mrb[92].mxu0 %v3302_v6  ;;  %v6376_v22 = vpack.i.bf16 %v9363_v10, %v9360_v4  ;;  %3259 = vadd.xlane.f32.xlu0 %v9274_v50 }
 0xaa8   : > { %v6717_v13 = vpop.eup %6716  ;;  %v2824_v55 = vpop.xlane.xlu1 %2823  ;;  %v9376_v29 = vmul.f32 %v6715_v21, %v9103_v16 }
 0xaa9   : > { %6726 = vrcp.f32 %v2824_v55  ;;  %v1898_v58 = vpop.xlane.xlu0 %1897  ;;  %v9379_v17 = vmul.f32 %v6717_v13, %v10696_v8  ;;  %v10702_v13 = vld [vmem:[#allocation80_spill] sm:$0xff] }
 0xaaa   : > { %6728 = vrcp.f32 %v1898_v58  ;;  %v6381_v52 = vpack.i.bf16 %v9376_v29, %v9344_v15  ;;  %6342 = vrot.lane.b32.xlu1 %v6341_v30, %s7267_s4 }
 0xaab   : > { %v6719_v42 = vpop.eup %6718  ;;  %3255 = vadd.xlane.f32.xlu0 %v9267_v1 }
 0xaac   : > { %v6721_v37 = vpop.eup %6720  ;;  %v2828_v50 = vpop.xlane.xlu1 %2827  ;;  %v9386_v47 = vmul.f32 %v6719_v42, %v10697_v11  ;;  %v10703_v42 = vld [vmem:[#allocation82_spill] sm:$0xff] }
 0xaad   : > { %6730 = vrcp.f32 %v2828_v50  ;;  %v1902_v16 = vpop.xlane.xlu0 %1901  ;;  %v9389_v57 = vmul.f32 %v6721_v37, %v9109_v46 }
 0xaae   : > { %6732 = vrcp.f32 %v1902_v16  ;;  %v6396_v35 = vpack.i.bf16 %v9386_v47, %v9366_v2 }
 0xaaf   : > { %v6723_v63 = vpop.eup %6722  ;;  %3267 = vadd.xlane.f32.xlu0 %v9304_v20 }
 0xab0   : > { %v6725_v53 = vpop.eup %6724  ;;  %v1900_v30 = vpop.xlane.xlu1 %1899  ;;  %v9395_v1 = vmul.f32 %v6723_v63, %v10698_v43  ;;  %v10704_v63 = vld [vmem:[#allocation76_spill] sm:$0xff]  ;;  %v10706_v43 = vld [vmem:[#allocation81_spill] sm:$0xff] }
 0xab1   : > { %6734 = vrcp.f32 %v1900_v30  ;;  %v1906_v31 = vpop.xlane.xlu0 %1905  ;;  %v9398_v25 = vmul.f32 %v6725_v53, %v9107_v18  ;;  %v10705_v53 = vld [vmem:[#allocation79_spill] sm:$0xff] }
 0xab2   : > { %6736 = vrcp.f32 %v1906_v31  ;;  %v6401_v46 = vpack.i.bf16 %v9395_v1, %v9379_v17 }
 0xab3   : > { %v6727_v3 = vpop.eup %6726  ;;  %3263 = vadd.xlane.f32.xlu0 %v9297_v60 }
 0xab4   : > { %v6729_v7 = vpop.eup %6728  ;;  %v1904_v45 = vpop.xlane.xlu1 %1903  ;;  %v9404_v20 = vmul.f32 %v6727_v3, %v9113_v26  ;;  %v10701_v26 = vld [vmem:[#allocation77_spill] sm:$0xff] }
 0xab5   : > { %6738 = vrcp.f32 %v1904_v45  ;;  %v1910_v24 = vpop.xlane.xlu0 %1909  ;;  %v2050_v9 = vmul.f32 %v6729_v7, %v10699_v38  ;;  %v10707_v7 = vld [vmem:[#allocation84_spill] sm:$0xff]  ;;  %v10708_v38 = vld [vmem:[#allocation83_spill] sm:$0xff] }
 0xab6   : > { %6740 = vrcp.f32 %v1910_v24  ;;  %v10717_v5 = vpack.i.bf16 %v9404_v20, %v9389_v57 }
 0xab7   : > { %v6731_v23 = vpop.eup %6730  ;;  %3275 = vadd.xlane.f32.xlu0 %v9338_v19 }
 0xab8   : > { %v6733_v62 = vpop.eup %6732  ;;  %v1908_v34 = vpop.xlane.xlu1 %1907  ;;  %v9411_v36 = vmul.f32 %v6731_v23, %v10700_v49 }
 0xab9   : > { %6742 = vrcp.f32 %v1908_v34  ;;  %v6308_v60 = vpop.permute.xlu0 %6307  ;;  %v2052_v40 = vmul.f32 %v6733_v62, %v10701_v26 }
 0xaba   : > { %v6309_v12 = vunpack.i.l.bf16 %v6308_v60  ;;  %v6310_v58 = vunpack.i.h.bf16 %v6308_v60  ;;  %v10716_v44 = vpack.i.bf16 %v9411_v36, %v9398_v25 }
 0xabb   : > { %v6735_v51 = vpop.eup %6734  ;;  %3271 = vadd.xlane.f32.xlu0 %v9340_v59 }
 0xabc   : > { %v6737_v21 = vpop.eup %6736  ;;  %v2051_v55 = vmul.f32 %v6735_v51, %v10702_v13  ;;  %v3632_v8 = vsel %vm1671_vm0, %v2050_v9, %v6309_v12  ;;  %v1912_v19 = vpop.xlane.xlu1 %1911 }
 0xabd   : > { %6744 = vrcp.f32 %v1912_v19  ;;  %v2054_v37 = vmul.f32 %v6737_v21, %v10703_v42  ;;  %v10709_v19 = vld [vmem:[#allocation86_spill] sm:$0xff] }
 0xabe   : > { %v3633_v50 = vsel %vm1671_vm0, %v2051_v55, %v6310_v58 }
 0xabf   : > { %v6739_v11 = vpop.eup %6738  ;;  %1925 = vadd.xlane.f32.xlu0 %v10704_v63  ;;  %v10710_v63 = vld [vmem:[#allocation85_spill] sm:$0xff] }
 0xac0   : > { %v6741_v16 = vpop.eup %6740  ;;  %v2053_v30 = vmul.f32 %v6739_v11, %v10705_v53 }
 0xac1   : > { %v2056_v31 = vmul.f32 %v6741_v16, %v10706_v43 }
 0xac3   : > { %v6743_v3 = vpop.eup %6742 }
 0xac4   : > { %v2055_v45 = vmul.f32 %v6743_v3, %v10707_v7 }
 0xac7   : > { %v6745_v24 = vpop.eup %6744 }
 0xac8   : > { %v2057_v59 = vmul.f32 %v6745_v24, %v10708_v38 }
 0xace   : > { %3253 = vadd.xlane.f32.xlu1 %v9249_v32 }
 0xad2   : > { %3249 = vadd.xlane.f32.xlu1 %v9252_v27 }
 0xad6   : > { %3261 = vadd.xlane.f32.xlu1 %v9270_v56 }
 0xad7   : > { %v6313_v9 = vpop.permute.xlu1 %6312 }
 0xad8   : > { %v6315_v23 = vunpack.i.h.bf16 %v6313_v9  ;;  %v6314_v62 = vunpack.i.l.bf16 %v6313_v9 }
 0xada   : > { %v3635_v34 = vsel %vm1671_vm0, %v2053_v30, %v6315_v23  ;;  %v3634_v49 = vsel %vm1671_vm0, %v2052_v40, %v6314_v62  ;;  %3257 = vadd.xlane.f32.xlu1 %v9272_v39  ;;  %v10711_v30 = vld [vmem:[#allocation87_spill] sm:$0xff] }
 0xadb   : > { %v6318_v60 = vpop.permute.xlu1 %6317 }
 0xadc   : > { %v6320_v26 = vunpack.i.h.bf16 %v6318_v60  ;;  %v6319_v12 = vunpack.i.l.bf16 %v6318_v60 }
 0xade   : > { %v9433_v51 = vsel %vm3648_vm1, %v3632_v8, %v6319_v12  ;;  %v9436_v32 = vsel %vm3648_vm1, %v3633_v50, %v6320_v26  ;;  %3269 = vadd.xlane.f32.xlu1 %v9300_v48 }
 0xadf   : > { %v6323_v27 = vpop.permute.xlu1 %6322 }
 0xae0   : > { %v6325_v56 = vunpack.i.h.bf16 %v6323_v27  ;;  %v6324_v21 = vunpack.i.l.bf16 %v6323_v27  ;;  %v10712_v27 = vld [vmem:[#allocation88_spill] sm:$0xff] }
 0xae2   : > { %v9440_v13 = vsel %vm3648_vm1, %v3635_v34, %v6325_v56  ;;  %v9443_v39 = vsel %vm3648_vm1, %v3634_v49, %v6324_v21  ;;  %3265 = vadd.xlane.f32.xlu1 %v9302_v28 }
 0xae6   : > { %3277 = vadd.xlane.f32.xlu1 %v9346_v61 }
 0xaea   : > { %v1914_v40 = vpop.xlane.xlu0 %1913  ;;  %3273 = vadd.xlane.f32.xlu1 %v9348_v14 }
 0xaeb   : > { %6746 = vrcp.f32 %v1914_v40 }
 0xaee   : > { %v1918_v55 = vpop.xlane.xlu0 %1917 }
 0xaef   : > { %6748 = vrcp.f32 %v1918_v55 }
 0xaf2   : > { %v1920_v48 = vpop.xlane.xlu0 %1919 }
 0xaf3   : > { %6750 = vrcp.f32 %v1920_v48  ;;  %v10713_v48 = vld [vmem:[#allocation90_spill] sm:$0xff] }
 0xaf5   : > { %v6747_v58 = vpop.eup %6746 }
 0xaf6   : > { %v6328_v8 = vpop.permute.xlu0 %6327  ;;  %v9449_v42 = vmul.f32 %v6747_v58, %v10709_v19  ;;  %v6459_v19 = vld [vmem:[%s7697_s20 + $0x8] sm:$0xff]  }
 0xaf7   : > { %v6330_v50 = vunpack.i.h.bf16 %v6328_v8  ;;  %v6329_v11 = vunpack.i.l.bf16 %v6328_v8  ;;  %v6458_v8 = vld [vmem:[%s7697_s20] sm:$0xff]  }
 0xaf8   : > { %6076 = vmatprep.subr.bf16.mxu0 %v6458_v8 }
 0xaf9   : > { %v6749_v16 = vpop.eup %6748  ;;  %v3637_v28 = vsel %vm1671_vm0, %v2055_v45, %v6330_v50  ;;  %v3636_v61 = vsel %vm1671_vm0, %v2054_v37, %v6329_v11  ;;  %6077 = vmatpush3.bf16.msra.mxu0 %v6458_v8  ;;  %v6460_v50 = vld [vmem:[%s7697_s20 + $0x10] sm:$0xff]   ;;  %v6461_v11 = vld [vmem:[%s7697_s20 + $0x18] sm:$0xff]  }
 0xafa   : > { %v9454_v53 = vmul.f32 %v6749_v16, %v10710_v63  ;;  %6078 = vmatprep.subr.bf16.mxu0 %v6459_v19 }
 0xafd   : > { %v6751_v14 = vpop.eup %6750  ;;  %6079 = vmatpush3.bf16.msra.mxu0 %v6459_v19 }
 0xafe   : > { %v9457_v43 = vmul.f32 %v6751_v14, %v10711_v30  ;;  %6080 = vmatprep.subr.bf16.mxu0 %v6460_v50 }
 0xb01   : > { %6081 = vmatpush3.bf16.msra.mxu0 %v6460_v50 }
 0xb02   : > { %6082 = vmatprep.subr.bf16.mxu0 %v6461_v11 }
 0xb05   : > { %6083 = vmatpush3.bf16.msra.mxu0 %v6461_v11 }
 0xb1e   : > { %v1916_v3 = vpop.xlane.xlu1 %1915 }
 0xb1f   : > { %6752 = vrcp.f32 %v1916_v3  ;;  %v6463_v3 = vld [vmem:[%s7697_s20 + $0x28] sm:$0xff]  }
 0xb22   : > { %v6333_v7 = vpop.permute.xlu1 %6332 }
 0xb23   : > { %v6335_v24 = vunpack.i.h.bf16 %v6333_v7  ;;  %v6334_v38 = vunpack.i.l.bf16 %v6333_v7 }
 0xb25   : > { %v3639_v9 = vsel %vm1671_vm0, %v2057_v59, %v6335_v24  ;;  %v3638_v23 = vsel %vm1671_vm0, %v2056_v31, %v6334_v38 }
 0xb26   : > { %v6338_v62 = vpop.permute.xlu1 %6337 }
 0xb27   : > { %v6340_v45 = vunpack.i.h.bf16 %v6338_v62  ;;  %v6339_v37 = vunpack.i.l.bf16 %v6338_v62 }
 0xb28   : > { %v1922_v34 = vpop.xlane.xlu0 %1921 }
 0xb29   : > { %6754 = vrcp.f32 %v1922_v34  ;;  %v6753_v49 = vpop.eup %6752  ;;  %v9462_v60 = vsel %vm3648_vm1, %v3636_v61, %v6339_v37  ;;  %v9465_v26 = vsel %vm3648_vm1, %v3637_v28, %v6340_v45  ;;  %v6462_v28 = vld [vmem:[%s7697_s20 + $0x20] sm:$0xff]   ;;  %v6464_v34 = vld [vmem:[%s7697_s20 + $0x30] sm:$0xff]  }
 0xb2a   : > { %v6343_v12 = vpop.permute.xlu1 %6342  ;;  %v9468_v59 = vmul.f32 %v6753_v49, %v10712_v27  ;;  %6084 = vmatprep.subr.bf16.mxu0 %v6462_v28  ;;  %v6465_v27 = vld [vmem:[%s7697_s20 + $0x38] sm:$0xff]   ;;  %s10721_s20 = scalar_lea.vmem [#allocation9], %s7685_s21 }
 0xb2b   : > { %v6345_v31 = vunpack.i.h.bf16 %v6343_v12  ;;  %v6344_v56 = vunpack.i.l.bf16 %v6343_v12  ;;  %6085 = vmatpush3.bf16.msra.mxu0 %v6462_v28 }
 0xb2c   : > { %v3252_v63 = vpop.xlane.xlu0 %3251  ;;  %6086 = vmatprep.subr.bf16.mxu0 %v6463_v3 }
 0xb2d   : > { %v9471_v21 = vsel %vm3648_vm1, %v3639_v9, %v6345_v31  ;;  %v9474_v40 = vsel %vm3648_vm1, %v3638_v23, %v6344_v56  ;;  %6756 = vrcp.f32 %v3252_v63 }
 0xb2f   : > { %6087 = vmatpush3.bf16.msra.mxu0 %v6463_v3 }
 0xb30   : > { %v3248_v7 = vpop.xlane.xlu0 %3247  ;;  %6088 = vmatprep.subr.bf16.mxu0 %v6464_v34 }
 0xb33   : > { %v6755_v55 = vpop.eup %6754  ;;  %6089 = vmatpush3.bf16.msra.mxu0 %v6464_v34 }
 0xb34   : > { %v9477_v58 = vmul.f32 %v6755_v55, %v10713_v48  ;;  %v3260_v24 = vpop.xlane.xlu0 %3259  ;;  %6090 = vmatprep.subr.bf16.mxu0 %v6465_v27 }
 0xb37   : > { %v6757_v55 = vpop.eup %6756  ;;  %6091 = vmatpush3.bf16.msra.mxu0 %v6465_v27 }
 0xb38   : > { %v3256_v37 = vpop.xlane.xlu0 %3255 }
 0xb3c   : > { %v3268_v12 = vpop.xlane.xlu0 %3267 }
 0xb40   : > { %v3264_v3 = vpop.xlane.xlu0 %3263 }
 0xb4a   : > { %v6062_v16 = vpop.f32.mrb[80].mxu0 }
 0xb4b   : > { %v3361_v61 = vpop.f32.mrb[81].mxu0  ;;  %v3426_v50 = vmul.f32 %v6757_v55, %v6062_v16 }
 0xb4c   : > { %v6063_v14 = vpop.f32.mrb[82].mxu0 }
 0xb4d   : > { %v3364_v30 = vpop.f32.mrb[83].mxu0 }
 0xb5a   : > { %v6066_v38 = vpop.f32.mrb[84].mxu0 }
 0xb5b   : > { %v3377_v9 = vpop.f32.mrb[85].mxu0  ;;  %v3254_v62 = vpop.xlane.xlu1 %3253 }
 0xb5c   : > { %v6067_v23 = vpop.f32.mrb[86].mxu0  ;;  %6758 = vrcp.f32 %v3254_v62 }
 0xb5d   : > { %v3380_v45 = vpop.f32.mrb[87].mxu0  ;;  %6760 = vrcp.f32 %v3248_v7 }
 0xb5f   : > { %v3250_v49 = vpop.xlane.xlu1 %3249 }
 0xb60   : > { %6762 = vrcp.f32 %v3250_v49 }
 0xb61   : > { %6764 = vrcp.f32 %v3260_v24 }
 0xb63   : > { %v3262_v31 = vpop.xlane.xlu1 %3261 }
 0xb64   : > { %6766 = vrcp.f32 %v3262_v31 }
 0xb65   : > { %6768 = vrcp.f32 %v3256_v37  ;;  %v3276_v37 = vpop.xlane.xlu0 %3275 }
 0xb66   : > { %v6070_v56 = vpop.f32.mrb[88].mxu0  ;;  %v6759_v8 = vpop.eup %6758 }
 0xb67   : > { %v3393_v48 = vpop.f32.mrb[89].mxu0  ;;  %v3258_v11 = vpop.xlane.xlu1 %3257  ;;  %v3427_v63 = vmul.f32 %v6759_v8, %v6063_v14 }
 0xb68   : > { %v6071_v19 = vpop.f32.mrb[90].mxu0  ;;  %6770 = vrcp.f32 %v3258_v11  ;;  %v6761_v7 = vpop.eup %6760 }
 0xb69   : > { %v3396_v28 = vpop.f32.mrb[91].mxu0  ;;  %v6346_v62 = vpack.i.bf16 %v3427_v63, %v3426_v50  ;;  %6772 = vrcp.f32 %v3268_v12  ;;  %v3424_v24 = vmul.f32 %v6761_v7, %v3361_v61 }
 0xb6a   : > { %v6763_v34 = vpop.eup %6762 }
 0xb6b   : > { %v3270_v49 = vpop.xlane.xlu1 %3269  ;;  %6347 = vrot.lane.b32.xlu1 %v6346_v62, %s7266_s2  ;;  %v3425_v31 = vmul.f32 %v6763_v34, %v3364_v30  ;;  %v6765_v27 = vpop.eup %6764 }
 0xb6c   : > { %6774 = vrcp.f32 %v3270_v49  ;;  %v3430_v16 = vmul.f32 %v6765_v27, %v6066_v38  ;;  %v3272_v30 = vpop.xlane.xlu0 %3271 }
 0xb6d   : > { %v6351_v18 = vpack.i.bf16 %v3425_v31, %v3424_v24  ;;  %6776 = vrcp.f32 %v3264_v3 }
 0xb6e   : > { %v6767_v6 = vpop.eup %6766 }
 0xb6f   : > { %v3266_v55 = vpop.xlane.xlu1 %3265  ;;  %6352 = vrot.lane.b32.xlu0 %v6351_v18, %s7266_s2  ;;  %v3431_v14 = vmul.f32 %v6767_v6, %v6067_v23  ;;  %v6769_v8 = vpop.eup %6768 }
 0xb70   : > { %6778 = vrcp.f32 %v3266_v55  ;;  %v3428_v61 = vmul.f32 %v6769_v8, %v3377_v9  ;;  %v1926_v54 = vpop.xlane.xlu0 %1925 }
 0xb71   : > { %v6356_v50 = vpack.i.bf16 %v3431_v14, %v3430_v16  ;;  %6780 = vrcp.f32 %v3276_v37 }
 0xb72   : > { %v6771_v12 = vpop.eup %6770 }
 0xb73   : > { %v3278_v11 = vpop.xlane.xlu1 %3277  ;;  %v3429_v63 = vmul.f32 %v6771_v12, %v3380_v45  ;;  %v6773_v7 = vpop.eup %6772 }
 0xb74   : > { %6782 = vrcp.f32 %v3278_v11  ;;  %v3434_v3 = vmul.f32 %v6773_v7, %v6070_v56  ;;  %v10714_v7 = vld [vmem:[#allocation75_spill] sm:$0xff] }
 0xb75   : > { %v6361_v62 = vpack.i.bf16 %v3429_v63, %v3428_v61  ;;  %6784 = vrcp.f32 %v3272_v30 }
 0xb76   : > { %v6775_v34 = vpop.eup %6774 }
 0xb77   : > { %v3274_v38 = vpop.xlane.xlu1 %3273  ;;  %6362 = vrot.lane.b32.xlu0 %v6361_v62, %s7266_s2  ;;  %v3435_v18 = vmul.f32 %v6775_v34, %v6071_v19  ;;  %v6777_v23 = vpop.eup %6776  ;;  %v10715_v62 = vld [vmem:[#allocation74_spill] sm:$0xff] }
 0xb78   : > { %6786 = vrcp.f32 %v3274_v38  ;;  %v3432_v27 = vmul.f32 %v6777_v23, %v3393_v48 }
 0xb79   : > { %v6391_v49 = vpack.i.bf16 %v3435_v18, %v3434_v3 }
 0xb7a   : > { %v6074_v6 = vpop.f32.mrb[92].mxu0  ;;  %v6779_v31 = vpop.eup %6778 }
 0xb7b   : > { %v3409_v24 = vpop.f32.mrb[93].mxu0  ;;  %v3433_v37 = vmul.f32 %v6779_v31, %v3396_v28  ;;  %v6781_v16 = vpop.eup %6780 }
 0xb7c   : > { %v6075_v9 = vpop.f32.mrb[94].mxu0  ;;  %v3438_v8 = vmul.f32 %v6781_v16, %v6074_v6 }
 0xb7d   : > { %v3412_v45 = vpop.f32.mrb[95].mxu0  ;;  %v6386_v55 = vpack.i.bf16 %v3433_v37, %v3432_v27 }
 0xb7e   : > { %v6783_v14 = vpop.eup %6782 }
 0xb7f   : > { %v3439_v12 = vmul.f32 %v6783_v14, %v6075_v9  ;;  %v6785_v56 = vpop.eup %6784 }
 0xb80   : > { %v3436_v63 = vmul.f32 %v6785_v56, %v3409_v24 }
 0xb81   : > { %v6421_v61 = vpack.i.bf16 %v3439_v12, %v3438_v8 }
 0xb82   : > { %v6787_v11 = vpop.eup %6786 }
 0xb83   : > { %v3437_v19 = vmul.f32 %v6787_v11, %v3412_v45 }
 0xb85   : > { %v6416_v30 = vpack.i.bf16 %v3437_v19, %v3436_v63 }
 0xb8f   : > { %1923 = vadd.xlane.f32.xlu1 %v10714_v7 }
 0xb96   : > { %1927 = vadd.xlane.f32.xlu0 %v10715_v62 }
 0xba0   : > { %6357 = vrot.lane.b32.xlu1 %v6356_v50, %s7266_s2 }
 0xba4   : > { %6372 = vrot.lane.b32.xlu1 %v6371_v33, %s7268_s7 }
 0xba8   : > { %6377 = vrot.lane.b32.xlu1 %v6376_v22, %s7267_s4 }
 0xbac   : > { %6382 = vrot.lane.b32.xlu1 %v6381_v52, %s7267_s4  ;;  %6367 = vrot.lane.b32.xlu0 %v6366_v41, %s7268_s7 }
 0xbb0   : > { %6392 = vrot.lane.b32.xlu1 %v6391_v49, %s7266_s2  ;;  %6387 = vrot.lane.b32.xlu0 %v6386_v55, %s7266_s2 }
 0xbb4   : > { %6402 = vrot.lane.b32.xlu1 %v6401_v46, %s7268_s7  ;;  %6397 = vrot.lane.b32.xlu0 %v6396_v35, %s7268_s7 }
 0xbb8   : > { %6412 = vrot.lane.b32.xlu1 %v10716_v44, %s7267_s4  ;;  %6407 = vrot.lane.b32.xlu0 %v10717_v5, %s7267_s4 }
 0xbbc   : > { %6422 = vrot.lane.b32.xlu1 %v6421_v61, %s7266_s2  ;;  %6417 = vrot.lane.b32.xlu0 %v6416_v30, %s7266_s2 }
 0xbdd   : > { %v6348_v41 = vpop.permute.xlu1 %6347 }
 0xbde   : > { %v6350_v0 = vunpack.i.h.bf16 %v6348_v41  ;;  %v6349_v33 = vunpack.i.l.bf16 %v6348_v41 }
 0xbe0   : > { %v3669_v15 = vsel %vm3665_vm2, %v9440_v13, %v6350_v0  ;;  %v3668_v4 = vsel %vm3665_vm2, %v9443_v39, %v6349_v33 }
 0xbe1   : > { %v3683_v10 = vpack.c.bf16 %v3669_v15, %v3668_v4  ;;  %v6353_v2 = vpop.permute.xlu0 %6352 }
 0xbe2   : > { %v6355_v22 = vunpack.i.h.bf16 %v6353_v2  ;;  %v6354_v29 = vunpack.i.l.bf16 %v6353_v2 }
 0xbe4   : > { %v3666_v17 = vsel %vm3665_vm2, %v9433_v51, %v6354_v29  ;;  %v3667_v52 = vsel %vm3665_vm2, %v9436_v32, %v6355_v22 }
 0xbe5   : > { %v3682_v47 = vpack.c.bf16 %v3667_v52, %v3666_v17 }
 0xbe7   : > { %6092 = vmatprep.mubr.bf16.mxu0 %v3682_v47 }
 0xbe8   : > { %6093 = vmatmul.mubr.bf16.vlgmr.msra.gmra.mrb[96].mxu0 %v3683_v10  ;;  %v10718_v10 = vld [vmem:[#allocation92_spill] sm:$0xff] }
 0xbe9   : > { %v6363_v57 = vpop.permute.xlu0 %6362 }
 0xbea   : > { %v6365_v35 = vunpack.i.h.bf16 %v6363_v57  ;;  %v6364_v1 = vunpack.i.l.bf16 %v6363_v57 }
 0xbec   : > { %v3670_v25 = vsel %vm3665_vm2, %v9462_v60, %v6364_v1  ;;  %v3671_v46 = vsel %vm3665_vm2, %v9465_v26, %v6365_v35 }
 0xbed   : > { %v3684_v20 = vpack.c.bf16 %v3671_v46, %v3670_v25 }
 0xbef   : > { %6096 = vmatprep.mubr.bf16.mxu0 %v3684_v20 }
 0xc1c   : > { %v1924_v36 = vpop.xlane.xlu1 %1923 }
 0xc1d   : > { %6788 = vrcp.f32 %v1924_v36 }
 0xc1e   : > { %6790 = vrcp.f32 %v1926_v54 }
 0xc20   : > { %v6358_v13 = vpop.permute.xlu1 %6357 }
 0xc21   : > { %v6360_v51 = vunpack.i.h.bf16 %v6358_v13  ;;  %v6359_v39 = vunpack.i.l.bf16 %v6358_v13 }
 0xc23   : > { %v1928_v48 = vpop.xlane.xlu0 %1927  ;;  %v3672_v32 = vsel %vm3665_vm2, %v9474_v40, %v6359_v39  ;;  %v3673_v28 = vsel %vm3665_vm2, %v9471_v21, %v6360_v51  ;;  %v10719_v39 = vld [vmem:[#allocation89_spill] sm:$0xff] }
 0xc24   : > { %v6373_v50 = vpop.permute.xlu1 %6372  ;;  %v3685_v34 = vpack.c.bf16 %v3673_v28, %v3672_v32  ;;  %6792 = vrcp.f32 %v1928_v48  ;;  %v10720_v32 = vld [vmem:[#allocation91_spill] sm:$0xff] }
 0xc25   : > { %v6375_v9 = vunpack.i.h.bf16 %v6373_v50  ;;  %v6374_v27 = vunpack.i.l.bf16 %v6373_v50 }
 0xc26   : > { %6097 = vmatmul.mubr.bf16.gmra.mrb[100].mxu0 %v3685_v34 }
 0xc27   : > { %v6368_v60 = vpop.permute.xlu0 %6367  ;;  %v3643_v56 = vsel %vm1671_vm0, %v9457_v43, %v6375_v9  ;;  %v3642_v61 = vsel %vm1671_vm0, %v9454_v53, %v6374_v27  ;;  %v6789_v7 = vpop.eup %6788 }
 0xc28   : > { %v6370_v3 = vunpack.i.h.bf16 %v6368_v60  ;;  %v6369_v38 = vunpack.i.l.bf16 %v6368_v60  ;;  %v6378_v26 = vpop.permute.xlu1 %6377  ;;  %v6791_v33 = vpop.eup %6790  ;;  %v2063_v2 = vmul.f32 %v6789_v7, %v10718_v10 }
 0xc29   : > { %v6380_v18 = vunpack.i.h.bf16 %v6378_v26  ;;  %v6379_v6 = vunpack.i.l.bf16 %v6378_v26  ;;  %v2064_v48 = vmul.f32 %v6791_v33, %v10719_v39  ;;  %v10728_v33 = vld [vmem:[#allocation43_spill] sm:$0xff] }
 0xc2a   : > { %v3641_v23 = vsel %vm1671_vm0, %v9468_v59, %v6370_v3  ;;  %v3640_v24 = vsel %vm1671_vm0, %v9449_v42, %v6369_v38 }
 0xc2b   : > { %v6388_v40 = vpop.permute.xlu0 %6387  ;;  %v3657_v45 = vsel %vm3648_vm1, %v3640_v24, %v6379_v6  ;;  %v3658_v37 = vsel %vm3648_vm1, %v3641_v23, %v6380_v18 }
 0xc2c   : > { %v6390_v21 = vunpack.i.h.bf16 %v6388_v40  ;;  %v6389_v49 = vunpack.i.l.bf16 %v6388_v40  ;;  %v6383_v31 = vpop.permute.xlu1 %6382  ;;  %v9579_v40 = vld [vmem:[%s10721_s20] ss:$0 sm:$0xff] }
 0xc2d   : > { %v6385_v16 = vunpack.i.h.bf16 %v6383_v31  ;;  %v6384_v55 = vunpack.i.l.bf16 %v6383_v31 }
 0xc2e   : > { %v3674_v14 = vsel %vm3665_vm2, %v3657_v45, %v6389_v49  ;;  %v3675_v59 = vsel %vm3665_vm2, %v3658_v37, %v6390_v21  ;;  %v6793_v4 = vpop.eup %6792  ;;  %v10722_v45 = vld [vmem:[#allocation37_spill] sm:$0xff] }
 0xc2f   : > { %v6398_v8 = vpop.permute.xlu0 %6397  ;;  %v3686_v42 = vpack.c.bf16 %v3675_v59, %v3674_v14  ;;  %v3659_v19 = vsel %vm3648_vm1, %v3642_v61, %v6384_v55  ;;  %v3660_v30 = vsel %vm3648_vm1, %v3643_v56, %v6385_v16  ;;  %v10723_v14 = vld [vmem:[#allocation36_spill] sm:$0xff]  ;;  %v10725_v56 = vld [vmem:[#allocation38_spill] sm:$0xff] }
 0xc30   : > { %v6393_v12 = vpop.permute.xlu1 %6392  ;;  %v6400_v54 = vunpack.i.h.bf16 %v6398_v8  ;;  %v6399_v41 = vunpack.i.l.bf16 %v6398_v8 }
 0xc31   : > { %v6395_v11 = vunpack.i.h.bf16 %v6393_v12  ;;  %v6394_v63 = vunpack.i.l.bf16 %v6393_v12  ;;  %6100 = vmatprep.mubr.bf16.mxu0 %v3686_v42  ;;  %v10724_v42 = vld [vmem:[#allocation39_spill] sm:$0xff] }
 0xc32   : > { %v3645_v29 = vsel %vm1671_vm0, %v2063_v2, %v6400_v54  ;;  %v3644_v17 = vsel %vm1671_vm0, %v9477_v58, %v6399_v41  ;;  %v2065_v58 = vmul.f32 %v6793_v4, %v10720_v32  ;;  %v10727_v41 = vld [vmem:[#allocation40_spill] sm:$0xff] }
 0xc33   : > { %v6408_v62 = vpop.permute.xlu0 %6407  ;;  %v3676_v44 = vsel %vm3665_vm2, %v3659_v19, %v6394_v63  ;;  %v3677_v5 = vsel %vm3665_vm2, %v3660_v30, %v6395_v11 }
 0xc34   : > { %v6403_v0 = vpop.permute.xlu1 %6402  ;;  %v3687_v43 = vpack.c.bf16 %v3677_v5, %v3676_v44  ;;  %v6410_v15 = vunpack.i.h.bf16 %v6408_v62  ;;  %v6409_v53 = vunpack.i.l.bf16 %v6408_v62  ;;  %v10726_v62 = vld [vmem:[#allocation42_spill] sm:$0xff] }
 0xc35   : > { %v6405_v25 = vunpack.i.h.bf16 %v6403_v0  ;;  %v6404_v46 = vunpack.i.l.bf16 %v6403_v0 }
 0xc36   : > { %6101 = vmatmul.mubr.bf16.gmra.mrb[104].mxu0 %v3687_v43  ;;  %v3661_v35 = vsel %vm3648_vm1, %v3644_v17, %v6409_v53  ;;  %v3662_v1 = vsel %vm3648_vm1, %v3645_v29, %v6410_v15  ;;  %v10729_v53 = vld [vmem:[#allocation41_spill] sm:$0xff] }
 0xc37   : > { %v6418_v22 = vpop.permute.xlu0 %6417  ;;  %v3646_v34 = vsel %vm1671_vm0, %v2064_v48, %v6404_v46  ;;  %v3647_v60 = vsel %vm1671_vm0, %v2065_v58, %v6405_v25 }
 0xc38   : > { %v6420_v52 = vunpack.i.h.bf16 %v6418_v22  ;;  %v6419_v47 = vunpack.i.l.bf16 %v6418_v22  ;;  %v6413_v57 = vpop.permute.xlu1 %6412 }
 0xc39   : > { %v6415_v20 = vunpack.i.h.bf16 %v6413_v57  ;;  %v6414_v36 = vunpack.i.l.bf16 %v6413_v57 }
 0xc3a   : > { %v3678_v13 = vsel %vm3665_vm2, %v3661_v35, %v6419_v47  ;;  %v3679_v51 = vsel %vm3665_vm2, %v3662_v1, %v6420_v52  ;;  %v10730_v52 = vld [vmem:[#allocation46_spill] sm:$0xff]  ;;  %v10731_v1 = vld [vmem:[#allocation44_spill] sm:$0xff] }
 0xc3b   : > { %v3688_v28 = vpack.c.bf16 %v3679_v51, %v3678_v13  ;;  %v3663_v26 = vsel %vm3648_vm1, %v3646_v34, %v6414_v36  ;;  %v3664_v18 = vsel %vm3648_vm1, %v3647_v60, %v6415_v20  ;;  %v10732_v20 = vld [vmem:[#allocation47_spill] sm:$0xff]  ;;  %v10733_v13 = vld [vmem:[#allocation45_spill] sm:$0xff] }
 0xc3c   : > { %v6423_v50 = vpop.permute.xlu1 %6422 }
 0xc3d   : > { %v6425_v3 = vunpack.i.h.bf16 %v6423_v50  ;;  %v6424_v38 = vunpack.i.l.bf16 %v6423_v50  ;;  %6104 = vmatprep.mubr.bf16.mxu0 %v3688_v28  ;;  %v10734_v50 = vld [vmem:[#allocation50_spill] sm:$0xff] }
 0xc3f   : > { %v3680_v6 = vsel %vm3665_vm2, %v3663_v26, %v6424_v38  ;;  %v3681_v23 = vsel %vm3665_vm2, %v3664_v18, %v6425_v3  ;;  %v10735_v38 = vld [vmem:[#allocation48_spill] sm:$0xff] }
 0xc40   : > { %v3689_v24 = vpack.c.bf16 %v3681_v23, %v3680_v6  ;;  %v10736_v6 = vld [vmem:[#allocation51_spill] sm:$0xff] }
 0xc42   : > { %6105 = vmatmul.mubr.bf16.gmra.mrb[108].mxu0 %v3689_v24  ;;  %v10737_v24 = vld [vmem:[#allocation49_spill] sm:$0xff] }
 0xcbb   : > { %v6094_v21 = vpop.f32.mrb[96].mxu0 }
 0xcbc   : > { %v3804_v49 = vadd.f32 %v6094_v21, %v9579_v40  ;;  %v3795_v31 = vpop.f32.mrb[97].mxu0 }
 0xcbd   : > { %v3796_v9 = vadd.f32 %v9579_v40, %v3795_v31  ;;  %v6095_v27 = vpop.f32.mrb[98].mxu0  ;;  %v6471_v31 = vld [vmem:[%s7705_s27 + $0x14] ss:$8 sps:$4 sm:$0xff]  }
 0xcbe   : > { %v9584_v37 = vadd.f32 %v3804_v49, %v10722_v45  ;;  %v3807_v16 = vadd.f32 %v6095_v27, %v9579_v40  ;;  %v3798_v55 = vpop.f32.mrb[99].mxu0  ;;  %v6468_v49 = vld [vmem:[%s7705_s27 + $0x4] ss:$8 sps:$4 sm:$0xff]  }
 0xcbf   : > { %v9588_v59 = vadd.f32 %v3796_v9, %v10723_v14  ;;  %v3799_v8 = vadd.f32 %v9579_v40, %v3798_v55  ;;  %4212 = vmatprep.subr.bf16.mxu1 %v6468_v49  ;;  %v6469_v9 = vld [vmem:[%s7705_s27 + $0x10] ss:$8 sps:$4 sm:$0xff]  }
 0xcc0   : > { %4879 = vst [vmem:[#allocation3 + $0x10] sm:$0xff] %v9584_v37  ;;  %v9593_v12 = vadd.f32 %v3807_v16, %v10724_v42 }
 0xcc1   : > { %4877 = vst [vmem:[#allocation3] sm:$0xff] %v9588_v59  ;;  %v9597_v61 = vadd.f32 %v3799_v8, %v10725_v56  ;;  %3876 = vadd.xlane.f32.xlu0 %v9588_v59 }
 0xcc2   : > { %4880 = vst [vmem:[#allocation3 + $0x18] sm:$0xff] %v9593_v12 }
 0xcc3   : > { %4878 = vst [vmem:[#allocation3 + $0x8] sm:$0xff] %v9597_v61  ;;  %3878 = vadd.xlane.f32.xlu1 %v9597_v61 }
 0xcc5   : > { %3880 = vadd.xlane.f32.xlu0 %v9584_v37 }
 0xcc9   : > { %3882 = vadd.xlane.f32.xlu0 %v9593_v12 }
 0xcf9   : > { %v6098_v11 = vpop.f32.mrb[100].mxu0 }
 0xcfa   : > { %v3820_v63 = vadd.f32 %v6098_v11, %v9579_v40  ;;  %v3811_v19 = vpop.f32.mrb[101].mxu0 }
 0xcfb   : > { %v3812_v30 = vadd.f32 %v9579_v40, %v3811_v19  ;;  %v6099_v7 = vpop.f32.mrb[102].mxu0 }
 0xcfc   : > { %v9608_v44 = vadd.f32 %v3820_v63, %v10726_v62  ;;  %v3823_v5 = vadd.f32 %v6099_v7, %v9579_v40  ;;  %v3814_v54 = vpop.f32.mrb[103].mxu0 }
 0xcfd   : > { %v9612_v0 = vadd.f32 %v3812_v30, %v10727_v41  ;;  %v3815_v43 = vadd.f32 %v9579_v40, %v3814_v54  ;;  %v6474_v41 = vld [vmem:[%s7705_s27 + $0x24] ss:$8 sps:$4 sm:$0xff]  }
 0xcfe   : > { %4883 = vst [vmem:[#allocation3 + $0x30] sm:$0xff] %v9608_v44  ;;  %v9617_v15 = vadd.f32 %v3823_v5, %v10728_v33  ;;  %v6477_v33 = vld [vmem:[%s7705_s27 + $0x34] ss:$8 sps:$4 sm:$0xff]  }
 0xcff   : > { %4881 = vst [vmem:[#allocation3 + $0x20] sm:$0xff] %v9612_v0  ;;  %v9621_v4 = vadd.f32 %v3815_v43, %v10729_v53  ;;  %3884 = vadd.xlane.f32.xlu0 %v9612_v0  ;;  %v6472_v43 = vld [vmem:[%s7705_s27 + $0x20] ss:$8 sps:$4 sm:$0xff]   ;;  %v6475_v53 = vld [vmem:[%s7705_s27 + $0x30] ss:$8 sps:$4 sm:$0xff]  }
 0xd00   : > { %4884 = vst [vmem:[#allocation3 + $0x38] sm:$0xff] %v9617_v15 }
 0xd01   : > { %4882 = vst [vmem:[#allocation3 + $0x28] sm:$0xff] %v9621_v4  ;;  %3886 = vadd.xlane.f32.xlu1 %v9621_v4 }
 0xd03   : > { %3888 = vadd.xlane.f32.xlu0 %v9608_v44 }
 0xd05   : > { %3890 = vadd.xlane.f32.xlu1 %v9617_v15 }
 0xd09   : > { %v6102_v10 = vpop.f32.mrb[104].mxu0 }
 0xd0a   : > { %v3836_v2 = vadd.f32 %v6102_v10, %v9579_v40  ;;  %v3827_v22 = vpop.f32.mrb[105].mxu0  ;;  %v6480_v10 = vld [vmem:[%s7705_s27 + $0x44] ss:$8 sps:$4 sm:$0xff]  }
 0xd0b   : > { %v3828_v29 = vadd.f32 %v9579_v40, %v3827_v22  ;;  %v6103_v17 = vpop.f32.mrb[106].mxu0  ;;  %v6483_v22 = vld [vmem:[%s7705_s27 + $0x54] ss:$8 sps:$4 sm:$0xff]  }
 0xd0c   : > { %v9632_v47 = vadd.f32 %v3836_v2, %v10730_v52  ;;  %v3839_v57 = vadd.f32 %v6103_v17, %v9579_v40  ;;  %v3830_v35 = vpop.f32.mrb[107].mxu0  ;;  %v6478_v2 = vld [vmem:[%s7705_s27 + $0x40] ss:$8 sps:$4 sm:$0xff]   ;;  %v6486_v17 = vld [vmem:[%s7705_s27 + $0x64] ss:$8 sps:$4 sm:$0xff]  }
 0xd0d   : > { %v9636_v25 = vadd.f32 %v3828_v29, %v10731_v1  ;;  %v3831_v46 = vadd.f32 %v9579_v40, %v3830_v35  ;;  %v6481_v29 = vld [vmem:[%s7705_s27 + $0x50] ss:$8 sps:$4 sm:$0xff]   ;;  %v6484_v52 = vld [vmem:[%s7705_s27 + $0x60] ss:$8 sps:$4 sm:$0xff]   ;;  %v6489_v35 = vld [vmem:[%s7705_s27 + $0x74] ss:$8 sps:$4 sm:$0xff]  }
 0xd0e   : > { %4887 = vst [vmem:[#allocation3 + $0x50] sm:$0xff] %v9632_v47  ;;  %v9641_v36 = vadd.f32 %v3839_v57, %v10732_v20  ;;  %v6487_v57 = vld [vmem:[%s7705_s27 + $0x70] ss:$8 sps:$4 sm:$0xff]  }
 0xd0f   : > { %4885 = vst [vmem:[#allocation3 + $0x40] sm:$0xff] %v9636_v25  ;;  %v9645_v51 = vadd.f32 %v3831_v46, %v10733_v13  ;;  %3892 = vadd.xlane.f32.xlu0 %v9636_v25 }
 0xd10   : > { %4888 = vst [vmem:[#allocation3 + $0x58] sm:$0xff] %v9641_v36 }
 0xd11   : > { %4886 = vst [vmem:[#allocation3 + $0x48] sm:$0xff] %v9645_v51  ;;  %3894 = vadd.xlane.f32.xlu1 %v9645_v51 }
 0xd13   : > { %3896 = vadd.xlane.f32.xlu0 %v9632_v47 }
 0xd15   : > { %v6106_v39 = vpop.f32.mrb[108].mxu0  ;;  %3898 = vadd.xlane.f32.xlu1 %v9641_v36 }
 0xd16   : > { %v3852_v48 = vadd.f32 %v6106_v39, %v9579_v40  ;;  %v3843_v32 = vpop.f32.mrb[109].mxu0 }
 0xd17   : > { %v3844_v58 = vadd.f32 %v9579_v40, %v3843_v32  ;;  %v6107_v28 = vpop.f32.mrb[110].mxu0 }
 0xd18   : > { %v9656_v34 = vadd.f32 %v3852_v48, %v10734_v50  ;;  %v3855_v60 = vadd.f32 %v6107_v28, %v9579_v40  ;;  %v3846_v3 = vpop.f32.mrb[111].mxu0 }
 0xd19   : > { %v9660_v26 = vadd.f32 %v3844_v58, %v10735_v38  ;;  %v3847_v18 = vadd.f32 %v9579_v40, %v3846_v3  ;;  %v6466_v40 = vld [vmem:[%s7705_s27] ss:$8 sps:$4 sm:$0xff]  }
 0xd1a   : > { %4891 = vst [vmem:[#allocation3 + $0x70] sm:$0xff] %v9656_v34  ;;  %v9665_v23 = vadd.f32 %v3855_v60, %v10736_v6  ;;  %4213 = vmatpush1.bf16.msra.mxu1 %v6466_v40 }
 0xd1b   : > { %4889 = vst [vmem:[#allocation3 + $0x60] sm:$0xff] %v9660_v26  ;;  %v9669_v21 = vadd.f32 %v3847_v18, %v10737_v24  ;;  %3900 = vadd.xlane.f32.xlu0 %v9660_v26  ;;  %4214 = vmatprep.subr.bf16.mxu1 %v6471_v31 }
 0xd1c   : > { %4892 = vst [vmem:[#allocation3 + $0x78] sm:$0xff] %v9665_v23 }
 0xd1d   : > { %4890 = vst [vmem:[#allocation3 + $0x68] sm:$0xff] %v9669_v21  ;;  %3902 = vadd.xlane.f32.xlu1 %v9669_v21 }
 0xd1e   : > { %4215 = vmatpush1.bf16.msra.mxu1 %v6469_v9 }
 0xd1f   : > { %3904 = vadd.xlane.f32.xlu0 %v9656_v34  ;;  %4216 = vmatprep.subr.bf16.mxu1 %v6474_v41 }
 0xd21   : > { %3906 = vadd.xlane.f32.xlu1 %v9665_v23 }
 0xd22   : > { %4217 = vmatpush1.bf16.msra.mxu1 %v6472_v43 }
 0xd23   : > { %4218 = vmatprep.subr.bf16.mxu1 %v6477_v33 }
 0xd26   : > { %4219 = vmatpush1.bf16.msra.mxu1 %v6475_v53 }
 0xd27   : > { %4220 = vmatprep.subr.bf16.mxu1 %v6480_v10 }
 0xd2a   : > { %4221 = vmatpush1.bf16.msra.mxu1 %v6478_v2 }
 0xd2b   : > { %4222 = vmatprep.subr.bf16.mxu1 %v6483_v22 }
 0xd2e   : > { %4223 = vmatpush1.bf16.msra.mxu1 %v6481_v29 }
 0xd2f   : > { %4224 = vmatprep.subr.bf16.mxu1 %v6486_v17 }
 0xd32   : > { %4225 = vmatpush1.bf16.msra.mxu1 %v6484_v52 }
 0xd33   : > { %4226 = vmatprep.subr.bf16.mxu1 %v6489_v35 }
 0xd36   : > { %4227 = vmatpush1.bf16.msra.mxu1 %v6487_v57 }
 0xd4e   : > { %v3877_v27 = vpop.xlane.xlu0 %3876 }
 0xd4f   : > { %v3908_v45 = vmul.f32 0.0078125, %v3877_v27 }
 0xd50   : > { %v3879_v16 = vpop.xlane.xlu1 %3878 }
 0xd51   : > { %v9682_v55 = vsub.f32 %v9588_v59, %v3908_v45  ;;  %v3909_v14 = vmul.f32 0.0078125, %v3879_v16 }
 0xd52   : > { %v3881_v8 = vpop.xlane.xlu0 %3880 }
 0xd53   : > { %v9685_v42 = vsub.f32 %v9597_v61, %v3909_v14  ;;  %v3910_v56 = vmul.f32 0.0078125, %v3881_v8  ;;  %v3940_v11 = vmul.f32 %v9682_v55, %v9682_v55 }
 0xd55   : > { %v9690_v63 = vsub.f32 %v9584_v37, %v3910_v56  ;;  %3956 = vadd.xlane.f32.xlu0 %v3940_v11  ;;  %v3941_v19 = vmul.f32 %v9685_v42, %v9685_v42 }
 0xd56   : > { %v3883_v30 = vpop.xlane.xlu0 %3882 }
 0xd57   : > { %v3911_v7 = vmul.f32 0.0078125, %v3883_v30  ;;  %3958 = vadd.xlane.f32.xlu1 %v3941_v19  ;;  %v3942_v62 = vmul.f32 %v9690_v63, %v9690_v63 }
 0xd59   : > { %v9697_v5 = vsub.f32 %v9593_v12, %v3911_v7  ;;  %3960 = vadd.xlane.f32.xlu0 %v3942_v62 }
 0xd5b   : > { %v3943_v54 = vmul.f32 %v9697_v5, %v9697_v5 }
 0xd5d   : > { %3962 = vadd.xlane.f32.xlu1 %v3943_v54 }
 0xd8c   : > { %v3885_v1 = vpop.xlane.xlu0 %3884 }
 0xd8d   : > { %v3912_v46 = vmul.f32 0.0078125, %v3885_v1 }
 0xd8e   : > { %v3887_v20 = vpop.xlane.xlu1 %3886 }
 0xd8f   : > { %v9714_v13 = vsub.f32 %v9612_v0, %v3912_v46  ;;  %v3913_v39 = vmul.f32 0.0078125, %v3887_v20 }
 0xd90   : > { %v3889_v48 = vpop.xlane.xlu0 %3888 }
 0xd91   : > { %v9717_v32 = vsub.f32 %v9621_v4, %v3913_v39  ;;  %v3914_v58 = vmul.f32 0.0078125, %v3889_v48  ;;  %v3944_v28 = vmul.f32 %v9714_v13, %v9714_v13 }
 0xd92   : > { %v3891_v50 = vpop.xlane.xlu1 %3890 }
 0xd93   : > { %v9722_v60 = vsub.f32 %v9608_v44, %v3914_v58  ;;  %v3915_v3 = vmul.f32 0.0078125, %v3891_v50  ;;  %3964 = vadd.xlane.f32.xlu0 %v3944_v28  ;;  %v3945_v38 = vmul.f32 %v9717_v32, %v9717_v32 }
 0xd95   : > { %v9727_v18 = vsub.f32 %v9617_v15, %v3915_v3  ;;  %3966 = vadd.xlane.f32.xlu1 %v3945_v38  ;;  %v3946_v6 = vmul.f32 %v9722_v60, %v9722_v60 }
 0xd97   : > { %3968 = vadd.xlane.f32.xlu0 %v3946_v6  ;;  %v3947_v24 = vmul.f32 %v9727_v18, %v9727_v18 }
 0xd99   : > { %3970 = vadd.xlane.f32.xlu1 %v3947_v24 }
 0xd9c   : > { %v3893_v40 = vpop.xlane.xlu0 %3892 }
 0xd9d   : > { %v3916_v49 = vmul.f32 0.0078125, %v3893_v40 }
 0xd9e   : > { %v3895_v31 = vpop.xlane.xlu1 %3894 }
 0xd9f   : > { %v9734_v9 = vsub.f32 %v9636_v25, %v3916_v49  ;;  %v3917_v27 = vmul.f32 0.0078125, %v3895_v31 }
 0xda0   : > { %v3897_v45 = vpop.xlane.xlu0 %3896 }
 0xda1   : > { %v9737_v16 = vsub.f32 %v9645_v51, %v3917_v27  ;;  %v3918_v14 = vmul.f32 0.0078125, %v3897_v45  ;;  %v3948_v8 = vmul.f32 %v9734_v9, %v9734_v9 }
 0xda2   : > { %v3899_v56 = vpop.xlane.xlu1 %3898 }
 0xda3   : > { %v9742_v11 = vsub.f32 %v9632_v47, %v3918_v14  ;;  %v3919_v19 = vmul.f32 0.0078125, %v3899_v56  ;;  %3972 = vadd.xlane.f32.xlu0 %v3948_v8  ;;  %v3949_v30 = vmul.f32 %v9737_v16, %v9737_v16  ;;  %v9778_v14 = vld [vmem:[%s853_s17] ss:$0 sm:$0xff] }
 0xda5   : > { %v9747_v7 = vsub.f32 %v9641_v36, %v3919_v19  ;;  %3974 = vadd.xlane.f32.xlu1 %v3949_v30  ;;  %v3950_v62 = vmul.f32 %v9742_v11, %v9742_v11 }
 0xda7   : > { %3976 = vadd.xlane.f32.xlu0 %v3950_v62  ;;  %v3951_v54 = vmul.f32 %v9747_v7, %v9747_v7 }
 0xda8   : > { %v3901_v41 = vpop.xlane.xlu0 %3900 }
 0xda9   : > { %v3920_v43 = vmul.f32 0.0078125, %v3901_v41  ;;  %3978 = vadd.xlane.f32.xlu1 %v3951_v54  ;;  %v9788_v54 = vld [vmem:[%s856_s18] ss:$0 sm:$0xff] }
 0xdaa   : > { %v3903_v33 = vpop.xlane.xlu1 %3902 }
 0xdab   : > { %v9754_v53 = vsub.f32 %v9660_v26, %v3920_v43  ;;  %v3921_v10 = vmul.f32 0.0078125, %v3903_v33 }
 0xdac   : > { %v3905_v2 = vpop.xlane.xlu0 %3904 }
 0xdad   : > { %v9757_v22 = vsub.f32 %v9669_v21, %v3921_v10  ;;  %v3922_v29 = vmul.f32 0.0078125, %v3905_v2  ;;  %v3952_v17 = vmul.f32 %v9754_v53, %v9754_v53 }
 0xdae   : > { %v3907_v52 = vpop.xlane.xlu1 %3906 }
 0xdaf   : > { %v9762_v57 = vsub.f32 %v9656_v34, %v3922_v29  ;;  %v3923_v35 = vmul.f32 0.0078125, %v3907_v52  ;;  %3980 = vadd.xlane.f32.xlu0 %v3952_v17  ;;  %v3953_v1 = vmul.f32 %v9757_v22, %v9757_v22  ;;  %v10740_v52 = vmov 0  }
 0xdb1   : > { %v9767_v46 = vsub.f32 %v9665_v23, %v3923_v35  ;;  %3982 = vadd.xlane.f32.xlu1 %v3953_v1  ;;  %v3954_v20 = vmul.f32 %v9762_v57, %v9762_v57 }
 0xdb3   : > { %3984 = vadd.xlane.f32.xlu0 %v3954_v20  ;;  %v3955_v39 = vmul.f32 %v9767_v46, %v9767_v46 }
 0xdb5   : > { %3986 = vadd.xlane.f32.xlu1 %v3955_v39 }
 0xde2   : > { %v3957_v48 = vpop.xlane.xlu0 %3956 }
 0xde3   : > { %v3988_v58 = vmul.f32 0.0078125, %v3957_v48 }
 0xde4   : > { %v3959_v28 = vpop.xlane.xlu1 %3958 }
 0xde5   : > { %v4004_v50 = vadd.f32 1e-05, %v3988_v58  ;;  %v3989_v3 = vmul.f32 0.0078125, %v3959_v28 }
 0xde6   : > { %v3961_v38 = vpop.xlane.xlu0 %3960 }
 0xde7   : > { %6794 = vrsqrt.f32 %v4004_v50  ;;  %v4005_v6 = vadd.f32 1e-05, %v3989_v3  ;;  %v3990_v24 = vmul.f32 0.0078125, %v3961_v38 }
 0xde9   : > { %6796 = vrsqrt.f32 %v4005_v6  ;;  %v4006_v40 = vadd.f32 1e-05, %v3990_v24 }
 0xdea   : > { %v3963_v49 = vpop.xlane.xlu1 %3962 }
 0xdeb   : > { %6798 = vrsqrt.f32 %v4006_v40  ;;  %v3991_v31 = vmul.f32 0.0078125, %v3963_v49 }
 0xded   : > { %v4007_v27 = vadd.f32 1e-05, %v3991_v31 }
 0xdef   : > { %6800 = vrsqrt.f32 %v4007_v27 }
 0xdf1   : > { %v6795_v45 = vpop.eup %6794 }
 0xdf2   : > { %v4036_v8 = vmul.f32 %v6795_v45, %v9682_v55 }
 0xdf3   : > { %v6797_v56 = vpop.eup %6796 }
 0xdf4   : > { %v4058_v19 = vmul.f32 %v9778_v14, %v4036_v8  ;;  %v4037_v30 = vmul.f32 %v6797_v56, %v9685_v42 }
 0xdf5   : > { %v6799_v62 = vpop.eup %6798 }
 0xdf6   : > { %v4059_v41 = vmul.f32 %v9778_v14, %v4037_v30  ;;  %v4080_v43 = vadd.f32 %v9788_v54, %v4058_v19  ;;  %v4038_v55 = vmul.f32 %v6799_v62, %v9690_v63 }
 0xdf8   : > { %v4081_v33 = vadd.f32 %v9788_v54, %v4059_v41  ;;  %v4060_v42 = vmul.f32 %v9778_v14, %v4038_v55 }
 0xdf9   : > { %v6801_v10 = vpop.eup %6800 }
 0xdfa   : > { %v4096_v2 = vpack.c.bf16 %v4081_v33, %v4080_v43  ;;  %v4039_v29 = vmul.f32 %v6801_v10, %v9697_v5  ;;  %v4082_v1 = vadd.f32 %v9788_v54, %v4060_v42 }
 0xdfc   : > { %4245 = vmatmul.mubr.bf16.vlgmr.msra.gmra.mrb[80].mxu1 %v4096_v2  ;;  %v4061_v17 = vmul.f32 %v9778_v14, %v4039_v29 }
 0xdfd   : > { %4254 = vmatprep.mubr.bf16.mxu1 %v10740_v52 }
 0xdfe   : > { %v4083_v35 = vadd.f32 %v9788_v54, %v4061_v17 }
 0xe00   : > { %v4097_v20 = vpack.c.bf16 %v4083_v35, %v4082_v1 }
 0xe04   : > { %4255 = vmatmul.mubr.bf16.gmra.mrb[84].mxu1 %v4097_v20 }
 0xe05   : > { %4264 = vmatprep.mubr.bf16.mxu1 %v10740_v52 }
 0xe20   : > { %v3965_v63 = vpop.xlane.xlu0 %3964 }
 0xe21   : > { %v3992_v39 = vmul.f32 0.0078125, %v3965_v63 }
 0xe22   : > { %v3967_v48 = vpop.xlane.xlu1 %3966 }
 0xe23   : > { %v4008_v58 = vadd.f32 1e-05, %v3992_v39  ;;  %v3993_v5 = vmul.f32 0.0078125, %v3967_v48 }
 0xe24   : > { %v3969_v28 = vpop.xlane.xlu0 %3968 }
 0xe25   : > { %6802 = vrsqrt.f32 %v4008_v58  ;;  %v4009_v50 = vadd.f32 1e-05, %v3993_v5  ;;  %v3994_v3 = vmul.f32 0.0078125, %v3969_v28 }
 0xe26   : > { %v3971_v38 = vpop.xlane.xlu1 %3970 }
 0xe27   : > { %6804 = vrsqrt.f32 %v4009_v50  ;;  %v4010_v6 = vadd.f32 1e-05, %v3994_v3  ;;  %v3995_v24 = vmul.f32 0.0078125, %v3971_v38 }
 0xe29   : > { %6806 = vrsqrt.f32 %v4010_v6  ;;  %v4011_v40 = vadd.f32 1e-05, %v3995_v24 }
 0xe2b   : > { %6808 = vrsqrt.f32 %v4011_v40 }
 0xe2f   : > { %v6803_v49 = vpop.eup %6802 }
 0xe30   : > { %v3973_v31 = vpop.xlane.xlu0 %3972  ;;  %v4040_v27 = vmul.f32 %v6803_v49, %v9714_v13 }
 0xe31   : > { %v6805_v45 = vpop.eup %6804  ;;  %v3996_v8 = vmul.f32 0.0078125, %v3973_v31 }
 0xe32   : > { %v3975_v56 = vpop.xlane.xlu1 %3974  ;;  %v4041_v19 = vmul.f32 %v6805_v45, %v9717_v32  ;;  %v4062_v30 = vmul.f32 %v9778_v14, %v4040_v27 }
 0xe33   : > { %v6807_v62 = vpop.eup %6806  ;;  %v4012_v41 = vadd.f32 1e-05, %v3996_v8  ;;  %v3997_v43 = vmul.f32 0.0078125, %v3975_v56 }
 0xe34   : > { %v3977_v33 = vpop.xlane.xlu0 %3976  ;;  %v4063_v55 = vmul.f32 %v9778_v14, %v4041_v19  ;;  %v4084_v13 = vadd.f32 %v9788_v54, %v4062_v30  ;;  %v4042_v35 = vmul.f32 %v6807_v62, %v9722_v60 }
 0xe35   : > { %v6809_v10 = vpop.eup %6808  ;;  %6810 = vrsqrt.f32 %v4012_v41  ;;  %v4013_v2 = vadd.f32 1e-05, %v3997_v43  ;;  %v3998_v29 = vmul.f32 0.0078125, %v3977_v33 }
 0xe36   : > { %v3979_v42 = vpop.xlane.xlu1 %3978  ;;  %v4085_v17 = vadd.f32 %v9788_v54, %v4063_v55  ;;  %v4043_v32 = vmul.f32 %v6809_v10, %v9727_v18  ;;  %v4064_v58 = vmul.f32 %v9778_v14, %v4042_v35 }
 0xe37   : > { %6812 = vrsqrt.f32 %v4013_v2  ;;  %v4014_v1 = vadd.f32 1e-05, %v3998_v29  ;;  %v3999_v20 = vmul.f32 0.0078125, %v3979_v42 }
 0xe38   : > { %v4098_v63 = vpack.c.bf16 %v4085_v17, %v4084_v13  ;;  %v4065_v39 = vmul.f32 %v9778_v14, %v4043_v32  ;;  %v4086_v18 = vadd.f32 %v9788_v54, %v4064_v58 }
 0xe39   : > { %6814 = vrsqrt.f32 %v4014_v1  ;;  %v4015_v48 = vadd.f32 1e-05, %v3999_v20  ;;  %v6490_v20 = vld [vmem:[%s7711_s10 + $0x40] sm:$0xff]  }
 0xe3a   : > { %4265 = vmatmul.mubr.bf16.gmra.mrb[88].mxu1 %v4098_v63  ;;  %v4087_v28 = vadd.f32 %v9788_v54, %v4065_v39  ;;  %5724 = vmatprep.subr.bf16.mxu0 %v6490_v20 }
 0xe3b   : > { %6816 = vrsqrt.f32 %v4015_v48  ;;  %4274 = vmatprep.mubr.bf16.mxu1 %v10740_v52  ;;  %v6491_v48 = vld [vmem:[%s7711_s10] sm:$0xff]   ;;  %6108 = vmatprep.subr.bf16.mxu1 %v6490_v20 }
 0xe3c   : > { %v3981_v5 = vpop.xlane.xlu0 %3980  ;;  %v4099_v40 = vpack.c.bf16 %v4087_v28, %v4086_v18  ;;  %5725 = vmatpush3.bf16.msra.mxu0 %v6491_v48  ;;  %6116 = vmatpush3.bf16.msra.mxu1 %v6491_v48 }
 0xe3d   : > { %v4000_v60 = vmul.f32 0.0078125, %v3981_v5 }
 0xe3e   : > { %v3983_v50 = vpop.xlane.xlu1 %3982 }
 0xe3f   : > { %v6811_v3 = vpop.eup %6810  ;;  %v4016_v38 = vadd.f32 1e-05, %v4000_v60  ;;  %v4001_v6 = vmul.f32 0.0078125, %v3983_v50  ;;  %v6493_v50 = vld [vmem:[%s7711_s10 + $0x8] sm:$0xff]  }
 0xe40   : > { %v3985_v24 = vpop.xlane.xlu0 %3984  ;;  %v4044_v49 = vmul.f32 %v6811_v3, %v9734_v9 }
 0xe41   : > { %v6813_v31 = vpop.eup %6812  ;;  %6818 = vrsqrt.f32 %v4016_v38  ;;  %v4017_v27 = vadd.f32 1e-05, %v4001_v6  ;;  %v4002_v45 = vmul.f32 0.0078125, %v3985_v24  ;;  %v6494_v38 = vld [vmem:[%s7711_s10 + $0x50] sm:$0xff]  }
 0xe42   : > { %v3987_v8 = vpop.xlane.xlu1 %3986  ;;  %4275 = vmatmul.mubr.bf16.gmra.mrb[92].mxu1 %v4099_v40  ;;  %v4045_v56 = vmul.f32 %v6813_v31, %v9737_v16  ;;  %v4066_v19 = vmul.f32 %v9778_v14, %v4044_v49  ;;  %v6495_v40 = vld [vmem:[%s7711_s10 + $0x10] sm:$0xff]   ;;  %v6497_v31 = vld [vmem:[%s7711_s10 + $0x18] sm:$0xff]  }
 0xe43   : > { %v6815_v30 = vpop.eup %6814  ;;  %6820 = vrsqrt.f32 %v4017_v27  ;;  %v4003_v62 = vmul.f32 0.0078125, %v3987_v8  ;;  %4284 = vmatprep.mubr.bf16.mxu1 %v10740_v52  ;;  %v4018_v33 = vadd.f32 1e-05, %v4002_v45  ;;  %v6498_v45 = vld [vmem:[%s7711_s10 + $0x60] sm:$0xff]  }
 0xe44   : > { %v4067_v41 = vmul.f32 %v9778_v14, %v4045_v56  ;;  %v4088_v55 = vadd.f32 %v9788_v54, %v4066_v19  ;;  %v4046_v2 = vmul.f32 %v6815_v30, %v9742_v11  ;;  %v6499_v8 = vld [vmem:[%s7711_s10 + $0x20] sm:$0xff]   ;;  %v6501_v56 = vld [vmem:[%s7711_s10 + $0x28] sm:$0xff]   ;;  %v6502_v19 = vld [vmem:[%s7711_s10 + $0x70] sm:$0xff]  }
 0xe45   : > { %v6817_v43 = vpop.eup %6816  ;;  %v4019_v9 = vadd.f32 1e-05, %v4003_v62  ;;  %v6504_v30 = vld [vmem:[%s7711_s10 + $0x78] sm:$0xff]  }
 0xe46   : > { %v4089_v10 = vadd.f32 %v9788_v54, %v4067_v41  ;;  %v4047_v16 = vmul.f32 %v6817_v43, %v9747_v7  ;;  %v4068_v13 = vmul.f32 %v9778_v14, %v4046_v2  ;;  %v6505_v62 = vld [vmem:[%s7711_s10 + $0x38] sm:$0xff]   ;;  %v10741_v43 = vld [vmem:[#allocation52_spill] sm:$0xff] }
 0xe47   : > { %6822 = vrsqrt.f32 %v4019_v9  ;;  %v4120_v41 = vld [vmem:[%s7757_s24] sm:$0x3] }
 0xe48   : > { %v4100_v29 = vpack.c.bf16 %v4089_v10, %v4088_v55  ;;  %v4069_v42 = vmul.f32 %v9778_v14, %v4047_v16  ;;  %6824 = vrsqrt.f32 %v4018_v33  ;;  %v4090_v11 = vadd.f32 %v9788_v54, %v4068_v13 }
 0xe49   : > { %v10742_v33 = vsub.s32 0, %v10741_v43  ;;  %v10743_v55 = vsub.s32 1, %v10741_v43 }
 0xe4a   : > { %4285 = vmatmul.mubr.bf16.gmra.mrb[96].mxu1 %v4100_v29  ;;  %v4091_v35 = vadd.f32 %v9788_v54, %v4069_v42 }
 0xe4b   : > { %v6819_v17 = vpop.eup %6818  ;;  %4294 = vmatprep.mubr.bf16.mxu1 %v10740_v52  ;;  %v9861_v9 = vrot.slane %v4120_v41, %v10742_v33  ;;  %v9865_v10 = vrot.slane %v4120_v41, %v10743_v55 }
 0xe4c   : > { %v4048_v7 = vmul.f32 %v6819_v17, %v9754_v53  ;;  %v4101_v63 = vpack.c.bf16 %v4091_v35, %v4090_v11  ;;  %v6492_v53 = vld [vmem:[%s7711_s10 + $0x48] sm:$0xff]  }
 0xe4d   : > { %v6821_v32 = vpop.eup %6820  ;;  %5726 = vmatprep.subr.bf16.mxu0 %v6492_v53  ;;  %6109 = vmatprep.subr.bf16.mxu1 %v6492_v53 }
 0xe4e   : > { %v4049_v1 = vmul.f32 %v6821_v32, %v9757_v22  ;;  %v4070_v5 = vmul.f32 %v9778_v14, %v4048_v7  ;;  %5727 = vmatpush3.bf16.msra.mxu0 %v6493_v50  ;;  %6117 = vmatpush3.bf16.msra.mxu1 %v6493_v50 }
 0xe4f   : > { %5728 = vmatprep.subr.bf16.mxu0 %v6494_v38  ;;  %6110 = vmatprep.subr.bf16.mxu1 %v6494_v38 }
 0xe50   : > { %v4071_v39 = vmul.f32 %v9778_v14, %v4049_v1  ;;  %v4092_v18 = vadd.f32 %v9788_v54, %v4070_v5 }
 0xe51   : > { %v6823_v58 = vpop.eup %6822 }
 0xe52   : > { %4295 = vmatmul.mubr.bf16.gmra.mrb[100].mxu1 %v4101_v63  ;;  %v6825_v28 = vpop.eup %6824  ;;  %v4093_v22 = vadd.f32 %v9788_v54, %v4071_v39  ;;  %v4051_v60 = vmul.f32 %v6823_v58, %v9767_v46  ;;  %5729 = vmatpush3.bf16.msra.mxu0 %v6495_v40 }
 0xe53   : > { %4304 = vmatprep.mubr.bf16.mxu1 %v10740_v52  ;;  %v4050_v3 = vmul.f32 %v6825_v28, %v9762_v57  ;;  %v6496_v57 = vld [vmem:[%s7711_s10 + $0x58] sm:$0xff]   ;;  %6118 = vmatpush3.bf16.msra.mxu1 %v6495_v40 }
 0xe54   : > { %v4102_v6 = vpack.c.bf16 %v4093_v22, %v4092_v18  ;;  %v4073_v24 = vmul.f32 %v9778_v14, %v4051_v60  ;;  %5730 = vmatprep.subr.bf16.mxu0 %v6496_v57  ;;  %6111 = vmatprep.subr.bf16.mxu1 %v6496_v57 }
 0xe55   : > { %v4072_v46 = vmul.f32 %v9778_v14, %v4050_v3 }
 0xe56   : > { %v4095_v49 = vadd.f32 %v9788_v54, %v4073_v24  ;;  %5731 = vmatpush3.bf16.msra.mxu0 %v6497_v31 }
 0xe57   : > { %v4094_v27 = vadd.f32 %v9788_v54, %v4072_v46  ;;  %6119 = vmatpush3.bf16.msra.mxu1 %v6497_v31  ;;  %5732 = vmatprep.subr.bf16.mxu0 %v6498_v45  ;;  %v6503_v54 = vld [vmem:[%s7711_s10 + $0x30] sm:$0xff]  }
 0xe58   : > { %6112 = vmatprep.subr.bf16.mxu1 %v6498_v45 }
 0xe59   : > { %v4103_v14 = vpack.c.bf16 %v4095_v49, %v4094_v27 }
 0xe5a   : > { %4305 = vmatmul.mubr.bf16.gmra.mrb[104].mxu1 %v4102_v6  ;;  %5733 = vmatpush3.bf16.msra.mxu0 %v6499_v8 }
 0xe5b   : > { %4314 = vmatprep.mubr.bf16.mxu1 %v10740_v52  ;;  %v6500_v52 = vld [vmem:[%s7711_s10 + $0x68] sm:$0xff]   ;;  %6120 = vmatpush3.bf16.msra.mxu1 %v6499_v8 }
 0xe5c   : > { %5734 = vmatprep.subr.bf16.mxu0 %v6500_v52  ;;  %6113 = vmatprep.subr.bf16.mxu1 %v6500_v52 }
 0xe5e   : > { %5735 = vmatpush3.bf16.msra.mxu0 %v6501_v56 }
 0xe5f   : > { %5736 = vmatprep.subr.bf16.mxu0 %v6502_v19  ;;  %6121 = vmatpush3.bf16.msra.mxu1 %v6501_v56 }
 0xe60   : > { %6114 = vmatprep.subr.bf16.mxu1 %v6502_v19 }
 0xe62   : > { %4315 = vmatmul.mubr.bf16.gmra.mrb[108].mxu1 %v4103_v14  ;;  %5737 = vmatpush3.bf16.msra.mxu0 %v6503_v54 }
 0xe63   : > { %5738 = vmatprep.subr.bf16.mxu0 %v6504_v30  ;;  %6122 = vmatpush3.bf16.msra.mxu1 %v6503_v54 }
 0xe64   : > { %6115 = vmatprep.subr.bf16.mxu1 %v6504_v30 }
 0xe66   : > { %5739 = vmatpush3.bf16.msra.mxu0 %v6505_v62 }
 0xe67   : > { %6123 = vmatpush3.bf16.msra.mxu1 %v6505_v62 }
 0xecf   : > { %v4246_v2 = vpop.f32.mrb[80].mxu1 }
 0xed0   : > { %v9868_v16 = vadd.f32 %v4246_v2, %v9861_v9  ;;  %v4248_v29 = vpop.f32.mrb[81].mxu1 }
 0xed1   : > { %v9871_v42 = vadd.f32 %v4248_v29, %v9865_v10  ;;  %v4250_v13 = vpop.f32.mrb[82].mxu1 }
 0xed2   : > { %v4357_v17 = vmul.f32 0.044715, %v9868_v16  ;;  %v9875_v35 = vadd.f32 %v4250_v13, %v9861_v9  ;;  %v4252_v32 = vpop.f32.mrb[83].mxu1 }
 0xed3   : > { %v4358_v11 = vmul.f32 0.044715, %v9871_v42  ;;  %v9879_v7 = vadd.f32 %v4252_v32, %v9865_v10 }
 0xed4   : > { %v4389_v1 = vmul.f32 %v4357_v17, %v9868_v16  ;;  %v4359_v20 = vmul.f32 0.044715, %v9875_v35 }
 0xed5   : > { %v4390_v63 = vmul.f32 %v4358_v11, %v9871_v42  ;;  %v4360_v39 = vmul.f32 0.044715, %v9879_v7 }
 0xed6   : > { %v4421_v48 = vmul.f32 %v4389_v1, %v9868_v16  ;;  %v4391_v58 = vmul.f32 %v4359_v20, %v9875_v35 }
 0xed7   : > { %v4422_v5 = vmul.f32 %v4390_v63, %v9871_v42  ;;  %v4392_v28 = vmul.f32 %v4360_v39, %v9879_v7  ;;  %v4256_v53 = vpop.f32.mrb[84].mxu1 }
 0xed8   : > { %v4453_v22 = vadd.f32 %v4421_v48, %v9868_v16  ;;  %v4423_v60 = vmul.f32 %v4391_v58, %v9875_v35  ;;  %v9892_v50 = vadd.f32 %v4256_v53, %v9861_v9  ;;  %v4258_v18 = vpop.f32.mrb[85].mxu1 }
 0xed9   : > { %v4424_v3 = vmul.f32 %v4392_v28, %v9879_v7  ;;  %v9896_v38 = vadd.f32 %v4258_v18, %v9865_v10  ;;  %v4260_v6 = vpop.f32.mrb[86].mxu1  ;;  %v4454_v24 = vadd.f32 %v4422_v5, %v9871_v42  ;;  %v4327_v18 = vmul.f32 0.5, %v9875_v35 }
 0xeda   : > { %v4485_v40 = vmul.f32 0.7978846, %v4453_v22  ;;  %v4455_v46 = vadd.f32 %v4423_v60, %v9875_v35  ;;  %v4361_v57 = vmul.f32 0.044715, %v9892_v50  ;;  %v4261_v49 = vadd.f32 %v4260_v6, %v9861_v9  ;;  %v4262_v31 = vpop.f32.mrb[87].mxu1 }
 0xedb   : > { %v4362_v27 = vmul.f32 0.044715, %v9896_v38  ;;  %v4263_v45 = vadd.f32 %v4262_v31, %v9865_v10  ;;  %v4456_v14 = vadd.f32 %v4424_v3, %v9879_v7  ;;  %v4486_v8 = vmul.f32 0.7978846, %v4454_v24 }
 0xedc   : > { %6826 = vtanh.f32 %v4485_v40  ;;  %v4487_v52 = vmul.f32 0.7978846, %v4455_v46  ;;  %v4393_v56 = vmul.f32 %v4361_v57, %v9892_v50  ;;  %v4363_v19 = vmul.f32 0.044715, %v4261_v49 }
 0xedd   : > { %v4394_v54 = vmul.f32 %v4362_v27, %v9896_v38  ;;  %v4364_v30 = vmul.f32 0.044715, %v4263_v45  ;;  %v4488_v62 = vmul.f32 0.7978846, %v4456_v14  ;;  %6828 = vtanh.f32 %v4486_v8 }
 0xede   : > { %6830 = vtanh.f32 %v4487_v52  ;;  %v4425_v41 = vmul.f32 %v4393_v56, %v9892_v50  ;;  %v4395_v43 = vmul.f32 %v4363_v19, %v4261_v49  ;;  %v4325_v60 = vmul.f32 0.5, %v9868_v16 }
 0xedf   : > { %v4426_v33 = vmul.f32 %v4394_v54, %v9896_v38  ;;  %v4396_v55 = vmul.f32 %v4364_v30, %v4263_v45  ;;  %6832 = vtanh.f32 %v4488_v62  ;;  %v4326_v6 = vmul.f32 0.5, %v9871_v42 }
 0xee0   : > { %v4427_v2 = vmul.f32 %v4395_v43, %v4261_v49  ;;  %v4457_v29 = vadd.f32 %v4425_v41, %v9892_v50  ;;  %v4328_v24 = vmul.f32 0.5, %v9879_v7  ;;  %v4329_v35 = vmul.f32 0.5, %v9892_v50 }
 0xee1   : > { %v4428_v13 = vmul.f32 %v4396_v55, %v4263_v45  ;;  %v4458_v17 = vadd.f32 %v4426_v33, %v9896_v38  ;;  %v4331_v42 = vmul.f32 0.5, %v4261_v49  ;;  %v4330_v7 = vmul.f32 0.5, %v9896_v38 }
 0xee2   : > { %v4459_v32 = vadd.f32 %v4427_v2, %v4261_v49  ;;  %v4489_v11 = vmul.f32 0.7978846, %v4457_v29  ;;  %v4332_v41 = vmul.f32 0.5, %v4263_v45 }
 0xee3   : > { %v4460_v1 = vadd.f32 %v4428_v13, %v4263_v45  ;;  %v4490_v20 = vmul.f32 0.7978846, %v4458_v17 }
 0xee4   : > { %v4491_v63 = vmul.f32 0.7978846, %v4459_v32  ;;  %6834 = vtanh.f32 %v4489_v11 }
 0xee5   : > { %v4492_v39 = vmul.f32 0.7978846, %v4460_v1  ;;  %6836 = vtanh.f32 %v4490_v20 }
 0xee6   : > { %v6827_v48 = vpop.eup %6826  ;;  %6838 = vtanh.f32 %v4491_v63 }
 0xee7   : > { %v6829_v58 = vpop.eup %6828  ;;  %v4549_v5 = vadd.f32 1.0, %v6827_v48  ;;  %6840 = vtanh.f32 %v4492_v39 }
 0xee8   : > { %v6831_v28 = vpop.eup %6830  ;;  %v4550_v53 = vadd.f32 1.0, %v6829_v58 }
 0xee9   : > { %v6833_v22 = vpop.eup %6832  ;;  %v4551_v3 = vadd.f32 1.0, %v6831_v28  ;;  %v4581_v46 = vmul.f32 %v4549_v5, %v4325_v60 }
 0xeea   : > { %v4552_v40 = vadd.f32 1.0, %v6833_v22  ;;  %v4582_v31 = vmul.f32 %v4550_v53, %v4326_v6 }
 0xeeb   : > { %v4583_v57 = vmul.f32 %v4551_v3, %v4327_v18 }
 0xeec   : > { %v4584_v27 = vmul.f32 %v4552_v40, %v4328_v24 }
 0xeed   : > { %v4613_v14 = vpack.c.bf16 %v4583_v57, %v4581_v46 }
 0xeee   : > { %v6835_v8 = vpop.eup %6834  ;;  %v4614_v52 = vpack.c.bf16 %v4584_v27, %v4582_v31 }
 0xeef   : > { %v6837_v56 = vpop.eup %6836  ;;  %v4553_v19 = vadd.f32 1.0, %v6835_v8 }
 0xef0   : > { %v6839_v54 = vpop.eup %6838  ;;  %4796 = vmatprep.mubr.bf16.mxu0 %v4614_v52  ;;  %v4554_v16 = vadd.f32 1.0, %v6837_v56 }
 0xef1   : > { %v6841_v30 = vpop.eup %6840  ;;  %4797 = vmatmul.mubr.bf16.vlgmr.msra.gmra.mrb[112].mxu0 %v4613_v14  ;;  %v4555_v62 = vadd.f32 1.0, %v6839_v54  ;;  %v4585_v33 = vmul.f32 %v4553_v19, %v4329_v35 }
 0xef2   : > { %v4556_v43 = vadd.f32 1.0, %v6841_v30  ;;  %v4586_v2 = vmul.f32 %v4554_v16, %v4330_v7 }
 0xef3   : > { %v4587_v55 = vmul.f32 %v4555_v62, %v4331_v42 }
 0xef4   : > { %v4588_v29 = vmul.f32 %v4556_v43, %v4332_v41 }
 0xef5   : > { %v4615_v13 = vpack.c.bf16 %v4587_v55, %v4585_v33 }
 0xef6   : > { %v4616_v17 = vpack.c.bf16 %v4588_v29, %v4586_v2 }
 0xef8   : > { %4804 = vmatprep.mubr.bf16.mxu0 %v4616_v17 }
 0xef9   : > { %4805 = vmatmul.mubr.bf16.gmra.mrb[116].mxu0 %v4615_v13 }
 0xf0d   : > { %v4266_v32 = vpop.f32.mrb[88].mxu1 }
 0xf0e   : > { %v4267_v11 = vadd.f32 %v4266_v32, %v9861_v9  ;;  %v4268_v1 = vpop.f32.mrb[89].mxu1 }
 0xf0f   : > { %v9919_v50 = vadd.f32 %v4268_v1, %v9865_v10  ;;  %v4270_v49 = vpop.f32.mrb[90].mxu1 }
 0xf10   : > { %v4365_v20 = vmul.f32 0.044715, %v4267_v11  ;;  %v9922_v38 = vadd.f32 %v4270_v49, %v9861_v9  ;;  %v4272_v45 = vpop.f32.mrb[91].mxu1 }
 0xf11   : > { %v4366_v63 = vmul.f32 0.044715, %v9919_v50  ;;  %v9926_v39 = vadd.f32 %v4272_v45, %v9865_v10 }
 0xf12   : > { %v4397_v48 = vmul.f32 %v4365_v20, %v4267_v11  ;;  %v4367_v58 = vmul.f32 0.044715, %v9922_v38 }
 0xf13   : > { %v4398_v5 = vmul.f32 %v4366_v63, %v9919_v50  ;;  %v4368_v28 = vmul.f32 0.044715, %v9926_v39 }
 0xf14   : > { %v4429_v53 = vmul.f32 %v4397_v48, %v4267_v11  ;;  %v4399_v22 = vmul.f32 %v4367_v58, %v9922_v38 }
 0xf15   : > { %v4430_v60 = vmul.f32 %v4398_v5, %v9919_v50  ;;  %v4400_v18 = vmul.f32 %v4368_v28, %v9926_v39  ;;  %v4276_v3 = vpop.f32.mrb[92].mxu1 }
 0xf16   : > { %v4431_v6 = vmul.f32 %v4399_v22, %v9922_v38  ;;  %v9936_v24 = vadd.f32 %v4276_v3, %v9861_v9  ;;  %v4278_v40 = vpop.f32.mrb[93].mxu1  ;;  %v4461_v46 = vadd.f32 %v4429_v53, %v4267_v11  ;;  %v4333_v22 = vmul.f32 0.5, %v4267_v11 }
 0xf17   : > { %v4432_v57 = vmul.f32 %v4400_v18, %v9926_v39  ;;  %v9940_v31 = vadd.f32 %v4278_v40, %v9865_v10  ;;  %v4280_v27 = vpop.f32.mrb[94].mxu1  ;;  %v4462_v14 = vadd.f32 %v4430_v60, %v9919_v50 }
 0xf18   : > { %v4369_v8 = vmul.f32 0.044715, %v9936_v24  ;;  %v9945_v52 = vadd.f32 %v4280_v27, %v9861_v9  ;;  %v4282_v56 = vpop.f32.mrb[95].mxu1  ;;  %v4463_v19 = vadd.f32 %v4431_v6, %v9922_v38  ;;  %v4493_v54 = vmul.f32 0.7978846, %v4461_v46 }
 0xf19   : > { %v4370_v16 = vmul.f32 0.044715, %v9940_v31  ;;  %v9950_v30 = vadd.f32 %v4282_v56, %v9865_v10  ;;  %v4464_v35 = vadd.f32 %v4432_v57, %v9926_v39  ;;  %v4494_v42 = vmul.f32 0.7978846, %v4462_v14 }
 0xf1a   : > { %v4401_v62 = vmul.f32 %v4369_v8, %v9936_v24  ;;  %v4371_v7 = vmul.f32 0.044715, %v9945_v52  ;;  %v4495_v41 = vmul.f32 0.7978846, %v4463_v19  ;;  %6842 = vtanh.f32 %v4493_v54 }
 0xf1b   : > { %v4402_v43 = vmul.f32 %v4370_v16, %v9940_v31  ;;  %v4372_v33 = vmul.f32 0.044715, %v9950_v30  ;;  %v4496_v55 = vmul.f32 0.7978846, %v4464_v35  ;;  %6844 = vtanh.f32 %v4494_v42 }
 0xf1c   : > { %v4433_v2 = vmul.f32 %v4401_v62, %v9936_v24  ;;  %v4403_v29 = vmul.f32 %v4371_v7, %v9945_v52  ;;  %6846 = vtanh.f32 %v4495_v41  ;;  %v4334_v19 = vmul.f32 0.5, %v9919_v50 }
 0xf1d   : > { %v4434_v13 = vmul.f32 %v4402_v43, %v9940_v31  ;;  %v4404_v17 = vmul.f32 %v4372_v33, %v9950_v30  ;;  %v4286_v32 = vpop.f32.mrb[96].mxu1  ;;  %6848 = vtanh.f32 %v4496_v55  ;;  %v4336_v54 = vmul.f32 0.5, %v9926_v39 }
 0xf1e   : > { %v4435_v1 = vmul.f32 %v4403_v29, %v9945_v52  ;;  %v9963_v49 = vadd.f32 %v4286_v32, %v9861_v9  ;;  %v4288_v20 = vpop.f32.mrb[97].mxu1  ;;  %v4465_v5 = vadd.f32 %v4433_v2, %v9936_v24  ;;  %v4335_v16 = vmul.f32 0.5, %v9922_v38 }
 0xf1f   : > { %v4436_v45 = vmul.f32 %v4404_v17, %v9950_v30  ;;  %v9967_v63 = vadd.f32 %v4288_v20, %v9865_v10  ;;  %v4290_v48 = vpop.f32.mrb[98].mxu1  ;;  %v4466_v58 = vadd.f32 %v4434_v13, %v9940_v31  ;;  %v4338_v50 = vmul.f32 0.5, %v9940_v31 }
 0xf20   : > { %v9972_v28 = vadd.f32 %v4290_v48, %v9861_v9  ;;  %v4292_v53 = vpop.f32.mrb[99].mxu1  ;;  %v4467_v60 = vadd.f32 %v4435_v1, %v9945_v52  ;;  %v4373_v46 = vmul.f32 0.044715, %v9963_v49  ;;  %v4497_v57 = vmul.f32 0.7978846, %v4465_v5 }
 0xf21   : > { %v4374_v18 = vmul.f32 0.044715, %v9967_v63  ;;  %v9977_v3 = vadd.f32 %v4292_v53, %v9865_v10  ;;  %v4468_v6 = vadd.f32 %v4436_v45, %v9950_v30  ;;  %v4498_v40 = vmul.f32 0.7978846, %v4466_v58 }
 0xf22   : > { %v4499_v27 = vmul.f32 0.7978846, %v4467_v60  ;;  %v4375_v42 = vmul.f32 0.044715, %v9972_v28  ;;  %v4405_v38 = vmul.f32 %v4373_v46, %v9963_v49  ;;  %v4340_v48 = vmul.f32 0.5, %v9950_v30 }
 0xf23   : > { %v4406_v14 = vmul.f32 %v4374_v18, %v9967_v63  ;;  %v4376_v8 = vmul.f32 0.044715, %v9977_v3  ;;  %v4500_v56 = vmul.f32 0.7978846, %v4468_v6  ;;  %6850 = vtanh.f32 %v4498_v40 }
 0xf24   : > { %v6843_v11 = vpop.eup %6842  ;;  %6852 = vtanh.f32 %v4497_v57  ;;  %v4337_v31 = vmul.f32 0.5, %v9936_v24  ;;  %v4407_v58 = vmul.f32 %v4375_v42, %v9972_v28  ;;  %v4339_v40 = vmul.f32 0.5, %v9945_v52 }
 0xf25   : > { %v6845_v35 = vpop.eup %6844  ;;  %v4408_v62 = vmul.f32 %v4376_v8, %v9977_v3  ;;  %v4296_v7 = vpop.f32.mrb[100].mxu1  ;;  %v4557_v41 = vadd.f32 1.0, %v6843_v11  ;;  %6854 = vtanh.f32 %v4500_v56  ;;  %v4438_v33 = vmul.f32 %v4406_v14, %v9967_v63 }
 0xf26   : > { %v6847_v43 = vpop.eup %6846  ;;  %v4298_v55 = vpop.f32.mrb[101].mxu1  ;;  %v4558_v2 = vadd.f32 1.0, %v6845_v35  ;;  %6856 = vtanh.f32 %v4499_v27  ;;  %v9993_v13 = vadd.f32 %v4296_v7, %v9861_v9  ;;  %v4437_v57 = vmul.f32 %v4405_v38, %v9963_v49 }
 0xf27   : > { %v6849_v39 = vpop.eup %6848  ;;  %v4440_v29 = vmul.f32 %v4408_v62, %v9977_v3  ;;  %v4300_v17 = vpop.f32.mrb[102].mxu1  ;;  %v4559_v32 = vadd.f32 1.0, %v6847_v43  ;;  %v9996_v1 = vadd.f32 %v4298_v55, %v9865_v10  ;;  %v4589_v53 = vmul.f32 %v4557_v41, %v4333_v22 }
 0xf28   : > { %v4302_v20 = vpop.f32.mrb[103].mxu1  ;;  %v4560_v45 = vadd.f32 1.0, %v6849_v39  ;;  %v4590_v18 = vmul.f32 %v4558_v2, %v4334_v19  ;;  %v4470_v46 = vadd.f32 %v4438_v33, %v9967_v63  ;;  %v4377_v27 = vmul.f32 0.044715, %v9993_v13 }
 0xf29   : > { %v10002_v5 = vadd.f32 %v4302_v20, %v9865_v10  ;;  %v4591_v60 = vmul.f32 %v4559_v32, %v4335_v16  ;;  %v4472_v24 = vadd.f32 %v4440_v29, %v9977_v3  ;;  %v4378_v14 = vmul.f32 0.044715, %v9996_v1 }
 0xf2a   : > { %v4592_v6 = vmul.f32 %v4560_v45, %v4336_v54  ;;  %v10011_v8 = vadd.f32 %v4300_v17, %v9861_v9  ;;  %v4502_v56 = vmul.f32 0.7978846, %v4470_v46  ;;  %v4439_v19 = vmul.f32 %v4407_v58, %v9972_v28 }
 0xf2b   : > { %v4617_v30 = vpack.c.bf16 %v4591_v60, %v4589_v53  ;;  %v4380_v52 = vmul.f32 0.044715, %v10002_v5  ;;  %v10016_v16 = vmul.f32 0.5, %v9967_v63  ;;  %v4504_v35 = vmul.f32 0.7978846, %v4472_v24 }
 0xf2c   : > { %v4618_v22 = vpack.c.bf16 %v4592_v6, %v4590_v18  ;;  %v10022_v43 = vmul.f32 0.5, %v9977_v3  ;;  %6858 = vtanh.f32 %v4502_v56  ;;  %v4409_v55 = vmul.f32 %v4377_v27, %v9993_v13 }
 0xf2d   : > { %v6851_v11 = vpop.eup %6850  ;;  %v4306_v54 = vpop.f32.mrb[104].mxu1  ;;  %6860 = vtanh.f32 %v4504_v35  ;;  %v4379_v29 = vmul.f32 0.044715, %v10011_v8  ;;  %v4410_v45 = vmul.f32 %v4378_v14, %v9996_v1  ;;  %v4412_v58 = vmul.f32 %v4380_v52, %v10002_v5 }
 0xf2e   : > { %v6853_v42 = vpop.eup %6852  ;;  %v10019_v62 = vadd.f32 %v4306_v54, %v9861_v9  ;;  %v4308_v7 = vpop.f32.mrb[105].mxu1  ;;  %4812 = vmatprep.mubr.bf16.mxu0 %v4618_v22  ;;  %v4562_v41 = vadd.f32 1.0, %v6851_v11  ;;  %v4469_v54 = vadd.f32 %v4437_v57, %v9963_v49 }
 0xf2f   : > { %v6855_v33 = vpop.eup %6854  ;;  %v10026_v2 = vadd.f32 %v4308_v7, %v9865_v10  ;;  %v4310_v63 = vpop.f32.mrb[106].mxu1  ;;  %4813 = vmatmul.mubr.bf16.gmra.mrb[120].mxu0 %v4617_v30  ;;  %v4561_v39 = vadd.f32 1.0, %v6853_v42  ;;  %v4442_v35 = vmul.f32 %v4410_v45, %v9996_v1  ;;  %v4411_v42 = vmul.f32 %v4379_v29, %v10011_v8 }
 0xf30   : > { %v6857_v38 = vpop.eup %6856  ;;  %v4381_v17 = vmul.f32 0.044715, %v10019_v62  ;;  %v10031_v32 = vadd.f32 %v4310_v63, %v9861_v9  ;;  %v4312_v3 = vpop.f32.mrb[107].mxu1  ;;  %v4564_v20 = vadd.f32 1.0, %v6855_v33  ;;  %v4594_v46 = vmul.f32 %v4562_v41, %v4338_v50 }
 0xf31   : > { %v10036_v53 = vadd.f32 %v4312_v3, %v9865_v10  ;;  %v4563_v60 = vadd.f32 1.0, %v6857_v38  ;;  %v4382_v30 = vmul.f32 0.044715, %v10026_v2  ;;  %v4593_v22 = vmul.f32 %v4561_v39, %v4337_v31 }
 0xf32   : > { %v4413_v18 = vmul.f32 %v4381_v17, %v10019_v62  ;;  %v4383_v6 = vmul.f32 0.044715, %v10031_v32  ;;  %v4596_v27 = vmul.f32 %v4564_v20, %v4340_v48  ;;  %v4471_v48 = vadd.f32 %v4439_v19, %v9972_v28 }
 0xf33   : > { %v4384_v24 = vmul.f32 0.044715, %v10036_v53  ;;  %v4595_v56 = vmul.f32 %v4563_v60, %v4339_v40  ;;  %v4501_v63 = vmul.f32 0.7978846, %v4469_v54  ;;  %v4444_v57 = vmul.f32 %v4412_v58, %v10002_v5 }
 0xf34   : > { %v4445_v14 = vmul.f32 %v4413_v18, %v10019_v62  ;;  %v4415_v11 = vmul.f32 %v4383_v6, %v10031_v32  ;;  %v4620_v52 = vpack.c.bf16 %v4596_v27, %v4594_v46  ;;  %v4414_v39 = vmul.f32 %v4382_v30, %v10026_v2 }
 0xf35   : > { %v4316_v7 = vpop.f32.mrb[108].mxu1  ;;  %v4619_v50 = vpack.c.bf16 %v4595_v56, %v4593_v22  ;;  %v4416_v38 = vmul.f32 %v4384_v24, %v10036_v53  ;;  %v4503_v18 = vmul.f32 0.7978846, %v4471_v48  ;;  %6862 = vtanh.f32 %v4501_v63 }
 0xf36   : > { %v4477_v41 = vadd.f32 %v4445_v14, %v10019_v62  ;;  %v4447_v31 = vmul.f32 %v4415_v11, %v10031_v32  ;;  %v10051_v40 = vadd.f32 %v4316_v7, %v9861_v9  ;;  %v4318_v33 = vpop.f32.mrb[109].mxu1  ;;  %4820 = vmatprep.mubr.bf16.mxu0 %v4620_v52  ;;  %v6859_v17 = vpop.eup %6858  ;;  %v4441_v56 = vmul.f32 %v4409_v55, %v9993_v13 }
 0xf37   : > { %v10057_v29 = vadd.f32 %v4318_v33, %v9865_v10  ;;  %v4320_v19 = vpop.f32.mrb[110].mxu1  ;;  %4821 = vmatmul.mubr.bf16.gmra.mrb[124].mxu0 %v4619_v50  ;;  %v6861_v6 = vpop.eup %6860  ;;  %v4566_v27 = vadd.f32 1.0, %v6859_v17  ;;  %v4443_v52 = vmul.f32 %v4411_v42, %v10011_v8  ;;  %v4448_v54 = vmul.f32 %v4416_v38, %v10036_v53 }
 0xf38   : > { %v4509_v3 = vmul.f32 0.7978846, %v4477_v41  ;;  %v4479_v20 = vadd.f32 %v4447_v31, %v10031_v32  ;;  %v10061_v45 = vadd.f32 %v4320_v19, %v9861_v9  ;;  %v4322_v60 = vpop.f32.mrb[111].mxu1  ;;  %v4385_v24 = vmul.f32 0.044715, %v10051_v40 }
 0xf39   : > { %v4386_v58 = vmul.f32 0.044715, %v10057_v29  ;;  %v10065_v46 = vadd.f32 %v4322_v60, %v9865_v10  ;;  %v4568_v11 = vadd.f32 1.0, %v6861_v6  ;;  %v4446_v10 = vmul.f32 %v4414_v39, %v10026_v2 }
 0xf3a   : > { %6864 = vtanh.f32 %v4509_v3  ;;  %v4511_v30 = vmul.f32 0.7978846, %v4479_v20  ;;  %v4387_v22 = vmul.f32 0.044715, %v10061_v45  ;;  %v4598_v50 = vmul.f32 %v4566_v27, %v10016_v16 }
 0xf3b   : > { %v4418_v9 = vmul.f32 %v4386_v58, %v10057_v29  ;;  %v4388_v14 = vmul.f32 0.044715, %v10065_v46  ;;  %v4600_v48 = vmul.f32 %v4568_v11, %v10022_v43  ;;  %v4417_v55 = vmul.f32 %v4385_v24, %v10051_v40 }
 0xf3c   : > { %6866 = vtanh.f32 %v4511_v30  ;;  %v4419_v41 = vmul.f32 %v4387_v22, %v10061_v45  ;;  %v4474_v31 = vadd.f32 %v4442_v35, %v9996_v1  ;;  %v4476_v42 = vadd.f32 %v4444_v57, %v10002_v5 }
 0xf3d   : > { %v4420_v7 = vmul.f32 %v4388_v14, %v10065_v46  ;;  %6868 = vtanh.f32 %v4503_v18  ;;  %v4450_v33 = vmul.f32 %v4418_v9, %v10057_v29  ;;  %v4622_v63 = vpack.c.bf16 %v4600_v48, %v4598_v50 }
 0xf3e   : > { %v4473_v39 = vadd.f32 %v4441_v56, %v9993_v13  ;;  %v4506_v19 = vmul.f32 0.7978846, %v4474_v31  ;;  %v4508_v16 = vmul.f32 0.7978846, %v4476_v42  ;;  %v4475_v43 = vadd.f32 %v4443_v52, %v10011_v8 }
 0xf3f   : > { %v4452_v38 = vmul.f32 %v4420_v7, %v10065_v46  ;;  %4828 = vmatprep.mubr.bf16.mxu0 %v4622_v63  ;;  %v4478_v3 = vadd.f32 %v4446_v10, %v10026_v2  ;;  %v4480_v20 = vadd.f32 %v4448_v54, %v10036_v53  ;;  %v4449_v35 = vmul.f32 %v4417_v55, %v10051_v40  ;;  %v6863_v18 = vpop.eup %6862 }
 0xf40   : > { %v4505_v17 = vmul.f32 0.7978846, %v4473_v39  ;;  %v4451_v57 = vmul.f32 %v4419_v41, %v10061_v45  ;;  %6870 = vtanh.f32 %v4506_v19  ;;  %v4507_v60 = vmul.f32 0.7978846, %v4475_v43 }
 0xf41   : > { %6872 = vtanh.f32 %v4508_v16  ;;  %v4510_v6 = vmul.f32 0.7978846, %v4478_v3  ;;  %v4512_v58 = vmul.f32 0.7978846, %v4480_v20  ;;  %v4482_v27 = vadd.f32 %v4450_v33, %v10057_v29 }
 0xf42   : > { %v4341_v24 = vmul.f32 0.5, %v9963_v49  ;;  %6874 = vtanh.f32 %v4505_v17  ;;  %v4484_v22 = vadd.f32 %v4452_v38, %v10065_v46  ;;  %v4349_v56 = vmul.f32 0.5, %v10019_v62 }
 0xf43   : > { %6876 = vtanh.f32 %v4507_v60  ;;  %v4514_v14 = vmul.f32 0.7978846, %v4482_v27  ;;  %v4565_v52 = vadd.f32 1.0, %v6863_v18  ;;  %v4481_v54 = vadd.f32 %v4449_v35, %v10051_v40 }
 0xf44   : > { %v6865_v30 = vpop.eup %6864  ;;  %6878 = vtanh.f32 %v4510_v6  ;;  %v4516_v10 = vmul.f32 0.7978846, %v4484_v22  ;;  %v4351_v50 = vmul.f32 0.5, %v10031_v32  ;;  %v4483_v49 = vadd.f32 %v4451_v57, %v10061_v45 }
 0xf45   : > { %v4573_v9 = vadd.f32 1.0, %v6865_v30  ;;  %6880 = vtanh.f32 %v4512_v58  ;;  %v4343_v55 = vmul.f32 0.5, %v9972_v28  ;;  %v4513_v62 = vmul.f32 0.7978846, %v4481_v54 }
 0xf46   : > { %v6867_v11 = vpop.eup %6866  ;;  %6882 = vtanh.f32 %v4514_v14  ;;  %v4515_v33 = vmul.f32 0.7978846, %v4483_v49  ;;  %v4597_v63 = vmul.f32 %v4565_v52, %v4341_v24  ;;  %v4346_v28 = vmul.f32 0.5, %v9996_v1 }
 0xf47   : > { %v6869_v7 = vpop.eup %6868  ;;  %v4575_v48 = vadd.f32 1.0, %v6867_v11  ;;  %v4605_v31 = vmul.f32 %v4573_v9, %v4349_v56  ;;  %6884 = vtanh.f32 %v4516_v10  ;;  %v4348_v3 = vmul.f32 0.5, %v10002_v5 }
 0xf48   : > { %v4567_v41 = vadd.f32 1.0, %v6869_v7  ;;  %6886 = vtanh.f32 %v4513_v62  ;;  %v4345_v57 = vmul.f32 0.5, %v9993_v13  ;;  %v4347_v27 = vmul.f32 0.5, %v10011_v8 }
 0xf49   : > { %v4607_v42 = vmul.f32 %v4575_v48, %v4351_v50  ;;  %6888 = vtanh.f32 %v4515_v33  ;;  %v4350_v22 = vmul.f32 0.5, %v10026_v2  ;;  %v4352_v56 = vmul.f32 0.5, %v10036_v53 }
 0xf4a   : > { %v4599_v39 = vmul.f32 %v4567_v41, %v4343_v55  ;;  %v6871_v19 = vpop.eup %6870  ;;  %v4354_v13 = vmul.f32 0.5, %v10057_v29  ;;  %v4356_v54 = vmul.f32 0.5, %v10065_v46  ;;  %v4353_v53 = vmul.f32 0.5, %v10051_v40  ;;  %v10113_v40 = vld [vmem:[%s863_s19] ss:$0 sm:$0xff] }
 0xf4b   : > { %v4625_v38 = vpack.c.bf16 %v4607_v42, %v4605_v31  ;;  %v6873_v16 = vpop.eup %6872  ;;  %v4570_v43 = vadd.f32 1.0, %v6871_v19  ;;  %v4355_v41 = vmul.f32 0.5, %v10061_v45 }
 0xf4c   : > { %v4621_v32 = vpack.c.bf16 %v4599_v39, %v4597_v63  ;;  %v6875_v17 = vpop.eup %6874  ;;  %v4572_v20 = vadd.f32 1.0, %v6873_v16 }
 0xf4d   : > { %v6877_v35 = vpop.eup %6876  ;;  %v4569_v60 = vadd.f32 1.0, %v6875_v17  ;;  %v4602_v6 = vmul.f32 %v4570_v43, %v4346_v28 }
 0xf4e   : > { %4829 = vmatmul.mubr.bf16.gmra.mrb[128].mxu0 %v4621_v32  ;;  %v6879_v18 = vpop.eup %6878  ;;  %v4604_v58 = vmul.f32 %v4572_v20, %v4348_v3  ;;  %v4571_v30 = vadd.f32 1.0, %v6877_v35 }
 0xf4f   : > { %v6881_v24 = vpop.eup %6880  ;;  %v4574_v9 = vadd.f32 1.0, %v6879_v18  ;;  %v4601_v5 = vmul.f32 %v4569_v60, %v4345_v57 }
 0xf50   : > { %v6883_v1 = vpop.eup %6882  ;;  %v4624_v14 = vpack.c.bf16 %v4604_v58, %v4602_v6  ;;  %v4603_v11 = vmul.f32 %v4571_v30, %v4347_v27  ;;  %v4576_v52 = vadd.f32 1.0, %v6881_v24 }
 0xf51   : > { %v6885_v10 = vpop.eup %6884  ;;  %v4578_v7 = vadd.f32 1.0, %v6883_v1  ;;  %v4606_v48 = vmul.f32 %v4574_v9, %v4350_v22 }
 0xf52   : > { %v6887_v50 = vpop.eup %6886  ;;  %4836 = vmatprep.mubr.bf16.mxu0 %v4624_v14  ;;  %v4623_v8 = vpack.c.bf16 %v4603_v11, %v4601_v5  ;;  %v4608_v49 = vmul.f32 %v4576_v52, %v4352_v56  ;;  %v4580_v2 = vadd.f32 1.0, %v6885_v10 }
 0xf53   : > { %v6889_v55 = vpop.eup %6888  ;;  %v4577_v62 = vadd.f32 1.0, %v6887_v50  ;;  %v4610_v42 = vmul.f32 %v4578_v7, %v4354_v13 }
 0xf54   : > { %v4626_v31 = vpack.c.bf16 %v4608_v49, %v4606_v48  ;;  %v4612_v29 = vmul.f32 %v4580_v2, %v4356_v54  ;;  %v4579_v33 = vadd.f32 1.0, %v6889_v55 }
 0xf55   : > { %v4609_v63 = vmul.f32 %v4577_v62, %v4353_v53 }
 0xf56   : > { %4837 = vmatmul.mubr.bf16.gmra.mrb[132].mxu0 %v4623_v8  ;;  %4844 = vmatprep.mubr.bf16.mxu1 %v4626_v31  ;;  %v4628_v46 = vpack.c.bf16 %v4612_v29, %v4610_v42  ;;  %v4611_v39 = vmul.f32 %v4579_v33, %v4355_v41 }
 0xf57   : > { %4845 = vmatmul.mubr.bf16.vlgmr.msra.gmra.mrb[112].mxu1 %v4625_v38 }
 0xf58   : > { %4852 = vmatprep.mubr.bf16.mxu1 %v4628_v46  ;;  %v4627_v19 = vpack.c.bf16 %v4611_v39, %v4609_v63 }
 0xf5f   : > { %4853 = vmatmul.mubr.bf16.gmra.mrb[116].mxu1 %v4627_v19 }
 0xfc4   : > { %v5740_v32 = vpop.f32.mrb[112].mxu0 }
 0xfc5   : > { %v5741_v45 = vpop.f32.mrb[113].mxu0 }
 0xfc6   : > { %v5742_v16 = vadd.f32 %v5741_v45, %v5740_v32  ;;  %v5743_v43 = vpop.f32.mrb[114].mxu0 }
 0xfc7   : > { %v5744_v17 = vpop.f32.mrb[115].mxu0 }
 0xfc8   : > { %v10116_v28 = vadd.f32 %v5742_v16, %v10113_v40  ;;  %v5745_v3 = vadd.f32 %v5744_v17, %v5743_v43 }
 0xfca   : > { %4861 = vst [vmem:[#allocation2] sm:$0xff] %v10116_v28  ;;  %v10120_v38 = vadd.f32 %v5745_v3, %v10113_v40 }
 0xfcc   : > { %4862 = vst [vmem:[#allocation2 + $0x8] sm:$0xff] %v10120_v38  ;;  %v5746_v20 = vpop.f32.mrb[116].mxu0 }
 0xfcd   : > { %v5747_v35 = vpop.f32.mrb[117].mxu0 }
 0xfce   : > { %v5748_v57 = vadd.f32 %v5747_v35, %v5746_v20  ;;  %v5749_v60 = vpop.f32.mrb[118].mxu0 }
 0xfcf   : > { %v5750_v18 = vpop.f32.mrb[119].mxu0 }
 0xfd0   : > { %v10124_v6 = vadd.f32 %v5748_v57, %v10113_v40  ;;  %v5751_v58 = vadd.f32 %v5750_v18, %v5749_v60 }
 0xfd2   : > { %4863 = vst [vmem:[#allocation2 + $0x10] sm:$0xff] %v10124_v6  ;;  %v10128_v27 = vadd.f32 %v5751_v58, %v10113_v40 }
 0xfd4   : > { %4864 = vst [vmem:[#allocation2 + $0x18] sm:$0xff] %v10128_v27 }
0x1002   : > { %v5752_v30 = vpop.f32.mrb[120].mxu0 }
0x1003   : > { %v5753_v24 = vpop.f32.mrb[121].mxu0 }
0x1004   : > { %v5754_v22 = vadd.f32 %v5753_v24, %v5752_v30  ;;  %v5755_v56 = vpop.f32.mrb[122].mxu0 }
0x1005   : > { %v5756_v9 = vpop.f32.mrb[123].mxu0 }
0x1006   : > { %v10132_v1 = vadd.f32 %v5754_v22, %v10113_v40  ;;  %v5757_v14 = vadd.f32 %v5756_v9, %v5755_v56 }
0x1008   : > { %4865 = vst [vmem:[#allocation2 + $0x20] sm:$0xff] %v10132_v1  ;;  %v10136_v5 = vadd.f32 %v5757_v14, %v10113_v40  ;;  %v4897_v14 = vadd.f32 (!%p5551_p13), %v10116_v28, %v9588_v59 }
0x100a   : > { %4866 = vst [vmem:[#allocation2 + $0x28] sm:$0xff] %v10136_v5  ;;  %v5758_v11 = vpop.f32.mrb[124].mxu0  ;;  %4915 = vadd.xlane.f32.xlu0 (!%p5551_p13), %v4897_v14 }
0x100b   : > { %v5759_v52 = vpop.f32.mrb[125].mxu0 }
0x100c   : > { %v5760_v10 = vadd.f32 %v5759_v52, %v5758_v11  ;;  %v5761_v13 = vpop.f32.mrb[126].mxu0  ;;  %v4899_v11 = vadd.f32 (!%p5551_p13), %v10124_v6, %v9584_v37  ;;  %v4898_v52 = vadd.f32 (!%p5551_p13), %v10120_v38, %v9597_v61 }
0x100d   : > { %v5762_v54 = vpop.f32.mrb[127].mxu0 }
0x100e   : > { %v4823_v7 = vadd.f32 %v5760_v10, %v10113_v40  ;;  %v5763_v50 = vadd.f32 %v5762_v54, %v5761_v13  ;;  %4919 = vadd.xlane.f32.xlu1 (!%p5551_p13), %v4899_v11  ;;  %v4900_v10 = vadd.f32 (!%p5551_p13), %v10128_v27, %v9593_v12  ;;  %4917 = vadd.xlane.f32.xlu0 (!%p5551_p13), %v4898_v52 }
0x100f   : > { %v4902_v13 = vadd.f32 (!%p5551_p13), %v10136_v5, %v9621_v4 }
0x1010   : > { %4867 = vst [vmem:[#allocation2 + $0x30] sm:$0xff] %v4823_v7  ;;  %v4826_v8 = vadd.f32 %v5763_v50, %v10113_v40  ;;  %v4903_v37 = vadd.f32 (!%p5551_p13), %v4823_v7, %v9608_v44 }
0x1012   : > { %4868 = vst [vmem:[#allocation2 + $0x38] sm:$0xff] %v4826_v8  ;;  %4921 = vadd.xlane.f32.xlu1 (!%p5551_p13), %v4900_v10  ;;  %v4904_v59 = vadd.f32 (!%p5551_p13), %v4826_v8, %v9617_v15 }
0x1016   : > { %4925 = vadd.xlane.f32.xlu1 (!%p5551_p13), %v4902_v13 }
0x101a   : > { %4929 = vadd.xlane.f32.xlu1 (!%p5551_p13), %v4904_v59 }
0x1021   : > { %v5764_v48 = vpop.f32.mrb[128].mxu0 }
0x1022   : > { %v5765_v49 = vpop.f32.mrb[129].mxu0 }
0x1023   : > { %v5766_v2 = vadd.f32 %v5765_v49, %v5764_v48  ;;  %v5767_v55 = vpop.f32.mrb[130].mxu0 }
0x1024   : > { %v5768_v53 = vpop.f32.mrb[131].mxu0 }
0x1025   : > { %v4831_v41 = vadd.f32 %v5766_v2, %v10113_v40  ;;  %v5769_v62 = vadd.f32 %v5768_v53, %v5767_v55 }
0x1027   : > { %4869 = vst [vmem:[#allocation2 + $0x40] sm:$0xff] %v4831_v41  ;;  %v4834_v31 = vadd.f32 %v5769_v62, %v10113_v40  ;;  %v4905_v61 = vadd.f32 (!%p5551_p13), %v4831_v41, %v9636_v25 }
0x1029   : > { %4870 = vst [vmem:[#allocation2 + $0x48] sm:$0xff] %v4834_v31  ;;  %v5770_v42 = vpop.f32.mrb[132].mxu0  ;;  %v4906_v12 = vadd.f32 (!%p5551_p13), %v4834_v31, %v9645_v51 }
0x102a   : > { %v5771_v29 = vpop.f32.mrb[133].mxu0  ;;  %v5776_v39 = vpop.f32.mrb[112].mxu1 }
0x102b   : > { %v5772_v33 = vadd.f32 %v5771_v29, %v5770_v42  ;;  %v5773_v46 = vpop.f32.mrb[134].mxu0  ;;  %v5777_v45 = vpop.f32.mrb[113].mxu1  ;;  %4933 = vadd.xlane.f32.xlu1 (!%p5551_p13), %v4906_v12 }
0x102c   : > { %v5774_v63 = vpop.f32.mrb[135].mxu0  ;;  %v5778_v16 = vadd.f32 %v5777_v45, %v5776_v39  ;;  %v5779_v43 = vpop.f32.mrb[114].mxu1 }
0x102d   : > { %v4839_v19 = vadd.f32 %v5772_v33, %v10113_v40  ;;  %v5775_v32 = vadd.f32 %v5774_v63, %v5773_v46  ;;  %v5780_v3 = vpop.f32.mrb[115].mxu1 }
0x102e   : > { %v4847_v20 = vadd.f32 %v5778_v16, %v10113_v40  ;;  %v5781_v35 = vadd.f32 %v5780_v3, %v5779_v43 }
0x102f   : > { %4871 = vst [vmem:[#allocation2 + $0x50] sm:$0xff] %v4839_v19  ;;  %v4842_v17 = vadd.f32 %v5775_v32, %v10113_v40  ;;  %v4907_v28 = vadd.f32 (!%p5551_p13), %v4839_v19, %v9632_v47 }
0x1030   : > { %4873 = vst [vmem:[#allocation2 + $0x60] sm:$0xff] %v4847_v20  ;;  %v4850_v57 = vadd.f32 %v5781_v35, %v10113_v40  ;;  %v10172_v44 = vadd.f32 (!%p5551_p13), %v4847_v20, %v9660_v26 }
0x1031   : > { %4872 = vst [vmem:[#allocation2 + $0x58] sm:$0xff] %v4842_v17 }
0x1032   : > { %4874 = vst [vmem:[#allocation2 + $0x68] sm:$0xff] %v4850_v57  ;;  %v5782_v60 = vpop.f32.mrb[116].mxu1  ;;  %v10175_v15 = vadd.f32 (!%p5551_p13), %v4850_v57, %v9669_v21 }
0x1033   : > { %v5783_v18 = vpop.f32.mrb[117].mxu1 }
0x1034   : > { %v5784_v58 = vadd.f32 %v5783_v18, %v5782_v60  ;;  %v5785_v30 = vpop.f32.mrb[118].mxu1  ;;  %4896 = sbr.rel (%p5551_p13) target bundleno = 4487 (0x1187), region = 120 }
0x1035   : > { %v5786_v24 = vpop.f32.mrb[119].mxu1 }
0x1036   : > { %v4855_v22 = vadd.f32 %v5784_v58, %v10113_v40  ;;  %v5787_v56 = vadd.f32 %v5786_v24, %v5785_v30 }
0x1038   : > { %4875 = vst [vmem:[#allocation2 + $0x70] sm:$0xff] %v4855_v22  ;;  %v4858_v9 = vadd.f32 %v5787_v56, %v10113_v40  ;;  %v4901_v40 = vadd.f32 (!%p5551_p13), %v10132_v1, %v9612_v0  ;;  %v10168_v0 = vadd.f32 (!%p5551_p13), %v4842_v17, %v9641_v36  ;;  %v10180_v4 = vadd.f32 (!%p5551_p13), %v4855_v22, %v9656_v34 }
0x103a   : > { %4876 = vst [vmem:[#allocation2 + $0x78] sm:$0xff] %v4858_v9  ;;  %4923 = vadd.xlane.f32.xlu0 (!%p5551_p13), %v4901_v40  ;;  %4937 = vadd.xlane.f32.xlu1 (!%p5551_p13), %v10168_v0  ;;  %v10183_v47 = vadd.f32 (!%p5551_p13), %v4858_v9, %v9665_v23 }
0x103e   : > { %4927 = vadd.xlane.f32.xlu0 %v4903_v37  ;;  %4941 = vadd.xlane.f32.xlu1 %v10175_v15 }
0x1042   : > { %4931 = vadd.xlane.f32.xlu0 %v4905_v61  ;;  %4945 = vadd.xlane.f32.xlu1 %v10183_v47 }
0x1046   : > { %4935 = vadd.xlane.f32.xlu0 %v4907_v28 }
0x104a   : > { %4939 = vadd.xlane.f32.xlu0 %v10172_v44 }
0x104e   : > { %4943 = vadd.xlane.f32.xlu0 %v10180_v4 }
0x1097   : > { %v4916_v25 = vpop.xlane.xlu0 %4915 }
0x1098   : > { %v4947_v51 = vmul.f32 0.0078125, %v4916_v25 }
0x109a   : > { %v10187_v21 = vsub.f32 %v4897_v14, %v4947_v51 }
0x109b   : > { %v4920_v36 = vpop.xlane.xlu1 %4919  ;;  %v4918_v6 = vpop.xlane.xlu0 %4917 }
0x109c   : > { %v4949_v26 = vmul.f32 0.0078125, %v4920_v36  ;;  %v4948_v1 = vmul.f32 0.0078125, %v4918_v6  ;;  %v4979_v34 = vmul.f32 %v10187_v21, %v10187_v21 }
0x109e   : > { %v10189_v38 = vsub.f32 %v4899_v11, %v4949_v26  ;;  %v10193_v5 = vsub.f32 %v4898_v52, %v4948_v1  ;;  %4995 = vadd.xlane.f32.xlu0 %v4979_v34 }
0x109f   : > { %v4922_v27 = vpop.xlane.xlu1 %4921 }
0x10a0   : > { %v4950_v23 = vmul.f32 0.0078125, %v4922_v27  ;;  %v4981_v7 = vmul.f32 %v10189_v38, %v10189_v38  ;;  %v4980_v49 = vmul.f32 %v10193_v5, %v10193_v5 }
0x10a2   : > { %v10195_v54 = vsub.f32 %v4900_v10, %v4950_v23  ;;  %4999 = vadd.xlane.f32.xlu0 %v4981_v7  ;;  %4997 = vadd.xlane.f32.xlu1 %v4980_v49 }
0x10a3   : > { %v4926_v8 = vpop.xlane.xlu1 %4925 }
0x10a4   : > { %v4952_v2 = vmul.f32 0.0078125, %v4926_v8  ;;  %v4982_v41 = vmul.f32 %v10195_v54, %v10195_v54 }
0x10a6   : > { %v10203_v53 = vsub.f32 %v4902_v13, %v4952_v2  ;;  %5001 = vadd.xlane.f32.xlu1 %v4982_v41 }
0x10a7   : > { %v4930_v31 = vpop.xlane.xlu1 %4929 }
0x10a8   : > { %v4954_v33 = vmul.f32 0.0078125, %v4930_v31  ;;  %v4984_v39 = vmul.f32 %v10203_v53, %v10203_v53 }
0x10aa   : > { %v10211_v63 = vsub.f32 %v4904_v59, %v4954_v33  ;;  %5005 = vadd.xlane.f32.xlu1 %v4984_v39  ;;  %v10259_v33 = vld [vmem:[%s10746_s3] ss:$0 sm:$0xff] }
0x10ac   : > { %v4986_v20 = vmul.f32 %v10211_v63, %v10211_v63 }
0x10ae   : > { %5009 = vadd.xlane.f32.xlu1 %v4986_v20 }
0x10b8   : > { %v4934_v32 = vpop.xlane.xlu1 %4933 }
0x10b9   : > { %v4956_v43 = vmul.f32 0.0078125, %v4934_v32 }
0x10bb   : > { %v10219_v3 = vsub.f32 %v4906_v12, %v4956_v43  ;;  %v10262_v43 = vld [vmem:[#allocation13] ss:$0 sm:$0xff] }
0x10bd   : > { %v4988_v22 = vmul.f32 %v10219_v3, %v10219_v3 }
0x10bf   : > { %5013 = vadd.xlane.f32.xlu1 %v4988_v22 }
0x10c7   : > { %v4924_v50 = vpop.xlane.xlu0 %4923  ;;  %v4938_v57 = vpop.xlane.xlu1 %4937 }
0x10c8   : > { %v4951_v48 = vmul.f32 0.0078125, %v4924_v50  ;;  %v4958_v58 = vmul.f32 0.0078125, %v4938_v57 }
0x10ca   : > { %v10201_v55 = vsub.f32 %v4901_v40, %v4951_v48  ;;  %v10228_v24 = vsub.f32 %v10168_v0, %v4958_v58 }
0x10cb   : > { %v4928_v62 = vpop.xlane.xlu0 %4927  ;;  %v4942_v9 = vpop.xlane.xlu1 %4941 }
0x10cc   : > { %v4953_v42 = vmul.f32 0.0078125, %v4928_v62  ;;  %v4983_v29 = vmul.f32 %v10201_v55, %v10201_v55  ;;  %v4960_v52 = vmul.f32 0.0078125, %v4942_v9  ;;  %v4990_v13 = vmul.f32 %v10228_v24, %v10228_v24 }
0x10ce   : > { %v10209_v46 = vsub.f32 %v4903_v37, %v4953_v42  ;;  %5003 = vadd.xlane.f32.xlu0 %v4983_v29  ;;  %v10238_v40 = vsub.f32 %v10175_v15, %v4960_v52  ;;  %5017 = vadd.xlane.f32.xlu1 %v4990_v13 }
0x10cf   : > { %v4932_v19 = vpop.xlane.xlu0 %4931  ;;  %v4946_v59 = vpop.xlane.xlu1 %4945 }
0x10d0   : > { %v4955_v45 = vmul.f32 0.0078125, %v4932_v19  ;;  %v4985_v16 = vmul.f32 %v10209_v46, %v10209_v46  ;;  %v4992_v15 = vmul.f32 %v10238_v40, %v10238_v40 }
0x10d2   : > { %v10217_v17 = vsub.f32 %v4905_v61, %v4955_v45  ;;  %5007 = vadd.xlane.f32.xlu0 %v4985_v16  ;;  %5021 = vadd.xlane.f32.xlu1 %v4992_v15 }
0x10d3   : > { %v4936_v35 = vpop.xlane.xlu0 %4935 }
0x10d4   : > { %v4957_v60 = vmul.f32 0.0078125, %v4936_v35  ;;  %v4987_v18 = vmul.f32 %v10217_v17, %v10217_v17 }
0x10d6   : > { %v10225_v30 = vsub.f32 %v4907_v28, %v4957_v60  ;;  %5011 = vadd.xlane.f32.xlu0 %v4987_v18  ;;  %v4962_v28 = vmul.f32 0.0078125, %v4946_v59 }
0x10d7   : > { %v4940_v56 = vpop.xlane.xlu0 %4939 }
0x10d8   : > { %v4959_v14 = vmul.f32 0.0078125, %v4940_v56  ;;  %v4989_v11 = vmul.f32 %v10225_v30, %v10225_v30 }
0x10da   : > { %v10235_v10 = vsub.f32 %v10172_v44, %v4959_v14  ;;  %5015 = vadd.xlane.f32.xlu0 %v4989_v11  ;;  %v10248_v44 = vsub.f32 %v10183_v47, %v4962_v28 }
0x10db   : > { %v4944_v37 = vpop.xlane.xlu0 %4943 }
0x10dc   : > { %v4961_v61 = vmul.f32 0.0078125, %v4944_v37  ;;  %v4991_v12 = vmul.f32 %v10235_v10, %v10235_v10  ;;  %v4994_v36 = vmul.f32 %v10248_v44, %v10248_v44 }
0x10de   : > { %v10245_v0 = vsub.f32 %v10180_v4, %v4961_v61  ;;  %5019 = vadd.xlane.f32.xlu0 %v4991_v12  ;;  %5025 = vadd.xlane.f32.xlu1 %v4994_v36 }
0x10e0   : > { %v4993_v25 = vmul.f32 %v10245_v0, %v10245_v0 }
0x10e2   : > { %5023 = vadd.xlane.f32.xlu0 %v4993_v25 }
0x112b   : > { %v4996_v51 = vpop.xlane.xlu0 %4995 }
0x112c   : > { %v5027_v4 = vmul.f32 0.0078125, %v4996_v51 }
0x112e   : > { %v5043_v26 = vadd.f32 1e-05, %v5027_v4 }
0x112f   : > { %v4998_v6 = vpop.xlane.xlu1 %4997  ;;  %v5000_v27 = vpop.xlane.xlu0 %4999 }
0x1130   : > { %6906 = vrsqrt.f32 %v5043_v26  ;;  %v5028_v47 = vmul.f32 0.0078125, %v4998_v6  ;;  %v5029_v1 = vmul.f32 0.0078125, %v5000_v27 }
0x1132   : > { %v5044_v34 = vadd.f32 1e-05, %v5028_v47  ;;  %v5045_v23 = vadd.f32 1e-05, %v5029_v1 }
0x1133   : > { %v5002_v7 = vpop.xlane.xlu1 %5001 }
0x1134   : > { %6908 = vrsqrt.f32 %v5044_v34  ;;  %v5030_v8 = vmul.f32 0.0078125, %v5002_v7 }
0x1135   : > { %6910 = vrsqrt.f32 %v5045_v23 }
0x1136   : > { %v5046_v49 = vadd.f32 1e-05, %v5030_v8 }
0x1137   : > { %v5006_v41 = vpop.xlane.xlu1 %5005 }
0x1138   : > { %6912 = vrsqrt.f32 %v5046_v49  ;;  %v5032_v31 = vmul.f32 0.0078125, %v5006_v41 }
0x113a   : > { %v6907_v29 = vpop.eup %6906  ;;  %v5048_v39 = vadd.f32 1e-05, %v5032_v31 }
0x113b   : > { %v5075_v32 = vmul.f32 %v6907_v29, %v10187_v21  ;;  %v5010_v45 = vpop.xlane.xlu1 %5009 }
0x113c   : > { %v5034_v20 = vmul.f32 0.0078125, %v5010_v45 }
0x113d   : > { %v5097_v57 = vmul.f32 %v10259_v33, %v5075_v32 }
0x113e   : > { %v6909_v60 = vpop.eup %6908  ;;  %v5050_v18 = vadd.f32 1e-05, %v5034_v20 }
0x113f   : > { %v6911_v22 = vpop.eup %6910  ;;  %v5119_v56 = vadd.f32 %v10262_v43, %v5097_v57  ;;  %v5076_v9 = vmul.f32 %v6909_v60, %v10193_v5 }
0x1140   : > { %v5077_v11 = vmul.f32 %v6911_v22, %v10189_v38 }
0x1141   : > { %5135 = vst [vmem:[%s7763_s1] sm:$0xff] %v5119_v56  ;;  %v5098_v37 = vmul.f32 %v10259_v33, %v5076_v9 }
0x1142   : > { %v6913_v59 = vpop.eup %6912  ;;  %v5099_v61 = vmul.f32 %v10259_v33, %v5077_v11 }
0x1143   : > { %v5120_v5 = vadd.f32 %v10262_v43, %v5098_v37  ;;  %v5078_v25 = vmul.f32 %v6913_v59, %v10195_v54 }
0x1144   : > { %v5121_v51 = vadd.f32 %v10262_v43, %v5099_v61 }
0x1145   : > { %5136 = vst [vmem:[%s7763_s1 + $0x8] sm:$0xff] %v5120_v5  ;;  %v5100_v6 = vmul.f32 %v10259_v33, %v5078_v25 }
0x1146   : > { %5137 = vst [vmem:[%s7763_s1 + $0x10] sm:$0xff] %v5121_v51 }
0x1147   : > { %v5122_v23 = vadd.f32 %v10262_v43, %v5100_v6 }
0x1149   : > { %5138 = vst [vmem:[%s7763_s1 + $0x18] sm:$0xff] %v5122_v23 }
0x114c   : > { %v5014_v21 = vpop.xlane.xlu1 %5013 }
0x114d   : > { %v5036_v52 = vmul.f32 0.0078125, %v5014_v21 }
0x114f   : > { %v5052_v12 = vadd.f32 1e-05, %v5036_v52 }
0x115b   : > { %v5004_v50 = vpop.xlane.xlu0 %5003  ;;  %v5018_v38 = vpop.xlane.xlu1 %5017 }
0x115c   : > { %v5031_v48 = vmul.f32 0.0078125, %v5004_v50  ;;  %v5038_v26 = vmul.f32 0.0078125, %v5018_v38 }
0x115e   : > { %v5047_v2 = vadd.f32 1e-05, %v5031_v48  ;;  %v5054_v34 = vadd.f32 1e-05, %v5038_v26 }
0x115f   : > { %v5008_v62 = vpop.xlane.xlu0 %5007  ;;  %v5022_v50 = vpop.xlane.xlu1 %5021 }
0x1160   : > { %v5033_v42 = vmul.f32 0.0078125, %v5008_v62  ;;  %6914 = vrsqrt.f32 %v5047_v2  ;;  %v5040_v2 = vmul.f32 0.0078125, %v5022_v50 }
0x1161   : > { %6916 = vrsqrt.f32 %v5048_v39 }
0x1162   : > { %v5049_v19 = vadd.f32 1e-05, %v5033_v42  ;;  %v5056_v42 = vadd.f32 1e-05, %v5040_v2 }
0x1163   : > { %v5012_v16 = vpop.xlane.xlu0 %5011 }
0x1164   : > { %v5035_v35 = vmul.f32 0.0078125, %v5012_v16  ;;  %6918 = vrsqrt.f32 %v5049_v19 }
0x1165   : > { %6920 = vrsqrt.f32 %v5050_v18 }
0x1166   : > { %v5051_v58 = vadd.f32 1e-05, %v5035_v35 }
0x1167   : > { %v5016_v14 = vpop.xlane.xlu0 %5015 }
0x1168   : > { %v5037_v13 = vmul.f32 0.0078125, %v5016_v14  ;;  %6922 = vrsqrt.f32 %v5051_v58 }
0x1169   : > { %6924 = vrsqrt.f32 %v5052_v12 }
0x116a   : > { %v5053_v28 = vadd.f32 1e-05, %v5037_v13  ;;  %v6915_v15 = vpop.eup %6914 }
0x116b   : > { %v5020_v36 = vpop.xlane.xlu0 %5019  ;;  %v5079_v4 = vmul.f32 %v6915_v15, %v10201_v55  ;;  %v6917_v47 = vpop.eup %6916 }
0x116c   : > { %6926 = vrsqrt.f32 %v5053_v28  ;;  %v5039_v27 = vmul.f32 0.0078125, %v5020_v36  ;;  %v5080_v7 = vmul.f32 %v6917_v47, %v10203_v53  ;;  %v5026_v32 = vpop.xlane.xlu1 %5025 }
0x116d   : > { %v5101_v1 = vmul.f32 %v10259_v33, %v5079_v4  ;;  %6928 = vrsqrt.f32 %v5054_v34  ;;  %v5042_v20 = vmul.f32 0.0078125, %v5026_v32 }
0x116e   : > { %v6919_v54 = vpop.eup %6918  ;;  %v5055_v55 = vadd.f32 1e-05, %v5039_v27  ;;  %v5102_v41 = vmul.f32 %v10259_v33, %v5080_v7 }
0x116f   : > { %v5024_v8 = vpop.xlane.xlu0 %5023  ;;  %v5123_v48 = vadd.f32 %v10262_v43, %v5101_v1  ;;  %v5081_v49 = vmul.f32 %v6919_v54, %v10209_v46  ;;  %v6921_v31 = vpop.eup %6920  ;;  %v5058_v18 = vadd.f32 1e-05, %v5042_v20 }
0x1170   : > { %6930 = vrsqrt.f32 %v5055_v55  ;;  %v5041_v62 = vmul.f32 0.0078125, %v5024_v8  ;;  %v5124_v39 = vadd.f32 %v10262_v43, %v5102_v41  ;;  %v5082_v19 = vmul.f32 %v6921_v31, %v10211_v63 }
0x1171   : > { %5139 = vst [vmem:[%s7763_s1 + $0x20] sm:$0xff] %v5123_v48  ;;  %v5103_v53 = vmul.f32 %v10259_v33, %v5081_v49  ;;  %6932 = vrsqrt.f32 %v5056_v42 }
0x1172   : > { %v6923_v29 = vpop.eup %6922  ;;  %v5057_v46 = vadd.f32 1e-05, %v5041_v62  ;;  %5140 = vst [vmem:[%s7763_s1 + $0x28] sm:$0xff] %v5124_v39  ;;  %v5104_v35 = vmul.f32 %v10259_v33, %v5082_v19 }
0x1173   : > { %v5125_v45 = vadd.f32 %v10262_v43, %v5103_v53  ;;  %v5083_v16 = vmul.f32 %v6923_v29, %v10217_v17  ;;  %v6925_v57 = vpop.eup %6924 }
0x1174   : > { %6934 = vrsqrt.f32 %v5057_v46  ;;  %v5126_v58 = vadd.f32 %v10262_v43, %v5104_v35  ;;  %v5084_v22 = vmul.f32 %v6925_v57, %v10219_v3 }
0x1175   : > { %5141 = vst [vmem:[%s7763_s1 + $0x30] sm:$0xff] %v5125_v45  ;;  %v5105_v60 = vmul.f32 %v10259_v33, %v5083_v16  ;;  %6936 = vrsqrt.f32 %v5058_v18 }
0x1176   : > { %v6927_v63 = vpop.eup %6926  ;;  %5142 = vst [vmem:[%s7763_s1 + $0x38] sm:$0xff] %v5126_v58  ;;  %v5106_v9 = vmul.f32 %v10259_v33, %v5084_v22 }
0x1177   : > { %v5127_v17 = vadd.f32 %v10262_v43, %v5105_v60  ;;  %v5085_v56 = vmul.f32 %v6927_v63, %v10225_v30  ;;  %v6929_v21 = vpop.eup %6928 }
0x1178   : > { %v5128_v52 = vadd.f32 %v10262_v43, %v5106_v9  ;;  %v5086_v13 = vmul.f32 %v6929_v21, %v10228_v24 }
0x1179   : > { %5143 = vst [vmem:[%s7763_s1 + $0x40] sm:$0xff] %v5127_v17  ;;  %v5107_v14 = vmul.f32 %v10259_v33, %v5085_v56 }
0x117a   : > { %v6931_v11 = vpop.eup %6930  ;;  %5144 = vst [vmem:[%s7763_s1 + $0x48] sm:$0xff] %v5128_v52  ;;  %v5108_v30 = vmul.f32 %v10259_v33, %v5086_v13 }
0x117b   : > { %v5129_v3 = vadd.f32 %v10262_v43, %v5107_v14  ;;  %v5087_v37 = vmul.f32 %v6931_v11, %v10235_v10  ;;  %v6933_v59 = vpop.eup %6932 }
0x117c   : > { %v5130_v28 = vadd.f32 %v10262_v43, %v5108_v30  ;;  %v5088_v24 = vmul.f32 %v6933_v59, %v10238_v40 }
0x117d   : > { %5145 = vst [vmem:[%s7763_s1 + $0x50] sm:$0xff] %v5129_v3  ;;  %v5109_v61 = vmul.f32 %v10259_v33, %v5087_v37 }
0x117e   : > { %v6935_v12 = vpop.eup %6934  ;;  %5146 = vst [vmem:[%s7763_s1 + $0x58] sm:$0xff] %v5130_v28  ;;  %v5110_v10 = vmul.f32 %v10259_v33, %v5088_v24 }
0x117f   : > { %v5131_v15 = vadd.f32 %v10262_v43, %v5109_v61  ;;  %v5089_v5 = vmul.f32 %v6935_v12, %v10245_v0  ;;  %v6937_v25 = vpop.eup %6936 }
0x1180   : > { %v5132_v36 = vadd.f32 %v10262_v43, %v5110_v10  ;;  %v5090_v51 = vmul.f32 %v6937_v25, %v10248_v44 }
0x1181   : > { %5147 = vst [vmem:[%s7763_s1 + $0x60] sm:$0xff] %v5131_v15  ;;  %v5111_v38 = vmul.f32 %v10259_v33, %v5089_v5 }
0x1182   : > { %5148 = vst [vmem:[%s7763_s1 + $0x68] sm:$0xff] %v5132_v36  ;;  %v5112_v40 = vmul.f32 %v10259_v33, %v5090_v51 }
0x1183   : > { %v5133_v4 = vadd.f32 %v10262_v43, %v5111_v38 }
0x1184   : > { %v5134_v26 = vadd.f32 %v10262_v43, %v5112_v40 }
0x1185   : > { %5149 = vst [vmem:[%s7763_s1 + $0x70] sm:$0xff] %v5133_v4 }
0x1186   : > { %5150 = vst [vmem:[%s7763_s1 + $0x78] sm:$0xff] %v5134_v26 }
0x1187 PF: > { %s10747_s11 = sld [smem:[#allocation26_spill]]  ;;  %s10748_s26 = sld [smem:[#allocation22_spill]] }
0x1188   : > { %s10749_s29 = sld [smem:[#allocation33_spill]]  ;;  %s10750_s9 = sld [smem:[#allocation122_spill]] }
0x1189   : > { %s5165_s13 = sshll.u32 %s7763_s1, 4  ;;  %s7269_s16 = smov [#allocation15]   ;;  %s10334_s13 = int_to_ptr.vmem [resolvable:$true] %s5165_s13 }
0x118a   : > { %s7116_s25 = scalar_lea.vmem %s10334_s13, 2048  ;;  %s7120_s20 = sshll.u32 %s7269_s16, 4  ;;  %s7121_s20 = int_to_ptr.vmem [resolvable:$false] %s7120_s20 }
0x118b   : > { %p7117_p5 = scmp.ne.s32.totalorder %s10334_s13, %s7116_s25  ;;  %s7122_s21 = scalar_lea.vmem %s7121_s20, 4096 }
0x118c   : > { %p7123_p9 = scmp.lt.s32.totalorder %s10334_s13, %s7121_s20  ;;  %p7124_p3 = scmp.lt.s32.totalorder %s7122_s21, %s7116_s25 }
0x118d   : > { %s5563_s15 = sshll.u32 %s10747_s11, 11  ;;  %s10751_s12 = sand.u32 1, %s10748_s26  }
0x118e   : > { %s10331_s8 = scalar_lea.hbm %s10750_s9, %s5563_s15  ;;  %s10338_s5 = scalar_lea.sflag [#allocation6], %s10751_s12 }
0x118f   : > { %p10752_p0 = scmp.ne.s32.totalorder %s10749_s29, 0  ;;  %p7125_p8 = por %p7124_p3, %p7123_p9 }
0x1191   : > { %p7118_p11 = pnand %p7117_p5, %p10752_p0 }
0x1193   : > { %p7119_p1 = pneg %p7118_p11 }
0x1195   : > { %p7126_p2 = pnand %p7125_p8, %p7119_p1 }
0x1197   : > { %7129 = shalt.err (!%p7126_p2)
}
0x1198   : > { %s7130_s1 = scalar_lea.hbm %s10331_s8, 2048  ;;  %s7134_s4 = scalar_lea.hbm %s10750_s9, 4096 }
0x1199   : > { %p7131_p10 = scmp.ne.s32.totalorder %s10331_s8, %s7130_s1  ;;  %p7135_p4 = scmp.lt.u32.totalorder %s10331_s8, %s10750_s9 }
0x119a   : > { %p7136_p12 = scmp.lt.u32.totalorder %s7134_s4, %s7130_s1  ;;  %p7138_p5 = scmp.lt.u32.totalorder %s7130_s1, %s10331_s8 }
0x119b   : > { %p7132_p7 = pnand %p7131_p10, %p10752_p0 }
0x119c   : > { %p7137_p13 = por %p7136_p12, %p7135_p4 }
0x119d   : > { %p7133_p6 = pneg %p7132_p7 }
0x119e   : > { %p7139_p11 = por %p7138_p5, %p7137_p13 }
0x11a0   : > { %p7140_p1 = pnand %p7139_p11, %p7133_p6 }
0x11a2   : > { %7143 = shalt.err (!%p7140_p1)
}
0x11a3   : > { %s7270_s18 = smov 128   ;;  %s7271_s17 = smov 8  }
0x11a4   : > { %6174 = dma.vmem_to_hbm [thread:$0]  (%p10752_p0), %s10334_s13, 2048, %s10331_s8, %s10338_s5, %s7270_s18, %s7270_s18, %s7271_s17  }
0x11a5 PF: > { %s10753_s10 = sld [smem:[#allocation29_spill]]  ;;  %s10754_s23 = sld [smem:[#allocation21_spill]] }
0x11a6   : > { %s10755_s24 = sld [smem:[#allocation34_spill]] }
0x11ab   : > { %p6203_p9 = scmp.ge.s32.totalorder %s10753_s10, 2  ;;  %s5180_s19 = sand.u32 1, %s10754_s23  }
0x11ac   : > { %p10756_p3 = scmp.ne.s32.totalorder %s10755_s24, 0  ;;  %s5181_s3 = scalar_lea.sflag [#allocation6], %s5180_s19 }
0x11ae   : > { %p6197_p8 = pnand %p6203_p9, %p10756_p3 }
0x11b0   : > { %7205 = dma.done.wait (!%p6197_p8), %s5181_s3, 2048  }
0x11b1   : > { %7207 = vsyncadd (!%p6197_p8), %s5181_s3, 4294965248  ;;  %s40_s1 = sadd.s32 1, %s10753_s10   ;;  %s10757_s24 = sld [smem:[#allocation22_spill]] }
0x11b2   : > { %p37_p2 = scmp.ge.s32.totalorder %s40_s1, 6   ;;  %s10758_s25 = sld [smem:[#allocation23_spill]] }
0x11b3   : > { %s10759_s26 = sld [smem:[#allocation35_spill]]  ;;  %s10760_s11 = sld [smem:[#allocation24_spill]] }
0x11b4   : > { %s10761_s29 = sld [smem:[#allocation31_spill]]  ;;  %s10762_s0 = sld [smem:[#allocation27_spill]] }
0x11b5   : > { %s10763_s30 = sld [smem:[#allocation28_spill]]  ;;  %s10764_s18 = sld [smem:[#allocation30_spill]] }
0x11b6   : > { %s10765_s19 = sld [smem:[#allocation32_spill]]  ;;  %s10766_s27 = smov %s7226_s28 }
0x11b7   :  { %39 = sbr.rel (!%p37_p2) target bundleno = 33 (0x21), region = 217 }
0x11b9   : > { %s10767_s28 = smov %s10760_s11 }
0x11be   :  { %5186 = vsyncpa [#allocation5], 1 }
0x11bf   :  { %5188 = vsyncpa [#allocation5 + $0x1], 1 }
0x11c0   :  { %5189 = vsyncpa [#allocation8], 1 }
0x11c1   :  { %5191 = vsyncpa [#allocation8 + $0x1], 1 }
0x11c2   :  { %5192 = vsyncpa [#allocation11], 1 }
0x11c3   :  { %5194 = vsyncpa [#allocation11 + $0x1], 1 }
0x11c4   :  { %5195 = vsyncpa [#allocation14], 1 }
0x11c5   :  { %5196 = vsyncpa [#allocation6], 1 }
0x11c6   :  { %5198 = vsyncpa [#allocation6 + $0x1], 1 }

</bundles_post_ra>
